<compile_context>
chip_gen: v7x
topology: tpu7x:2x2x1
jax: 0.10.0
libtpu: 0.0.40
codegen_flags: <defaults>
</compile_context>

<pallas_src>
import functools

import jax
import jax.numpy as jnp
from jax.experimental import pallas as pl
from jax.experimental.pallas import tpu as pltpu


# ---------------------------------------------------------------------------
# helpers
# ---------------------------------------------------------------------------
def _ru(x, m):
    return (x + m - 1) // m * m


def _device_caps():
    """(tm_cap, tn_cap) per TPU generation."""
    try:
        kind = jax.devices()[0].device_kind.lower()
    except Exception:
        kind = ""
    if any(t in kind for t in ("v2", "v3", "v4", "v5")):
        return 256, 128          # v5e: MXU is 4x128x128, wider tn buys nothing
    return 512, 256              # v6e / v7x: fill the 256-wide MXU columns


_TM_CAP, _TN_CAP = _device_caps()


class KeyGen:
    def __init__(self, seed=0):
        self._key = jax.random.PRNGKey(seed)

    def __call__(self):
        self._key, sub = jax.random.split(self._key)
        return sub


# ---------------------------------------------------------------------------
# Pallas kernel: fused matmul + BN scale/shift + (residual) + activation
# ---------------------------------------------------------------------------
def _matmul_bn_act_kernel(*refs, act, residual):
    if residual:
        x_ref, w_ref, s_ref, b_ref, r_ref, o_ref = refs
    else:
        x_ref, w_ref, s_ref, b_ref, o_ref = refs
        r_ref = None

    k = pl.program_id(2)

    @pl.when(k == 0)
    def _():
        o_ref[...] = jnp.zeros_like(o_ref)

    # bf16 operands, f32 accumulation directly into the resident output block.
    o_ref[...] += jnp.dot(x_ref[...], w_ref[...],
                          preferred_element_type=jnp.float32)

    @pl.when(k == pl.num_programs(2) - 1)
    def _():
        y = o_ref[...] * s_ref[...] + b_ref[...]
        if residual:
            y = y + r_ref[...]
        if act == "relu":
            y = jnp.maximum(y, 0.0)
        elif act == "sigmoid":
            y = jax.nn.sigmoid(y)
        o_ref[...] = y


@functools.lru_cache(maxsize=None)
def _get_matmul_fn(Mp, Kp, Np, tm, tn, tk, act, residual):
    kernel = functools.partial(_matmul_bn_act_kernel, act=act, residual=residual)
    in_specs = [
        pl.BlockSpec((tm, tk), lambda i, j, k: (i, k)),   # x   (bf16)
        pl.BlockSpec((tk, tn), lambda i, j, k: (k, j)),   # w   (bf16)
        pl.BlockSpec((1, tn), lambda i, j, k: (0, j)),    # scale (f32)
        pl.BlockSpec((1, tn), lambda i, j, k: (0, j)),    # shift (f32)
    ]
    if residual:
        in_specs.append(pl.BlockSpec((tm, tn), lambda i, j, k: (i, j)))  # identity (f32)
    return pl.pallas_call(
        kernel,
        out_shape=jax.ShapeDtypeStruct((Mp, Np), jnp.float32),
        grid_spec=pltpu.PrefetchScalarGridSpec(
            num_scalar_prefetch=0,
            grid=(Mp // tm, Np // tn, Kp // tk),
            in_specs=in_specs,
            out_specs=pl.BlockSpec((tm, tn), lambda i, j, k: (i, j)),
        ),
        compiler_params=pltpu.CompilerParams(
            dimension_semantics=("parallel", "parallel", "arbitrary")),
    )


def matmul_bn_act(x, w, scale, shift, act="none", residual=None):
    """out = act((x @ w) * scale + shift [+ residual]).

    x:(M,K) bf16-castable, w:(K,N), scale/shift:(N,), residual:(M,N) f32 or None.
    """
    M, K = x.shape
    _, N = w.shape

    tm = min(_TM_CAP, _ru(M, 16))
    if M <= tm and M >= 32:
        # Split M into >=2 parallel tiles so both TensorCores (v7x) get work.
        tm = _ru(-(-M // 2), 16)
    tn = min(_TN_CAP, _ru(N, 128))
    tk = min(512, _ru(K, 128))
    Mp, Kp, Np = _ru(M, tm), _ru(K, tk), _ru(N, tn)

    xp = jnp.pad(x, ((0, Mp - M), (0, Kp - K))).astype(jnp.bfloat16)
    wp = jnp.pad(w, ((0, Kp - K), (0, Np - N))).astype(jnp.bfloat16)
    sp = jnp.pad(scale.reshape(1, N).astype(jnp.float32),
                 ((0, 0), (0, Np - N)), constant_values=1.0)
    bp = jnp.pad(shift.reshape(1, N).astype(jnp.float32), ((0, 0), (0, Np - N)))

    args = [xp, wp, sp, bp]
    if residual is not None:
        rp = jnp.pad(residual.astype(jnp.float32), ((0, Mp - M), (0, Np - N)))
        args.append(rp)

    out = _get_matmul_fn(Mp, Kp, Np, tm, tn, tk, act, residual is not None)(*args)
    return out[:M, :N]


# ---------------------------------------------------------------------------
# conv / pool / resize glue (im2col feeds the Pallas matmul kernel)
# ---------------------------------------------------------------------------
_BN_EPS = 1e-5


def conv_block(x, p, stride=1, padding=0, act="none", residual=None):
    """x: NHWC f32.  p: {'w':(O,I,kh,kw), optional 'b':(O,), optional 'bn':(g,b,m,v)}.

    If `residual` (NHWC tensor matching the conv output) is given, it is added in the
    kernel epilogue before the activation (fused residual add + ReLU).
    """
    w = p["w"]
    O = w.shape[0]
    bias = p.get("b", None)
    if "bn" in p:
        gamma, beta, mean, var = p["bn"]
        scale = gamma / jnp.sqrt(var + _BN_EPS)
        shift = beta - mean * scale
        if bias is not None:
            shift = shift + bias * scale
    else:
        scale = jnp.ones((O,), jnp.float32)
        shift = bias if bias is not None else jnp.zeros((O,), jnp.float32)

    N, H, W, C = x.shape
    _, I, kh, kw = w.shape
    Ho = (H + 2 * padding - kh) // stride + 1
    Wo = (W + 2 * padding - kw) // stride + 1

    xb = x.astype(jnp.bfloat16)  # im2col patches materialized in bf16 (half the bytes)
    if kh == 1 and kw == 1 and stride == 1 and padding == 0:
        patches = xb                                              # 1x1 conv: no im2col
    else:
        xp = jnp.pad(xb, ((0, 0), (padding, padding), (padding, padding), (0, 0)))
        # TODO(synk): fold the (dy,dx) taps into the kernel's reduction axis instead of
        # materializing the patch tensor (kh*kw x HBM blowup); kept as jit-fused glue.
        cols = []
        for dy in range(kh):
            for dx in range(kw):
                cols.append(xp[:, dy:dy + stride * (Ho - 1) + 1:stride,
                               dx:dx + stride * (Wo - 1) + 1:stride, :])
        patches = jnp.concatenate(cols, axis=-1)                  # (N,Ho,Wo,kh*kw*C)

    wmat = jnp.transpose(w, (2, 3, 1, 0)).reshape(kh * kw * I, O)  # (dy,dx,cin) x O
    res2d = residual.reshape(N * Ho * Wo, O) if residual is not None else None
    out = matmul_bn_act(patches.reshape(N * Ho * Wo, kh * kw * C), wmat,
                        scale, shift, act, res2d)
    return out.reshape(N, Ho, Wo, O)


def maxpool_3x3_s2(x):
    # TODO(synk): plain-JAX glue (fused by the surrounding jit), not a Pallas kernel.
    N, H, W, C = x.shape
    Ho = (H + 2 - 3) // 2 + 1
    Wo = (W + 2 - 3) // 2 + 1
    xp = jnp.pad(x, ((0, 0), (1, 1), (1, 1), (0, 0)), constant_values=-jnp.inf)
    out = None
    for dy in range(3):
        for dx in range(3):
            v = xp[:, dy:dy + 2 * (Ho - 1) + 1:2, dx:dx + 2 * (Wo - 1) + 1:2, :]
            out = v if out is None else jnp.maximum(out, v)
    return out


def resize_bilinear(x, ho, wo):
    # align_corners=False / half-pixel, matches F.interpolate(..., mode='bilinear').
    n, _, _, c = x.shape
    return jax.image.resize(x, (n, ho, wo, c), method="bilinear", antialias=False)


# ---------------------------------------------------------------------------
# parameter construction (deterministic, synthetic)
# ---------------------------------------------------------------------------
def conv_p(kg, cin, cout, k, bias=False, bn=True):
    p = {"w": 0.05 * jax.random.normal(kg(), (cout, cin, k, k), jnp.float32)}
    if bias:
        p["b"] = 0.02 * jax.random.normal(kg(), (cout,), jnp.float32)
    if bn:
        p["bn"] = (jnp.ones((cout,), jnp.float32), jnp.zeros((cout,), jnp.float32),
                   jnp.zeros((cout,), jnp.float32), jnp.ones((cout,), jnp.float32))
    return p


def make_bottleneck(kg, cin, width, stride):
    p = {"c1": conv_p(kg, cin, width, 1),
         "c2": conv_p(kg, width, width, 3),
         "c3": conv_p(kg, width, width * 4, 1)}
    if stride != 1 or cin != width * 4:
        p["down"] = conv_p(kg, cin, width * 4, 1)
    return p


def make_layer(kg, cin, width, blocks, stride):
    layers = [make_bottleneck(kg, cin, width, stride)]
    for _ in range(blocks - 1):
        layers.append(make_bottleneck(kg, width * 4, width, 1))
    return layers


def make_basic_block(kg, ch):
    return {"c1": conv_p(kg, ch, ch, 3), "c2": conv_p(kg, ch, ch, 3)}


def init_params(bc=8, seed=0):
    kg = KeyGen(seed)
    P = {"stem": conv_p(kg, 3, bc, 7)}
    P["layer1"] = make_layer(kg, bc, bc, 3, stride=1)           # -> bc*4
    P["layer2"] = make_layer(kg, bc * 4, bc * 2, 4, stride=2)   # -> bc*8
    P["layer3"] = make_layer(kg, bc * 8, bc * 4, 6, stride=2)   # -> bc*16
    P["layer4"] = make_layer(kg, bc * 16, bc * 8, 3, stride=2)  # -> bc*32
    P["squeeze5"] = conv_p(kg, bc * 32, bc * 4, 1, bias=True)
    P["squeeze4"] = conv_p(kg, bc * 16, bc * 2, 1, bias=True)
    P["squeeze3"] = conv_p(kg, bc * 8, bc * 2, 1, bias=True)
    P["squeeze2"] = conv_p(kg, bc * 4, bc * 2, 1, bias=True)
    P["squeeze1"] = conv_p(kg, bc, bc, 1, bias=True)
    for name, ch in [("mpm1", bc * 2), ("mpm2", bc * 2), ("mpm3", bc * 2),
                     ("mpm4", bc), ("mpm5", bc),
                     ("mpm12", bc * 2), ("mpm22", bc * 2), ("mpm32", bc * 2),
                     ("mpm42", bc), ("mpm52", bc)]:
        P[name] = make_basic_block(kg, ch)
    P["conv1"] = conv_p(kg, bc * 4, bc * 2, 3, bias=True)
    P["conv2"] = conv_p(kg, bc * 4, bc * 2, 3, bias=True)
    P["conv3"] = conv_p(kg, bc * 4, bc * 2, 3, bias=True)
    P["conv4"] = conv_p(kg, bc * 4, bc, 3, bias=True)
    P["conv5"] = conv_p(kg, bc * 2, bc, 3, bias=True)
    for name, cin in [("conv_out1", bc * 2), ("conv_out2", bc * 2), ("conv_out3", bc * 2),
                      ("conv_out4", bc), ("conv_out5", bc), ("conv_final", bc)]:
        P[name] = conv_p(kg, cin, 1, 3, bias=True, bn=False)
    return P


# ---------------------------------------------------------------------------
# model forward
# ---------------------------------------------------------------------------
def bottleneck_fwd(x, p, stride):
    idn = conv_block(x, p["down"], stride, 0, "none") if "down" in p else x
    out = conv_block(x, p["c1"], 1, 0, "relu")
    out = conv_block(out, p["c2"], stride, 1, "relu")
    # residual add + ReLU fused into the c3 matmul epilogue
    return conv_block(out, p["c3"], 1, 0, act="relu", residual=idn)


def run_layer(x, layer_params, stride):
    x = bottleneck_fwd(x, layer_params[0], stride)
    for bp in layer_params[1:]:
        x = bottleneck_fwd(x, bp, 1)
    return x


def basic_block_fwd(x, p):
    out = conv_block(x, p["c1"], 1, 1, "relu")
    # residual add + ReLU fused into the c2 matmul epilogue
    return conv_block(out, p["c2"], 1, 1, act="relu", residual=x)


def basnet_forward(P, x_nchw, defocus):
    # `defocus` is accepted but unused, matching the reference forward().
    del defocus
    hsize, wsize = x_nchw.shape[2], x_nchw.shape[3]
    x = jnp.transpose(x_nchw, (0, 2, 3, 1)).astype(jnp.float32)  # NCHW -> NHWC

    in2 = conv_block(x, P["stem"], stride=2, padding=3, act="relu")       # div_2
    skip2 = conv_block(in2, P["squeeze1"], 1, 0, "relu")
    in4 = run_layer(maxpool_3x3_s2(in2), P["layer1"], stride=1)            # div_4
    skip4 = conv_block(in4, P["squeeze2"], 1, 0, "relu")
    in8 = run_layer(in4, P["layer2"], stride=2)                            # div_8
    skip8 = conv_block(in8, P["squeeze3"], 1, 0, "relu")
    in16 = run_layer(in8, P["layer3"], stride=2)                           # div_16
    skip16 = conv_block(in16, P["squeeze4"], 1, 0, "relu")
    in32 = run_layer(in16, P["layer4"], stride=2)                          # div_32
    skip32 = conv_block(in32, P["squeeze5"], 1, 0, "relu")

    dec32 = conv_block(skip32, P["conv1"], 1, 1, "relu")
    dec32 = basic_block_fwd(basic_block_fwd(dec32, P["mpm1"]), P["mpm12"])

    d = jnp.concatenate([resize_bilinear(dec32, hsize // 16, wsize // 16), skip16], -1)
    dec16 = conv_block(d, P["conv2"], 1, 1, "relu")
    dec16 = basic_block_fwd(basic_block_fwd(dec16, P["mpm2"]), P["mpm22"])

    d = jnp.concatenate([resize_bilinear(dec16, hsize // 8, wsize // 8), skip8], -1)
    dec8 = conv_block(d, P["conv3"], 1, 1, "relu")
    dec8 = basic_block_fwd(basic_block_fwd(dec8, P["mpm3"]), P["mpm32"])

    d = jnp.concatenate([resize_bilinear(dec8, hsize // 4, wsize // 4), skip4], -1)
    dec4 = conv_block(d, P["conv4"], 1, 1, "relu")
    dec4 = basic_block_fwd(basic_block_fwd(dec4, P["mpm4"]), P["mpm42"])

    d = jnp.concatenate([resize_bilinear(dec4, hsize // 2, wsize // 2), skip2], -1)
    dec2 = conv_block(d, P["conv5"], 1, 1, "relu")
    dec2 = basic_block_fwd(basic_block_fwd(dec2, P["mpm5"]), P["mpm52"])

    dec1 = resize_bilinear(dec2, hsize, wsize)

    def out_head_resized(dec, pname):
        o = conv_block(dec, P[pname], 1, 1, "none")
        o = resize_bilinear(o, hsize, wsize)
        # TODO(synk): sigmoid is jit-fused into the resize; a dedicated fused
        # resize+sigmoid Pallas kernel is a possible follow-up.
        return jax.nn.sigmoid(o)

    out32 = out_head_resized(dec32, "conv_out1")
    out16 = out_head_resized(dec16, "conv_out2")
    out8 = out_head_resized(dec8, "conv_out3")
    out4 = out_head_resized(dec4, "conv_out4")
    out2 = out_head_resized(dec2, "conv_out5")
    # no resize for the final head -> sigmoid fused into the matmul epilogue
    out_final = conv_block(dec1, P["conv_final"], 1, 1, "sigmoid")

    to_nchw = lambda a: jnp.transpose(a, (0, 3, 1, 2))
    return tuple(to_nchw(o) for o in (out_final, out2, out4, out8, out16, out32))


# ---------------------------------------------------------------------------
if __name__ == "__main__":
    BC = 8          # basic_channels (width unit of the scaled-down ResNet-50 backbone)
    H = W = 64      # must be divisible by 32
    key = jax.random.PRNGKey(0)
    k1, k2 = jax.random.split(key)
    x = jax.random.normal(k1, (1, 3, H, W), jnp.float32)        # NCHW like PyTorch
    defocus = jax.random.normal(k2, (1, 1, H, W), jnp.float32)  # unused by forward()

    params = init_params(bc=BC, seed=0)

    forward = jax.jit(basnet_forward)   # single jit over the whole forward pass
    outs = forward(params, x, defocus)
    outs = jax.block_until_ready(outs)

    for o in outs:
        assert o.shape == (1, 1, H, W), o.shape
        assert bool(jnp.all(jnp.isfinite(o)))
        assert bool(jnp.all((o >= 0.0) & (o <= 1.0)))  # sigmoid range
    print("KERNEL_OK")
</pallas_src>

<mosaic_0001>
module attributes {stable_mosaic.version = 11 : i64} {
  func.func @_matmul_bn_act_kernel(%arg0: i32, %arg1: i32, %arg2: i32, %arg3: memref<512x256xbf16, #tpu.memory_space<vmem>>, %arg4: memref<256x128xbf16, #tpu.memory_space<vmem>>, %arg5: memref<1x128xf32, #tpu.memory_space<vmem>>, %arg6: memref<1x128xf32, #tpu.memory_space<vmem>>, %arg7: memref<512x128xf32, #tpu.memory_space<vmem>>) attributes {dimension_semantics = [#tpu.dimension_semantics<parallel>, #tpu.dimension_semantics<parallel>, #tpu.dimension_semantics<arbitrary>], iteration_bounds = array<i64: 2, 1, 1>, scalar_prefetch = 0 : i64, scratch_operands = 0 : i64, tpu.core_type = #tpu.core_type<tc>, window_params = [{transform_indices = @transform_0, window_bounds = array<i64: 512, 256>}, {transform_indices = @transform_1, window_bounds = array<i64: 256, 128>}, {transform_indices = @transform_2, window_bounds = array<i64: 1, 128>}, {transform_indices = @transform_3, window_bounds = array<i64: 1, 128>}, {transform_indices = @transform_4, window_bounds = array<i64: 512, 128>}]} {
    %c0_i32 = arith.constant 0 : i32
    %0 = arith.cmpi eq, %arg2, %c0_i32 : i32
    %1 = arith.extui %0 : i1 to i32
    %c0_i32_0 = arith.constant 0 : i32
    %2 = arith.cmpi ne, %1, %c0_i32_0 : i32
    scf.if %2 {
      %cst_10 = arith.constant 0.000000e+00 : f32
      %12 = vector.broadcast %cst_10 : f32 to vector<512x128xf32>
      %c0_11 = arith.constant 0 : index
      %c0_12 = arith.constant 0 : index
      %13 = vector.load %arg7[%c0_11, %c0_12] : memref<512x128xf32, #tpu.memory_space<vmem>>, vector<512x128xf32>
      tpu.vector_store %arg7[%c0_11, %c0_12], %12 {strides = array<i32>} : memref<512x128xf32, #tpu.memory_space<vmem>>, vector<512x128xf32>,
    } else {
    }
    %c0 = arith.constant 0 : index
    %c0_1 = arith.constant 0 : index
    %3 = vector.load %arg7[%c0, %c0_1] : memref<512x128xf32, #tpu.memory_space<vmem>>, vector<512x128xf32>
    %c0_2 = arith.constant 0 : index
    %c0_3 = arith.constant 0 : index
    %4 = vector.load %arg3[%c0_2, %c0_3] : memref<512x256xbf16, #tpu.memory_space<vmem>>, vector<512x256xbf16>
    %c0_4 = arith.constant 0 : index
    %c0_5 = arith.constant 0 : index
    %5 = vector.load %arg4[%c0_4, %c0_5] : memref<256x128xbf16, #tpu.memory_space<vmem>>, vector<256x128xbf16>
    %cst = arith.constant dense<0.000000e+00> : vector<512x128xf32>
    %6 = tpu.matmul %4, %5, %cst {dimension_numbers = #tpu.dot_dimension_numbers<[1], [0], [0], [1], [0, 0, 1, 1], [], []>} : vector<512x256xbf16>, vector<256x128xbf16>, vector<512x128xf32> -> vector<512x128xf32>
    %7 = arith.addf %3, %6 : vector<512x128xf32>
    %c0_6 = arith.constant 0 : index
    %c0_7 = arith.constant 0 : index
    %8 = vector.load %arg7[%c0_6, %c0_7] : memref<512x128xf32, #tpu.memory_space<vmem>>, vector<512x128xf32>
    tpu.vector_store %arg7[%c0_6, %c0_7], %7 {strides = array<i32>} : memref<512x128xf32, #tpu.memory_space<vmem>>, vector<512x128xf32>,
    %c0_i32_8 = arith.constant 0 : i32
    %9 = arith.cmpi eq, %arg2, %c0_i32_8 : i32
    %10 = arith.extui %9 : i1 to i32
    %c0_i32_9 = arith.constant 0 : i32
    %11 = arith.cmpi ne, %10, %c0_i32_9 : i32
    scf.if %11 {
      %c0_10 = arith.constant 0 : index
      %c0_11 = arith.constant 0 : index
      %12 = vector.load %arg7[%c0_10, %c0_11] : memref<512x128xf32, #tpu.memory_space<vmem>>, vector<512x128xf32>
      %c0_12 = arith.constant 0 : index
      %c0_13 = arith.constant 0 : index
      %13 = vector.load %arg5[%c0_12, %c0_13] : memref<1x128xf32, #tpu.memory_space<vmem>>, vector<1x128xf32>
      %14 = vector.broadcast %13 : vector<1x128xf32> to vector<512x128xf32>
      %15 = arith.mulf %12, %14 : vector<512x128xf32>
      %c0_14 = arith.constant 0 : index
      %c0_15 = arith.constant 0 : index
      %16 = vector.load %arg6[%c0_14, %c0_15] : memref<1x128xf32, #tpu.memory_space<vmem>>, vector<1x128xf32>
      %17 = vector.broadcast %16 : vector<1x128xf32> to vector<512x128xf32>
      %18 = arith.addf %15, %17 : vector<512x128xf32>
      %cst_16 = arith.constant 0.000000e+00 : f32
      %19 = vector.broadcast %cst_16 : f32 to vector<512x128xf32>
      %20 = arith.maximumf %18, %19 : vector<512x128xf32>
      %c0_17 = arith.constant 0 : index
      %c0_18 = arith.constant 0 : index
      %21 = vector.load %arg7[%c0_17, %c0_18] : memref<512x128xf32, #tpu.memory_space<vmem>>, vector<512x128xf32>
      tpu.vector_store %arg7[%c0_17, %c0_18], %20 {strides = array<i32>} : memref<512x128xf32, #tpu.memory_space<vmem>>, vector<512x128xf32>,
    } else {
    }
    return
  }
  func.func @transform_0(%arg0: i32, %arg1: i32, %arg2: i32) -> (i32, i32) {
    %c0_i32 = arith.constant 0 : i32
    return %arg0, %arg2 : i32, i32
  }
  func.func @transform_1(%arg0: i32, %arg1: i32, %arg2: i32) -> (i32, i32) {
    %c0_i32 = arith.constant 0 : i32
    return %arg2, %arg1 : i32, i32
  }
  func.func @transform_2(%arg0: i32, %arg1: i32, %arg2: i32) -> (i32, i32) {
    %c0_i32 = arith.constant 0 : i32
    %c0_i32_0 = arith.constant 0 : i32
    return %c0_i32, %arg1 : i32, i32
  }
  func.func @transform_3(%arg0: i32, %arg1: i32, %arg2: i32) -> (i32, i32) {
    %c0_i32 = arith.constant 0 : i32
    %c0_i32_0 = arith.constant 0 : i32
    return %c0_i32, %arg1 : i32, i32
  }
  func.func @transform_4(%arg0: i32, %arg1: i32, %arg2: i32) -> (i32, i32) {
    %c0_i32 = arith.constant 0 : i32
    return %arg0, %arg1 : i32, i32
  }
}

module attributes {stable_mosaic.version = 11 : i64} {
  func.func @_matmul_bn_act_kernel(%arg0: i32, %arg1: i32, %arg2: i32, %arg3: memref<128x128xbf16, #tpu.memory_space<vmem>>, %arg4: memref<128x128xbf16, #tpu.memory_space<vmem>>, %arg5: memref<1x128xf32, #tpu.memory_space<vmem>>, %arg6: memref<1x128xf32, #tpu.memory_space<vmem>>, %arg7: memref<128x128xf32, #tpu.memory_space<vmem>>) attributes {dimension_semantics = [#tpu.dimension_semantics<parallel>, #tpu.dimension_semantics<parallel>, #tpu.dimension_semantics<arbitrary>], iteration_bounds = array<i64: 2, 1, 1>, scalar_prefetch = 0 : i64, scratch_operands = 0 : i64, tpu.core_type = #tpu.core_type<tc>, window_params = [{transform_indices = @transform_0, window_bounds = array<i64: 128, 128>}, {transform_indices = @transform_1, window_bounds = array<i64: 128, 128>}, {transform_indices = @transform_2, window_bounds = array<i64: 1, 128>}, {transform_indices = @transform_3, window_bounds = array<i64: 1, 128>}, {transform_indices = @transform_4, window_bounds = array<i64: 128, 128>}]} {
    %c0_i32 = arith.constant 0 : i32
    %0 = arith.cmpi eq, %arg2, %c0_i32 : i32
    %1 = arith.extui %0 : i1 to i32
    %c0_i32_0 = arith.constant 0 : i32
    %2 = arith.cmpi ne, %1, %c0_i32_0 : i32
    scf.if %2 {
      %cst_10 = arith.constant 0.000000e+00 : f32
      %12 = vector.broadcast %cst_10 : f32 to vector<128x128xf32>
      %c0_11 = arith.constant 0 : index
      %c0_12 = arith.constant 0 : index
      %13 = vector.load %arg7[%c0_11, %c0_12] : memref<128x128xf32, #tpu.memory_space<vmem>>, vector<128x128xf32>
      tpu.vector_store %arg7[%c0_11, %c0_12], %12 {strides = array<i32>} : memref<128x128xf32, #tpu.memory_space<vmem>>, vector<128x128xf32>,
    } else {
    }
    %c0 = arith.constant 0 : index
    %c0_1 = arith.constant 0 : index
    %3 = vector.load %arg7[%c0, %c0_1] : memref<128x128xf32, #tpu.memory_space<vmem>>, vector<128x128xf32>
    %c0_2 = arith.constant 0 : index
    %c0_3 = arith.constant 0 : index
    %4 = vector.load %arg3[%c0_2, %c0_3] : memref<128x128xbf16, #tpu.memory_space<vmem>>, vector<128x128xbf16>
    %c0_4 = arith.constant 0 : index
    %c0_5 = arith.constant 0 : index
    %5 = vector.load %arg4[%c0_4, %c0_5] : memref<128x128xbf16, #tpu.memory_space<vmem>>, vector<128x128xbf16>
    %cst = arith.constant dense<0.000000e+00> : vector<128x128xf32>
    %6 = tpu.matmul %4, %5, %cst {dimension_numbers = #tpu.dot_dimension_numbers<[1], [0], [0], [1], [0, 0, 1, 1], [], []>} : vector<128x128xbf16>, vector<128x128xbf16>, vector<128x128xf32> -> vector<128x128xf32>
    %7 = arith.addf %3, %6 : vector<128x128xf32>
    %c0_6 = arith.constant 0 : index
    %c0_7 = arith.constant 0 : index
    %8 = vector.load %arg7[%c0_6, %c0_7] : memref<128x128xf32, #tpu.memory_space<vmem>>, vector<128x128xf32>
    tpu.vector_store %arg7[%c0_6, %c0_7], %7 {strides = array<i32>} : memref<128x128xf32, #tpu.memory_space<vmem>>, vector<128x128xf32>,
    %c0_i32_8 = arith.constant 0 : i32
    %9 = arith.cmpi eq, %arg2, %c0_i32_8 : i32
    %10 = arith.extui %9 : i1 to i32
    %c0_i32_9 = arith.constant 0 : i32
    %11 = arith.cmpi ne, %10, %c0_i32_9 : i32
    scf.if %11 {
      %c0_10 = arith.constant 0 : index
      %c0_11 = arith.constant 0 : index
      %12 = vector.load %arg7[%c0_10, %c0_11] : memref<128x128xf32, #tpu.memory_space<vmem>>, vector<128x128xf32>
      %c0_12 = arith.constant 0 : index
      %c0_13 = arith.constant 0 : index
      %13 = vector.load %arg5[%c0_12, %c0_13] : memref<1x128xf32, #tpu.memory_space<vmem>>, vector<1x128xf32>
      %14 = vector.broadcast %13 : vector<1x128xf32> to vector<128x128xf32>
      %15 = arith.mulf %12, %14 : vector<128x128xf32>
      %c0_14 = arith.constant 0 : index
      %c0_15 = arith.constant 0 : index
      %16 = vector.load %arg6[%c0_14, %c0_15] : memref<1x128xf32, #tpu.memory_space<vmem>>, vector<1x128xf32>
      %17 = vector.broadcast %16 : vector<1x128xf32> to vector<128x128xf32>
      %18 = arith.addf %15, %17 : vector<128x128xf32>
      %cst_16 = arith.constant 0.000000e+00 : f32
      %19 = vector.broadcast %cst_16 : f32 to vector<128x128xf32>
      %20 = arith.maximumf %18, %19 : vector<128x128xf32>
      %c0_17 = arith.constant 0 : index
      %c0_18 = arith.constant 0 : index
      %21 = vector.load %arg7[%c0_17, %c0_18] : memref<128x128xf32, #tpu.memory_space<vmem>>, vector<128x128xf32>
      tpu.vector_store %arg7[%c0_17, %c0_18], %20 {strides = array<i32>} : memref<128x128xf32, #tpu.memory_space<vmem>>, vector<128x128xf32>,
    } else {
    }
    return
  }
  func.func @transform_0(%arg0: i32, %arg1: i32, %arg2: i32) -> (i32, i32) {
    %c0_i32 = arith.constant 0 : i32
    return %arg0, %arg2 : i32, i32
  }
  func.func @transform_1(%arg0: i32, %arg1: i32, %arg2: i32) -> (i32, i32) {
    %c0_i32 = arith.constant 0 : i32
    return %arg2, %arg1 : i32, i32
  }
  func.func @transform_2(%arg0: i32, %arg1: i32, %arg2: i32) -> (i32, i32) {
    %c0_i32 = arith.constant 0 : i32
    %c0_i32_0 = arith.constant 0 : i32
    return %c0_i32, %arg1 : i32, i32
  }
  func.func @transform_3(%arg0: i32, %arg1: i32, %arg2: i32) -> (i32, i32) {
    %c0_i32 = arith.constant 0 : i32
    %c0_i32_0 = arith.constant 0 : i32
    return %c0_i32, %arg1 : i32, i32
  }
  func.func @transform_4(%arg0: i32, %arg1: i32, %arg2: i32) -> (i32, i32) {
    %c0_i32 = arith.constant 0 : i32
    return %arg0, %arg1 : i32, i32
  }
}

module attributes {stable_mosaic.version = 11 : i64} {
  func.func @_matmul_bn_act_kernel(%arg0: i32, %arg1: i32, %arg2: i32, %arg3: memref<128x128xbf16, #tpu.memory_space<vmem>>, %arg4: memref<128x128xbf16, #tpu.memory_space<vmem>>, %arg5: memref<1x128xf32, #tpu.memory_space<vmem>>, %arg6: memref<1x128xf32, #tpu.memory_space<vmem>>, %arg7: memref<128x128xf32, #tpu.memory_space<vmem>>) attributes {dimension_semantics = [#tpu.dimension_semantics<parallel>, #tpu.dimension_semantics<parallel>, #tpu.dimension_semantics<arbitrary>], iteration_bounds = array<i64: 2, 1, 1>, scalar_prefetch = 0 : i64, scratch_operands = 0 : i64, tpu.core_type = #tpu.core_type<tc>, window_params = [{transform_indices = @transform_0, window_bounds = array<i64: 128, 128>}, {transform_indices = @transform_1, window_bounds = array<i64: 128, 128>}, {transform_indices = @transform_2, window_bounds = array<i64: 1, 128>}, {transform_indices = @transform_3, window_bounds = array<i64: 1, 128>}, {transform_indices = @transform_4, window_bounds = array<i64: 128, 128>}]} {
    %c0_i32 = arith.constant 0 : i32
    %0 = arith.cmpi eq, %arg2, %c0_i32 : i32
    %1 = arith.extui %0 : i1 to i32
    %c0_i32_0 = arith.constant 0 : i32
    %2 = arith.cmpi ne, %1, %c0_i32_0 : i32
    scf.if %2 {
      %cst_10 = arith.constant 0.000000e+00 : f32
      %12 = vector.broadcast %cst_10 : f32 to vector<128x128xf32>
      %c0_11 = arith.constant 0 : index
      %c0_12 = arith.constant 0 : index
      %13 = vector.load %arg7[%c0_11, %c0_12] : memref<128x128xf32, #tpu.memory_space<vmem>>, vector<128x128xf32>
      tpu.vector_store %arg7[%c0_11, %c0_12], %12 {strides = array<i32>} : memref<128x128xf32, #tpu.memory_space<vmem>>, vector<128x128xf32>,
    } else {
    }
    %c0 = arith.constant 0 : index
    %c0_1 = arith.constant 0 : index
    %3 = vector.load %arg7[%c0, %c0_1] : memref<128x128xf32, #tpu.memory_space<vmem>>, vector<128x128xf32>
    %c0_2 = arith.constant 0 : index
    %c0_3 = arith.constant 0 : index
    %4 = vector.load %arg3[%c0_2, %c0_3] : memref<128x128xbf16, #tpu.memory_space<vmem>>, vector<128x128xbf16>
    %c0_4 = arith.constant 0 : index
    %c0_5 = arith.constant 0 : index
    %5 = vector.load %arg4[%c0_4, %c0_5] : memref<128x128xbf16, #tpu.memory_space<vmem>>, vector<128x128xbf16>
    %cst = arith.constant dense<0.000000e+00> : vector<128x128xf32>
    %6 = tpu.matmul %4, %5, %cst {dimension_numbers = #tpu.dot_dimension_numbers<[1], [0], [0], [1], [0, 0, 1, 1], [], []>} : vector<128x128xbf16>, vector<128x128xbf16>, vector<128x128xf32> -> vector<128x128xf32>
    %7 = arith.addf %3, %6 : vector<128x128xf32>
    %c0_6 = arith.constant 0 : index
    %c0_7 = arith.constant 0 : index
    %8 = vector.load %arg7[%c0_6, %c0_7] : memref<128x128xf32, #tpu.memory_space<vmem>>, vector<128x128xf32>
    tpu.vector_store %arg7[%c0_6, %c0_7], %7 {strides = array<i32>} : memref<128x128xf32, #tpu.memory_space<vmem>>, vector<128x128xf32>,
    %c0_i32_8 = arith.constant 0 : i32
    %9 = arith.cmpi eq, %arg2, %c0_i32_8 : i32
    %10 = arith.extui %9 : i1 to i32
    %c0_i32_9 = arith.constant 0 : i32
    %11 = arith.cmpi ne, %10, %c0_i32_9 : i32
    scf.if %11 {
      %c0_10 = arith.constant 0 : index
      %c0_11 = arith.constant 0 : index
      %12 = vector.load %arg7[%c0_10, %c0_11] : memref<128x128xf32, #tpu.memory_space<vmem>>, vector<128x128xf32>
      %c0_12 = arith.constant 0 : index
      %c0_13 = arith.constant 0 : index
      %13 = vector.load %arg5[%c0_12, %c0_13] : memref<1x128xf32, #tpu.memory_space<vmem>>, vector<1x128xf32>
      %14 = vector.broadcast %13 : vector<1x128xf32> to vector<128x128xf32>
      %15 = arith.mulf %12, %14 : vector<128x128xf32>
      %c0_14 = arith.constant 0 : index
      %c0_15 = arith.constant 0 : index
      %16 = vector.load %arg6[%c0_14, %c0_15] : memref<1x128xf32, #tpu.memory_space<vmem>>, vector<1x128xf32>
      %17 = vector.broadcast %16 : vector<1x128xf32> to vector<128x128xf32>
      %18 = arith.addf %15, %17 : vector<128x128xf32>
      %c0_16 = arith.constant 0 : index
      %c0_17 = arith.constant 0 : index
      %19 = vector.load %arg7[%c0_16, %c0_17] : memref<128x128xf32, #tpu.memory_space<vmem>>, vector<128x128xf32>
      tpu.vector_store %arg7[%c0_16, %c0_17], %18 {strides = array<i32>} : memref<128x128xf32, #tpu.memory_space<vmem>>, vector<128x128xf32>,
    } else {
    }
    return
  }
  func.func @transform_0(%arg0: i32, %arg1: i32, %arg2: i32) -> (i32, i32) {
    %c0_i32 = arith.constant 0 : i32
    return %arg0, %arg2 : i32, i32
  }
  func.func @transform_1(%arg0: i32, %arg1: i32, %arg2: i32) -> (i32, i32) {
    %c0_i32 = arith.constant 0 : i32
    return %arg2, %arg1 : i32, i32
  }
  func.func @transform_2(%arg0: i32, %arg1: i32, %arg2: i32) -> (i32, i32) {
    %c0_i32 = arith.constant 0 : i32
    %c0_i32_0 = arith.constant 0 : i32
    return %c0_i32, %arg1 : i32, i32
  }
  func.func @transform_3(%arg0: i32, %arg1: i32, %arg2: i32) -> (i32, i32) {
    %c0_i32 = arith.constant 0 : i32
    %c0_i32_0 = arith.constant 0 : i32
    return %c0_i32, %arg1 : i32, i32
  }
  func.func @transform_4(%arg0: i32, %arg1: i32, %arg2: i32) -> (i32, i32) {
    %c0_i32 = arith.constant 0 : i32
    return %arg0, %arg1 : i32, i32
  }
}

module attributes {stable_mosaic.version = 11 : i64} {
  func.func @_matmul_bn_act_kernel(%arg0: i32, %arg1: i32, %arg2: i32, %arg3: memref<128x128xbf16, #tpu.memory_space<vmem>>, %arg4: memref<128x128xbf16, #tpu.memory_space<vmem>>, %arg5: memref<1x128xf32, #tpu.memory_space<vmem>>, %arg6: memref<1x128xf32, #tpu.memory_space<vmem>>, %arg7: memref<128x128xf32, #tpu.memory_space<vmem>>, %arg8: memref<128x128xf32, #tpu.memory_space<vmem>>) attributes {dimension_semantics = [#tpu.dimension_semantics<parallel>, #tpu.dimension_semantics<parallel>, #tpu.dimension_semantics<arbitrary>], iteration_bounds = array<i64: 2, 1, 1>, scalar_prefetch = 0 : i64, scratch_operands = 0 : i64, tpu.core_type = #tpu.core_type<tc>, window_params = [{transform_indices = @transform_0, window_bounds = array<i64: 128, 128>}, {transform_indices = @transform_1, window_bounds = array<i64: 128, 128>}, {transform_indices = @transform_2, window_bounds = array<i64: 1, 128>}, {transform_indices = @transform_3, window_bounds = array<i64: 1, 128>}, {transform_indices = @transform_4, window_bounds = array<i64: 128, 128>}, {transform_indices = @transform_5, window_bounds = array<i64: 128, 128>}]} {
    %c0_i32 = arith.constant 0 : i32
    %0 = arith.cmpi eq, %arg2, %c0_i32 : i32
    %1 = arith.extui %0 : i1 to i32
    %c0_i32_0 = arith.constant 0 : i32
    %2 = arith.cmpi ne, %1, %c0_i32_0 : i32
    scf.if %2 {
      %cst_10 = arith.constant 0.000000e+00 : f32
      %12 = vector.broadcast %cst_10 : f32 to vector<128x128xf32>
      %c0_11 = arith.constant 0 : index
      %c0_12 = arith.constant 0 : index
      %13 = vector.load %arg8[%c0_11, %c0_12] : memref<128x128xf32, #tpu.memory_space<vmem>>, vector<128x128xf32>
      tpu.vector_store %arg8[%c0_11, %c0_12], %12 {strides = array<i32>} : memref<128x128xf32, #tpu.memory_space<vmem>>, vector<128x128xf32>,
    } else {
    }
    %c0 = arith.constant 0 : index
    %c0_1 = arith.constant 0 : index
    %3 = vector.load %arg8[%c0, %c0_1] : memref<128x128xf32, #tpu.memory_space<vmem>>, vector<128x128xf32>
    %c0_2 = arith.constant 0 : index
    %c0_3 = arith.constant 0 : index
    %4 = vector.load %arg3[%c0_2, %c0_3] : memref<128x128xbf16, #tpu.memory_space<vmem>>, vector<128x128xbf16>
    %c0_4 = arith.constant 0 : index
    %c0_5 = arith.constant 0 : index
    %5 = vector.load %arg4[%c0_4, %c0_5] : memref<128x128xbf16, #tpu.memory_space<vmem>>, vector<128x128xbf16>
    %cst = arith.constant dense<0.000000e+00> : vector<128x128xf32>
    %6 = tpu.matmul %4, %5, %cst {dimension_numbers = #tpu.dot_dimension_numbers<[1], [0], [0], [1], [0, 0, 1, 1], [], []>} : vector<128x128xbf16>, vector<128x128xbf16>, vector<128x128xf32> -> vector<128x128xf32>
    %7 = arith.addf %3, %6 : vector<128x128xf32>
    %c0_6 = arith.constant 0 : index
    %c0_7 = arith.constant 0 : index
    %8 = vector.load %arg8[%c0_6, %c0_7] : memref<128x128xf32, #tpu.memory_space<vmem>>, vector<128x128xf32>
    tpu.vector_store %arg8[%c0_6, %c0_7], %7 {strides = array<i32>} : memref<128x128xf32, #tpu.memory_space<vmem>>, vector<128x128xf32>,
    %c0_i32_8 = arith.constant 0 : i32
    %9 = arith.cmpi eq, %arg2, %c0_i32_8 : i32
    %10 = arith.extui %9 : i1 to i32
    %c0_i32_9 = arith.constant 0 : i32
    %11 = arith.cmpi ne, %10, %c0_i32_9 : i32
    scf.if %11 {
      %c0_10 = arith.constant 0 : index
      %c0_11 = arith.constant 0 : index
      %12 = vector.load %arg8[%c0_10, %c0_11] : memref<128x128xf32, #tpu.memory_space<vmem>>, vector<128x128xf32>
      %c0_12 = arith.constant 0 : index
      %c0_13 = arith.constant 0 : index
      %13 = vector.load %arg5[%c0_12, %c0_13] : memref<1x128xf32, #tpu.memory_space<vmem>>, vector<1x128xf32>
      %14 = vector.broadcast %13 : vector<1x128xf32> to vector<128x128xf32>
      %15 = arith.mulf %12, %14 : vector<128x128xf32>
      %c0_14 = arith.constant 0 : index
      %c0_15 = arith.constant 0 : index
      %16 = vector.load %arg6[%c0_14, %c0_15] : memref<1x128xf32, #tpu.memory_space<vmem>>, vector<1x128xf32>
      %17 = vector.broadcast %16 : vector<1x128xf32> to vector<128x128xf32>
      %18 = arith.addf %15, %17 : vector<128x128xf32>
      %c0_16 = arith.constant 0 : index
      %c0_17 = arith.constant 0 : index
      %19 = vector.load %arg7[%c0_16, %c0_17] : memref<128x128xf32, #tpu.memory_space<vmem>>, vector<128x128xf32>
      %20 = arith.addf %18, %19 : vector<128x128xf32>
      %cst_18 = arith.constant 0.000000e+00 : f32
      %21 = vector.broadcast %cst_18 : f32 to vector<128x128xf32>
      %22 = arith.maximumf %20, %21 : vector<128x128xf32>
      %c0_19 = arith.constant 0 : index
      %c0_20 = arith.constant 0 : index
      %23 = vector.load %arg8[%c0_19, %c0_20] : memref<128x128xf32, #tpu.memory_space<vmem>>, vector<128x128xf32>
      tpu.vector_store %arg8[%c0_19, %c0_20], %22 {strides = array<i32>} : memref<128x128xf32, #tpu.memory_space<vmem>>, vector<128x128xf32>,
    } else {
    }
    return
  }
  func.func @transform_0(%arg0: i32, %arg1: i32, %arg2: i32) -> (i32, i32) {
    %c0_i32 = arith.constant 0 : i32
    return %arg0, %arg2 : i32, i32
  }
  func.func @transform_1(%arg0: i32, %arg1: i32, %arg2: i32) -> (i32, i32) {
    %c0_i32 = arith.constant 0 : i32
    return %arg2, %arg1 : i32, i32
  }
  func.func @transform_2(%arg0: i32, %arg1: i32, %arg2: i32) -> (i32, i32) {
    %c0_i32 = arith.constant 0 : i32
    %c0_i32_0 = arith.constant 0 : i32
    return %c0_i32, %arg1 : i32, i32
  }
  func.func @transform_3(%arg0: i32, %arg1: i32, %arg2: i32) -> (i32, i32) {
    %c0_i32 = arith.constant 0 : i32
    %c0_i32_0 = arith.constant 0 : i32
    return %c0_i32, %arg1 : i32, i32
  }
  func.func @transform_4(%arg0: i32, %arg1: i32, %arg2: i32) -> (i32, i32) {
    %c0_i32 = arith.constant 0 : i32
    return %arg0, %arg1 : i32, i32
  }
  func.func @transform_5(%arg0: i32, %arg1: i32, %arg2: i32) -> (i32, i32) {
    %c0_i32 = arith.constant 0 : i32
    return %arg0, %arg1 : i32, i32
  }
}

module attributes {stable_mosaic.version = 11 : i64} {
  func.func @_matmul_bn_act_kernel(%arg0: i32, %arg1: i32, %arg2: i32, %arg3: memref<32x256xbf16, #tpu.memory_space<vmem>>, %arg4: memref<256x128xbf16, #tpu.memory_space<vmem>>, %arg5: memref<1x128xf32, #tpu.memory_space<vmem>>, %arg6: memref<1x128xf32, #tpu.memory_space<vmem>>, %arg7: memref<32x128xf32, #tpu.memory_space<vmem>>) attributes {dimension_semantics = [#tpu.dimension_semantics<parallel>, #tpu.dimension_semantics<parallel>, #tpu.dimension_semantics<arbitrary>], iteration_bounds = array<i64: 2, 1, 1>, scalar_prefetch = 0 : i64, scratch_operands = 0 : i64, tpu.core_type = #tpu.core_type<tc>, window_params = [{transform_indices = @transform_0, window_bounds = array<i64: 32, 256>}, {transform_indices = @transform_1, window_bounds = array<i64: 256, 128>}, {transform_indices = @transform_2, window_bounds = array<i64: 1, 128>}, {transform_indices = @transform_3, window_bounds = array<i64: 1, 128>}, {transform_indices = @transform_4, window_bounds = array<i64: 32, 128>}]} {
    %c0_i32 = arith.constant 0 : i32
    %0 = arith.cmpi eq, %arg2, %c0_i32 : i32
    %1 = arith.extui %0 : i1 to i32
    %c0_i32_0 = arith.constant 0 : i32
    %2 = arith.cmpi ne, %1, %c0_i32_0 : i32
    scf.if %2 {
      %cst_10 = arith.constant 0.000000e+00 : f32
      %12 = vector.broadcast %cst_10 : f32 to vector<32x128xf32>
      %c0_11 = arith.constant 0 : index
      %c0_12 = arith.constant 0 : index
      %13 = vector.load %arg7[%c0_11, %c0_12] : memref<32x128xf32, #tpu.memory_space<vmem>>, vector<32x128xf32>
      tpu.vector_store %arg7[%c0_11, %c0_12], %12 {strides = array<i32>} : memref<32x128xf32, #tpu.memory_space<vmem>>, vector<32x128xf32>,
    } else {
    }
    %c0 = arith.constant 0 : index
    %c0_1 = arith.constant 0 : index
    %3 = vector.load %arg7[%c0, %c0_1] : memref<32x128xf32, #tpu.memory_space<vmem>>, vector<32x128xf32>
    %c0_2 = arith.constant 0 : index
    %c0_3 = arith.constant 0 : index
    %4 = vector.load %arg3[%c0_2, %c0_3] : memref<32x256xbf16, #tpu.memory_space<vmem>>, vector<32x256xbf16>
    %c0_4 = arith.constant 0 : index
    %c0_5 = arith.constant 0 : index
    %5 = vector.load %arg4[%c0_4, %c0_5] : memref<256x128xbf16, #tpu.memory_space<vmem>>, vector<256x128xbf16>
    %cst = arith.constant dense<0.000000e+00> : vector<32x128xf32>
    %6 = tpu.matmul %4, %5, %cst {dimension_numbers = #tpu.dot_dimension_numbers<[1], [0], [0], [1], [0, 0, 1, 1], [], []>} : vector<32x256xbf16>, vector<256x128xbf16>, vector<32x128xf32> -> vector<32x128xf32>
    %7 = arith.addf %3, %6 : vector<32x128xf32>
    %c0_6 = arith.constant 0 : index
    %c0_7 = arith.constant 0 : index
    %8 = vector.load %arg7[%c0_6, %c0_7] : memref<32x128xf32, #tpu.memory_space<vmem>>, vector<32x128xf32>
    tpu.vector_store %arg7[%c0_6, %c0_7], %7 {strides = array<i32>} : memref<32x128xf32, #tpu.memory_space<vmem>>, vector<32x128xf32>,
    %c0_i32_8 = arith.constant 0 : i32
    %9 = arith.cmpi eq, %arg2, %c0_i32_8 : i32
    %10 = arith.extui %9 : i1 to i32
    %c0_i32_9 = arith.constant 0 : i32
    %11 = arith.cmpi ne, %10, %c0_i32_9 : i32
    scf.if %11 {
      %c0_10 = arith.constant 0 : index
      %c0_11 = arith.constant 0 : index
      %12 = vector.load %arg7[%c0_10, %c0_11] : memref<32x128xf32, #tpu.memory_space<vmem>>, vector<32x128xf32>
      %c0_12 = arith.constant 0 : index
      %c0_13 = arith.constant 0 : index
      %13 = vector.load %arg5[%c0_12, %c0_13] : memref<1x128xf32, #tpu.memory_space<vmem>>, vector<1x128xf32>
      %14 = vector.broadcast %13 : vector<1x128xf32> to vector<32x128xf32>
      %15 = arith.mulf %12, %14 : vector<32x128xf32>
      %c0_14 = arith.constant 0 : index
      %c0_15 = arith.constant 0 : index
      %16 = vector.load %arg6[%c0_14, %c0_15] : memref<1x128xf32, #tpu.memory_space<vmem>>, vector<1x128xf32>
      %17 = vector.broadcast %16 : vector<1x128xf32> to vector<32x128xf32>
      %18 = arith.addf %15, %17 : vector<32x128xf32>
      %cst_16 = arith.constant 0.000000e+00 : f32
      %19 = vector.broadcast %cst_16 : f32 to vector<32x128xf32>
      %20 = arith.maximumf %18, %19 : vector<32x128xf32>
      %c0_17 = arith.constant 0 : index
      %c0_18 = arith.constant 0 : index
      %21 = vector.load %arg7[%c0_17, %c0_18] : memref<32x128xf32, #tpu.memory_space<vmem>>, vector<32x128xf32>
      tpu.vector_store %arg7[%c0_17, %c0_18], %20 {strides = array<i32>} : memref<32x128xf32, #tpu.memory_space<vmem>>, vector<32x128xf32>,
    } else {
    }
    return
  }
  func.func @transform_0(%arg0: i32, %arg1: i32, %arg2: i32) -> (i32, i32) {
    %c0_i32 = arith.constant 0 : i32
    return %arg0, %arg2 : i32, i32
  }
  func.func @transform_1(%arg0: i32, %arg1: i32, %arg2: i32) -> (i32, i32) {
    %c0_i32 = arith.constant 0 : i32
    return %arg2, %arg1 : i32, i32
  }
  func.func @transform_2(%arg0: i32, %arg1: i32, %arg2: i32) -> (i32, i32) {
    %c0_i32 = arith.constant 0 : i32
    %c0_i32_0 = arith.constant 0 : i32
    return %c0_i32, %arg1 : i32, i32
  }
  func.func @transform_3(%arg0: i32, %arg1: i32, %arg2: i32) -> (i32, i32) {
    %c0_i32 = arith.constant 0 : i32
    %c0_i32_0 = arith.constant 0 : i32
    return %c0_i32, %arg1 : i32, i32
  }
  func.func @transform_4(%arg0: i32, %arg1: i32, %arg2: i32) -> (i32, i32) {
    %c0_i32 = arith.constant 0 : i32
    return %arg0, %arg1 : i32, i32
  }
}

module attributes {stable_mosaic.version = 11 : i64} {
  func.func @_matmul_bn_act_kernel(%arg0: i32, %arg1: i32, %arg2: i32, %arg3: memref<32x128xbf16, #tpu.memory_space<vmem>>, %arg4: memref<128x128xbf16, #tpu.memory_space<vmem>>, %arg5: memref<1x128xf32, #tpu.memory_space<vmem>>, %arg6: memref<1x128xf32, #tpu.memory_space<vmem>>, %arg7: memref<32x128xf32, #tpu.memory_space<vmem>>) attributes {dimension_semantics = [#tpu.dimension_semantics<parallel>, #tpu.dimension_semantics<parallel>, #tpu.dimension_semantics<arbitrary>], iteration_bounds = array<i64: 2, 1, 1>, scalar_prefetch = 0 : i64, scratch_operands = 0 : i64, tpu.core_type = #tpu.core_type<tc>, window_params = [{transform_indices = @transform_0, window_bounds = array<i64: 32, 128>}, {transform_indices = @transform_1, window_bounds = array<i64: 128, 128>}, {transform_indices = @transform_2, window_bounds = array<i64: 1, 128>}, {transform_indices = @transform_3, window_bounds = array<i64: 1, 128>}, {transform_indices = @transform_4, window_bounds = array<i64: 32, 128>}]} {
    %c0_i32 = arith.constant 0 : i32
    %0 = arith.cmpi eq, %arg2, %c0_i32 : i32
    %1 = arith.extui %0 : i1 to i32
    %c0_i32_0 = arith.constant 0 : i32
    %2 = arith.cmpi ne, %1, %c0_i32_0 : i32
    scf.if %2 {
      %cst_10 = arith.constant 0.000000e+00 : f32
      %12 = vector.broadcast %cst_10 : f32 to vector<32x128xf32>
      %c0_11 = arith.constant 0 : index
      %c0_12 = arith.constant 0 : index
      %13 = vector.load %arg7[%c0_11, %c0_12] : memref<32x128xf32, #tpu.memory_space<vmem>>, vector<32x128xf32>
      tpu.vector_store %arg7[%c0_11, %c0_12], %12 {strides = array<i32>} : memref<32x128xf32, #tpu.memory_space<vmem>>, vector<32x128xf32>,
    } else {
    }
    %c0 = arith.constant 0 : index
    %c0_1 = arith.constant 0 : index
    %3 = vector.load %arg7[%c0, %c0_1] : memref<32x128xf32, #tpu.memory_space<vmem>>, vector<32x128xf32>
    %c0_2 = arith.constant 0 : index
    %c0_3 = arith.constant 0 : index
    %4 = vector.load %arg3[%c0_2, %c0_3] : memref<32x128xbf16, #tpu.memory_space<vmem>>, vector<32x128xbf16>
    %c0_4 = arith.constant 0 : index
    %c0_5 = arith.constant 0 : index
    %5 = vector.load %arg4[%c0_4, %c0_5] : memref<128x128xbf16, #tpu.memory_space<vmem>>, vector<128x128xbf16>
    %cst = arith.constant dense<0.000000e+00> : vector<32x128xf32>
    %6 = tpu.matmul %4, %5, %cst {dimension_numbers = #tpu.dot_dimension_numbers<[1], [0], [0], [1], [0, 0, 1, 1], [], []>} : vector<32x128xbf16>, vector<128x128xbf16>, vector<32x128xf32> -> vector<32x128xf32>
    %7 = arith.addf %3, %6 : vector<32x128xf32>
    %c0_6 = arith.constant 0 : index
    %c0_7 = arith.constant 0 : index
    %8 = vector.load %arg7[%c0_6, %c0_7] : memref<32x128xf32, #tpu.memory_space<vmem>>, vector<32x128xf32>
    tpu.vector_store %arg7[%c0_6, %c0_7], %7 {strides = array<i32>} : memref<32x128xf32, #tpu.memory_space<vmem>>, vector<32x128xf32>,
    %c0_i32_8 = arith.constant 0 : i32
    %9 = arith.cmpi eq, %arg2, %c0_i32_8 : i32
    %10 = arith.extui %9 : i1 to i32
    %c0_i32_9 = arith.constant 0 : i32
    %11 = arith.cmpi ne, %10, %c0_i32_9 : i32
    scf.if %11 {
      %c0_10 = arith.constant 0 : index
      %c0_11 = arith.constant 0 : index
      %12 = vector.load %arg7[%c0_10, %c0_11] : memref<32x128xf32, #tpu.memory_space<vmem>>, vector<32x128xf32>
      %c0_12 = arith.constant 0 : index
      %c0_13 = arith.constant 0 : index
      %13 = vector.load %arg5[%c0_12, %c0_13] : memref<1x128xf32, #tpu.memory_space<vmem>>, vector<1x128xf32>
      %14 = vector.broadcast %13 : vector<1x128xf32> to vector<32x128xf32>
      %15 = arith.mulf %12, %14 : vector<32x128xf32>
      %c0_14 = arith.constant 0 : index
      %c0_15 = arith.constant 0 : index
      %16 = vector.load %arg6[%c0_14, %c0_15] : memref<1x128xf32, #tpu.memory_space<vmem>>, vector<1x128xf32>
      %17 = vector.broadcast %16 : vector<1x128xf32> to vector<32x128xf32>
      %18 = arith.addf %15, %17 : vector<32x128xf32>
      %c0_16 = arith.constant 0 : index
      %c0_17 = arith.constant 0 : index
      %19 = vector.load %arg7[%c0_16, %c0_17] : memref<32x128xf32, #tpu.memory_space<vmem>>, vector<32x128xf32>
      tpu.vector_store %arg7[%c0_16, %c0_17], %18 {strides = array<i32>} : memref<32x128xf32, #tpu.memory_space<vmem>>, vector<32x128xf32>,
    } else {
    }
    return
  }
  func.func @transform_0(%arg0: i32, %arg1: i32, %arg2: i32) -> (i32, i32) {
    %c0_i32 = arith.constant 0 : i32
    return %arg0, %arg2 : i32, i32
  }
  func.func @transform_1(%arg0: i32, %arg1: i32, %arg2: i32) -> (i32, i32) {
    %c0_i32 = arith.constant 0 : i32
    return %arg2, %arg1 : i32, i32
  }
  func.func @transform_2(%arg0: i32, %arg1: i32, %arg2: i32) -> (i32, i32) {
    %c0_i32 = arith.constant 0 : i32
    %c0_i32_0 = arith.constant 0 : i32
    return %c0_i32, %arg1 : i32, i32
  }
  func.func @transform_3(%arg0: i32, %arg1: i32, %arg2: i32) -> (i32, i32) {
    %c0_i32 = arith.constant 0 : i32
    %c0_i32_0 = arith.constant 0 : i32
    return %c0_i32, %arg1 : i32, i32
  }
  func.func @transform_4(%arg0: i32, %arg1: i32, %arg2: i32) -> (i32, i32) {
    %c0_i32 = arith.constant 0 : i32
    return %arg0, %arg1 : i32, i32
  }
}

module attributes {stable_mosaic.version = 11 : i64} {
  func.func @_matmul_bn_act_kernel(%arg0: i32, %arg1: i32, %arg2: i32, %arg3: memref<32x128xbf16, #tpu.memory_space<vmem>>, %arg4: memref<128x128xbf16, #tpu.memory_space<vmem>>, %arg5: memref<1x128xf32, #tpu.memory_space<vmem>>, %arg6: memref<1x128xf32, #tpu.memory_space<vmem>>, %arg7: memref<32x128xf32, #tpu.memory_space<vmem>>) attributes {dimension_semantics = [#tpu.dimension_semantics<parallel>, #tpu.dimension_semantics<parallel>, #tpu.dimension_semantics<arbitrary>], iteration_bounds = array<i64: 2, 1, 1>, scalar_prefetch = 0 : i64, scratch_operands = 0 : i64, tpu.core_type = #tpu.core_type<tc>, window_params = [{transform_indices = @transform_0, window_bounds = array<i64: 32, 128>}, {transform_indices = @transform_1, window_bounds = array<i64: 128, 128>}, {transform_indices = @transform_2, window_bounds = array<i64: 1, 128>}, {transform_indices = @transform_3, window_bounds = array<i64: 1, 128>}, {transform_indices = @transform_4, window_bounds = array<i64: 32, 128>}]} {
    %c0_i32 = arith.constant 0 : i32
    %0 = arith.cmpi eq, %arg2, %c0_i32 : i32
    %1 = arith.extui %0 : i1 to i32
    %c0_i32_0 = arith.constant 0 : i32
    %2 = arith.cmpi ne, %1, %c0_i32_0 : i32
    scf.if %2 {
      %cst_10 = arith.constant 0.000000e+00 : f32
      %12 = vector.broadcast %cst_10 : f32 to vector<32x128xf32>
      %c0_11 = arith.constant 0 : index
      %c0_12 = arith.constant 0 : index
      %13 = vector.load %arg7[%c0_11, %c0_12] : memref<32x128xf32, #tpu.memory_space<vmem>>, vector<32x128xf32>
      tpu.vector_store %arg7[%c0_11, %c0_12], %12 {strides = array<i32>} : memref<32x128xf32, #tpu.memory_space<vmem>>, vector<32x128xf32>,
    } else {
    }
    %c0 = arith.constant 0 : index
    %c0_1 = arith.constant 0 : index
    %3 = vector.load %arg7[%c0, %c0_1] : memref<32x128xf32, #tpu.memory_space<vmem>>, vector<32x128xf32>
    %c0_2 = arith.constant 0 : index
    %c0_3 = arith.constant 0 : index
    %4 = vector.load %arg3[%c0_2, %c0_3] : memref<32x128xbf16, #tpu.memory_space<vmem>>, vector<32x128xbf16>
    %c0_4 = arith.constant 0 : index
    %c0_5 = arith.constant 0 : index
    %5 = vector.load %arg4[%c0_4, %c0_5] : memref<128x128xbf16, #tpu.memory_space<vmem>>, vector<128x128xbf16>
    %cst = arith.constant dense<0.000000e+00> : vector<32x128xf32>
    %6 = tpu.matmul %4, %5, %cst {dimension_numbers = #tpu.dot_dimension_numbers<[1], [0], [0], [1], [0, 0, 1, 1], [], []>} : vector<32x128xbf16>, vector<128x128xbf16>, vector<32x128xf32> -> vector<32x128xf32>
    %7 = arith.addf %3, %6 : vector<32x128xf32>
    %c0_6 = arith.constant 0 : index
    %c0_7 = arith.constant 0 : index
    %8 = vector.load %arg7[%c0_6, %c0_7] : memref<32x128xf32, #tpu.memory_space<vmem>>, vector<32x128xf32>
    tpu.vector_store %arg7[%c0_6, %c0_7], %7 {strides = array<i32>} : memref<32x128xf32, #tpu.memory_space<vmem>>, vector<32x128xf32>,
    %c0_i32_8 = arith.constant 0 : i32
    %9 = arith.cmpi eq, %arg2, %c0_i32_8 : i32
    %10 = arith.extui %9 : i1 to i32
    %c0_i32_9 = arith.constant 0 : i32
    %11 = arith.cmpi ne, %10, %c0_i32_9 : i32
    scf.if %11 {
      %c0_10 = arith.constant 0 : index
      %c0_11 = arith.constant 0 : index
      %12 = vector.load %arg7[%c0_10, %c0_11] : memref<32x128xf32, #tpu.memory_space<vmem>>, vector<32x128xf32>
      %c0_12 = arith.constant 0 : index
      %c0_13 = arith.constant 0 : index
      %13 = vector.load %arg5[%c0_12, %c0_13] : memref<1x128xf32, #tpu.memory_space<vmem>>, vector<1x128xf32>
      %14 = vector.broadcast %13 : vector<1x128xf32> to vector<32x128xf32>
      %15 = arith.mulf %12, %14 : vector<32x128xf32>
      %c0_14 = arith.constant 0 : index
      %c0_15 = arith.constant 0 : index
      %16 = vector.load %arg6[%c0_14, %c0_15] : memref<1x128xf32, #tpu.memory_space<vmem>>, vector<1x128xf32>
      %17 = vector.broadcast %16 : vector<1x128xf32> to vector<32x128xf32>
      %18 = arith.addf %15, %17 : vector<32x128xf32>
      %cst_16 = arith.constant 0.000000e+00 : f32
      %19 = vector.broadcast %cst_16 : f32 to vector<32x128xf32>
      %20 = arith.maximumf %18, %19 : vector<32x128xf32>
      %c0_17 = arith.constant 0 : index
      %c0_18 = arith.constant 0 : index
      %21 = vector.load %arg7[%c0_17, %c0_18] : memref<32x128xf32, #tpu.memory_space<vmem>>, vector<32x128xf32>
      tpu.vector_store %arg7[%c0_17, %c0_18], %20 {strides = array<i32>} : memref<32x128xf32, #tpu.memory_space<vmem>>, vector<32x128xf32>,
    } else {
    }
    return
  }
  func.func @transform_0(%arg0: i32, %arg1: i32, %arg2: i32) -> (i32, i32) {
    %c0_i32 = arith.constant 0 : i32
    return %arg0, %arg2 : i32, i32
  }
  func.func @transform_1(%arg0: i32, %arg1: i32, %arg2: i32) -> (i32, i32) {
    %c0_i32 = arith.constant 0 : i32
    return %arg2, %arg1 : i32, i32
  }
  func.func @transform_2(%arg0: i32, %arg1: i32, %arg2: i32) -> (i32, i32) {
    %c0_i32 = arith.constant 0 : i32
    %c0_i32_0 = arith.constant 0 : i32
    return %c0_i32, %arg1 : i32, i32
  }
  func.func @transform_3(%arg0: i32, %arg1: i32, %arg2: i32) -> (i32, i32) {
    %c0_i32 = arith.constant 0 : i32
    %c0_i32_0 = arith.constant 0 : i32
    return %c0_i32, %arg1 : i32, i32
  }
  func.func @transform_4(%arg0: i32, %arg1: i32, %arg2: i32) -> (i32, i32) {
    %c0_i32 = arith.constant 0 : i32
    return %arg0, %arg1 : i32, i32
  }
}

module attributes {stable_mosaic.version = 11 : i64} {
  func.func @_matmul_bn_act_kernel(%arg0: i32, %arg1: i32, %arg2: i32, %arg3: memref<32x128xbf16, #tpu.memory_space<vmem>>, %arg4: memref<128x128xbf16, #tpu.memory_space<vmem>>, %arg5: memref<1x128xf32, #tpu.memory_space<vmem>>, %arg6: memref<1x128xf32, #tpu.memory_space<vmem>>, %arg7: memref<32x128xf32, #tpu.memory_space<vmem>>, %arg8: memref<32x128xf32, #tpu.memory_space<vmem>>) attributes {dimension_semantics = [#tpu.dimension_semantics<parallel>, #tpu.dimension_semantics<parallel>, #tpu.dimension_semantics<arbitrary>], iteration_bounds = array<i64: 2, 1, 1>, scalar_prefetch = 0 : i64, scratch_operands = 0 : i64, tpu.core_type = #tpu.core_type<tc>, window_params = [{transform_indices = @transform_0, window_bounds = array<i64: 32, 128>}, {transform_indices = @transform_1, window_bounds = array<i64: 128, 128>}, {transform_indices = @transform_2, window_bounds = array<i64: 1, 128>}, {transform_indices = @transform_3, window_bounds = array<i64: 1, 128>}, {transform_indices = @transform_4, window_bounds = array<i64: 32, 128>}, {transform_indices = @transform_5, window_bounds = array<i64: 32, 128>}]} {
    %c0_i32 = arith.constant 0 : i32
    %0 = arith.cmpi eq, %arg2, %c0_i32 : i32
    %1 = arith.extui %0 : i1 to i32
    %c0_i32_0 = arith.constant 0 : i32
    %2 = arith.cmpi ne, %1, %c0_i32_0 : i32
    scf.if %2 {
      %cst_10 = arith.constant 0.000000e+00 : f32
      %12 = vector.broadcast %cst_10 : f32 to vector<32x128xf32>
      %c0_11 = arith.constant 0 : index
      %c0_12 = arith.constant 0 : index
      %13 = vector.load %arg8[%c0_11, %c0_12] : memref<32x128xf32, #tpu.memory_space<vmem>>, vector<32x128xf32>
      tpu.vector_store %arg8[%c0_11, %c0_12], %12 {strides = array<i32>} : memref<32x128xf32, #tpu.memory_space<vmem>>, vector<32x128xf32>,
    } else {
    }
    %c0 = arith.constant 0 : index
    %c0_1 = arith.constant 0 : index
    %3 = vector.load %arg8[%c0, %c0_1] : memref<32x128xf32, #tpu.memory_space<vmem>>, vector<32x128xf32>
    %c0_2 = arith.constant 0 : index
    %c0_3 = arith.constant 0 : index
    %4 = vector.load %arg3[%c0_2, %c0_3] : memref<32x128xbf16, #tpu.memory_space<vmem>>, vector<32x128xbf16>
    %c0_4 = arith.constant 0 : index
    %c0_5 = arith.constant 0 : index
    %5 = vector.load %arg4[%c0_4, %c0_5] : memref<128x128xbf16, #tpu.memory_space<vmem>>, vector<128x128xbf16>
    %cst = arith.constant dense<0.000000e+00> : vector<32x128xf32>
    %6 = tpu.matmul %4, %5, %cst {dimension_numbers = #tpu.dot_dimension_numbers<[1], [0], [0], [1], [0, 0, 1, 1], [], []>} : vector<32x128xbf16>, vector<128x128xbf16>, vector<32x128xf32> -> vector<32x128xf32>
    %7 = arith.addf %3, %6 : vector<32x128xf32>
    %c0_6 = arith.constant 0 : index
    %c0_7 = arith.constant 0 : index
    %8 = vector.load %arg8[%c0_6, %c0_7] : memref<32x128xf32, #tpu.memory_space<vmem>>, vector<32x128xf32>
    tpu.vector_store %arg8[%c0_6, %c0_7], %7 {strides = array<i32>} : memref<32x128xf32, #tpu.memory_space<vmem>>, vector<32x128xf32>,
    %c0_i32_8 = arith.constant 0 : i32
    %9 = arith.cmpi eq, %arg2, %c0_i32_8 : i32
    %10 = arith.extui %9 : i1 to i32
    %c0_i32_9 = arith.constant 0 : i32
    %11 = arith.cmpi ne, %10, %c0_i32_9 : i32
    scf.if %11 {
      %c0_10 = arith.constant 0 : index
      %c0_11 = arith.constant 0 : index
      %12 = vector.load %arg8[%c0_10, %c0_11] : memref<32x128xf32, #tpu.memory_space<vmem>>, vector<32x128xf32>
      %c0_12 = arith.constant 0 : index
      %c0_13 = arith.constant 0 : index
      %13 = vector.load %arg5[%c0_12, %c0_13] : memref<1x128xf32, #tpu.memory_space<vmem>>, vector<1x128xf32>
      %14 = vector.broadcast %13 : vector<1x128xf32> to vector<32x128xf32>
      %15 = arith.mulf %12, %14 : vector<32x128xf32>
      %c0_14 = arith.constant 0 : index
      %c0_15 = arith.constant 0 : index
      %16 = vector.load %arg6[%c0_14, %c0_15] : memref<1x128xf32, #tpu.memory_space<vmem>>, vector<1x128xf32>
      %17 = vector.broadcast %16 : vector<1x128xf32> to vector<32x128xf32>
      %18 = arith.addf %15, %17 : vector<32x128xf32>
      %c0_16 = arith.constant 0 : index
      %c0_17 = arith.constant 0 : index
      %19 = vector.load %arg7[%c0_16, %c0_17] : memref<32x128xf32, #tpu.memory_space<vmem>>, vector<32x128xf32>
      %20 = arith.addf %18, %19 : vector<32x128xf32>
      %cst_18 = arith.constant 0.000000e+00 : f32
      %21 = vector.broadcast %cst_18 : f32 to vector<32x128xf32>
      %22 = arith.maximumf %20, %21 : vector<32x128xf32>
      %c0_19 = arith.constant 0 : index
      %c0_20 = arith.constant 0 : index
      %23 = vector.load %arg8[%c0_19, %c0_20] : memref<32x128xf32, #tpu.memory_space<vmem>>, vector<32x128xf32>
      tpu.vector_store %arg8[%c0_19, %c0_20], %22 {strides = array<i32>} : memref<32x128xf32, #tpu.memory_space<vmem>>, vector<32x128xf32>,
    } else {
    }
    return
  }
  func.func @transform_0(%arg0: i32, %arg1: i32, %arg2: i32) -> (i32, i32) {
    %c0_i32 = arith.constant 0 : i32
    return %arg0, %arg2 : i32, i32
  }
  func.func @transform_1(%arg0: i32, %arg1: i32, %arg2: i32) -> (i32, i32) {
    %c0_i32 = arith.constant 0 : i32
    return %arg2, %arg1 : i32, i32
  }
  func.func @transform_2(%arg0: i32, %arg1: i32, %arg2: i32) -> (i32, i32) {
    %c0_i32 = arith.constant 0 : i32
    %c0_i32_0 = arith.constant 0 : i32
    return %c0_i32, %arg1 : i32, i32
  }
  func.func @transform_3(%arg0: i32, %arg1: i32, %arg2: i32) -> (i32, i32) {
    %c0_i32 = arith.constant 0 : i32
    %c0_i32_0 = arith.constant 0 : i32
    return %c0_i32, %arg1 : i32, i32
  }
  func.func @transform_4(%arg0: i32, %arg1: i32, %arg2: i32) -> (i32, i32) {
    %c0_i32 = arith.constant 0 : i32
    return %arg0, %arg1 : i32, i32
  }
  func.func @transform_5(%arg0: i32, %arg1: i32, %arg2: i32) -> (i32, i32) {
    %c0_i32 = arith.constant 0 : i32
    return %arg0, %arg1 : i32, i32
  }
}

module attributes {stable_mosaic.version = 11 : i64} {
  func.func @_matmul_bn_act_kernel(%arg0: i32, %arg1: i32, %arg2: i32, %arg3: memref<16x384xbf16, #tpu.memory_space<vmem>>, %arg4: memref<384x128xbf16, #tpu.memory_space<vmem>>, %arg5: memref<1x128xf32, #tpu.memory_space<vmem>>, %arg6: memref<1x128xf32, #tpu.memory_space<vmem>>, %arg7: memref<16x128xf32, #tpu.memory_space<vmem>>) attributes {dimension_semantics = [#tpu.dimension_semantics<parallel>, #tpu.dimension_semantics<parallel>, #tpu.dimension_semantics<arbitrary>], iteration_bounds = array<i64: 1, 1, 1>, scalar_prefetch = 0 : i64, scratch_operands = 0 : i64, tpu.core_type = #tpu.core_type<tc>, window_params = [{transform_indices = @transform_0, window_bounds = array<i64: 16, 384>}, {transform_indices = @transform_1, window_bounds = array<i64: 384, 128>}, {transform_indices = @transform_2, window_bounds = array<i64: 1, 128>}, {transform_indices = @transform_3, window_bounds = array<i64: 1, 128>}, {transform_indices = @transform_4, window_bounds = array<i64: 16, 128>}]} {
    %c0_i32 = arith.constant 0 : i32
    %0 = arith.cmpi eq, %arg2, %c0_i32 : i32
    %1 = arith.extui %0 : i1 to i32
    %c0_i32_0 = arith.constant 0 : i32
    %2 = arith.cmpi ne, %1, %c0_i32_0 : i32
    scf.if %2 {
      %cst_10 = arith.constant 0.000000e+00 : f32
      %12 = vector.broadcast %cst_10 : f32 to vector<16x128xf32>
      %c0_11 = arith.constant 0 : index
      %c0_12 = arith.constant 0 : index
      %13 = vector.load %arg7[%c0_11, %c0_12] : memref<16x128xf32, #tpu.memory_space<vmem>>, vector<16x128xf32>
      tpu.vector_store %arg7[%c0_11, %c0_12], %12 {strides = array<i32>} : memref<16x128xf32, #tpu.memory_space<vmem>>, vector<16x128xf32>,
    } else {
    }
    %c0 = arith.constant 0 : index
    %c0_1 = arith.constant 0 : index
    %3 = vector.load %arg7[%c0, %c0_1] : memref<16x128xf32, #tpu.memory_space<vmem>>, vector<16x128xf32>
    %c0_2 = arith.constant 0 : index
    %c0_3 = arith.constant 0 : index
    %4 = vector.load %arg3[%c0_2, %c0_3] : memref<16x384xbf16, #tpu.memory_space<vmem>>, vector<16x384xbf16>
    %c0_4 = arith.constant 0 : index
    %c0_5 = arith.constant 0 : index
    %5 = vector.load %arg4[%c0_4, %c0_5] : memref<384x128xbf16, #tpu.memory_space<vmem>>, vector<384x128xbf16>
    %cst = arith.constant dense<0.000000e+00> : vector<16x128xf32>
    %6 = tpu.matmul %4, %5, %cst {dimension_numbers = #tpu.dot_dimension_numbers<[1], [0], [0], [1], [0, 0, 1, 1], [], []>} : vector<16x384xbf16>, vector<384x128xbf16>, vector<16x128xf32> -> vector<16x128xf32>
    %7 = arith.addf %3, %6 : vector<16x128xf32>
    %c0_6 = arith.constant 0 : index
    %c0_7 = arith.constant 0 : index
    %8 = vector.load %arg7[%c0_6, %c0_7] : memref<16x128xf32, #tpu.memory_space<vmem>>, vector<16x128xf32>
    tpu.vector_store %arg7[%c0_6, %c0_7], %7 {strides = array<i32>} : memref<16x128xf32, #tpu.memory_space<vmem>>, vector<16x128xf32>,
    %c0_i32_8 = arith.constant 0 : i32
    %9 = arith.cmpi eq, %arg2, %c0_i32_8 : i32
    %10 = arith.extui %9 : i1 to i32
    %c0_i32_9 = arith.constant 0 : i32
    %11 = arith.cmpi ne, %10, %c0_i32_9 : i32
    scf.if %11 {
      %c0_10 = arith.constant 0 : index
      %c0_11 = arith.constant 0 : index
      %12 = vector.load %arg7[%c0_10, %c0_11] : memref<16x128xf32, #tpu.memory_space<vmem>>, vector<16x128xf32>
      %c0_12 = arith.constant 0 : index
      %c0_13 = arith.constant 0 : index
      %13 = vector.load %arg5[%c0_12, %c0_13] : memref<1x128xf32, #tpu.memory_space<vmem>>, vector<1x128xf32>
      %14 = vector.broadcast %13 : vector<1x128xf32> to vector<16x128xf32>
      %15 = arith.mulf %12, %14 : vector<16x128xf32>
      %c0_14 = arith.constant 0 : index
      %c0_15 = arith.constant 0 : index
      %16 = vector.load %arg6[%c0_14, %c0_15] : memref<1x128xf32, #tpu.memory_space<vmem>>, vector<1x128xf32>
      %17 = vector.broadcast %16 : vector<1x128xf32> to vector<16x128xf32>
      %18 = arith.addf %15, %17 : vector<16x128xf32>
      %cst_16 = arith.constant 0.000000e+00 : f32
      %19 = vector.broadcast %cst_16 : f32 to vector<16x128xf32>
      %20 = arith.maximumf %18, %19 : vector<16x128xf32>
      %c0_17 = arith.constant 0 : index
      %c0_18 = arith.constant 0 : index
      %21 = vector.load %arg7[%c0_17, %c0_18] : memref<16x128xf32, #tpu.memory_space<vmem>>, vector<16x128xf32>
      tpu.vector_store %arg7[%c0_17, %c0_18], %20 {strides = array<i32>} : memref<16x128xf32, #tpu.memory_space<vmem>>, vector<16x128xf32>,
    } else {
    }
    return
  }
  func.func @transform_0(%arg0: i32, %arg1: i32, %arg2: i32) -> (i32, i32) {
    %c0_i32 = arith.constant 0 : i32
    return %arg0, %arg2 : i32, i32
  }
  func.func @transform_1(%arg0: i32, %arg1: i32, %arg2: i32) -> (i32, i32) {
    %c0_i32 = arith.constant 0 : i32
    return %arg2, %arg1 : i32, i32
  }
  func.func @transform_2(%arg0: i32, %arg1: i32, %arg2: i32) -> (i32, i32) {
    %c0_i32 = arith.constant 0 : i32
    %c0_i32_0 = arith.constant 0 : i32
    return %c0_i32, %arg1 : i32, i32
  }
  func.func @transform_3(%arg0: i32, %arg1: i32, %arg2: i32) -> (i32, i32) {
    %c0_i32 = arith.constant 0 : i32
    %c0_i32_0 = arith.constant 0 : i32
    return %c0_i32, %arg1 : i32, i32
  }
  func.func @transform_4(%arg0: i32, %arg1: i32, %arg2: i32) -> (i32, i32) {
    %c0_i32 = arith.constant 0 : i32
    return %arg0, %arg1 : i32, i32
  }
}

module attributes {stable_mosaic.version = 11 : i64} {
  func.func @_matmul_bn_act_kernel(%arg0: i32, %arg1: i32, %arg2: i32, %arg3: memref<16x128xbf16, #tpu.memory_space<vmem>>, %arg4: memref<128x128xbf16, #tpu.memory_space<vmem>>, %arg5: memref<1x128xf32, #tpu.memory_space<vmem>>, %arg6: memref<1x128xf32, #tpu.memory_space<vmem>>, %arg7: memref<16x128xf32, #tpu.memory_space<vmem>>) attributes {dimension_semantics = [#tpu.dimension_semantics<parallel>, #tpu.dimension_semantics<parallel>, #tpu.dimension_semantics<arbitrary>], iteration_bounds = array<i64: 1, 1, 1>, scalar_prefetch = 0 : i64, scratch_operands = 0 : i64, tpu.core_type = #tpu.core_type<tc>, window_params = [{transform_indices = @transform_0, window_bounds = array<i64: 16, 128>}, {transform_indices = @transform_1, window_bounds = array<i64: 128, 128>}, {transform_indices = @transform_2, window_bounds = array<i64: 1, 128>}, {transform_indices = @transform_3, window_bounds = array<i64: 1, 128>}, {transform_indices = @transform_4, window_bounds = array<i64: 16, 128>}]} {
    %c0_i32 = arith.constant 0 : i32
    %0 = arith.cmpi eq, %arg2, %c0_i32 : i32
    %1 = arith.extui %0 : i1 to i32
    %c0_i32_0 = arith.constant 0 : i32
    %2 = arith.cmpi ne, %1, %c0_i32_0 : i32
    scf.if %2 {
      %cst_10 = arith.constant 0.000000e+00 : f32
      %12 = vector.broadcast %cst_10 : f32 to vector<16x128xf32>
      %c0_11 = arith.constant 0 : index
      %c0_12 = arith.constant 0 : index
      %13 = vector.load %arg7[%c0_11, %c0_12] : memref<16x128xf32, #tpu.memory_space<vmem>>, vector<16x128xf32>
      tpu.vector_store %arg7[%c0_11, %c0_12], %12 {strides = array<i32>} : memref<16x128xf32, #tpu.memory_space<vmem>>, vector<16x128xf32>,
    } else {
    }
    %c0 = arith.constant 0 : index
    %c0_1 = arith.constant 0 : index
    %3 = vector.load %arg7[%c0, %c0_1] : memref<16x128xf32, #tpu.memory_space<vmem>>, vector<16x128xf32>
    %c0_2 = arith.constant 0 : index
    %c0_3 = arith.constant 0 : index
    %4 = vector.load %arg3[%c0_2, %c0_3] : memref<16x128xbf16, #tpu.memory_space<vmem>>, vector<16x128xbf16>
    %c0_4 = arith.constant 0 : index
    %c0_5 = arith.constant 0 : index
    %5 = vector.load %arg4[%c0_4, %c0_5] : memref<128x128xbf16, #tpu.memory_space<vmem>>, vector<128x128xbf16>
    %cst = arith.constant dense<0.000000e+00> : vector<16x128xf32>
    %6 = tpu.matmul %4, %5, %cst {dimension_numbers = #tpu.dot_dimension_numbers<[1], [0], [0], [1], [0, 0, 1, 1], [], []>} : vector<16x128xbf16>, vector<128x128xbf16>, vector<16x128xf32> -> vector<16x128xf32>
    %7 = arith.addf %3, %6 : vector<16x128xf32>
    %c0_6 = arith.constant 0 : index
    %c0_7 = arith.constant 0 : index
    %8 = vector.load %arg7[%c0_6, %c0_7] : memref<16x128xf32, #tpu.memory_space<vmem>>, vector<16x128xf32>
    tpu.vector_store %arg7[%c0_6, %c0_7], %7 {strides = array<i32>} : memref<16x128xf32, #tpu.memory_space<vmem>>, vector<16x128xf32>,
    %c0_i32_8 = arith.constant 0 : i32
    %9 = arith.cmpi eq, %arg2, %c0_i32_8 : i32
    %10 = arith.extui %9 : i1 to i32
    %c0_i32_9 = arith.constant 0 : i32
    %11 = arith.cmpi ne, %10, %c0_i32_9 : i32
    scf.if %11 {
      %c0_10 = arith.constant 0 : index
      %c0_11 = arith.constant 0 : index
      %12 = vector.load %arg7[%c0_10, %c0_11] : memref<16x128xf32, #tpu.memory_space<vmem>>, vector<16x128xf32>
      %c0_12 = arith.constant 0 : index
      %c0_13 = arith.constant 0 : index
      %13 = vector.load %arg5[%c0_12, %c0_13] : memref<1x128xf32, #tpu.memory_space<vmem>>, vector<1x128xf32>
      %14 = vector.broadcast %13 : vector<1x128xf32> to vector<16x128xf32>
      %15 = arith.mulf %12, %14 : vector<16x128xf32>
      %c0_14 = arith.constant 0 : index
      %c0_15 = arith.constant 0 : index
      %16 = vector.load %arg6[%c0_14, %c0_15] : memref<1x128xf32, #tpu.memory_space<vmem>>, vector<1x128xf32>
      %17 = vector.broadcast %16 : vector<1x128xf32> to vector<16x128xf32>
      %18 = arith.addf %15, %17 : vector<16x128xf32>
      %c0_16 = arith.constant 0 : index
      %c0_17 = arith.constant 0 : index
      %19 = vector.load %arg7[%c0_16, %c0_17] : memref<16x128xf32, #tpu.memory_space<vmem>>, vector<16x128xf32>
      tpu.vector_store %arg7[%c0_16, %c0_17], %18 {strides = array<i32>} : memref<16x128xf32, #tpu.memory_space<vmem>>, vector<16x128xf32>,
    } else {
    }
    return
  }
  func.func @transform_0(%arg0: i32, %arg1: i32, %arg2: i32) -> (i32, i32) {
    %c0_i32 = arith.constant 0 : i32
    return %arg0, %arg2 : i32, i32
  }
  func.func @transform_1(%arg0: i32, %arg1: i32, %arg2: i32) -> (i32, i32) {
    %c0_i32 = arith.constant 0 : i32
    return %arg2, %arg1 : i32, i32
  }
  func.func @transform_2(%arg0: i32, %arg1: i32, %arg2: i32) -> (i32, i32) {
    %c0_i32 = arith.constant 0 : i32
    %c0_i32_0 = arith.constant 0 : i32
    return %c0_i32, %arg1 : i32, i32
  }
  func.func @transform_3(%arg0: i32, %arg1: i32, %arg2: i32) -> (i32, i32) {
    %c0_i32 = arith.constant 0 : i32
    %c0_i32_0 = arith.constant 0 : i32
    return %c0_i32, %arg1 : i32, i32
  }
  func.func @transform_4(%arg0: i32, %arg1: i32, %arg2: i32) -> (i32, i32) {
    %c0_i32 = arith.constant 0 : i32
    return %arg0, %arg1 : i32, i32
  }
}

module attributes {stable_mosaic.version = 11 : i64} {
  func.func @_matmul_bn_act_kernel(%arg0: i32, %arg1: i32, %arg2: i32, %arg3: memref<16x128xbf16, #tpu.memory_space<vmem>>, %arg4: memref<128x128xbf16, #tpu.memory_space<vmem>>, %arg5: memref<1x128xf32, #tpu.memory_space<vmem>>, %arg6: memref<1x128xf32, #tpu.memory_space<vmem>>, %arg7: memref<16x128xf32, #tpu.memory_space<vmem>>, %arg8: memref<16x128xf32, #tpu.memory_space<vmem>>) attributes {dimension_semantics = [#tpu.dimension_semantics<parallel>, #tpu.dimension_semantics<parallel>, #tpu.dimension_semantics<arbitrary>], iteration_bounds = array<i64: 1, 1, 1>, scalar_prefetch = 0 : i64, scratch_operands = 0 : i64, tpu.core_type = #tpu.core_type<tc>, window_params = [{transform_indices = @transform_0, window_bounds = array<i64: 16, 128>}, {transform_indices = @transform_1, window_bounds = array<i64: 128, 128>}, {transform_indices = @transform_2, window_bounds = array<i64: 1, 128>}, {transform_indices = @transform_3, window_bounds = array<i64: 1, 128>}, {transform_indices = @transform_4, window_bounds = array<i64: 16, 128>}, {transform_indices = @transform_5, window_bounds = array<i64: 16, 128>}]} {
    %c0_i32 = arith.constant 0 : i32
    %0 = arith.cmpi eq, %arg2, %c0_i32 : i32
    %1 = arith.extui %0 : i1 to i32
    %c0_i32_0 = arith.constant 0 : i32
    %2 = arith.cmpi ne, %1, %c0_i32_0 : i32
    scf.if %2 {
      %cst_10 = arith.constant 0.000000e+00 : f32
      %12 = vector.broadcast %cst_10 : f32 to vector<16x128xf32>
      %c0_11 = arith.constant 0 : index
      %c0_12 = arith.constant 0 : index
      %13 = vector.load %arg8[%c0_11, %c0_12] : memref<16x128xf32, #tpu.memory_space<vmem>>, vector<16x128xf32>
      tpu.vector_store %arg8[%c0_11, %c0_12], %12 {strides = array<i32>} : memref<16x128xf32, #tpu.memory_space<vmem>>, vector<16x128xf32>,
    } else {
    }
    %c0 = arith.constant 0 : index
    %c0_1 = arith.constant 0 : index
    %3 = vector.load %arg8[%c0, %c0_1] : memref<16x128xf32, #tpu.memory_space<vmem>>, vector<16x128xf32>
    %c0_2 = arith.constant 0 : index
    %c0_3 = arith.constant 0 : index
    %4 = vector.load %arg3[%c0_2, %c0_3] : memref<16x128xbf16, #tpu.memory_space<vmem>>, vector<16x128xbf16>
    %c0_4 = arith.constant 0 : index
    %c0_5 = arith.constant 0 : index
    %5 = vector.load %arg4[%c0_4, %c0_5] : memref<128x128xbf16, #tpu.memory_space<vmem>>, vector<128x128xbf16>
    %cst = arith.constant dense<0.000000e+00> : vector<16x128xf32>
    %6 = tpu.matmul %4, %5, %cst {dimension_numbers = #tpu.dot_dimension_numbers<[1], [0], [0], [1], [0, 0, 1, 1], [], []>} : vector<16x128xbf16>, vector<128x128xbf16>, vector<16x128xf32> -> vector<16x128xf32>
    %7 = arith.addf %3, %6 : vector<16x128xf32>
    %c0_6 = arith.constant 0 : index
    %c0_7 = arith.constant 0 : index
    %8 = vector.load %arg8[%c0_6, %c0_7] : memref<16x128xf32, #tpu.memory_space<vmem>>, vector<16x128xf32>
    tpu.vector_store %arg8[%c0_6, %c0_7], %7 {strides = array<i32>} : memref<16x128xf32, #tpu.memory_space<vmem>>, vector<16x128xf32>,
    %c0_i32_8 = arith.constant 0 : i32
    %9 = arith.cmpi eq, %arg2, %c0_i32_8 : i32
    %10 = arith.extui %9 : i1 to i32
    %c0_i32_9 = arith.constant 0 : i32
    %11 = arith.cmpi ne, %10, %c0_i32_9 : i32
    scf.if %11 {
      %c0_10 = arith.constant 0 : index
      %c0_11 = arith.constant 0 : index
      %12 = vector.load %arg8[%c0_10, %c0_11] : memref<16x128xf32, #tpu.memory_space<vmem>>, vector<16x128xf32>
      %c0_12 = arith.constant 0 : index
      %c0_13 = arith.constant 0 : index
      %13 = vector.load %arg5[%c0_12, %c0_13] : memref<1x128xf32, #tpu.memory_space<vmem>>, vector<1x128xf32>
      %14 = vector.broadcast %13 : vector<1x128xf32> to vector<16x128xf32>
      %15 = arith.mulf %12, %14 : vector<16x128xf32>
      %c0_14 = arith.constant 0 : index
      %c0_15 = arith.constant 0 : index
      %16 = vector.load %arg6[%c0_14, %c0_15] : memref<1x128xf32, #tpu.memory_space<vmem>>, vector<1x128xf32>
      %17 = vector.broadcast %16 : vector<1x128xf32> to vector<16x128xf32>
      %18 = arith.addf %15, %17 : vector<16x128xf32>
      %c0_16 = arith.constant 0 : index
      %c0_17 = arith.constant 0 : index
      %19 = vector.load %arg7[%c0_16, %c0_17] : memref<16x128xf32, #tpu.memory_space<vmem>>, vector<16x128xf32>
      %20 = arith.addf %18, %19 : vector<16x128xf32>
      %cst_18 = arith.constant 0.000000e+00 : f32
      %21 = vector.broadcast %cst_18 : f32 to vector<16x128xf32>
      %22 = arith.maximumf %20, %21 : vector<16x128xf32>
      %c0_19 = arith.constant 0 : index
      %c0_20 = arith.constant 0 : index
      %23 = vector.load %arg8[%c0_19, %c0_20] : memref<16x128xf32, #tpu.memory_space<vmem>>, vector<16x128xf32>
      tpu.vector_store %arg8[%c0_19, %c0_20], %22 {strides = array<i32>} : memref<16x128xf32, #tpu.memory_space<vmem>>, vector<16x128xf32>,
    } else {
    }
    return
  }
  func.func @transform_0(%arg0: i32, %arg1: i32, %arg2: i32) -> (i32, i32) {
    %c0_i32 = arith.constant 0 : i32
    return %arg0, %arg2 : i32, i32
  }
  func.func @transform_1(%arg0: i32, %arg1: i32, %arg2: i32) -> (i32, i32) {
    %c0_i32 = arith.constant 0 : i32
    return %arg2, %arg1 : i32, i32
  }
  func.func @transform_2(%arg0: i32, %arg1: i32, %arg2: i32) -> (i32, i32) {
    %c0_i32 = arith.constant 0 : i32
    %c0_i32_0 = arith.constant 0 : i32
    return %c0_i32, %arg1 : i32, i32
  }
  func.func @transform_3(%arg0: i32, %arg1: i32, %arg2: i32) -> (i32, i32) {
    %c0_i32 = arith.constant 0 : i32
    %c0_i32_0 = arith.constant 0 : i32
    return %c0_i32, %arg1 : i32, i32
  }
  func.func @transform_4(%arg0: i32, %arg1: i32, %arg2: i32) -> (i32, i32) {
    %c0_i32 = arith.constant 0 : i32
    return %arg0, %arg1 : i32, i32
  }
  func.func @transform_5(%arg0: i32, %arg1: i32, %arg2: i32) -> (i32, i32) {
    %c0_i32 = arith.constant 0 : i32
    return %arg0, %arg1 : i32, i32
  }
}

module attributes {stable_mosaic.version = 11 : i64} {
  func.func @_matmul_bn_act_kernel(%arg0: i32, %arg1: i32, %arg2: i32, %arg3: memref<16x128xbf16, #tpu.memory_space<vmem>>, %arg4: memref<128x128xbf16, #tpu.memory_space<vmem>>, %arg5: memref<1x128xf32, #tpu.memory_space<vmem>>, %arg6: memref<1x128xf32, #tpu.memory_space<vmem>>, %arg7: memref<16x128xf32, #tpu.memory_space<vmem>>) attributes {dimension_semantics = [#tpu.dimension_semantics<parallel>, #tpu.dimension_semantics<parallel>, #tpu.dimension_semantics<arbitrary>], iteration_bounds = array<i64: 1, 1, 1>, scalar_prefetch = 0 : i64, scratch_operands = 0 : i64, tpu.core_type = #tpu.core_type<tc>, window_params = [{transform_indices = @transform_0, window_bounds = array<i64: 16, 128>}, {transform_indices = @transform_1, window_bounds = array<i64: 128, 128>}, {transform_indices = @transform_2, window_bounds = array<i64: 1, 128>}, {transform_indices = @transform_3, window_bounds = array<i64: 1, 128>}, {transform_indices = @transform_4, window_bounds = array<i64: 16, 128>}]} {
    %c0_i32 = arith.constant 0 : i32
    %0 = arith.cmpi eq, %arg2, %c0_i32 : i32
    %1 = arith.extui %0 : i1 to i32
    %c0_i32_0 = arith.constant 0 : i32
    %2 = arith.cmpi ne, %1, %c0_i32_0 : i32
    scf.if %2 {
      %cst_10 = arith.constant 0.000000e+00 : f32
      %12 = vector.broadcast %cst_10 : f32 to vector<16x128xf32>
      %c0_11 = arith.constant 0 : index
      %c0_12 = arith.constant 0 : index
      %13 = vector.load %arg7[%c0_11, %c0_12] : memref<16x128xf32, #tpu.memory_space<vmem>>, vector<16x128xf32>
      tpu.vector_store %arg7[%c0_11, %c0_12], %12 {strides = array<i32>} : memref<16x128xf32, #tpu.memory_space<vmem>>, vector<16x128xf32>,
    } else {
    }
    %c0 = arith.constant 0 : index
    %c0_1 = arith.constant 0 : index
    %3 = vector.load %arg7[%c0, %c0_1] : memref<16x128xf32, #tpu.memory_space<vmem>>, vector<16x128xf32>
    %c0_2 = arith.constant 0 : index
    %c0_3 = arith.constant 0 : index
    %4 = vector.load %arg3[%c0_2, %c0_3] : memref<16x128xbf16, #tpu.memory_space<vmem>>, vector<16x128xbf16>
    %c0_4 = arith.constant 0 : index
    %c0_5 = arith.constant 0 : index
    %5 = vector.load %arg4[%c0_4, %c0_5] : memref<128x128xbf16, #tpu.memory_space<vmem>>, vector<128x128xbf16>
    %cst = arith.constant dense<0.000000e+00> : vector<16x128xf32>
    %6 = tpu.matmul %4, %5, %cst {dimension_numbers = #tpu.dot_dimension_numbers<[1], [0], [0], [1], [0, 0, 1, 1], [], []>} : vector<16x128xbf16>, vector<128x128xbf16>, vector<16x128xf32> -> vector<16x128xf32>
    %7 = arith.addf %3, %6 : vector<16x128xf32>
    %c0_6 = arith.constant 0 : index
    %c0_7 = arith.constant 0 : index
    %8 = vector.load %arg7[%c0_6, %c0_7] : memref<16x128xf32, #tpu.memory_space<vmem>>, vector<16x128xf32>
    tpu.vector_store %arg7[%c0_6, %c0_7], %7 {strides = array<i32>} : memref<16x128xf32, #tpu.memory_space<vmem>>, vector<16x128xf32>,
    %c0_i32_8 = arith.constant 0 : i32
    %9 = arith.cmpi eq, %arg2, %c0_i32_8 : i32
    %10 = arith.extui %9 : i1 to i32
    %c0_i32_9 = arith.constant 0 : i32
    %11 = arith.cmpi ne, %10, %c0_i32_9 : i32
    scf.if %11 {
      %c0_10 = arith.constant 0 : index
      %c0_11 = arith.constant 0 : index
      %12 = vector.load %arg7[%c0_10, %c0_11] : memref<16x128xf32, #tpu.memory_space<vmem>>, vector<16x128xf32>
      %c0_12 = arith.constant 0 : index
      %c0_13 = arith.constant 0 : index
      %13 = vector.load %arg5[%c0_12, %c0_13] : memref<1x128xf32, #tpu.memory_space<vmem>>, vector<1x128xf32>
      %14 = vector.broadcast %13 : vector<1x128xf32> to vector<16x128xf32>
      %15 = arith.mulf %12, %14 : vector<16x128xf32>
      %c0_14 = arith.constant 0 : index
      %c0_15 = arith.constant 0 : index
      %16 = vector.load %arg6[%c0_14, %c0_15] : memref<1x128xf32, #tpu.memory_space<vmem>>, vector<1x128xf32>
      %17 = vector.broadcast %16 : vector<1x128xf32> to vector<16x128xf32>
      %18 = arith.addf %15, %17 : vector<16x128xf32>
      %cst_16 = arith.constant 0.000000e+00 : f32
      %19 = vector.broadcast %cst_16 : f32 to vector<16x128xf32>
      %20 = arith.maximumf %18, %19 : vector<16x128xf32>
      %c0_17 = arith.constant 0 : index
      %c0_18 = arith.constant 0 : index
      %21 = vector.load %arg7[%c0_17, %c0_18] : memref<16x128xf32, #tpu.memory_space<vmem>>, vector<16x128xf32>
      tpu.vector_store %arg7[%c0_17, %c0_18], %20 {strides = array<i32>} : memref<16x128xf32, #tpu.memory_space<vmem>>, vector<16x128xf32>,
    } else {
    }
    return
  }
  func.func @transform_0(%arg0: i32, %arg1: i32, %arg2: i32) -> (i32, i32) {
    %c0_i32 = arith.constant 0 : i32
    return %arg0, %arg2 : i32, i32
  }
  func.func @transform_1(%arg0: i32, %arg1: i32, %arg2: i32) -> (i32, i32) {
    %c0_i32 = arith.constant 0 : i32
    return %arg2, %arg1 : i32, i32
  }
  func.func @transform_2(%arg0: i32, %arg1: i32, %arg2: i32) -> (i32, i32) {
    %c0_i32 = arith.constant 0 : i32
    %c0_i32_0 = arith.constant 0 : i32
    return %c0_i32, %arg1 : i32, i32
  }
  func.func @transform_3(%arg0: i32, %arg1: i32, %arg2: i32) -> (i32, i32) {
    %c0_i32 = arith.constant 0 : i32
    %c0_i32_0 = arith.constant 0 : i32
    return %c0_i32, %arg1 : i32, i32
  }
  func.func @transform_4(%arg0: i32, %arg1: i32, %arg2: i32) -> (i32, i32) {
    %c0_i32 = arith.constant 0 : i32
    return %arg0, %arg1 : i32, i32
  }
}

module attributes {stable_mosaic.version = 11 : i64} {
  func.func @_matmul_bn_act_kernel(%arg0: i32, %arg1: i32, %arg2: i32, %arg3: memref<16x512xbf16, #tpu.memory_space<vmem>>, %arg4: memref<512x128xbf16, #tpu.memory_space<vmem>>, %arg5: memref<1x128xf32, #tpu.memory_space<vmem>>, %arg6: memref<1x128xf32, #tpu.memory_space<vmem>>, %arg7: memref<16x128xf32, #tpu.memory_space<vmem>>) attributes {dimension_semantics = [#tpu.dimension_semantics<parallel>, #tpu.dimension_semantics<parallel>, #tpu.dimension_semantics<arbitrary>], iteration_bounds = array<i64: 1, 1, 2>, scalar_prefetch = 0 : i64, scratch_operands = 0 : i64, tpu.core_type = #tpu.core_type<tc>, window_params = [{transform_indices = @transform_0, window_bounds = array<i64: 16, 512>}, {transform_indices = @transform_1, window_bounds = array<i64: 512, 128>}, {transform_indices = @transform_2, window_bounds = array<i64: 1, 128>}, {transform_indices = @transform_3, window_bounds = array<i64: 1, 128>}, {transform_indices = @transform_4, window_bounds = array<i64: 16, 128>}]} {
    %c0_i32 = arith.constant 0 : i32
    %0 = arith.cmpi eq, %arg2, %c0_i32 : i32
    %1 = arith.extui %0 : i1 to i32
    %c0_i32_0 = arith.constant 0 : i32
    %2 = arith.cmpi ne, %1, %c0_i32_0 : i32
    scf.if %2 {
      %cst_9 = arith.constant 0.000000e+00 : f32
      %12 = vector.broadcast %cst_9 : f32 to vector<16x128xf32>
      %c0_10 = arith.constant 0 : index
      %c0_11 = arith.constant 0 : index
      %13 = vector.load %arg7[%c0_10, %c0_11] : memref<16x128xf32, #tpu.memory_space<vmem>>, vector<16x128xf32>
      tpu.vector_store %arg7[%c0_10, %c0_11], %12 {strides = array<i32>} : memref<16x128xf32, #tpu.memory_space<vmem>>, vector<16x128xf32>,
    } else {
    }
    %c0 = arith.constant 0 : index
    %c0_1 = arith.constant 0 : index
    %3 = vector.load %arg7[%c0, %c0_1] : memref<16x128xf32, #tpu.memory_space<vmem>>, vector<16x128xf32>
    %c0_2 = arith.constant 0 : index
    %c0_3 = arith.constant 0 : index
    %4 = vector.load %arg3[%c0_2, %c0_3] : memref<16x512xbf16, #tpu.memory_space<vmem>>, vector<16x512xbf16>
    %c0_4 = arith.constant 0 : index
    %c0_5 = arith.constant 0 : index
    %5 = vector.load %arg4[%c0_4, %c0_5] : memref<512x128xbf16, #tpu.memory_space<vmem>>, vector<512x128xbf16>
    %cst = arith.constant dense<0.000000e+00> : vector<16x128xf32>
    %6 = tpu.matmul %4, %5, %cst {dimension_numbers = #tpu.dot_dimension_numbers<[1], [0], [0], [1], [0, 0, 1, 1], [], []>} : vector<16x512xbf16>, vector<512x128xbf16>, vector<16x128xf32> -> vector<16x128xf32>
    %7 = arith.addf %3, %6 : vector<16x128xf32>
    %c0_6 = arith.constant 0 : index
    %c0_7 = arith.constant 0 : index
    %8 = vector.load %arg7[%c0_6, %c0_7] : memref<16x128xf32, #tpu.memory_space<vmem>>, vector<16x128xf32>
    tpu.vector_store %arg7[%c0_6, %c0_7], %7 {strides = array<i32>} : memref<16x128xf32, #tpu.memory_space<vmem>>, vector<16x128xf32>,
    %c1_i32 = arith.constant 1 : i32
    %9 = arith.cmpi eq, %arg2, %c1_i32 : i32
    %10 = arith.extui %9 : i1 to i32
    %c0_i32_8 = arith.constant 0 : i32
    %11 = arith.cmpi ne, %10, %c0_i32_8 : i32
    scf.if %11 {
      %c0_9 = arith.constant 0 : index
      %c0_10 = arith.constant 0 : index
      %12 = vector.load %arg7[%c0_9, %c0_10] : memref<16x128xf32, #tpu.memory_space<vmem>>, vector<16x128xf32>
      %c0_11 = arith.constant 0 : index
      %c0_12 = arith.constant 0 : index
      %13 = vector.load %arg5[%c0_11, %c0_12] : memref<1x128xf32, #tpu.memory_space<vmem>>, vector<1x128xf32>
      %14 = vector.broadcast %13 : vector<1x128xf32> to vector<16x128xf32>
      %15 = arith.mulf %12, %14 : vector<16x128xf32>
      %c0_13 = arith.constant 0 : index
      %c0_14 = arith.constant 0 : index
      %16 = vector.load %arg6[%c0_13, %c0_14] : memref<1x128xf32, #tpu.memory_space<vmem>>, vector<1x128xf32>
      %17 = vector.broadcast %16 : vector<1x128xf32> to vector<16x128xf32>
      %18 = arith.addf %15, %17 : vector<16x128xf32>
      %cst_15 = arith.constant 0.000000e+00 : f32
      %19 = vector.broadcast %cst_15 : f32 to vector<16x128xf32>
      %20 = arith.maximumf %18, %19 : vector<16x128xf32>
      %c0_16 = arith.constant 0 : index
      %c0_17 = arith.constant 0 : index
      %21 = vector.load %arg7[%c0_16, %c0_17] : memref<16x128xf32, #tpu.memory_space<vmem>>, vector<16x128xf32>
      tpu.vector_store %arg7[%c0_16, %c0_17], %20 {strides = array<i32>} : memref<16x128xf32, #tpu.memory_space<vmem>>, vector<16x128xf32>,
    } else {
    }
    return
  }
  func.func @transform_0(%arg0: i32, %arg1: i32, %arg2: i32) -> (i32, i32) {
    %c0_i32 = arith.constant 0 : i32
    return %arg0, %arg2 : i32, i32
  }
  func.func @transform_1(%arg0: i32, %arg1: i32, %arg2: i32) -> (i32, i32) {
    %c0_i32 = arith.constant 0 : i32
    return %arg2, %arg1 : i32, i32
  }
  func.func @transform_2(%arg0: i32, %arg1: i32, %arg2: i32) -> (i32, i32) {
    %c0_i32 = arith.constant 0 : i32
    %c0_i32_0 = arith.constant 0 : i32
    return %c0_i32, %arg1 : i32, i32
  }
  func.func @transform_3(%arg0: i32, %arg1: i32, %arg2: i32) -> (i32, i32) {
    %c0_i32 = arith.constant 0 : i32
    %c0_i32_0 = arith.constant 0 : i32
    return %c0_i32, %arg1 : i32, i32
  }
  func.func @transform_4(%arg0: i32, %arg1: i32, %arg2: i32) -> (i32, i32) {
    %c0_i32 = arith.constant 0 : i32
    return %arg0, %arg1 : i32, i32
  }
}

module attributes {stable_mosaic.version = 11 : i64} {
  func.func @_matmul_bn_act_kernel(%arg0: i32, %arg1: i32, %arg2: i32, %arg3: memref<16x128xbf16, #tpu.memory_space<vmem>>, %arg4: memref<128x256xbf16, #tpu.memory_space<vmem>>, %arg5: memref<1x256xf32, #tpu.memory_space<vmem>>, %arg6: memref<1x256xf32, #tpu.memory_space<vmem>>, %arg7: memref<16x256xf32, #tpu.memory_space<vmem>>) attributes {dimension_semantics = [#tpu.dimension_semantics<parallel>, #tpu.dimension_semantics<parallel>, #tpu.dimension_semantics<arbitrary>], iteration_bounds = array<i64: 1, 1, 1>, scalar_prefetch = 0 : i64, scratch_operands = 0 : i64, tpu.core_type = #tpu.core_type<tc>, window_params = [{transform_indices = @transform_0, window_bounds = array<i64: 16, 128>}, {transform_indices = @transform_1, window_bounds = array<i64: 128, 256>}, {transform_indices = @transform_2, window_bounds = array<i64: 1, 256>}, {transform_indices = @transform_3, window_bounds = array<i64: 1, 256>}, {transform_indices = @transform_4, window_bounds = array<i64: 16, 256>}]} {
    %c0_i32 = arith.constant 0 : i32
    %0 = arith.cmpi eq, %arg2, %c0_i32 : i32
    %1 = arith.extui %0 : i1 to i32
    %c0_i32_0 = arith.constant 0 : i32
    %2 = arith.cmpi ne, %1, %c0_i32_0 : i32
    scf.if %2 {
      %cst_10 = arith.constant 0.000000e+00 : f32
      %12 = vector.broadcast %cst_10 : f32 to vector<16x256xf32>
      %c0_11 = arith.constant 0 : index
      %c0_12 = arith.constant 0 : index
      %13 = vector.load %arg7[%c0_11, %c0_12] : memref<16x256xf32, #tpu.memory_space<vmem>>, vector<16x256xf32>
      tpu.vector_store %arg7[%c0_11, %c0_12], %12 {strides = array<i32>} : memref<16x256xf32, #tpu.memory_space<vmem>>, vector<16x256xf32>,
    } else {
    }
    %c0 = arith.constant 0 : index
    %c0_1 = arith.constant 0 : index
    %3 = vector.load %arg7[%c0, %c0_1] : memref<16x256xf32, #tpu.memory_space<vmem>>, vector<16x256xf32>
    %c0_2 = arith.constant 0 : index
    %c0_3 = arith.constant 0 : index
    %4 = vector.load %arg3[%c0_2, %c0_3] : memref<16x128xbf16, #tpu.memory_space<vmem>>, vector<16x128xbf16>
    %c0_4 = arith.constant 0 : index
    %c0_5 = arith.constant 0 : index
    %5 = vector.load %arg4[%c0_4, %c0_5] : memref<128x256xbf16, #tpu.memory_space<vmem>>, vector<128x256xbf16>
    %cst = arith.constant dense<0.000000e+00> : vector<16x256xf32>
    %6 = tpu.matmul %4, %5, %cst {dimension_numbers = #tpu.dot_dimension_numbers<[1], [0], [0], [1], [0, 0, 1, 1], [], []>} : vector<16x128xbf16>, vector<128x256xbf16>, vector<16x256xf32> -> vector<16x256xf32>
    %7 = arith.addf %3, %6 : vector<16x256xf32>
    %c0_6 = arith.constant 0 : index
    %c0_7 = arith.constant 0 : index
    %8 = vector.load %arg7[%c0_6, %c0_7] : memref<16x256xf32, #tpu.memory_space<vmem>>, vector<16x256xf32>
    tpu.vector_store %arg7[%c0_6, %c0_7], %7 {strides = array<i32>} : memref<16x256xf32, #tpu.memory_space<vmem>>, vector<16x256xf32>,
    %c0_i32_8 = arith.constant 0 : i32
    %9 = arith.cmpi eq, %arg2, %c0_i32_8 : i32
    %10 = arith.extui %9 : i1 to i32
    %c0_i32_9 = arith.constant 0 : i32
    %11 = arith.cmpi ne, %10, %c0_i32_9 : i32
    scf.if %11 {
      %c0_10 = arith.constant 0 : index
      %c0_11 = arith.constant 0 : index
      %12 = vector.load %arg7[%c0_10, %c0_11] : memref<16x256xf32, #tpu.memory_space<vmem>>, vector<16x256xf32>
      %c0_12 = arith.constant 0 : index
      %c0_13 = arith.constant 0 : index
      %13 = vector.load %arg5[%c0_12, %c0_13] : memref<1x256xf32, #tpu.memory_space<vmem>>, vector<1x256xf32>
      %14 = vector.broadcast %13 : vector<1x256xf32> to vector<16x256xf32>
      %15 = arith.mulf %12, %14 : vector<16x256xf32>
      %c0_14 = arith.constant 0 : index
      %c0_15 = arith.constant 0 : index
      %16 = vector.load %arg6[%c0_14, %c0_15] : memref<1x256xf32, #tpu.memory_space<vmem>>, vector<1x256xf32>
      %17 = vector.broadcast %16 : vector<1x256xf32> to vector<16x256xf32>
      %18 = arith.addf %15, %17 : vector<16x256xf32>
      %c0_16 = arith.constant 0 : index
      %c0_17 = arith.constant 0 : index
      %19 = vector.load %arg7[%c0_16, %c0_17] : memref<16x256xf32, #tpu.memory_space<vmem>>, vector<16x256xf32>
      tpu.vector_store %arg7[%c0_16, %c0_17], %18 {strides = array<i32>} : memref<16x256xf32, #tpu.memory_space<vmem>>, vector<16x256xf32>,
    } else {
    }
    return
  }
  func.func @transform_0(%arg0: i32, %arg1: i32, %arg2: i32) -> (i32, i32) {
    %c0_i32 = arith.constant 0 : i32
    return %arg0, %arg2 : i32, i32
  }
  func.func @transform_1(%arg0: i32, %arg1: i32, %arg2: i32) -> (i32, i32) {
    %c0_i32 = arith.constant 0 : i32
    return %arg2, %arg1 : i32, i32
  }
  func.func @transform_2(%arg0: i32, %arg1: i32, %arg2: i32) -> (i32, i32) {
    %c0_i32 = arith.constant 0 : i32
    %c0_i32_0 = arith.constant 0 : i32
    return %c0_i32, %arg1 : i32, i32
  }
  func.func @transform_3(%arg0: i32, %arg1: i32, %arg2: i32) -> (i32, i32) {
    %c0_i32 = arith.constant 0 : i32
    %c0_i32_0 = arith.constant 0 : i32
    return %c0_i32, %arg1 : i32, i32
  }
  func.func @transform_4(%arg0: i32, %arg1: i32, %arg2: i32) -> (i32, i32) {
    %c0_i32 = arith.constant 0 : i32
    return %arg0, %arg1 : i32, i32
  }
}

module attributes {stable_mosaic.version = 11 : i64} {
  func.func @_matmul_bn_act_kernel(%arg0: i32, %arg1: i32, %arg2: i32, %arg3: memref<16x128xbf16, #tpu.memory_space<vmem>>, %arg4: memref<128x256xbf16, #tpu.memory_space<vmem>>, %arg5: memref<1x256xf32, #tpu.memory_space<vmem>>, %arg6: memref<1x256xf32, #tpu.memory_space<vmem>>, %arg7: memref<16x256xf32, #tpu.memory_space<vmem>>, %arg8: memref<16x256xf32, #tpu.memory_space<vmem>>) attributes {dimension_semantics = [#tpu.dimension_semantics<parallel>, #tpu.dimension_semantics<parallel>, #tpu.dimension_semantics<arbitrary>], iteration_bounds = array<i64: 1, 1, 1>, scalar_prefetch = 0 : i64, scratch_operands = 0 : i64, tpu.core_type = #tpu.core_type<tc>, window_params = [{transform_indices = @transform_0, window_bounds = array<i64: 16, 128>}, {transform_indices = @transform_1, window_bounds = array<i64: 128, 256>}, {transform_indices = @transform_2, window_bounds = array<i64: 1, 256>}, {transform_indices = @transform_3, window_bounds = array<i64: 1, 256>}, {transform_indices = @transform_4, window_bounds = array<i64: 16, 256>}, {transform_indices = @transform_5, window_bounds = array<i64: 16, 256>}]} {
    %c0_i32 = arith.constant 0 : i32
    %0 = arith.cmpi eq, %arg2, %c0_i32 : i32
    %1 = arith.extui %0 : i1 to i32
    %c0_i32_0 = arith.constant 0 : i32
    %2 = arith.cmpi ne, %1, %c0_i32_0 : i32
    scf.if %2 {
      %cst_10 = arith.constant 0.000000e+00 : f32
      %12 = vector.broadcast %cst_10 : f32 to vector<16x256xf32>
      %c0_11 = arith.constant 0 : index
      %c0_12 = arith.constant 0 : index
      %13 = vector.load %arg8[%c0_11, %c0_12] : memref<16x256xf32, #tpu.memory_space<vmem>>, vector<16x256xf32>
      tpu.vector_store %arg8[%c0_11, %c0_12], %12 {strides = array<i32>} : memref<16x256xf32, #tpu.memory_space<vmem>>, vector<16x256xf32>,
    } else {
    }
    %c0 = arith.constant 0 : index
    %c0_1 = arith.constant 0 : index
    %3 = vector.load %arg8[%c0, %c0_1] : memref<16x256xf32, #tpu.memory_space<vmem>>, vector<16x256xf32>
    %c0_2 = arith.constant 0 : index
    %c0_3 = arith.constant 0 : index
    %4 = vector.load %arg3[%c0_2, %c0_3] : memref<16x128xbf16, #tpu.memory_space<vmem>>, vector<16x128xbf16>
    %c0_4 = arith.constant 0 : index
    %c0_5 = arith.constant 0 : index
    %5 = vector.load %arg4[%c0_4, %c0_5] : memref<128x256xbf16, #tpu.memory_space<vmem>>, vector<128x256xbf16>
    %cst = arith.constant dense<0.000000e+00> : vector<16x256xf32>
    %6 = tpu.matmul %4, %5, %cst {dimension_numbers = #tpu.dot_dimension_numbers<[1], [0], [0], [1], [0, 0, 1, 1], [], []>} : vector<16x128xbf16>, vector<128x256xbf16>, vector<16x256xf32> -> vector<16x256xf32>
    %7 = arith.addf %3, %6 : vector<16x256xf32>
    %c0_6 = arith.constant 0 : index
    %c0_7 = arith.constant 0 : index
    %8 = vector.load %arg8[%c0_6, %c0_7] : memref<16x256xf32, #tpu.memory_space<vmem>>, vector<16x256xf32>
    tpu.vector_store %arg8[%c0_6, %c0_7], %7 {strides = array<i32>} : memref<16x256xf32, #tpu.memory_space<vmem>>, vector<16x256xf32>,
    %c0_i32_8 = arith.constant 0 : i32
    %9 = arith.cmpi eq, %arg2, %c0_i32_8 : i32
    %10 = arith.extui %9 : i1 to i32
    %c0_i32_9 = arith.constant 0 : i32
    %11 = arith.cmpi ne, %10, %c0_i32_9 : i32
    scf.if %11 {
      %c0_10 = arith.constant 0 : index
      %c0_11 = arith.constant 0 : index
      %12 = vector.load %arg8[%c0_10, %c0_11] : memref<16x256xf32, #tpu.memory_space<vmem>>, vector<16x256xf32>
      %c0_12 = arith.constant 0 : index
      %c0_13 = arith.constant 0 : index
      %13 = vector.load %arg5[%c0_12, %c0_13] : memref<1x256xf32, #tpu.memory_space<vmem>>, vector<1x256xf32>
      %14 = vector.broadcast %13 : vector<1x256xf32> to vector<16x256xf32>
      %15 = arith.mulf %12, %14 : vector<16x256xf32>
      %c0_14 = arith.constant 0 : index
      %c0_15 = arith.constant 0 : index
      %16 = vector.load %arg6[%c0_14, %c0_15] : memref<1x256xf32, #tpu.memory_space<vmem>>, vector<1x256xf32>
      %17 = vector.broadcast %16 : vector<1x256xf32> to vector<16x256xf32>
      %18 = arith.addf %15, %17 : vector<16x256xf32>
      %c0_16 = arith.constant 0 : index
      %c0_17 = arith.constant 0 : index
      %19 = vector.load %arg7[%c0_16, %c0_17] : memref<16x256xf32, #tpu.memory_space<vmem>>, vector<16x256xf32>
      %20 = arith.addf %18, %19 : vector<16x256xf32>
      %cst_18 = arith.constant 0.000000e+00 : f32
      %21 = vector.broadcast %cst_18 : f32 to vector<16x256xf32>
      %22 = arith.maximumf %20, %21 : vector<16x256xf32>
      %c0_19 = arith.constant 0 : index
      %c0_20 = arith.constant 0 : index
      %23 = vector.load %arg8[%c0_19, %c0_20] : memref<16x256xf32, #tpu.memory_space<vmem>>, vector<16x256xf32>
      tpu.vector_store %arg8[%c0_19, %c0_20], %22 {strides = array<i32>} : memref<16x256xf32, #tpu.memory_space<vmem>>, vector<16x256xf32>,
    } else {
    }
    return
  }
  func.func @transform_0(%arg0: i32, %arg1: i32, %arg2: i32) -> (i32, i32) {
    %c0_i32 = arith.constant 0 : i32
    return %arg0, %arg2 : i32, i32
  }
  func.func @transform_1(%arg0: i32, %arg1: i32, %arg2: i32) -> (i32, i32) {
    %c0_i32 = arith.constant 0 : i32
    return %arg2, %arg1 : i32, i32
  }
  func.func @transform_2(%arg0: i32, %arg1: i32, %arg2: i32) -> (i32, i32) {
    %c0_i32 = arith.constant 0 : i32
    %c0_i32_0 = arith.constant 0 : i32
    return %c0_i32, %arg1 : i32, i32
  }
  func.func @transform_3(%arg0: i32, %arg1: i32, %arg2: i32) -> (i32, i32) {
    %c0_i32 = arith.constant 0 : i32
    %c0_i32_0 = arith.constant 0 : i32
    return %c0_i32, %arg1 : i32, i32
  }
  func.func @transform_4(%arg0: i32, %arg1: i32, %arg2: i32) -> (i32, i32) {
    %c0_i32 = arith.constant 0 : i32
    return %arg0, %arg1 : i32, i32
  }
  func.func @transform_5(%arg0: i32, %arg1: i32, %arg2: i32) -> (i32, i32) {
    %c0_i32 = arith.constant 0 : i32
    return %arg0, %arg1 : i32, i32
  }
}

module attributes {stable_mosaic.version = 11 : i64} {
  func.func @_matmul_bn_act_kernel(%arg0: i32, %arg1: i32, %arg2: i32, %arg3: memref<16x256xbf16, #tpu.memory_space<vmem>>, %arg4: memref<256x128xbf16, #tpu.memory_space<vmem>>, %arg5: memref<1x128xf32, #tpu.memory_space<vmem>>, %arg6: memref<1x128xf32, #tpu.memory_space<vmem>>, %arg7: memref<16x128xf32, #tpu.memory_space<vmem>>) attributes {dimension_semantics = [#tpu.dimension_semantics<parallel>, #tpu.dimension_semantics<parallel>, #tpu.dimension_semantics<arbitrary>], iteration_bounds = array<i64: 1, 1, 1>, scalar_prefetch = 0 : i64, scratch_operands = 0 : i64, tpu.core_type = #tpu.core_type<tc>, window_params = [{transform_indices = @transform_0, window_bounds = array<i64: 16, 256>}, {transform_indices = @transform_1, window_bounds = array<i64: 256, 128>}, {transform_indices = @transform_2, window_bounds = array<i64: 1, 128>}, {transform_indices = @transform_3, window_bounds = array<i64: 1, 128>}, {transform_indices = @transform_4, window_bounds = array<i64: 16, 128>}]} {
    %c0_i32 = arith.constant 0 : i32
    %0 = arith.cmpi eq, %arg2, %c0_i32 : i32
    %1 = arith.extui %0 : i1 to i32
    %c0_i32_0 = arith.constant 0 : i32
    %2 = arith.cmpi ne, %1, %c0_i32_0 : i32
    scf.if %2 {
      %cst_10 = arith.constant 0.000000e+00 : f32
      %12 = vector.broadcast %cst_10 : f32 to vector<16x128xf32>
      %c0_11 = arith.constant 0 : index
      %c0_12 = arith.constant 0 : index
      %13 = vector.load %arg7[%c0_11, %c0_12] : memref<16x128xf32, #tpu.memory_space<vmem>>, vector<16x128xf32>
      tpu.vector_store %arg7[%c0_11, %c0_12], %12 {strides = array<i32>} : memref<16x128xf32, #tpu.memory_space<vmem>>, vector<16x128xf32>,
    } else {
    }
    %c0 = arith.constant 0 : index
    %c0_1 = arith.constant 0 : index
    %3 = vector.load %arg7[%c0, %c0_1] : memref<16x128xf32, #tpu.memory_space<vmem>>, vector<16x128xf32>
    %c0_2 = arith.constant 0 : index
    %c0_3 = arith.constant 0 : index
    %4 = vector.load %arg3[%c0_2, %c0_3] : memref<16x256xbf16, #tpu.memory_space<vmem>>, vector<16x256xbf16>
    %c0_4 = arith.constant 0 : index
    %c0_5 = arith.constant 0 : index
    %5 = vector.load %arg4[%c0_4, %c0_5] : memref<256x128xbf16, #tpu.memory_space<vmem>>, vector<256x128xbf16>
    %cst = arith.constant dense<0.000000e+00> : vector<16x128xf32>
    %6 = tpu.matmul %4, %5, %cst {dimension_numbers = #tpu.dot_dimension_numbers<[1], [0], [0], [1], [0, 0, 1, 1], [], []>} : vector<16x256xbf16>, vector<256x128xbf16>, vector<16x128xf32> -> vector<16x128xf32>
    %7 = arith.addf %3, %6 : vector<16x128xf32>
    %c0_6 = arith.constant 0 : index
    %c0_7 = arith.constant 0 : index
    %8 = vector.load %arg7[%c0_6, %c0_7] : memref<16x128xf32, #tpu.memory_space<vmem>>, vector<16x128xf32>
    tpu.vector_store %arg7[%c0_6, %c0_7], %7 {strides = array<i32>} : memref<16x128xf32, #tpu.memory_space<vmem>>, vector<16x128xf32>,
    %c0_i32_8 = arith.constant 0 : i32
    %9 = arith.cmpi eq, %arg2, %c0_i32_8 : i32
    %10 = arith.extui %9 : i1 to i32
    %c0_i32_9 = arith.constant 0 : i32
    %11 = arith.cmpi ne, %10, %c0_i32_9 : i32
    scf.if %11 {
      %c0_10 = arith.constant 0 : index
      %c0_11 = arith.constant 0 : index
      %12 = vector.load %arg7[%c0_10, %c0_11] : memref<16x128xf32, #tpu.memory_space<vmem>>, vector<16x128xf32>
      %c0_12 = arith.constant 0 : index
      %c0_13 = arith.constant 0 : index
      %13 = vector.load %arg5[%c0_12, %c0_13] : memref<1x128xf32, #tpu.memory_space<vmem>>, vector<1x128xf32>
      %14 = vector.broadcast %13 : vector<1x128xf32> to vector<16x128xf32>
      %15 = arith.mulf %12, %14 : vector<16x128xf32>
      %c0_14 = arith.constant 0 : index
      %c0_15 = arith.constant 0 : index
      %16 = vector.load %arg6[%c0_14, %c0_15] : memref<1x128xf32, #tpu.memory_space<vmem>>, vector<1x128xf32>
      %17 = vector.broadcast %16 : vector<1x128xf32> to vector<16x128xf32>
      %18 = arith.addf %15, %17 : vector<16x128xf32>
      %cst_16 = arith.constant 0.000000e+00 : f32
      %19 = vector.broadcast %cst_16 : f32 to vector<16x128xf32>
      %20 = arith.maximumf %18, %19 : vector<16x128xf32>
      %c0_17 = arith.constant 0 : index
      %c0_18 = arith.constant 0 : index
      %21 = vector.load %arg7[%c0_17, %c0_18] : memref<16x128xf32, #tpu.memory_space<vmem>>, vector<16x128xf32>
      tpu.vector_store %arg7[%c0_17, %c0_18], %20 {strides = array<i32>} : memref<16x128xf32, #tpu.memory_space<vmem>>, vector<16x128xf32>,
    } else {
    }
    return
  }
  func.func @transform_0(%arg0: i32, %arg1: i32, %arg2: i32) -> (i32, i32) {
    %c0_i32 = arith.constant 0 : i32
    return %arg0, %arg2 : i32, i32
  }
  func.func @transform_1(%arg0: i32, %arg1: i32, %arg2: i32) -> (i32, i32) {
    %c0_i32 = arith.constant 0 : i32
    return %arg2, %arg1 : i32, i32
  }
  func.func @transform_2(%arg0: i32, %arg1: i32, %arg2: i32) -> (i32, i32) {
    %c0_i32 = arith.constant 0 : i32
    %c0_i32_0 = arith.constant 0 : i32
    return %c0_i32, %arg1 : i32, i32
  }
  func.func @transform_3(%arg0: i32, %arg1: i32, %arg2: i32) -> (i32, i32) {
    %c0_i32 = arith.constant 0 : i32
    %c0_i32_0 = arith.constant 0 : i32
    return %c0_i32, %arg1 : i32, i32
  }
  func.func @transform_4(%arg0: i32, %arg1: i32, %arg2: i32) -> (i32, i32) {
    %c0_i32 = arith.constant 0 : i32
    return %arg0, %arg1 : i32, i32
  }
}

module attributes {stable_mosaic.version = 11 : i64} {
  func.func @_matmul_bn_act_kernel(%arg0: i32, %arg1: i32, %arg2: i32, %arg3: memref<16x256xbf16, #tpu.memory_space<vmem>>, %arg4: memref<256x128xbf16, #tpu.memory_space<vmem>>, %arg5: memref<1x128xf32, #tpu.memory_space<vmem>>, %arg6: memref<1x128xf32, #tpu.memory_space<vmem>>, %arg7: memref<16x128xf32, #tpu.memory_space<vmem>>, %arg8: memref<16x128xf32, #tpu.memory_space<vmem>>) attributes {dimension_semantics = [#tpu.dimension_semantics<parallel>, #tpu.dimension_semantics<parallel>, #tpu.dimension_semantics<arbitrary>], iteration_bounds = array<i64: 1, 1, 1>, scalar_prefetch = 0 : i64, scratch_operands = 0 : i64, tpu.core_type = #tpu.core_type<tc>, window_params = [{transform_indices = @transform_0, window_bounds = array<i64: 16, 256>}, {transform_indices = @transform_1, window_bounds = array<i64: 256, 128>}, {transform_indices = @transform_2, window_bounds = array<i64: 1, 128>}, {transform_indices = @transform_3, window_bounds = array<i64: 1, 128>}, {transform_indices = @transform_4, window_bounds = array<i64: 16, 128>}, {transform_indices = @transform_5, window_bounds = array<i64: 16, 128>}]} {
    %c0_i32 = arith.constant 0 : i32
    %0 = arith.cmpi eq, %arg2, %c0_i32 : i32
    %1 = arith.extui %0 : i1 to i32
    %c0_i32_0 = arith.constant 0 : i32
    %2 = arith.cmpi ne, %1, %c0_i32_0 : i32
    scf.if %2 {
      %cst_10 = arith.constant 0.000000e+00 : f32
      %12 = vector.broadcast %cst_10 : f32 to vector<16x128xf32>
      %c0_11 = arith.constant 0 : index
      %c0_12 = arith.constant 0 : index
      %13 = vector.load %arg8[%c0_11, %c0_12] : memref<16x128xf32, #tpu.memory_space<vmem>>, vector<16x128xf32>
      tpu.vector_store %arg8[%c0_11, %c0_12], %12 {strides = array<i32>} : memref<16x128xf32, #tpu.memory_space<vmem>>, vector<16x128xf32>,
    } else {
    }
    %c0 = arith.constant 0 : index
    %c0_1 = arith.constant 0 : index
    %3 = vector.load %arg8[%c0, %c0_1] : memref<16x128xf32, #tpu.memory_space<vmem>>, vector<16x128xf32>
    %c0_2 = arith.constant 0 : index
    %c0_3 = arith.constant 0 : index
    %4 = vector.load %arg3[%c0_2, %c0_3] : memref<16x256xbf16, #tpu.memory_space<vmem>>, vector<16x256xbf16>
    %c0_4 = arith.constant 0 : index
    %c0_5 = arith.constant 0 : index
    %5 = vector.load %arg4[%c0_4, %c0_5] : memref<256x128xbf16, #tpu.memory_space<vmem>>, vector<256x128xbf16>
    %cst = arith.constant dense<0.000000e+00> : vector<16x128xf32>
    %6 = tpu.matmul %4, %5, %cst {dimension_numbers = #tpu.dot_dimension_numbers<[1], [0], [0], [1], [0, 0, 1, 1], [], []>} : vector<16x256xbf16>, vector<256x128xbf16>, vector<16x128xf32> -> vector<16x128xf32>
    %7 = arith.addf %3, %6 : vector<16x128xf32>
    %c0_6 = arith.constant 0 : index
    %c0_7 = arith.constant 0 : index
    %8 = vector.load %arg8[%c0_6, %c0_7] : memref<16x128xf32, #tpu.memory_space<vmem>>, vector<16x128xf32>
    tpu.vector_store %arg8[%c0_6, %c0_7], %7 {strides = array<i32>} : memref<16x128xf32, #tpu.memory_space<vmem>>, vector<16x128xf32>,
    %c0_i32_8 = arith.constant 0 : i32
    %9 = arith.cmpi eq, %arg2, %c0_i32_8 : i32
    %10 = arith.extui %9 : i1 to i32
    %c0_i32_9 = arith.constant 0 : i32
    %11 = arith.cmpi ne, %10, %c0_i32_9 : i32
    scf.if %11 {
      %c0_10 = arith.constant 0 : index
      %c0_11 = arith.constant 0 : index
      %12 = vector.load %arg8[%c0_10, %c0_11] : memref<16x128xf32, #tpu.memory_space<vmem>>, vector<16x128xf32>
      %c0_12 = arith.constant 0 : index
      %c0_13 = arith.constant 0 : index
      %13 = vector.load %arg5[%c0_12, %c0_13] : memref<1x128xf32, #tpu.memory_space<vmem>>, vector<1x128xf32>
      %14 = vector.broadcast %13 : vector<1x128xf32> to vector<16x128xf32>
      %15 = arith.mulf %12, %14 : vector<16x128xf32>
      %c0_14 = arith.constant 0 : index
      %c0_15 = arith.constant 0 : index
      %16 = vector.load %arg6[%c0_14, %c0_15] : memref<1x128xf32, #tpu.memory_space<vmem>>, vector<1x128xf32>
      %17 = vector.broadcast %16 : vector<1x128xf32> to vector<16x128xf32>
      %18 = arith.addf %15, %17 : vector<16x128xf32>
      %c0_16 = arith.constant 0 : index
      %c0_17 = arith.constant 0 : index
      %19 = vector.load %arg7[%c0_16, %c0_17] : memref<16x128xf32, #tpu.memory_space<vmem>>, vector<16x128xf32>
      %20 = arith.addf %18, %19 : vector<16x128xf32>
      %cst_18 = arith.constant 0.000000e+00 : f32
      %21 = vector.broadcast %cst_18 : f32 to vector<16x128xf32>
      %22 = arith.maximumf %20, %21 : vector<16x128xf32>
      %c0_19 = arith.constant 0 : index
      %c0_20 = arith.constant 0 : index
      %23 = vector.load %arg8[%c0_19, %c0_20] : memref<16x128xf32, #tpu.memory_space<vmem>>, vector<16x128xf32>
      tpu.vector_store %arg8[%c0_19, %c0_20], %22 {strides = array<i32>} : memref<16x128xf32, #tpu.memory_space<vmem>>, vector<16x128xf32>,
    } else {
    }
    return
  }
  func.func @transform_0(%arg0: i32, %arg1: i32, %arg2: i32) -> (i32, i32) {
    %c0_i32 = arith.constant 0 : i32
    return %arg0, %arg2 : i32, i32
  }
  func.func @transform_1(%arg0: i32, %arg1: i32, %arg2: i32) -> (i32, i32) {
    %c0_i32 = arith.constant 0 : i32
    return %arg2, %arg1 : i32, i32
  }
  func.func @transform_2(%arg0: i32, %arg1: i32, %arg2: i32) -> (i32, i32) {
    %c0_i32 = arith.constant 0 : i32
    %c0_i32_0 = arith.constant 0 : i32
    return %c0_i32, %arg1 : i32, i32
  }
  func.func @transform_3(%arg0: i32, %arg1: i32, %arg2: i32) -> (i32, i32) {
    %c0_i32 = arith.constant 0 : i32
    %c0_i32_0 = arith.constant 0 : i32
    return %c0_i32, %arg1 : i32, i32
  }
  func.func @transform_4(%arg0: i32, %arg1: i32, %arg2: i32) -> (i32, i32) {
    %c0_i32 = arith.constant 0 : i32
    return %arg0, %arg1 : i32, i32
  }
  func.func @transform_5(%arg0: i32, %arg1: i32, %arg2: i32) -> (i32, i32) {
    %c0_i32 = arith.constant 0 : i32
    return %arg0, %arg1 : i32, i32
  }
}

module attributes {stable_mosaic.version = 11 : i64} {
  func.func @_matmul_bn_act_kernel(%arg0: i32, %arg1: i32, %arg2: i32, %arg3: memref<16x256xbf16, #tpu.memory_space<vmem>>, %arg4: memref<256x128xbf16, #tpu.memory_space<vmem>>, %arg5: memref<1x128xf32, #tpu.memory_space<vmem>>, %arg6: memref<1x128xf32, #tpu.memory_space<vmem>>, %arg7: memref<16x128xf32, #tpu.memory_space<vmem>>) attributes {dimension_semantics = [#tpu.dimension_semantics<parallel>, #tpu.dimension_semantics<parallel>, #tpu.dimension_semantics<arbitrary>], iteration_bounds = array<i64: 1, 1, 1>, scalar_prefetch = 0 : i64, scratch_operands = 0 : i64, tpu.core_type = #tpu.core_type<tc>, window_params = [{transform_indices = @transform_0, window_bounds = array<i64: 16, 256>}, {transform_indices = @transform_1, window_bounds = array<i64: 256, 128>}, {transform_indices = @transform_2, window_bounds = array<i64: 1, 128>}, {transform_indices = @transform_3, window_bounds = array<i64: 1, 128>}, {transform_indices = @transform_4, window_bounds = array<i64: 16, 128>}]} {
    %c0_i32 = arith.constant 0 : i32
    %0 = arith.cmpi eq, %arg2, %c0_i32 : i32
    %1 = arith.extui %0 : i1 to i32
    %c0_i32_0 = arith.constant 0 : i32
    %2 = arith.cmpi ne, %1, %c0_i32_0 : i32
    scf.if %2 {
      %cst_10 = arith.constant 0.000000e+00 : f32
      %12 = vector.broadcast %cst_10 : f32 to vector<16x128xf32>
      %c0_11 = arith.constant 0 : index
      %c0_12 = arith.constant 0 : index
      %13 = vector.load %arg7[%c0_11, %c0_12] : memref<16x128xf32, #tpu.memory_space<vmem>>, vector<16x128xf32>
      tpu.vector_store %arg7[%c0_11, %c0_12], %12 {strides = array<i32>} : memref<16x128xf32, #tpu.memory_space<vmem>>, vector<16x128xf32>,
    } else {
    }
    %c0 = arith.constant 0 : index
    %c0_1 = arith.constant 0 : index
    %3 = vector.load %arg7[%c0, %c0_1] : memref<16x128xf32, #tpu.memory_space<vmem>>, vector<16x128xf32>
    %c0_2 = arith.constant 0 : index
    %c0_3 = arith.constant 0 : index
    %4 = vector.load %arg3[%c0_2, %c0_3] : memref<16x256xbf16, #tpu.memory_space<vmem>>, vector<16x256xbf16>
    %c0_4 = arith.constant 0 : index
    %c0_5 = arith.constant 0 : index
    %5 = vector.load %arg4[%c0_4, %c0_5] : memref<256x128xbf16, #tpu.memory_space<vmem>>, vector<256x128xbf16>
    %cst = arith.constant dense<0.000000e+00> : vector<16x128xf32>
    %6 = tpu.matmul %4, %5, %cst {dimension_numbers = #tpu.dot_dimension_numbers<[1], [0], [0], [1], [0, 0, 1, 1], [], []>} : vector<16x256xbf16>, vector<256x128xbf16>, vector<16x128xf32> -> vector<16x128xf32>
    %7 = arith.addf %3, %6 : vector<16x128xf32>
    %c0_6 = arith.constant 0 : index
    %c0_7 = arith.constant 0 : index
    %8 = vector.load %arg7[%c0_6, %c0_7] : memref<16x128xf32, #tpu.memory_space<vmem>>, vector<16x128xf32>
    tpu.vector_store %arg7[%c0_6, %c0_7], %7 {strides = array<i32>} : memref<16x128xf32, #tpu.memory_space<vmem>>, vector<16x128xf32>,
    %c0_i32_8 = arith.constant 0 : i32
    %9 = arith.cmpi eq, %arg2, %c0_i32_8 : i32
    %10 = arith.extui %9 : i1 to i32
    %c0_i32_9 = arith.constant 0 : i32
    %11 = arith.cmpi ne, %10, %c0_i32_9 : i32
    scf.if %11 {
      %c0_10 = arith.constant 0 : index
      %c0_11 = arith.constant 0 : index
      %12 = vector.load %arg7[%c0_10, %c0_11] : memref<16x128xf32, #tpu.memory_space<vmem>>, vector<16x128xf32>
      %c0_12 = arith.constant 0 : index
      %c0_13 = arith.constant 0 : index
      %13 = vector.load %arg5[%c0_12, %c0_13] : memref<1x128xf32, #tpu.memory_space<vmem>>, vector<1x128xf32>
      %14 = vector.broadcast %13 : vector<1x128xf32> to vector<16x128xf32>
      %15 = arith.mulf %12, %14 : vector<16x128xf32>
      %c0_14 = arith.constant 0 : index
      %c0_15 = arith.constant 0 : index
      %16 = vector.load %arg6[%c0_14, %c0_15] : memref<1x128xf32, #tpu.memory_space<vmem>>, vector<1x128xf32>
      %17 = vector.broadcast %16 : vector<1x128xf32> to vector<16x128xf32>
      %18 = arith.addf %15, %17 : vector<16x128xf32>
      %c0_16 = arith.constant 0 : index
      %c0_17 = arith.constant 0 : index
      %19 = vector.load %arg7[%c0_16, %c0_17] : memref<16x128xf32, #tpu.memory_space<vmem>>, vector<16x128xf32>
      tpu.vector_store %arg7[%c0_16, %c0_17], %18 {strides = array<i32>} : memref<16x128xf32, #tpu.memory_space<vmem>>, vector<16x128xf32>,
    } else {
    }
    return
  }
  func.func @transform_0(%arg0: i32, %arg1: i32, %arg2: i32) -> (i32, i32) {
    %c0_i32 = arith.constant 0 : i32
    return %arg0, %arg2 : i32, i32
  }
  func.func @transform_1(%arg0: i32, %arg1: i32, %arg2: i32) -> (i32, i32) {
    %c0_i32 = arith.constant 0 : i32
    return %arg2, %arg1 : i32, i32
  }
  func.func @transform_2(%arg0: i32, %arg1: i32, %arg2: i32) -> (i32, i32) {
    %c0_i32 = arith.constant 0 : i32
    %c0_i32_0 = arith.constant 0 : i32
    return %c0_i32, %arg1 : i32, i32
  }
  func.func @transform_3(%arg0: i32, %arg1: i32, %arg2: i32) -> (i32, i32) {
    %c0_i32 = arith.constant 0 : i32
    %c0_i32_0 = arith.constant 0 : i32
    return %c0_i32, %arg1 : i32, i32
  }
  func.func @transform_4(%arg0: i32, %arg1: i32, %arg2: i32) -> (i32, i32) {
    %c0_i32 = arith.constant 0 : i32
    return %arg0, %arg1 : i32, i32
  }
}

module attributes {stable_mosaic.version = 11 : i64} {
  func.func @_matmul_bn_act_kernel(%arg0: i32, %arg1: i32, %arg2: i32, %arg3: memref<32x384xbf16, #tpu.memory_space<vmem>>, %arg4: memref<384x128xbf16, #tpu.memory_space<vmem>>, %arg5: memref<1x128xf32, #tpu.memory_space<vmem>>, %arg6: memref<1x128xf32, #tpu.memory_space<vmem>>, %arg7: memref<32x128xf32, #tpu.memory_space<vmem>>) attributes {dimension_semantics = [#tpu.dimension_semantics<parallel>, #tpu.dimension_semantics<parallel>, #tpu.dimension_semantics<arbitrary>], iteration_bounds = array<i64: 2, 1, 1>, scalar_prefetch = 0 : i64, scratch_operands = 0 : i64, tpu.core_type = #tpu.core_type<tc>, window_params = [{transform_indices = @transform_0, window_bounds = array<i64: 32, 384>}, {transform_indices = @transform_1, window_bounds = array<i64: 384, 128>}, {transform_indices = @transform_2, window_bounds = array<i64: 1, 128>}, {transform_indices = @transform_3, window_bounds = array<i64: 1, 128>}, {transform_indices = @transform_4, window_bounds = array<i64: 32, 128>}]} {
    %c0_i32 = arith.constant 0 : i32
    %0 = arith.cmpi eq, %arg2, %c0_i32 : i32
    %1 = arith.extui %0 : i1 to i32
    %c0_i32_0 = arith.constant 0 : i32
    %2 = arith.cmpi ne, %1, %c0_i32_0 : i32
    scf.if %2 {
      %cst_10 = arith.constant 0.000000e+00 : f32
      %12 = vector.broadcast %cst_10 : f32 to vector<32x128xf32>
      %c0_11 = arith.constant 0 : index
      %c0_12 = arith.constant 0 : index
      %13 = vector.load %arg7[%c0_11, %c0_12] : memref<32x128xf32, #tpu.memory_space<vmem>>, vector<32x128xf32>
      tpu.vector_store %arg7[%c0_11, %c0_12], %12 {strides = array<i32>} : memref<32x128xf32, #tpu.memory_space<vmem>>, vector<32x128xf32>,
    } else {
    }
    %c0 = arith.constant 0 : index
    %c0_1 = arith.constant 0 : index
    %3 = vector.load %arg7[%c0, %c0_1] : memref<32x128xf32, #tpu.memory_space<vmem>>, vector<32x128xf32>
    %c0_2 = arith.constant 0 : index
    %c0_3 = arith.constant 0 : index
    %4 = vector.load %arg3[%c0_2, %c0_3] : memref<32x384xbf16, #tpu.memory_space<vmem>>, vector<32x384xbf16>
    %c0_4 = arith.constant 0 : index
    %c0_5 = arith.constant 0 : index
    %5 = vector.load %arg4[%c0_4, %c0_5] : memref<384x128xbf16, #tpu.memory_space<vmem>>, vector<384x128xbf16>
    %cst = arith.constant dense<0.000000e+00> : vector<32x128xf32>
    %6 = tpu.matmul %4, %5, %cst {dimension_numbers = #tpu.dot_dimension_numbers<[1], [0], [0], [1], [0, 0, 1, 1], [], []>} : vector<32x384xbf16>, vector<384x128xbf16>, vector<32x128xf32> -> vector<32x128xf32>
    %7 = arith.addf %3, %6 : vector<32x128xf32>
    %c0_6 = arith.constant 0 : index
    %c0_7 = arith.constant 0 : index
    %8 = vector.load %arg7[%c0_6, %c0_7] : memref<32x128xf32, #tpu.memory_space<vmem>>, vector<32x128xf32>
    tpu.vector_store %arg7[%c0_6, %c0_7], %7 {strides = array<i32>} : memref<32x128xf32, #tpu.memory_space<vmem>>, vector<32x128xf32>,
    %c0_i32_8 = arith.constant 0 : i32
    %9 = arith.cmpi eq, %arg2, %c0_i32_8 : i32
    %10 = arith.extui %9 : i1 to i32
    %c0_i32_9 = arith.constant 0 : i32
    %11 = arith.cmpi ne, %10, %c0_i32_9 : i32
    scf.if %11 {
      %c0_10 = arith.constant 0 : index
      %c0_11 = arith.constant 0 : index
      %12 = vector.load %arg7[%c0_10, %c0_11] : memref<32x128xf32, #tpu.memory_space<vmem>>, vector<32x128xf32>
      %c0_12 = arith.constant 0 : index
      %c0_13 = arith.constant 0 : index
      %13 = vector.load %arg5[%c0_12, %c0_13] : memref<1x128xf32, #tpu.memory_space<vmem>>, vector<1x128xf32>
      %14 = vector.broadcast %13 : vector<1x128xf32> to vector<32x128xf32>
      %15 = arith.mulf %12, %14 : vector<32x128xf32>
      %c0_14 = arith.constant 0 : index
      %c0_15 = arith.constant 0 : index
      %16 = vector.load %arg6[%c0_14, %c0_15] : memref<1x128xf32, #tpu.memory_space<vmem>>, vector<1x128xf32>
      %17 = vector.broadcast %16 : vector<1x128xf32> to vector<32x128xf32>
      %18 = arith.addf %15, %17 : vector<32x128xf32>
      %cst_16 = arith.constant 0.000000e+00 : f32
      %19 = vector.broadcast %cst_16 : f32 to vector<32x128xf32>
      %20 = arith.maximumf %18, %19 : vector<32x128xf32>
      %c0_17 = arith.constant 0 : index
      %c0_18 = arith.constant 0 : index
      %21 = vector.load %arg7[%c0_17, %c0_18] : memref<32x128xf32, #tpu.memory_space<vmem>>, vector<32x128xf32>
      tpu.vector_store %arg7[%c0_17, %c0_18], %20 {strides = array<i32>} : memref<32x128xf32, #tpu.memory_space<vmem>>, vector<32x128xf32>,
    } else {
    }
    return
  }
  func.func @transform_0(%arg0: i32, %arg1: i32, %arg2: i32) -> (i32, i32) {
    %c0_i32 = arith.constant 0 : i32
    return %arg0, %arg2 : i32, i32
  }
  func.func @transform_1(%arg0: i32, %arg1: i32, %arg2: i32) -> (i32, i32) {
    %c0_i32 = arith.constant 0 : i32
    return %arg2, %arg1 : i32, i32
  }
  func.func @transform_2(%arg0: i32, %arg1: i32, %arg2: i32) -> (i32, i32) {
    %c0_i32 = arith.constant 0 : i32
    %c0_i32_0 = arith.constant 0 : i32
    return %c0_i32, %arg1 : i32, i32
  }
  func.func @transform_3(%arg0: i32, %arg1: i32, %arg2: i32) -> (i32, i32) {
    %c0_i32 = arith.constant 0 : i32
    %c0_i32_0 = arith.constant 0 : i32
    return %c0_i32, %arg1 : i32, i32
  }
  func.func @transform_4(%arg0: i32, %arg1: i32, %arg2: i32) -> (i32, i32) {
    %c0_i32 = arith.constant 0 : i32
    return %arg0, %arg1 : i32, i32
  }
}

module attributes {stable_mosaic.version = 11 : i64} {
  func.func @_matmul_bn_act_kernel(%arg0: i32, %arg1: i32, %arg2: i32, %arg3: memref<32x256xbf16, #tpu.memory_space<vmem>>, %arg4: memref<256x128xbf16, #tpu.memory_space<vmem>>, %arg5: memref<1x128xf32, #tpu.memory_space<vmem>>, %arg6: memref<1x128xf32, #tpu.memory_space<vmem>>, %arg7: memref<32x128xf32, #tpu.memory_space<vmem>>, %arg8: memref<32x128xf32, #tpu.memory_space<vmem>>) attributes {dimension_semantics = [#tpu.dimension_semantics<parallel>, #tpu.dimension_semantics<parallel>, #tpu.dimension_semantics<arbitrary>], iteration_bounds = array<i64: 2, 1, 1>, scalar_prefetch = 0 : i64, scratch_operands = 0 : i64, tpu.core_type = #tpu.core_type<tc>, window_params = [{transform_indices = @transform_0, window_bounds = array<i64: 32, 256>}, {transform_indices = @transform_1, window_bounds = array<i64: 256, 128>}, {transform_indices = @transform_2, window_bounds = array<i64: 1, 128>}, {transform_indices = @transform_3, window_bounds = array<i64: 1, 128>}, {transform_indices = @transform_4, window_bounds = array<i64: 32, 128>}, {transform_indices = @transform_5, window_bounds = array<i64: 32, 128>}]} {
    %c0_i32 = arith.constant 0 : i32
    %0 = arith.cmpi eq, %arg2, %c0_i32 : i32
    %1 = arith.extui %0 : i1 to i32
    %c0_i32_0 = arith.constant 0 : i32
    %2 = arith.cmpi ne, %1, %c0_i32_0 : i32
    scf.if %2 {
      %cst_10 = arith.constant 0.000000e+00 : f32
      %12 = vector.broadcast %cst_10 : f32 to vector<32x128xf32>
      %c0_11 = arith.constant 0 : index
      %c0_12 = arith.constant 0 : index
      %13 = vector.load %arg8[%c0_11, %c0_12] : memref<32x128xf32, #tpu.memory_space<vmem>>, vector<32x128xf32>
      tpu.vector_store %arg8[%c0_11, %c0_12], %12 {strides = array<i32>} : memref<32x128xf32, #tpu.memory_space<vmem>>, vector<32x128xf32>,
    } else {
    }
    %c0 = arith.constant 0 : index
    %c0_1 = arith.constant 0 : index
    %3 = vector.load %arg8[%c0, %c0_1] : memref<32x128xf32, #tpu.memory_space<vmem>>, vector<32x128xf32>
    %c0_2 = arith.constant 0 : index
    %c0_3 = arith.constant 0 : index
    %4 = vector.load %arg3[%c0_2, %c0_3] : memref<32x256xbf16, #tpu.memory_space<vmem>>, vector<32x256xbf16>
    %c0_4 = arith.constant 0 : index
    %c0_5 = arith.constant 0 : index
    %5 = vector.load %arg4[%c0_4, %c0_5] : memref<256x128xbf16, #tpu.memory_space<vmem>>, vector<256x128xbf16>
    %cst = arith.constant dense<0.000000e+00> : vector<32x128xf32>
    %6 = tpu.matmul %4, %5, %cst {dimension_numbers = #tpu.dot_dimension_numbers<[1], [0], [0], [1], [0, 0, 1, 1], [], []>} : vector<32x256xbf16>, vector<256x128xbf16>, vector<32x128xf32> -> vector<32x128xf32>
    %7 = arith.addf %3, %6 : vector<32x128xf32>
    %c0_6 = arith.constant 0 : index
    %c0_7 = arith.constant 0 : index
    %8 = vector.load %arg8[%c0_6, %c0_7] : memref<32x128xf32, #tpu.memory_space<vmem>>, vector<32x128xf32>
    tpu.vector_store %arg8[%c0_6, %c0_7], %7 {strides = array<i32>} : memref<32x128xf32, #tpu.memory_space<vmem>>, vector<32x128xf32>,
    %c0_i32_8 = arith.constant 0 : i32
    %9 = arith.cmpi eq, %arg2, %c0_i32_8 : i32
    %10 = arith.extui %9 : i1 to i32
    %c0_i32_9 = arith.constant 0 : i32
    %11 = arith.cmpi ne, %10, %c0_i32_9 : i32
    scf.if %11 {
      %c0_10 = arith.constant 0 : index
      %c0_11 = arith.constant 0 : index
      %12 = vector.load %arg8[%c0_10, %c0_11] : memref<32x128xf32, #tpu.memory_space<vmem>>, vector<32x128xf32>
      %c0_12 = arith.constant 0 : index
      %c0_13 = arith.constant 0 : index
      %13 = vector.load %arg5[%c0_12, %c0_13] : memref<1x128xf32, #tpu.memory_space<vmem>>, vector<1x128xf32>
      %14 = vector.broadcast %13 : vector<1x128xf32> to vector<32x128xf32>
      %15 = arith.mulf %12, %14 : vector<32x128xf32>
      %c0_14 = arith.constant 0 : index
      %c0_15 = arith.constant 0 : index
      %16 = vector.load %arg6[%c0_14, %c0_15] : memref<1x128xf32, #tpu.memory_space<vmem>>, vector<1x128xf32>
      %17 = vector.broadcast %16 : vector<1x128xf32> to vector<32x128xf32>
      %18 = arith.addf %15, %17 : vector<32x128xf32>
      %c0_16 = arith.constant 0 : index
      %c0_17 = arith.constant 0 : index
      %19 = vector.load %arg7[%c0_16, %c0_17] : memref<32x128xf32, #tpu.memory_space<vmem>>, vector<32x128xf32>
      %20 = arith.addf %18, %19 : vector<32x128xf32>
      %cst_18 = arith.constant 0.000000e+00 : f32
      %21 = vector.broadcast %cst_18 : f32 to vector<32x128xf32>
      %22 = arith.maximumf %20, %21 : vector<32x128xf32>
      %c0_19 = arith.constant 0 : index
      %c0_20 = arith.constant 0 : index
      %23 = vector.load %arg8[%c0_19, %c0_20] : memref<32x128xf32, #tpu.memory_space<vmem>>, vector<32x128xf32>
      tpu.vector_store %arg8[%c0_19, %c0_20], %22 {strides = array<i32>} : memref<32x128xf32, #tpu.memory_space<vmem>>, vector<32x128xf32>,
    } else {
    }
    return
  }
  func.func @transform_0(%arg0: i32, %arg1: i32, %arg2: i32) -> (i32, i32) {
    %c0_i32 = arith.constant 0 : i32
    return %arg0, %arg2 : i32, i32
  }
  func.func @transform_1(%arg0: i32, %arg1: i32, %arg2: i32) -> (i32, i32) {
    %c0_i32 = arith.constant 0 : i32
    return %arg2, %arg1 : i32, i32
  }
  func.func @transform_2(%arg0: i32, %arg1: i32, %arg2: i32) -> (i32, i32) {
    %c0_i32 = arith.constant 0 : i32
    %c0_i32_0 = arith.constant 0 : i32
    return %c0_i32, %arg1 : i32, i32
  }
  func.func @transform_3(%arg0: i32, %arg1: i32, %arg2: i32) -> (i32, i32) {
    %c0_i32 = arith.constant 0 : i32
    %c0_i32_0 = arith.constant 0 : i32
    return %c0_i32, %arg1 : i32, i32
  }
  func.func @transform_4(%arg0: i32, %arg1: i32, %arg2: i32) -> (i32, i32) {
    %c0_i32 = arith.constant 0 : i32
    return %arg0, %arg1 : i32, i32
  }
  func.func @transform_5(%arg0: i32, %arg1: i32, %arg2: i32) -> (i32, i32) {
    %c0_i32 = arith.constant 0 : i32
    return %arg0, %arg1 : i32, i32
  }
}

module attributes {stable_mosaic.version = 11 : i64} {
  func.func @_matmul_bn_act_kernel(%arg0: i32, %arg1: i32, %arg2: i32, %arg3: memref<32x256xbf16, #tpu.memory_space<vmem>>, %arg4: memref<256x128xbf16, #tpu.memory_space<vmem>>, %arg5: memref<1x128xf32, #tpu.memory_space<vmem>>, %arg6: memref<1x128xf32, #tpu.memory_space<vmem>>, %arg7: memref<32x128xf32, #tpu.memory_space<vmem>>) attributes {dimension_semantics = [#tpu.dimension_semantics<parallel>, #tpu.dimension_semantics<parallel>, #tpu.dimension_semantics<arbitrary>], iteration_bounds = array<i64: 2, 1, 1>, scalar_prefetch = 0 : i64, scratch_operands = 0 : i64, tpu.core_type = #tpu.core_type<tc>, window_params = [{transform_indices = @transform_0, window_bounds = array<i64: 32, 256>}, {transform_indices = @transform_1, window_bounds = array<i64: 256, 128>}, {transform_indices = @transform_2, window_bounds = array<i64: 1, 128>}, {transform_indices = @transform_3, window_bounds = array<i64: 1, 128>}, {transform_indices = @transform_4, window_bounds = array<i64: 32, 128>}]} {
    %c0_i32 = arith.constant 0 : i32
    %0 = arith.cmpi eq, %arg2, %c0_i32 : i32
    %1 = arith.extui %0 : i1 to i32
    %c0_i32_0 = arith.constant 0 : i32
    %2 = arith.cmpi ne, %1, %c0_i32_0 : i32
    scf.if %2 {
      %cst_10 = arith.constant 0.000000e+00 : f32
      %12 = vector.broadcast %cst_10 : f32 to vector<32x128xf32>
      %c0_11 = arith.constant 0 : index
      %c0_12 = arith.constant 0 : index
      %13 = vector.load %arg7[%c0_11, %c0_12] : memref<32x128xf32, #tpu.memory_space<vmem>>, vector<32x128xf32>
      tpu.vector_store %arg7[%c0_11, %c0_12], %12 {strides = array<i32>} : memref<32x128xf32, #tpu.memory_space<vmem>>, vector<32x128xf32>,
    } else {
    }
    %c0 = arith.constant 0 : index
    %c0_1 = arith.constant 0 : index
    %3 = vector.load %arg7[%c0, %c0_1] : memref<32x128xf32, #tpu.memory_space<vmem>>, vector<32x128xf32>
    %c0_2 = arith.constant 0 : index
    %c0_3 = arith.constant 0 : index
    %4 = vector.load %arg3[%c0_2, %c0_3] : memref<32x256xbf16, #tpu.memory_space<vmem>>, vector<32x256xbf16>
    %c0_4 = arith.constant 0 : index
    %c0_5 = arith.constant 0 : index
    %5 = vector.load %arg4[%c0_4, %c0_5] : memref<256x128xbf16, #tpu.memory_space<vmem>>, vector<256x128xbf16>
    %cst = arith.constant dense<0.000000e+00> : vector<32x128xf32>
    %6 = tpu.matmul %4, %5, %cst {dimension_numbers = #tpu.dot_dimension_numbers<[1], [0], [0], [1], [0, 0, 1, 1], [], []>} : vector<32x256xbf16>, vector<256x128xbf16>, vector<32x128xf32> -> vector<32x128xf32>
    %7 = arith.addf %3, %6 : vector<32x128xf32>
    %c0_6 = arith.constant 0 : index
    %c0_7 = arith.constant 0 : index
    %8 = vector.load %arg7[%c0_6, %c0_7] : memref<32x128xf32, #tpu.memory_space<vmem>>, vector<32x128xf32>
    tpu.vector_store %arg7[%c0_6, %c0_7], %7 {strides = array<i32>} : memref<32x128xf32, #tpu.memory_space<vmem>>, vector<32x128xf32>,
    %c0_i32_8 = arith.constant 0 : i32
    %9 = arith.cmpi eq, %arg2, %c0_i32_8 : i32
    %10 = arith.extui %9 : i1 to i32
    %c0_i32_9 = arith.constant 0 : i32
    %11 = arith.cmpi ne, %10, %c0_i32_9 : i32
    scf.if %11 {
      %c0_10 = arith.constant 0 : index
      %c0_11 = arith.constant 0 : index
      %12 = vector.load %arg7[%c0_10, %c0_11] : memref<32x128xf32, #tpu.memory_space<vmem>>, vector<32x128xf32>
      %c0_12 = arith.constant 0 : index
      %c0_13 = arith.constant 0 : index
      %13 = vector.load %arg5[%c0_12, %c0_13] : memref<1x128xf32, #tpu.memory_space<vmem>>, vector<1x128xf32>
      %14 = vector.broadcast %13 : vector<1x128xf32> to vector<32x128xf32>
      %15 = arith.mulf %12, %14 : vector<32x128xf32>
      %c0_14 = arith.constant 0 : index
      %c0_15 = arith.constant 0 : index
      %16 = vector.load %arg6[%c0_14, %c0_15] : memref<1x128xf32, #tpu.memory_space<vmem>>, vector<1x128xf32>
      %17 = vector.broadcast %16 : vector<1x128xf32> to vector<32x128xf32>
      %18 = arith.addf %15, %17 : vector<32x128xf32>
      %c0_16 = arith.constant 0 : index
      %c0_17 = arith.constant 0 : index
      %19 = vector.load %arg7[%c0_16, %c0_17] : memref<32x128xf32, #tpu.memory_space<vmem>>, vector<32x128xf32>
      tpu.vector_store %arg7[%c0_16, %c0_17], %18 {strides = array<i32>} : memref<32x128xf32, #tpu.memory_space<vmem>>, vector<32x128xf32>,
    } else {
    }
    return
  }
  func.func @transform_0(%arg0: i32, %arg1: i32, %arg2: i32) -> (i32, i32) {
    %c0_i32 = arith.constant 0 : i32
    return %arg0, %arg2 : i32, i32
  }
  func.func @transform_1(%arg0: i32, %arg1: i32, %arg2: i32) -> (i32, i32) {
    %c0_i32 = arith.constant 0 : i32
    return %arg2, %arg1 : i32, i32
  }
  func.func @transform_2(%arg0: i32, %arg1: i32, %arg2: i32) -> (i32, i32) {
    %c0_i32 = arith.constant 0 : i32
    %c0_i32_0 = arith.constant 0 : i32
    return %c0_i32, %arg1 : i32, i32
  }
  func.func @transform_3(%arg0: i32, %arg1: i32, %arg2: i32) -> (i32, i32) {
    %c0_i32 = arith.constant 0 : i32
    %c0_i32_0 = arith.constant 0 : i32
    return %c0_i32, %arg1 : i32, i32
  }
  func.func @transform_4(%arg0: i32, %arg1: i32, %arg2: i32) -> (i32, i32) {
    %c0_i32 = arith.constant 0 : i32
    return %arg0, %arg1 : i32, i32
  }
}

module attributes {stable_mosaic.version = 11 : i64} {
  func.func @_matmul_bn_act_kernel(%arg0: i32, %arg1: i32, %arg2: i32, %arg3: memref<128x384xbf16, #tpu.memory_space<vmem>>, %arg4: memref<384x128xbf16, #tpu.memory_space<vmem>>, %arg5: memref<1x128xf32, #tpu.memory_space<vmem>>, %arg6: memref<1x128xf32, #tpu.memory_space<vmem>>, %arg7: memref<128x128xf32, #tpu.memory_space<vmem>>) attributes {dimension_semantics = [#tpu.dimension_semantics<parallel>, #tpu.dimension_semantics<parallel>, #tpu.dimension_semantics<arbitrary>], iteration_bounds = array<i64: 2, 1, 1>, scalar_prefetch = 0 : i64, scratch_operands = 0 : i64, tpu.core_type = #tpu.core_type<tc>, window_params = [{transform_indices = @transform_0, window_bounds = array<i64: 128, 384>}, {transform_indices = @transform_1, window_bounds = array<i64: 384, 128>}, {transform_indices = @transform_2, window_bounds = array<i64: 1, 128>}, {transform_indices = @transform_3, window_bounds = array<i64: 1, 128>}, {transform_indices = @transform_4, window_bounds = array<i64: 128, 128>}]} {
    %c0_i32 = arith.constant 0 : i32
    %0 = arith.cmpi eq, %arg2, %c0_i32 : i32
    %1 = arith.extui %0 : i1 to i32
    %c0_i32_0 = arith.constant 0 : i32
    %2 = arith.cmpi ne, %1, %c0_i32_0 : i32
    scf.if %2 {
      %cst_10 = arith.constant 0.000000e+00 : f32
      %12 = vector.broadcast %cst_10 : f32 to vector<128x128xf32>
      %c0_11 = arith.constant 0 : index
      %c0_12 = arith.constant 0 : index
      %13 = vector.load %arg7[%c0_11, %c0_12] : memref<128x128xf32, #tpu.memory_space<vmem>>, vector<128x128xf32>
      tpu.vector_store %arg7[%c0_11, %c0_12], %12 {strides = array<i32>} : memref<128x128xf32, #tpu.memory_space<vmem>>, vector<128x128xf32>,
    } else {
    }
    %c0 = arith.constant 0 : index
    %c0_1 = arith.constant 0 : index
    %3 = vector.load %arg7[%c0, %c0_1] : memref<128x128xf32, #tpu.memory_space<vmem>>, vector<128x128xf32>
    %c0_2 = arith.constant 0 : index
    %c0_3 = arith.constant 0 : index
    %4 = vector.load %arg3[%c0_2, %c0_3] : memref<128x384xbf16, #tpu.memory_space<vmem>>, vector<128x384xbf16>
    %c0_4 = arith.constant 0 : index
    %c0_5 = arith.constant 0 : index
    %5 = vector.load %arg4[%c0_4, %c0_5] : memref<384x128xbf16, #tpu.memory_space<vmem>>, vector<384x128xbf16>
    %cst = arith.constant dense<0.000000e+00> : vector<128x128xf32>
    %6 = tpu.matmul %4, %5, %cst {dimension_numbers = #tpu.dot_dimension_numbers<[1], [0], [0], [1], [0, 0, 1, 1], [], []>} : vector<128x384xbf16>, vector<384x128xbf16>, vector<128x128xf32> -> vector<128x128xf32>
    %7 = arith.addf %3, %6 : vector<128x128xf32>
    %c0_6 = arith.constant 0 : index
    %c0_7 = arith.constant 0 : index
    %8 = vector.load %arg7[%c0_6, %c0_7] : memref<128x128xf32, #tpu.memory_space<vmem>>, vector<128x128xf32>
    tpu.vector_store %arg7[%c0_6, %c0_7], %7 {strides = array<i32>} : memref<128x128xf32, #tpu.memory_space<vmem>>, vector<128x128xf32>,
    %c0_i32_8 = arith.constant 0 : i32
    %9 = arith.cmpi eq, %arg2, %c0_i32_8 : i32
    %10 = arith.extui %9 : i1 to i32
    %c0_i32_9 = arith.constant 0 : i32
    %11 = arith.cmpi ne, %10, %c0_i32_9 : i32
    scf.if %11 {
      %c0_10 = arith.constant 0 : index
      %c0_11 = arith.constant 0 : index
      %12 = vector.load %arg7[%c0_10, %c0_11] : memref<128x128xf32, #tpu.memory_space<vmem>>, vector<128x128xf32>
      %c0_12 = arith.constant 0 : index
      %c0_13 = arith.constant 0 : index
      %13 = vector.load %arg5[%c0_12, %c0_13] : memref<1x128xf32, #tpu.memory_space<vmem>>, vector<1x128xf32>
      %14 = vector.broadcast %13 : vector<1x128xf32> to vector<128x128xf32>
      %15 = arith.mulf %12, %14 : vector<128x128xf32>
      %c0_14 = arith.constant 0 : index
      %c0_15 = arith.constant 0 : index
      %16 = vector.load %arg6[%c0_14, %c0_15] : memref<1x128xf32, #tpu.memory_space<vmem>>, vector<1x128xf32>
      %17 = vector.broadcast %16 : vector<1x128xf32> to vector<128x128xf32>
      %18 = arith.addf %15, %17 : vector<128x128xf32>
      %cst_16 = arith.constant 0.000000e+00 : f32
      %19 = vector.broadcast %cst_16 : f32 to vector<128x128xf32>
      %20 = arith.maximumf %18, %19 : vector<128x128xf32>
      %c0_17 = arith.constant 0 : index
      %c0_18 = arith.constant 0 : index
      %21 = vector.load %arg7[%c0_17, %c0_18] : memref<128x128xf32, #tpu.memory_space<vmem>>, vector<128x128xf32>
      tpu.vector_store %arg7[%c0_17, %c0_18], %20 {strides = array<i32>} : memref<128x128xf32, #tpu.memory_space<vmem>>, vector<128x128xf32>,
    } else {
    }
    return
  }
  func.func @transform_0(%arg0: i32, %arg1: i32, %arg2: i32) -> (i32, i32) {
    %c0_i32 = arith.constant 0 : i32
    return %arg0, %arg2 : i32, i32
  }
  func.func @transform_1(%arg0: i32, %arg1: i32, %arg2: i32) -> (i32, i32) {
    %c0_i32 = arith.constant 0 : i32
    return %arg2, %arg1 : i32, i32
  }
  func.func @transform_2(%arg0: i32, %arg1: i32, %arg2: i32) -> (i32, i32) {
    %c0_i32 = arith.constant 0 : i32
    %c0_i32_0 = arith.constant 0 : i32
    return %c0_i32, %arg1 : i32, i32
  }
  func.func @transform_3(%arg0: i32, %arg1: i32, %arg2: i32) -> (i32, i32) {
    %c0_i32 = arith.constant 0 : i32
    %c0_i32_0 = arith.constant 0 : i32
    return %c0_i32, %arg1 : i32, i32
  }
  func.func @transform_4(%arg0: i32, %arg1: i32, %arg2: i32) -> (i32, i32) {
    %c0_i32 = arith.constant 0 : i32
    return %arg0, %arg1 : i32, i32
  }
}

module attributes {stable_mosaic.version = 11 : i64} {
  func.func @_matmul_bn_act_kernel(%arg0: i32, %arg1: i32, %arg2: i32, %arg3: memref<512x128xbf16, #tpu.memory_space<vmem>>, %arg4: memref<128x128xbf16, #tpu.memory_space<vmem>>, %arg5: memref<1x128xf32, #tpu.memory_space<vmem>>, %arg6: memref<1x128xf32, #tpu.memory_space<vmem>>, %arg7: memref<512x128xf32, #tpu.memory_space<vmem>>) attributes {dimension_semantics = [#tpu.dimension_semantics<parallel>, #tpu.dimension_semantics<parallel>, #tpu.dimension_semantics<arbitrary>], iteration_bounds = array<i64: 2, 1, 1>, scalar_prefetch = 0 : i64, scratch_operands = 0 : i64, tpu.core_type = #tpu.core_type<tc>, window_params = [{transform_indices = @transform_0, window_bounds = array<i64: 512, 128>}, {transform_indices = @transform_1, window_bounds = array<i64: 128, 128>}, {transform_indices = @transform_2, window_bounds = array<i64: 1, 128>}, {transform_indices = @transform_3, window_bounds = array<i64: 1, 128>}, {transform_indices = @transform_4, window_bounds = array<i64: 512, 128>}]} {
    %c0_i32 = arith.constant 0 : i32
    %0 = arith.cmpi eq, %arg2, %c0_i32 : i32
    %1 = arith.extui %0 : i1 to i32
    %c0_i32_0 = arith.constant 0 : i32
    %2 = arith.cmpi ne, %1, %c0_i32_0 : i32
    scf.if %2 {
      %cst_10 = arith.constant 0.000000e+00 : f32
      %12 = vector.broadcast %cst_10 : f32 to vector<512x128xf32>
      %c0_11 = arith.constant 0 : index
      %c0_12 = arith.constant 0 : index
      %13 = vector.load %arg7[%c0_11, %c0_12] : memref<512x128xf32, #tpu.memory_space<vmem>>, vector<512x128xf32>
      tpu.vector_store %arg7[%c0_11, %c0_12], %12 {strides = array<i32>} : memref<512x128xf32, #tpu.memory_space<vmem>>, vector<512x128xf32>,
    } else {
    }
    %c0 = arith.constant 0 : index
    %c0_1 = arith.constant 0 : index
    %3 = vector.load %arg7[%c0, %c0_1] : memref<512x128xf32, #tpu.memory_space<vmem>>, vector<512x128xf32>
    %c0_2 = arith.constant 0 : index
    %c0_3 = arith.constant 0 : index
    %4 = vector.load %arg3[%c0_2, %c0_3] : memref<512x128xbf16, #tpu.memory_space<vmem>>, vector<512x128xbf16>
    %c0_4 = arith.constant 0 : index
    %c0_5 = arith.constant 0 : index
    %5 = vector.load %arg4[%c0_4, %c0_5] : memref<128x128xbf16, #tpu.memory_space<vmem>>, vector<128x128xbf16>
    %cst = arith.constant dense<0.000000e+00> : vector<512x128xf32>
    %6 = tpu.matmul %4, %5, %cst {dimension_numbers = #tpu.dot_dimension_numbers<[1], [0], [0], [1], [0, 0, 1, 1], [], []>} : vector<512x128xbf16>, vector<128x128xbf16>, vector<512x128xf32> -> vector<512x128xf32>
    %7 = arith.addf %3, %6 : vector<512x128xf32>
    %c0_6 = arith.constant 0 : index
    %c0_7 = arith.constant 0 : index
    %8 = vector.load %arg7[%c0_6, %c0_7] : memref<512x128xf32, #tpu.memory_space<vmem>>, vector<512x128xf32>
    tpu.vector_store %arg7[%c0_6, %c0_7], %7 {strides = array<i32>} : memref<512x128xf32, #tpu.memory_space<vmem>>, vector<512x128xf32>,
    %c0_i32_8 = arith.constant 0 : i32
    %9 = arith.cmpi eq, %arg2, %c0_i32_8 : i32
    %10 = arith.extui %9 : i1 to i32
    %c0_i32_9 = arith.constant 0 : i32
    %11 = arith.cmpi ne, %10, %c0_i32_9 : i32
    scf.if %11 {
      %c0_10 = arith.constant 0 : index
      %c0_11 = arith.constant 0 : index
      %12 = vector.load %arg7[%c0_10, %c0_11] : memref<512x128xf32, #tpu.memory_space<vmem>>, vector<512x128xf32>
      %c0_12 = arith.constant 0 : index
      %c0_13 = arith.constant 0 : index
      %13 = vector.load %arg5[%c0_12, %c0_13] : memref<1x128xf32, #tpu.memory_space<vmem>>, vector<1x128xf32>
      %14 = vector.broadcast %13 : vector<1x128xf32> to vector<512x128xf32>
      %15 = arith.mulf %12, %14 : vector<512x128xf32>
      %c0_14 = arith.constant 0 : index
      %c0_15 = arith.constant 0 : index
      %16 = vector.load %arg6[%c0_14, %c0_15] : memref<1x128xf32, #tpu.memory_space<vmem>>, vector<1x128xf32>
      %17 = vector.broadcast %16 : vector<1x128xf32> to vector<512x128xf32>
      %18 = arith.addf %15, %17 : vector<512x128xf32>
      %cst_16 = arith.constant 0.000000e+00 : f32
      %19 = vector.broadcast %cst_16 : f32 to vector<512x128xf32>
      %20 = arith.maximumf %18, %19 : vector<512x128xf32>
      %c0_17 = arith.constant 0 : index
      %c0_18 = arith.constant 0 : index
      %21 = vector.load %arg7[%c0_17, %c0_18] : memref<512x128xf32, #tpu.memory_space<vmem>>, vector<512x128xf32>
      tpu.vector_store %arg7[%c0_17, %c0_18], %20 {strides = array<i32>} : memref<512x128xf32, #tpu.memory_space<vmem>>, vector<512x128xf32>,
    } else {
    }
    return
  }
  func.func @transform_0(%arg0: i32, %arg1: i32, %arg2: i32) -> (i32, i32) {
    %c0_i32 = arith.constant 0 : i32
    return %arg0, %arg2 : i32, i32
  }
  func.func @transform_1(%arg0: i32, %arg1: i32, %arg2: i32) -> (i32, i32) {
    %c0_i32 = arith.constant 0 : i32
    return %arg2, %arg1 : i32, i32
  }
  func.func @transform_2(%arg0: i32, %arg1: i32, %arg2: i32) -> (i32, i32) {
    %c0_i32 = arith.constant 0 : i32
    %c0_i32_0 = arith.constant 0 : i32
    return %c0_i32, %arg1 : i32, i32
  }
  func.func @transform_3(%arg0: i32, %arg1: i32, %arg2: i32) -> (i32, i32) {
    %c0_i32 = arith.constant 0 : i32
    %c0_i32_0 = arith.constant 0 : i32
    return %c0_i32, %arg1 : i32, i32
  }
  func.func @transform_4(%arg0: i32, %arg1: i32, %arg2: i32) -> (i32, i32) {
    %c0_i32 = arith.constant 0 : i32
    return %arg0, %arg1 : i32, i32
  }
}

module attributes {stable_mosaic.version = 11 : i64} {
  func.func @_matmul_bn_act_kernel(%arg0: i32, %arg1: i32, %arg2: i32, %arg3: memref<512x128xbf16, #tpu.memory_space<vmem>>, %arg4: memref<128x128xbf16, #tpu.memory_space<vmem>>, %arg5: memref<1x128xf32, #tpu.memory_space<vmem>>, %arg6: memref<1x128xf32, #tpu.memory_space<vmem>>, %arg7: memref<512x128xf32, #tpu.memory_space<vmem>>, %arg8: memref<512x128xf32, #tpu.memory_space<vmem>>) attributes {dimension_semantics = [#tpu.dimension_semantics<parallel>, #tpu.dimension_semantics<parallel>, #tpu.dimension_semantics<arbitrary>], iteration_bounds = array<i64: 2, 1, 1>, scalar_prefetch = 0 : i64, scratch_operands = 0 : i64, tpu.core_type = #tpu.core_type<tc>, window_params = [{transform_indices = @transform_0, window_bounds = array<i64: 512, 128>}, {transform_indices = @transform_1, window_bounds = array<i64: 128, 128>}, {transform_indices = @transform_2, window_bounds = array<i64: 1, 128>}, {transform_indices = @transform_3, window_bounds = array<i64: 1, 128>}, {transform_indices = @transform_4, window_bounds = array<i64: 512, 128>}, {transform_indices = @transform_5, window_bounds = array<i64: 512, 128>}]} {
    %c0_i32 = arith.constant 0 : i32
    %0 = arith.cmpi eq, %arg2, %c0_i32 : i32
    %1 = arith.extui %0 : i1 to i32
    %c0_i32_0 = arith.constant 0 : i32
    %2 = arith.cmpi ne, %1, %c0_i32_0 : i32
    scf.if %2 {
      %cst_10 = arith.constant 0.000000e+00 : f32
      %12 = vector.broadcast %cst_10 : f32 to vector<512x128xf32>
      %c0_11 = arith.constant 0 : index
      %c0_12 = arith.constant 0 : index
      %13 = vector.load %arg8[%c0_11, %c0_12] : memref<512x128xf32, #tpu.memory_space<vmem>>, vector<512x128xf32>
      tpu.vector_store %arg8[%c0_11, %c0_12], %12 {strides = array<i32>} : memref<512x128xf32, #tpu.memory_space<vmem>>, vector<512x128xf32>,
    } else {
    }
    %c0 = arith.constant 0 : index
    %c0_1 = arith.constant 0 : index
    %3 = vector.load %arg8[%c0, %c0_1] : memref<512x128xf32, #tpu.memory_space<vmem>>, vector<512x128xf32>
    %c0_2 = arith.constant 0 : index
    %c0_3 = arith.constant 0 : index
    %4 = vector.load %arg3[%c0_2, %c0_3] : memref<512x128xbf16, #tpu.memory_space<vmem>>, vector<512x128xbf16>
    %c0_4 = arith.constant 0 : index
    %c0_5 = arith.constant 0 : index
    %5 = vector.load %arg4[%c0_4, %c0_5] : memref<128x128xbf16, #tpu.memory_space<vmem>>, vector<128x128xbf16>
    %cst = arith.constant dense<0.000000e+00> : vector<512x128xf32>
    %6 = tpu.matmul %4, %5, %cst {dimension_numbers = #tpu.dot_dimension_numbers<[1], [0], [0], [1], [0, 0, 1, 1], [], []>} : vector<512x128xbf16>, vector<128x128xbf16>, vector<512x128xf32> -> vector<512x128xf32>
    %7 = arith.addf %3, %6 : vector<512x128xf32>
    %c0_6 = arith.constant 0 : index
    %c0_7 = arith.constant 0 : index
    %8 = vector.load %arg8[%c0_6, %c0_7] : memref<512x128xf32, #tpu.memory_space<vmem>>, vector<512x128xf32>
    tpu.vector_store %arg8[%c0_6, %c0_7], %7 {strides = array<i32>} : memref<512x128xf32, #tpu.memory_space<vmem>>, vector<512x128xf32>,
    %c0_i32_8 = arith.constant 0 : i32
    %9 = arith.cmpi eq, %arg2, %c0_i32_8 : i32
    %10 = arith.extui %9 : i1 to i32
    %c0_i32_9 = arith.constant 0 : i32
    %11 = arith.cmpi ne, %10, %c0_i32_9 : i32
    scf.if %11 {
      %c0_10 = arith.constant 0 : index
      %c0_11 = arith.constant 0 : index
      %12 = vector.load %arg8[%c0_10, %c0_11] : memref<512x128xf32, #tpu.memory_space<vmem>>, vector<512x128xf32>
      %c0_12 = arith.constant 0 : index
      %c0_13 = arith.constant 0 : index
      %13 = vector.load %arg5[%c0_12, %c0_13] : memref<1x128xf32, #tpu.memory_space<vmem>>, vector<1x128xf32>
      %14 = vector.broadcast %13 : vector<1x128xf32> to vector<512x128xf32>
      %15 = arith.mulf %12, %14 : vector<512x128xf32>
      %c0_14 = arith.constant 0 : index
      %c0_15 = arith.constant 0 : index
      %16 = vector.load %arg6[%c0_14, %c0_15] : memref<1x128xf32, #tpu.memory_space<vmem>>, vector<1x128xf32>
      %17 = vector.broadcast %16 : vector<1x128xf32> to vector<512x128xf32>
      %18 = arith.addf %15, %17 : vector<512x128xf32>
      %c0_16 = arith.constant 0 : index
      %c0_17 = arith.constant 0 : index
      %19 = vector.load %arg7[%c0_16, %c0_17] : memref<512x128xf32, #tpu.memory_space<vmem>>, vector<512x128xf32>
      %20 = arith.addf %18, %19 : vector<512x128xf32>
      %cst_18 = arith.constant 0.000000e+00 : f32
      %21 = vector.broadcast %cst_18 : f32 to vector<512x128xf32>
      %22 = arith.maximumf %20, %21 : vector<512x128xf32>
      %c0_19 = arith.constant 0 : index
      %c0_20 = arith.constant 0 : index
      %23 = vector.load %arg8[%c0_19, %c0_20] : memref<512x128xf32, #tpu.memory_space<vmem>>, vector<512x128xf32>
      tpu.vector_store %arg8[%c0_19, %c0_20], %22 {strides = array<i32>} : memref<512x128xf32, #tpu.memory_space<vmem>>, vector<512x128xf32>,
    } else {
    }
    return
  }
  func.func @transform_0(%arg0: i32, %arg1: i32, %arg2: i32) -> (i32, i32) {
    %c0_i32 = arith.constant 0 : i32
    return %arg0, %arg2 : i32, i32
  }
  func.func @transform_1(%arg0: i32, %arg1: i32, %arg2: i32) -> (i32, i32) {
    %c0_i32 = arith.constant 0 : i32
    return %arg2, %arg1 : i32, i32
  }
  func.func @transform_2(%arg0: i32, %arg1: i32, %arg2: i32) -> (i32, i32) {
    %c0_i32 = arith.constant 0 : i32
    %c0_i32_0 = arith.constant 0 : i32
    return %c0_i32, %arg1 : i32, i32
  }
  func.func @transform_3(%arg0: i32, %arg1: i32, %arg2: i32) -> (i32, i32) {
    %c0_i32 = arith.constant 0 : i32
    %c0_i32_0 = arith.constant 0 : i32
    return %c0_i32, %arg1 : i32, i32
  }
  func.func @transform_4(%arg0: i32, %arg1: i32, %arg2: i32) -> (i32, i32) {
    %c0_i32 = arith.constant 0 : i32
    return %arg0, %arg1 : i32, i32
  }
  func.func @transform_5(%arg0: i32, %arg1: i32, %arg2: i32) -> (i32, i32) {
    %c0_i32 = arith.constant 0 : i32
    return %arg0, %arg1 : i32, i32
  }
}

module attributes {stable_mosaic.version = 11 : i64} {
  func.func @_matmul_bn_act_kernel(%arg0: i32, %arg1: i32, %arg2: i32, %arg3: memref<512x128xbf16, #tpu.memory_space<vmem>>, %arg4: memref<128x128xbf16, #tpu.memory_space<vmem>>, %arg5: memref<1x128xf32, #tpu.memory_space<vmem>>, %arg6: memref<1x128xf32, #tpu.memory_space<vmem>>, %arg7: memref<512x128xf32, #tpu.memory_space<vmem>>) attributes {dimension_semantics = [#tpu.dimension_semantics<parallel>, #tpu.dimension_semantics<parallel>, #tpu.dimension_semantics<arbitrary>], iteration_bounds = array<i64: 2, 1, 1>, scalar_prefetch = 0 : i64, scratch_operands = 0 : i64, tpu.core_type = #tpu.core_type<tc>, window_params = [{transform_indices = @transform_0, window_bounds = array<i64: 512, 128>}, {transform_indices = @transform_1, window_bounds = array<i64: 128, 128>}, {transform_indices = @transform_2, window_bounds = array<i64: 1, 128>}, {transform_indices = @transform_3, window_bounds = array<i64: 1, 128>}, {transform_indices = @transform_4, window_bounds = array<i64: 512, 128>}]} {
    %c0_i32 = arith.constant 0 : i32
    %0 = arith.cmpi eq, %arg2, %c0_i32 : i32
    %1 = arith.extui %0 : i1 to i32
    %c0_i32_0 = arith.constant 0 : i32
    %2 = arith.cmpi ne, %1, %c0_i32_0 : i32
    scf.if %2 {
      %cst_10 = arith.constant 0.000000e+00 : f32
      %12 = vector.broadcast %cst_10 : f32 to vector<512x128xf32>
      %c0_11 = arith.constant 0 : index
      %c0_12 = arith.constant 0 : index
      %13 = vector.load %arg7[%c0_11, %c0_12] : memref<512x128xf32, #tpu.memory_space<vmem>>, vector<512x128xf32>
      tpu.vector_store %arg7[%c0_11, %c0_12], %12 {strides = array<i32>} : memref<512x128xf32, #tpu.memory_space<vmem>>, vector<512x128xf32>,
    } else {
    }
    %c0 = arith.constant 0 : index
    %c0_1 = arith.constant 0 : index
    %3 = vector.load %arg7[%c0, %c0_1] : memref<512x128xf32, #tpu.memory_space<vmem>>, vector<512x128xf32>
    %c0_2 = arith.constant 0 : index
    %c0_3 = arith.constant 0 : index
    %4 = vector.load %arg3[%c0_2, %c0_3] : memref<512x128xbf16, #tpu.memory_space<vmem>>, vector<512x128xbf16>
    %c0_4 = arith.constant 0 : index
    %c0_5 = arith.constant 0 : index
    %5 = vector.load %arg4[%c0_4, %c0_5] : memref<128x128xbf16, #tpu.memory_space<vmem>>, vector<128x128xbf16>
    %cst = arith.constant dense<0.000000e+00> : vector<512x128xf32>
    %6 = tpu.matmul %4, %5, %cst {dimension_numbers = #tpu.dot_dimension_numbers<[1], [0], [0], [1], [0, 0, 1, 1], [], []>} : vector<512x128xbf16>, vector<128x128xbf16>, vector<512x128xf32> -> vector<512x128xf32>
    %7 = arith.addf %3, %6 : vector<512x128xf32>
    %c0_6 = arith.constant 0 : index
    %c0_7 = arith.constant 0 : index
    %8 = vector.load %arg7[%c0_6, %c0_7] : memref<512x128xf32, #tpu.memory_space<vmem>>, vector<512x128xf32>
    tpu.vector_store %arg7[%c0_6, %c0_7], %7 {strides = array<i32>} : memref<512x128xf32, #tpu.memory_space<vmem>>, vector<512x128xf32>,
    %c0_i32_8 = arith.constant 0 : i32
    %9 = arith.cmpi eq, %arg2, %c0_i32_8 : i32
    %10 = arith.extui %9 : i1 to i32
    %c0_i32_9 = arith.constant 0 : i32
    %11 = arith.cmpi ne, %10, %c0_i32_9 : i32
    scf.if %11 {
      %c0_10 = arith.constant 0 : index
      %c0_11 = arith.constant 0 : index
      %12 = vector.load %arg7[%c0_10, %c0_11] : memref<512x128xf32, #tpu.memory_space<vmem>>, vector<512x128xf32>
      %c0_12 = arith.constant 0 : index
      %c0_13 = arith.constant 0 : index
      %13 = vector.load %arg5[%c0_12, %c0_13] : memref<1x128xf32, #tpu.memory_space<vmem>>, vector<1x128xf32>
      %14 = vector.broadcast %13 : vector<1x128xf32> to vector<512x128xf32>
      %15 = arith.mulf %12, %14 : vector<512x128xf32>
      %c0_14 = arith.constant 0 : index
      %c0_15 = arith.constant 0 : index
      %16 = vector.load %arg6[%c0_14, %c0_15] : memref<1x128xf32, #tpu.memory_space<vmem>>, vector<1x128xf32>
      %17 = vector.broadcast %16 : vector<1x128xf32> to vector<512x128xf32>
      %18 = arith.addf %15, %17 : vector<512x128xf32>
      %c0_16 = arith.constant 0 : index
      %c0_17 = arith.constant 0 : index
      %19 = vector.load %arg7[%c0_16, %c0_17] : memref<512x128xf32, #tpu.memory_space<vmem>>, vector<512x128xf32>
      tpu.vector_store %arg7[%c0_16, %c0_17], %18 {strides = array<i32>} : memref<512x128xf32, #tpu.memory_space<vmem>>, vector<512x128xf32>,
    } else {
    }
    return
  }
  func.func @transform_0(%arg0: i32, %arg1: i32, %arg2: i32) -> (i32, i32) {
    %c0_i32 = arith.constant 0 : i32
    return %arg0, %arg2 : i32, i32
  }
  func.func @transform_1(%arg0: i32, %arg1: i32, %arg2: i32) -> (i32, i32) {
    %c0_i32 = arith.constant 0 : i32
    return %arg2, %arg1 : i32, i32
  }
  func.func @transform_2(%arg0: i32, %arg1: i32, %arg2: i32) -> (i32, i32) {
    %c0_i32 = arith.constant 0 : i32
    %c0_i32_0 = arith.constant 0 : i32
    return %c0_i32, %arg1 : i32, i32
  }
  func.func @transform_3(%arg0: i32, %arg1: i32, %arg2: i32) -> (i32, i32) {
    %c0_i32 = arith.constant 0 : i32
    %c0_i32_0 = arith.constant 0 : i32
    return %c0_i32, %arg1 : i32, i32
  }
  func.func @transform_4(%arg0: i32, %arg1: i32, %arg2: i32) -> (i32, i32) {
    %c0_i32 = arith.constant 0 : i32
    return %arg0, %arg1 : i32, i32
  }
}

module attributes {stable_mosaic.version = 11 : i64} {
  func.func @_matmul_bn_act_kernel(%arg0: i32, %arg1: i32, %arg2: i32, %arg3: memref<512x128xbf16, #tpu.memory_space<vmem>>, %arg4: memref<128x128xbf16, #tpu.memory_space<vmem>>, %arg5: memref<1x128xf32, #tpu.memory_space<vmem>>, %arg6: memref<1x128xf32, #tpu.memory_space<vmem>>, %arg7: memref<512x128xf32, #tpu.memory_space<vmem>>) attributes {dimension_semantics = [#tpu.dimension_semantics<parallel>, #tpu.dimension_semantics<parallel>, #tpu.dimension_semantics<arbitrary>], iteration_bounds = array<i64: 8, 1, 1>, scalar_prefetch = 0 : i64, scratch_operands = 0 : i64, tpu.core_type = #tpu.core_type<tc>, window_params = [{transform_indices = @transform_0, window_bounds = array<i64: 512, 128>}, {transform_indices = @transform_1, window_bounds = array<i64: 128, 128>}, {transform_indices = @transform_2, window_bounds = array<i64: 1, 128>}, {transform_indices = @transform_3, window_bounds = array<i64: 1, 128>}, {transform_indices = @transform_4, window_bounds = array<i64: 512, 128>}]} {
    %c0_i32 = arith.constant 0 : i32
    %0 = arith.cmpi eq, %arg2, %c0_i32 : i32
    %1 = arith.extui %0 : i1 to i32
    %c0_i32_0 = arith.constant 0 : i32
    %2 = arith.cmpi ne, %1, %c0_i32_0 : i32
    scf.if %2 {
      %cst_10 = arith.constant 0.000000e+00 : f32
      %12 = vector.broadcast %cst_10 : f32 to vector<512x128xf32>
      %c0_11 = arith.constant 0 : index
      %c0_12 = arith.constant 0 : index
      %13 = vector.load %arg7[%c0_11, %c0_12] : memref<512x128xf32, #tpu.memory_space<vmem>>, vector<512x128xf32>
      tpu.vector_store %arg7[%c0_11, %c0_12], %12 {strides = array<i32>} : memref<512x128xf32, #tpu.memory_space<vmem>>, vector<512x128xf32>,
    } else {
    }
    %c0 = arith.constant 0 : index
    %c0_1 = arith.constant 0 : index
    %3 = vector.load %arg7[%c0, %c0_1] : memref<512x128xf32, #tpu.memory_space<vmem>>, vector<512x128xf32>
    %c0_2 = arith.constant 0 : index
    %c0_3 = arith.constant 0 : index
    %4 = vector.load %arg3[%c0_2, %c0_3] : memref<512x128xbf16, #tpu.memory_space<vmem>>, vector<512x128xbf16>
    %c0_4 = arith.constant 0 : index
    %c0_5 = arith.constant 0 : index
    %5 = vector.load %arg4[%c0_4, %c0_5] : memref<128x128xbf16, #tpu.memory_space<vmem>>, vector<128x128xbf16>
    %cst = arith.constant dense<0.000000e+00> : vector<512x128xf32>
    %6 = tpu.matmul %4, %5, %cst {dimension_numbers = #tpu.dot_dimension_numbers<[1], [0], [0], [1], [0, 0, 1, 1], [], []>} : vector<512x128xbf16>, vector<128x128xbf16>, vector<512x128xf32> -> vector<512x128xf32>
    %7 = arith.addf %3, %6 : vector<512x128xf32>
    %c0_6 = arith.constant 0 : index
    %c0_7 = arith.constant 0 : index
    %8 = vector.load %arg7[%c0_6, %c0_7] : memref<512x128xf32, #tpu.memory_space<vmem>>, vector<512x128xf32>
    tpu.vector_store %arg7[%c0_6, %c0_7], %7 {strides = array<i32>} : memref<512x128xf32, #tpu.memory_space<vmem>>, vector<512x128xf32>,
    %c0_i32_8 = arith.constant 0 : i32
    %9 = arith.cmpi eq, %arg2, %c0_i32_8 : i32
    %10 = arith.extui %9 : i1 to i32
    %c0_i32_9 = arith.constant 0 : i32
    %11 = arith.cmpi ne, %10, %c0_i32_9 : i32
    scf.if %11 {
      %c0_10 = arith.constant 0 : index
      %c0_11 = arith.constant 0 : index
      %12 = vector.load %arg7[%c0_10, %c0_11] : memref<512x128xf32, #tpu.memory_space<vmem>>, vector<512x128xf32>
      %c0_12 = arith.constant 0 : index
      %c0_13 = arith.constant 0 : index
      %13 = vector.load %arg5[%c0_12, %c0_13] : memref<1x128xf32, #tpu.memory_space<vmem>>, vector<1x128xf32>
      %14 = vector.broadcast %13 : vector<1x128xf32> to vector<512x128xf32>
      %15 = arith.mulf %12, %14 : vector<512x128xf32>
      %c0_14 = arith.constant 0 : index
      %c0_15 = arith.constant 0 : index
      %16 = vector.load %arg6[%c0_14, %c0_15] : memref<1x128xf32, #tpu.memory_space<vmem>>, vector<1x128xf32>
      %17 = vector.broadcast %16 : vector<1x128xf32> to vector<512x128xf32>
      %18 = arith.addf %15, %17 : vector<512x128xf32>
      %19 = arith.negf %18 : vector<512x128xf32>
      %20 = math.exp %19 : vector<512x128xf32>
      %cst_16 = arith.constant 1.000000e+00 : f32
      %21 = vector.broadcast %cst_16 : f32 to vector<512x128xf32>
      %22 = arith.addf %21, %20 : vector<512x128xf32>
      %23 = arith.divf %21, %22 : vector<512x128xf32>
      %c0_17 = arith.constant 0 : index
      %c0_18 = arith.constant 0 : index
      %24 = vector.load %arg7[%c0_17, %c0_18] : memref<512x128xf32, #tpu.memory_space<vmem>>, vector<512x128xf32>
      tpu.vector_store %arg7[%c0_17, %c0_18], %23 {strides = array<i32>} : memref<512x128xf32, #tpu.memory_space<vmem>>, vector<512x128xf32>,
    } else {
    }
    return
  }
  func.func @transform_0(%arg0: i32, %arg1: i32, %arg2: i32) -> (i32, i32) {
    %c0_i32 = arith.constant 0 : i32
    return %arg0, %arg2 : i32, i32
  }
  func.func @transform_1(%arg0: i32, %arg1: i32, %arg2: i32) -> (i32, i32) {
    %c0_i32 = arith.constant 0 : i32
    return %arg2, %arg1 : i32, i32
  }
  func.func @transform_2(%arg0: i32, %arg1: i32, %arg2: i32) -> (i32, i32) {
    %c0_i32 = arith.constant 0 : i32
    %c0_i32_0 = arith.constant 0 : i32
    return %c0_i32, %arg1 : i32, i32
  }
  func.func @transform_3(%arg0: i32, %arg1: i32, %arg2: i32) -> (i32, i32) {
    %c0_i32 = arith.constant 0 : i32
    %c0_i32_0 = arith.constant 0 : i32
    return %c0_i32, %arg1 : i32, i32
  }
  func.func @transform_4(%arg0: i32, %arg1: i32, %arg2: i32) -> (i32, i32) {
    %c0_i32 = arith.constant 0 : i32
    return %arg0, %arg1 : i32, i32
  }
}

</mosaic_0001>

<bundles_post_ra>
// kernel: basnet_forward.89
= control target key start
LH: loop header
LB: loop body
LE: loop exit
PB: predicated region body
PF: predicated region fallthrough
CT: control target
= control target key end

     0   :  { %s2151_s15 = smov 0   ;;  %s2153_s16 = smov 0   ;;  %s2541_s0 = inlined_call_operand.vmem [shape: bf16[1024,256], index: 0, kind: input, shape index: {}]   ;;  %s2542_s1 = inlined_call_operand.vmem [shape: bf16[256,128], index: 1, kind: input, shape index: {}]   ;;  %s2543_s2 = inlined_call_operand.vmem [shape: f32[1,128], index: 2, kind: input, shape index: {}]   ;;  %s2544_s3 = inlined_call_operand.vmem [shape: f32[1,128], index: 3, kind: input, shape index: {}]   ;;  %s2545_s4 = inlined_call_operand.vmem [shape: f32[1024,128], index: 4, kind: output, shape index: {}]  }
   0x1   :  { %s2155_s17 = smov 0  }
   0x2 LB: > { %s33_s18 = sadd.s32 1, %s2119_s16  ;;  %p1840_p0 = scmp.ge.s32.totalorder %s2123_s17, 1  ;;  %s2123_s17 = sphi %s2155_s17, %s14_s17   ;;  %s2119_s16 = sphi %s2153_s16, %s2547_s16   ;;  %s2115_s15 = sphi %s2151_s15, %s2546_s15  }
   0x3   : > { %p35_p1 = scmp.ge.s32.totalorder %s33_s18, 2  ;;  %p224_p2 = scmp.lt.s32.totalorder %s2123_s17, 3 }
   0x5   : > { %s2549_s18 = smov (%p35_p1, %s33_s18), 0  ;;  %p225_p3 = pnand %p1840_p0, %p224_p2 }
   0x6   : > { %v1989_v0 = vld [vmem:[%s2542_s1] sm:$0xff] (!%p225_p3)   ;;  %v2125_v1 = vmov (!%p225_p3), 0   ;;  %s1841_s21 = sshll.u32 (!%p225_p3), %s2115_s15, 6  ;;  %v1990_v2 = vld [vmem:[%s2542_s1 + $0x8] sm:$0xff] (!%p225_p3)   ;;  %v1991_v3 = vld [vmem:[%s2542_s1 + $0x10] sm:$0xff] (!%p225_p3)  }
   0x7   : > { %228 = sbr.rel (%p225_p3) target bundleno = 412 (0x19c), region = 36  ;;  %953 = vmatprep.subr.bf16.mxu0 (!%p225_p3), %v2125_v1  ;;  %1931 = vmatprep.subr.bf16.mxu1 (!%p225_p3), %v2125_v1  ;;  %p274_p4 = scmp.lt.s32.totalorder (!%p225_p3), %s1841_s21, 127  ;;  %v1992_v4 = vld [vmem:[%s2542_s1 + $0x18] sm:$0xff] (!%p225_p3)   ;;  %v1993_v5 = vld [vmem:[%s2542_s1 + $0x20] sm:$0xff] (!%p225_p3)   ;;  %v1994_v7 = vld [vmem:[%s2542_s1 + $0x28] sm:$0xff] (!%p225_p3)  }
   0x8   : > { %954 = vmatpush1.bf16.msra.mxu0 (!%p225_p3), %v1989_v0  ;;  %1947 = vmatpush1.bf16.msra.mxu1 (!%p225_p3), %v1989_v0  ;;  %v1995_v9 = vld [vmem:[%s2542_s1 + $0x30] sm:$0xff] (!%p225_p3)   ;;  %v1996_v10 = vld [vmem:[%s2542_s1 + $0x38] sm:$0xff] (!%p225_p3)   ;;  %v1997_v11 = vld [vmem:[%s2542_s1 + $0x40] sm:$0xff] (!%p225_p3)  }
   0x9   : > { %955 = vmatprep.subr.bf16.mxu0 (!%p225_p3), %v2125_v1  ;;  %1932 = vmatprep.subr.bf16.mxu1 (!%p225_p3), %v2125_v1  ;;  %v1998_v12 = vld [vmem:[%s2542_s1 + $0x48] sm:$0xff] (!%p225_p3)   ;;  %v1999_v13 = vld [vmem:[%s2542_s1 + $0x50] sm:$0xff] (!%p225_p3)   ;;  %v2000_v14 = vld [vmem:[%s2542_s1 + $0x58] sm:$0xff] (!%p225_p3)  }
   0xa   : > { %v2001_v15 = vld [vmem:[%s2542_s1 + $0x60] sm:$0xff] (!%p225_p3)   ;;  %v2002_v16 = vld [vmem:[%s2542_s1 + $0x68] sm:$0xff] (!%p225_p3)   ;;  %v2003_v17 = vld [vmem:[%s2542_s1 + $0x70] sm:$0xff] (!%p225_p3)  }
   0xb   : > { %v2004_v18 = vld [vmem:[%s2542_s1 + $0x78] sm:$0xff] (!%p225_p3)  }
   0xc   : > { %956 = vmatpush1.bf16.msra.mxu0 (!%p225_p3), %v1990_v2  ;;  %1948 = vmatpush1.bf16.msra.mxu1 (!%p225_p3), %v1990_v2 }
   0xd   : > { %957 = vmatprep.subr.bf16.mxu0 (!%p225_p3), %v2125_v1  ;;  %1933 = vmatprep.subr.bf16.mxu1 (!%p225_p3), %v2125_v1 }
   0xe   : > { %s2551_s21 = smov (!%p274_p4, %s1841_s21), 127 }
   0xf   : > { %s1930_s28 = sshll.u32 %s2551_s21, 3 }
  0x10   : > { %958 = vmatpush1.bf16.msra.mxu0 %v1991_v3  ;;  %1949 = vmatpush1.bf16.msra.mxu1 %v1991_v3  ;;  %s2200_s7 = scalar_lea.vmem %s2541_s0, %s1930_s28  ;;  %s2344_s15 = scalar_lea.vmem %s2545_s4, %s1930_s28 }
  0x11   : > { %959 = vmatprep.subr.bf16.mxu0 %v2125_v1  ;;  %1934 = vmatprep.subr.bf16.mxu1 %v2125_v1  ;;  %v2007_v6 = vld [vmem:[%s2200_s7 + $0x4] ss:$8 sps:$4 sm:$0xff]   ;;  %v2005_v19 = vld [vmem:[%s2200_s7] ss:$8 sps:$4 sm:$0xff]   ;;  %v2011_v21 = vld [vmem:[%s2200_s7 + $0x14] ss:$8 sps:$4 sm:$0xff]  }
  0x12   : > { %v2010_v8 = vld [vmem:[%s2200_s7 + $0x104] ss:$8 sps:$4 sm:$0xff]   ;;  %985 = vmatprep.mubr.bf16.mxu0 %v2007_v6  ;;  %v2008_v20 = vld [vmem:[%s2200_s7 + $0x100] ss:$8 sps:$4 sm:$0xff]   ;;  %v2013_v22 = vld [vmem:[%s2200_s7 + $0x114] ss:$8 sps:$4 sm:$0xff]  }
  0x13   : > { %1113 = vmatprep.mubr.bf16.mxu1 %v2010_v8  ;;  %v2015_v23 = vld [vmem:[%s2200_s7 + $0x10] ss:$8 sps:$4 sm:$0xff]   ;;  %v2017_v25 = vld [vmem:[%s2200_s7 + $0x24] ss:$8 sps:$4 sm:$0xff]   ;;  %v2021_v27 = vld [vmem:[%s2200_s7 + $0x20] ss:$8 sps:$4 sm:$0xff]  }
  0x14   : > { %960 = vmatpush1.bf16.msra.mxu0 %v1992_v4  ;;  %1950 = vmatpush1.bf16.msra.mxu1 %v1992_v4  ;;  %v2016_v24 = vld [vmem:[%s2200_s7 + $0x110] ss:$8 sps:$4 sm:$0xff]   ;;  %v2019_v26 = vld [vmem:[%s2200_s7 + $0x124] ss:$8 sps:$4 sm:$0xff]   ;;  %v2022_v28 = vld [vmem:[%s2200_s7 + $0x120] ss:$8 sps:$4 sm:$0xff]  }
  0x15   : > { %961 = vmatprep.subr.bf16.mxu0 %v2125_v1  ;;  %1935 = vmatprep.subr.bf16.mxu1 %v2125_v1  ;;  %v2023_v29 = vld [vmem:[%s2200_s7 + $0x34] ss:$8 sps:$4 sm:$0xff]   ;;  %v2027_v31 = vld [vmem:[%s2200_s7 + $0x30] ss:$8 sps:$4 sm:$0xff]   ;;  %v2029_v33 = vld [vmem:[%s2200_s7 + $0x44] ss:$8 sps:$4 sm:$0xff]  }
  0x16   : > { %v2025_v30 = vld [vmem:[%s2200_s7 + $0x134] ss:$8 sps:$4 sm:$0xff]   ;;  %v2028_v32 = vld [vmem:[%s2200_s7 + $0x130] ss:$8 sps:$4 sm:$0xff]   ;;  %v2031_v34 = vld [vmem:[%s2200_s7 + $0x144] ss:$8 sps:$4 sm:$0xff]  }
  0x17   : > { %v2033_v35 = vld [vmem:[%s2200_s7 + $0x40] ss:$8 sps:$4 sm:$0xff]   ;;  %v2035_v37 = vld [vmem:[%s2200_s7 + $0x54] ss:$8 sps:$4 sm:$0xff]   ;;  %v2039_v39 = vld [vmem:[%s2200_s7 + $0x50] ss:$8 sps:$4 sm:$0xff]  }
  0x18   : > { %962 = vmatpush1.bf16.msra.mxu0 %v1993_v5  ;;  %1951 = vmatpush1.bf16.msra.mxu1 %v1993_v5  ;;  %v2034_v36 = vld [vmem:[%s2200_s7 + $0x140] ss:$8 sps:$4 sm:$0xff]   ;;  %v2037_v38 = vld [vmem:[%s2200_s7 + $0x154] ss:$8 sps:$4 sm:$0xff]   ;;  %v2040_v40 = vld [vmem:[%s2200_s7 + $0x150] ss:$8 sps:$4 sm:$0xff]  }
  0x19   : > { %963 = vmatprep.subr.bf16.mxu0 %v2125_v1  ;;  %1936 = vmatprep.subr.bf16.mxu1 %v2125_v1  ;;  %v2041_v41 = vld [vmem:[%s2200_s7 + $0x64] ss:$8 sps:$4 sm:$0xff]   ;;  %v2045_v43 = vld [vmem:[%s2200_s7 + $0x60] ss:$8 sps:$4 sm:$0xff]   ;;  %v2047_v45 = vld [vmem:[%s2200_s7 + $0x74] ss:$8 sps:$4 sm:$0xff]  }
  0x1a   : > { %v2043_v42 = vld [vmem:[%s2200_s7 + $0x164] ss:$8 sps:$4 sm:$0xff]   ;;  %v2046_v44 = vld [vmem:[%s2200_s7 + $0x160] ss:$8 sps:$4 sm:$0xff]   ;;  %v2049_v46 = vld [vmem:[%s2200_s7 + $0x174] ss:$8 sps:$4 sm:$0xff]  }
  0x1b   : > { %v2051_v47 = vld [vmem:[%s2200_s7 + $0x70] ss:$8 sps:$4 sm:$0xff]   ;;  %v2053_v49 = vld [vmem:[%s2200_s7 + $0x84] ss:$8 sps:$4 sm:$0xff]   ;;  %v2057_v51 = vld [vmem:[%s2200_s7 + $0x80] ss:$8 sps:$4 sm:$0xff]  }
  0x1c   : > { %964 = vmatpush1.bf16.msra.mxu0 %v1994_v7  ;;  %1952 = vmatpush1.bf16.msra.mxu1 %v1994_v7  ;;  %v2052_v48 = vld [vmem:[%s2200_s7 + $0x170] ss:$8 sps:$4 sm:$0xff]   ;;  %v2055_v50 = vld [vmem:[%s2200_s7 + $0x184] ss:$8 sps:$4 sm:$0xff]   ;;  %v2058_v52 = vld [vmem:[%s2200_s7 + $0x180] ss:$8 sps:$4 sm:$0xff]  }
  0x1d   : > { %965 = vmatprep.subr.bf16.mxu0 %v2125_v1  ;;  %1937 = vmatprep.subr.bf16.mxu1 %v2125_v1  ;;  %v2059_v53 = vld [vmem:[%s2200_s7 + $0x94] ss:$8 sps:$4 sm:$0xff]   ;;  %v2063_v55 = vld [vmem:[%s2200_s7 + $0x90] ss:$8 sps:$4 sm:$0xff]   ;;  %v2065_v57 = vld [vmem:[%s2200_s7 + $0xa4] ss:$8 sps:$4 sm:$0xff]  }
  0x1e   : > { %v2061_v54 = vld [vmem:[%s2200_s7 + $0x194] ss:$8 sps:$4 sm:$0xff]   ;;  %v2064_v56 = vld [vmem:[%s2200_s7 + $0x190] ss:$8 sps:$4 sm:$0xff]   ;;  %v2067_v58 = vld [vmem:[%s2200_s7 + $0x1a4] ss:$8 sps:$4 sm:$0xff]  }
  0x1f   : > { %v2069_v59 = vld [vmem:[%s2200_s7 + $0xa0] ss:$8 sps:$4 sm:$0xff]   ;;  %v2071_v61 = vld [vmem:[%s2200_s7 + $0xb4] ss:$8 sps:$4 sm:$0xff]   ;;  %v2075_v63 = vld [vmem:[%s2200_s7 + $0xb0] ss:$8 sps:$4 sm:$0xff]  }
  0x20   : > { %966 = vmatpush1.bf16.msra.mxu0 %v1995_v9  ;;  %1953 = vmatpush1.bf16.msra.mxu1 %v1995_v9  ;;  %v2070_v60 = vld [vmem:[%s2200_s7 + $0x1a0] ss:$8 sps:$4 sm:$0xff]   ;;  %v2073_v62 = vld [vmem:[%s2200_s7 + $0x1b4] ss:$8 sps:$4 sm:$0xff]   ;;  %v2076_v0 = vld [vmem:[%s2200_s7 + $0x1b0] ss:$8 sps:$4 sm:$0xff]  }
  0x21   : > { %967 = vmatprep.subr.bf16.mxu0 %v2125_v1  ;;  %1938 = vmatprep.subr.bf16.mxu1 %v2125_v1  ;;  %v2079_v2 = vld [vmem:[%s2200_s7 + $0x1c4] ss:$8 sps:$4 sm:$0xff]   ;;  %v2081_v3 = vld [vmem:[%s2200_s7 + $0xc0] ss:$8 sps:$4 sm:$0xff]   ;;  %v2083_v5 = vld [vmem:[%s2200_s7 + $0xd4] ss:$8 sps:$4 sm:$0xff]  }
  0x22   : > { %v2082_v4 = vld [vmem:[%s2200_s7 + $0x1c0] ss:$8 sps:$4 sm:$0xff]   ;;  %v2085_v6 = vld [vmem:[%s2200_s7 + $0x1d4] ss:$8 sps:$4 sm:$0xff]   ;;  %v2087_v7 = vld [vmem:[%s2200_s7 + $0xd0] ss:$8 sps:$4 sm:$0xff]  }
  0x23   : > { %v2088_v8 = vld [vmem:[%s2200_s7 + $0x1d0] ss:$8 sps:$4 sm:$0xff]   ;;  %v2089_v9 = vld [vmem:[%s2200_s7 + $0xe4] ss:$8 sps:$4 sm:$0xff]  }
  0x24   : > { %968 = vmatpush1.bf16.msra.mxu0 %v1996_v10  ;;  %1954 = vmatpush1.bf16.msra.mxu1 %v1996_v10  ;;  %v2091_v10 = vld [vmem:[%s2200_s7 + $0x1e4] ss:$8 sps:$4 sm:$0xff]  }
  0x25   : > { %969 = vmatprep.subr.bf16.mxu0 %v2125_v1  ;;  %1939 = vmatprep.subr.bf16.mxu1 %v2125_v1 }
  0x28   : > { %970 = vmatpush1.bf16.msra.mxu0 %v1997_v11  ;;  %1955 = vmatpush1.bf16.msra.mxu1 %v1997_v11  ;;  %v2093_v11 = vld [vmem:[%s2200_s7 + $0xe0] ss:$8 sps:$4 sm:$0xff]  }
  0x29   : > { %971 = vmatprep.subr.bf16.mxu0 %v2125_v1  ;;  %1940 = vmatprep.subr.bf16.mxu1 %v2125_v1 }
  0x2c   : > { %972 = vmatpush1.bf16.msra.mxu0 %v1998_v12  ;;  %1956 = vmatpush1.bf16.msra.mxu1 %v1998_v12  ;;  %v2094_v12 = vld [vmem:[%s2200_s7 + $0x1e0] ss:$8 sps:$4 sm:$0xff]  }
  0x2d   : > { %973 = vmatprep.subr.bf16.mxu0 %v2125_v1  ;;  %1941 = vmatprep.subr.bf16.mxu1 %v2125_v1 }
  0x30   : > { %974 = vmatpush1.bf16.msra.mxu0 %v1999_v13  ;;  %1957 = vmatpush1.bf16.msra.mxu1 %v1999_v13  ;;  %v2095_v13 = vld [vmem:[%s2200_s7 + $0xf4] ss:$8 sps:$4 sm:$0xff]  }
  0x31   : > { %975 = vmatprep.subr.bf16.mxu0 %v2125_v1  ;;  %1942 = vmatprep.subr.bf16.mxu1 %v2125_v1 }
  0x34   : > { %976 = vmatpush1.bf16.msra.mxu0 %v2000_v14  ;;  %1958 = vmatpush1.bf16.msra.mxu1 %v2000_v14  ;;  %v2097_v14 = vld [vmem:[%s2200_s7 + $0x1f4] ss:$8 sps:$4 sm:$0xff]  }
  0x35   : > { %977 = vmatprep.subr.bf16.mxu0 %v2125_v1  ;;  %1943 = vmatprep.subr.bf16.mxu1 %v2125_v1 }
  0x38   : > { %978 = vmatpush1.bf16.msra.mxu0 %v2001_v15  ;;  %1959 = vmatpush1.bf16.msra.mxu1 %v2001_v15  ;;  %v2099_v15 = vld [vmem:[%s2200_s7 + $0xf0] ss:$8 sps:$4 sm:$0xff]  }
  0x39   : > { %979 = vmatprep.subr.bf16.mxu0 %v2125_v1  ;;  %1944 = vmatprep.subr.bf16.mxu1 %v2125_v1 }
  0x3c   : > { %980 = vmatpush1.bf16.msra.mxu0 %v2002_v16  ;;  %1960 = vmatpush1.bf16.msra.mxu1 %v2002_v16  ;;  %v2100_v16 = vld [vmem:[%s2200_s7 + $0x1f0] ss:$8 sps:$4 sm:$0xff]  }
  0x3d   : > { %981 = vmatprep.subr.bf16.mxu0 %v2125_v1  ;;  %1945 = vmatprep.subr.bf16.mxu1 %v2125_v1 }
  0x40   : > { %982 = vmatpush1.bf16.msra.mxu0 %v2003_v17  ;;  %1961 = vmatpush1.bf16.msra.mxu1 %v2003_v17 }
  0x41   : > { %983 = vmatprep.subr.bf16.mxu0 %v2125_v1  ;;  %1946 = vmatprep.subr.bf16.mxu1 %v2125_v1  ;;  %v2077_v1 = vld [vmem:[%s2200_s7 + $0xc4] ss:$8 sps:$4 sm:$0xff]  }
  0x44   : > { %984 = vmatpush1.bf16.msra.mxu0 %v2004_v18  ;;  %1962 = vmatpush1.bf16.msra.mxu1 %v2004_v18  ;;  %v2326_v18 = vld [vmem:[%s2543_s2] ss:$0 sm:$0xff] }
  0x47   : > { %986 = vmatmul.mubr.bf16.vlgmr.msra.gmra.mrb[0].mxu0 %v2005_v19  ;;  %1114 = vmatmul.mubr.bf16.vlgmr.msra.gmra.mrb[0].mxu1 %v2008_v20 }
  0x48   : > { %993 = vmatprep.mubr.bf16.mxu0 %v2011_v21  ;;  %1121 = vmatprep.mubr.bf16.mxu1 %v2013_v22  ;;  %v2331_v22 = vld [vmem:[%s2544_s3] ss:$0 sm:$0xff] }
  0x4f   : > { %994 = vmatmul.mubr.bf16.gmra.mrb[4].mxu0 %v2015_v23  ;;  %1122 = vmatmul.mubr.bf16.gmra.mrb[4].mxu1 %v2016_v24 }
  0x50   : > { %1001 = vmatprep.mubr.bf16.mxu0 %v2017_v25  ;;  %1129 = vmatprep.mubr.bf16.mxu1 %v2019_v26 }
  0x57   : > { %1002 = vmatmul.mubr.bf16.gmra.mrb[8].mxu0 %v2021_v27  ;;  %1130 = vmatmul.mubr.bf16.gmra.mrb[8].mxu1 %v2022_v28 }
  0x58   : > { %1009 = vmatprep.mubr.bf16.mxu0 %v2023_v29  ;;  %1137 = vmatprep.mubr.bf16.mxu1 %v2025_v30 }
  0x5f   : > { %1010 = vmatmul.mubr.bf16.gmra.mrb[12].mxu0 %v2027_v31  ;;  %1138 = vmatmul.mubr.bf16.gmra.mrb[12].mxu1 %v2028_v32 }
  0x60   : > { %1017 = vmatprep.mubr.bf16.mxu0 %v2029_v33  ;;  %1145 = vmatprep.mubr.bf16.mxu1 %v2031_v34 }
  0x67   : > { %1018 = vmatmul.mubr.bf16.gmra.mrb[16].mxu0 %v2033_v35  ;;  %1146 = vmatmul.mubr.bf16.gmra.mrb[16].mxu1 %v2034_v36 }
  0x68   : > { %1025 = vmatprep.mubr.bf16.mxu0 %v2035_v37  ;;  %1153 = vmatprep.mubr.bf16.mxu1 %v2037_v38 }
  0x6f   : > { %1026 = vmatmul.mubr.bf16.gmra.mrb[20].mxu0 %v2039_v39  ;;  %1154 = vmatmul.mubr.bf16.gmra.mrb[20].mxu1 %v2040_v40 }
  0x70   : > { %1033 = vmatprep.mubr.bf16.mxu0 %v2041_v41  ;;  %1161 = vmatprep.mubr.bf16.mxu1 %v2043_v42 }
  0x77   : > { %1034 = vmatmul.mubr.bf16.gmra.mrb[24].mxu0 %v2045_v43  ;;  %1162 = vmatmul.mubr.bf16.gmra.mrb[24].mxu1 %v2046_v44 }
  0x78   : > { %1041 = vmatprep.mubr.bf16.mxu0 %v2047_v45  ;;  %1169 = vmatprep.mubr.bf16.mxu1 %v2049_v46 }
  0x7f   : > { %1042 = vmatmul.mubr.bf16.gmra.mrb[28].mxu0 %v2051_v47  ;;  %1170 = vmatmul.mubr.bf16.gmra.mrb[28].mxu1 %v2052_v48 }
  0x80   : > { %1049 = vmatprep.mubr.bf16.mxu0 %v2053_v49  ;;  %1177 = vmatprep.mubr.bf16.mxu1 %v2055_v50 }
  0x87   : > { %1050 = vmatmul.mubr.bf16.gmra.mrb[32].mxu0 %v2057_v51  ;;  %1178 = vmatmul.mubr.bf16.gmra.mrb[32].mxu1 %v2058_v52 }
  0x88   : > { %1057 = vmatprep.mubr.bf16.mxu0 %v2059_v53  ;;  %1185 = vmatprep.mubr.bf16.mxu1 %v2061_v54 }
  0x8f   : > { %1058 = vmatmul.mubr.bf16.gmra.mrb[36].mxu0 %v2063_v55  ;;  %1186 = vmatmul.mubr.bf16.gmra.mrb[36].mxu1 %v2064_v56 }
  0x90   : > { %1065 = vmatprep.mubr.bf16.mxu0 %v2065_v57  ;;  %1193 = vmatprep.mubr.bf16.mxu1 %v2067_v58 }
  0x97   : > { %1066 = vmatmul.mubr.bf16.gmra.mrb[40].mxu0 %v2069_v59  ;;  %1194 = vmatmul.mubr.bf16.gmra.mrb[40].mxu1 %v2070_v60 }
  0x98   : > { %1073 = vmatprep.mubr.bf16.mxu0 %v2071_v61  ;;  %1201 = vmatprep.mubr.bf16.mxu1 %v2073_v62 }
  0x9f   : > { %1074 = vmatmul.mubr.bf16.gmra.mrb[44].mxu0 %v2075_v63  ;;  %1202 = vmatmul.mubr.bf16.gmra.mrb[44].mxu1 %v2076_v0 }
  0xa0   : > { %1081 = vmatprep.mubr.bf16.mxu0 %v2077_v1  ;;  %1209 = vmatprep.mubr.bf16.mxu1 %v2079_v2 }
  0xa7   : > { %1082 = vmatmul.mubr.bf16.gmra.mrb[48].mxu0 %v2081_v3  ;;  %1210 = vmatmul.mubr.bf16.gmra.mrb[48].mxu1 %v2082_v4 }
  0xa8   : > { %1089 = vmatprep.mubr.bf16.mxu0 %v2083_v5  ;;  %1217 = vmatprep.mubr.bf16.mxu1 %v2085_v6 }
  0xaf   : > { %1090 = vmatmul.mubr.bf16.gmra.mrb[52].mxu0 %v2087_v7  ;;  %1218 = vmatmul.mubr.bf16.gmra.mrb[52].mxu1 %v2088_v8 }
  0xb0   : > { %1097 = vmatprep.mubr.bf16.mxu0 %v2089_v9  ;;  %1225 = vmatprep.mubr.bf16.mxu1 %v2091_v10 }
  0xb7   : > { %1098 = vmatmul.mubr.bf16.gmra.mrb[56].mxu0 %v2093_v11  ;;  %1226 = vmatmul.mubr.bf16.gmra.mrb[56].mxu1 %v2094_v12 }
  0xb8   : > { %1105 = vmatprep.mubr.bf16.mxu0 %v2095_v13  ;;  %1233 = vmatprep.mubr.bf16.mxu1 %v2097_v14 }
  0xbf   : > { %1106 = vmatmul.mubr.bf16.gmra.mrb[60].mxu0 %v2099_v15  ;;  %1234 = vmatmul.mubr.bf16.gmra.mrb[60].mxu1 %v2100_v16 }
 0x11a   : > { %v987_v17 = vpop.f32.mrb[0].mxu0  ;;  %v1115_v19 = vpop.f32.mrb[0].mxu1 }
 0x11b   : > { %v989_v20 = vpop.f32.mrb[1].mxu0  ;;  %v1117_v21 = vpop.f32.mrb[1].mxu1  ;;  %v1444_v25 = vmul.f32 %v2326_v18, %v987_v17  ;;  %v1476_v26 = vmul.f32 %v2326_v18, %v1115_v19 }
 0x11c   : > { %v990_v23 = vpop.f32.mrb[2].mxu0  ;;  %v1118_v24 = vpop.f32.mrb[2].mxu1 }
 0x11d   : > { %v992_v27 = vpop.f32.mrb[3].mxu0  ;;  %v1120_v28 = vpop.f32.mrb[3].mxu1  ;;  %v1515_v29 = vadd.f32 %v2331_v22, %v1444_v25  ;;  %v1547_v30 = vadd.f32 %v2331_v22, %v1476_v26  ;;  %v1445_v31 = vmul.f32 %v2326_v18, %v990_v23  ;;  %v1477_v32 = vmul.f32 %v2326_v18, %v1118_v24 }
 0x11f   : > { %v1579_v33 = vmax.f32 %v1515_v29, 0.0  ;;  %v1611_v34 = vmax.f32 %v1547_v30, 0.0  ;;  %v1516_v35 = vadd.f32 %v2331_v22, %v1445_v31  ;;  %v1548_v36 = vadd.f32 %v2331_v22, %v1477_v32 }
 0x121   : > { %1643 = vst [vmem:[%s2344_s15] sm:$0xff] %v1579_v33  ;;  %1675 = vst [vmem:[%s2344_s15 + $0x100] sm:$0xff] %v1611_v34  ;;  %v1580_v39 = vmax.f32 %v1516_v35, 0.0  ;;  %v1612_v40 = vmax.f32 %v1548_v36, 0.0 }
 0x122   : > { %v995_v37 = vpop.f32.mrb[4].mxu0  ;;  %v1123_v38 = vpop.f32.mrb[4].mxu1 }
 0x123   : > { %v997_v41 = vpop.f32.mrb[5].mxu0  ;;  %v1125_v42 = vpop.f32.mrb[5].mxu1  ;;  %1644 = vst [vmem:[%s2344_s15 + $0x8] sm:$0xff] %v1580_v39  ;;  %1676 = vst [vmem:[%s2344_s15 + $0x108] sm:$0xff] %v1612_v40  ;;  %v1446_v45 = vmul.f32 %v2326_v18, %v995_v37  ;;  %v1478_v46 = vmul.f32 %v2326_v18, %v1123_v38 }
 0x124   : > { %v998_v43 = vpop.f32.mrb[6].mxu0  ;;  %v1126_v44 = vpop.f32.mrb[6].mxu1 }
 0x125   : > { %v1000_v47 = vpop.f32.mrb[7].mxu0  ;;  %v1128_v48 = vpop.f32.mrb[7].mxu1  ;;  %v1517_v49 = vadd.f32 %v2331_v22, %v1446_v45  ;;  %v1549_v50 = vadd.f32 %v2331_v22, %v1478_v46  ;;  %v1447_v51 = vmul.f32 %v2326_v18, %v998_v43  ;;  %v1479_v52 = vmul.f32 %v2326_v18, %v1126_v44 }
 0x127   : > { %v1581_v53 = vmax.f32 %v1517_v49, 0.0  ;;  %v1613_v54 = vmax.f32 %v1549_v50, 0.0  ;;  %v1518_v55 = vadd.f32 %v2331_v22, %v1447_v51  ;;  %v1550_v56 = vadd.f32 %v2331_v22, %v1479_v52 }
 0x129   : > { %1645 = vst [vmem:[%s2344_s15 + $0x10] sm:$0xff] %v1581_v53  ;;  %1677 = vst [vmem:[%s2344_s15 + $0x110] sm:$0xff] %v1613_v54  ;;  %v1582_v59 = vmax.f32 %v1518_v55, 0.0  ;;  %v1614_v60 = vmax.f32 %v1550_v56, 0.0 }
 0x12a   : > { %v1003_v57 = vpop.f32.mrb[8].mxu0  ;;  %v1131_v58 = vpop.f32.mrb[8].mxu1 }
 0x12b   : > { %v1005_v61 = vpop.f32.mrb[9].mxu0  ;;  %v1133_v62 = vpop.f32.mrb[9].mxu1  ;;  %1646 = vst [vmem:[%s2344_s15 + $0x18] sm:$0xff] %v1582_v59  ;;  %1678 = vst [vmem:[%s2344_s15 + $0x118] sm:$0xff] %v1614_v60  ;;  %v1448_v1 = vmul.f32 %v2326_v18, %v1003_v57  ;;  %v1480_v2 = vmul.f32 %v2326_v18, %v1131_v58 }
 0x12c   : > { %v1006_v63 = vpop.f32.mrb[10].mxu0  ;;  %v1134_v0 = vpop.f32.mrb[10].mxu1 }
 0x12d   : > { %v1008_v3 = vpop.f32.mrb[11].mxu0  ;;  %v1136_v4 = vpop.f32.mrb[11].mxu1  ;;  %v1519_v5 = vadd.f32 %v2331_v22, %v1448_v1  ;;  %v1551_v6 = vadd.f32 %v2331_v22, %v1480_v2  ;;  %v1449_v7 = vmul.f32 %v2326_v18, %v1006_v63  ;;  %v1481_v8 = vmul.f32 %v2326_v18, %v1134_v0 }
 0x12f   : > { %v1583_v9 = vmax.f32 %v1519_v5, 0.0  ;;  %v1615_v10 = vmax.f32 %v1551_v6, 0.0  ;;  %v1520_v11 = vadd.f32 %v2331_v22, %v1449_v7  ;;  %v1552_v12 = vadd.f32 %v2331_v22, %v1481_v8 }
 0x131   : > { %1647 = vst [vmem:[%s2344_s15 + $0x20] sm:$0xff] %v1583_v9  ;;  %1679 = vst [vmem:[%s2344_s15 + $0x120] sm:$0xff] %v1615_v10  ;;  %v1584_v15 = vmax.f32 %v1520_v11, 0.0  ;;  %v1616_v16 = vmax.f32 %v1552_v12, 0.0 }
 0x132   : > { %v1011_v13 = vpop.f32.mrb[12].mxu0  ;;  %v1139_v14 = vpop.f32.mrb[12].mxu1 }
 0x133   : > { %v1013_v17 = vpop.f32.mrb[13].mxu0  ;;  %v1141_v19 = vpop.f32.mrb[13].mxu1  ;;  %1648 = vst [vmem:[%s2344_s15 + $0x28] sm:$0xff] %v1584_v15  ;;  %1680 = vst [vmem:[%s2344_s15 + $0x128] sm:$0xff] %v1616_v16  ;;  %v1450_v23 = vmul.f32 %v2326_v18, %v1011_v13  ;;  %v1482_v24 = vmul.f32 %v2326_v18, %v1139_v14 }
 0x134   : > { %v1014_v20 = vpop.f32.mrb[14].mxu0  ;;  %v1142_v21 = vpop.f32.mrb[14].mxu1 }
 0x135   : > { %v1016_v25 = vpop.f32.mrb[15].mxu0  ;;  %v1144_v26 = vpop.f32.mrb[15].mxu1  ;;  %v1521_v27 = vadd.f32 %v2331_v22, %v1450_v23  ;;  %v1553_v28 = vadd.f32 %v2331_v22, %v1482_v24  ;;  %v1451_v29 = vmul.f32 %v2326_v18, %v1014_v20  ;;  %v1483_v30 = vmul.f32 %v2326_v18, %v1142_v21 }
 0x137   : > { %v1585_v31 = vmax.f32 %v1521_v27, 0.0  ;;  %v1617_v32 = vmax.f32 %v1553_v28, 0.0  ;;  %v1522_v33 = vadd.f32 %v2331_v22, %v1451_v29  ;;  %v1554_v34 = vadd.f32 %v2331_v22, %v1483_v30 }
 0x139   : > { %1649 = vst [vmem:[%s2344_s15 + $0x30] sm:$0xff] %v1585_v31  ;;  %1681 = vst [vmem:[%s2344_s15 + $0x130] sm:$0xff] %v1617_v32  ;;  %v1586_v37 = vmax.f32 %v1522_v33, 0.0  ;;  %v1618_v38 = vmax.f32 %v1554_v34, 0.0 }
 0x13a   : > { %v1019_v35 = vpop.f32.mrb[16].mxu0  ;;  %v1147_v36 = vpop.f32.mrb[16].mxu1 }
 0x13b   : > { %v1021_v39 = vpop.f32.mrb[17].mxu0  ;;  %v1149_v40 = vpop.f32.mrb[17].mxu1  ;;  %1650 = vst [vmem:[%s2344_s15 + $0x38] sm:$0xff] %v1586_v37  ;;  %1682 = vst [vmem:[%s2344_s15 + $0x138] sm:$0xff] %v1618_v38  ;;  %v1452_v43 = vmul.f32 %v2326_v18, %v1019_v35  ;;  %v1484_v44 = vmul.f32 %v2326_v18, %v1147_v36 }
 0x13c   : > { %v1022_v41 = vpop.f32.mrb[18].mxu0  ;;  %v1150_v42 = vpop.f32.mrb[18].mxu1 }
 0x13d   : > { %v1024_v45 = vpop.f32.mrb[19].mxu0  ;;  %v1152_v46 = vpop.f32.mrb[19].mxu1  ;;  %v1523_v47 = vadd.f32 %v2331_v22, %v1452_v43  ;;  %v1555_v48 = vadd.f32 %v2331_v22, %v1484_v44  ;;  %v1453_v49 = vmul.f32 %v2326_v18, %v1022_v41  ;;  %v1485_v50 = vmul.f32 %v2326_v18, %v1150_v42 }
 0x13f   : > { %v1587_v51 = vmax.f32 %v1523_v47, 0.0  ;;  %v1619_v52 = vmax.f32 %v1555_v48, 0.0  ;;  %v1524_v53 = vadd.f32 %v2331_v22, %v1453_v49  ;;  %v1556_v54 = vadd.f32 %v2331_v22, %v1485_v50 }
 0x141   : > { %1651 = vst [vmem:[%s2344_s15 + $0x40] sm:$0xff] %v1587_v51  ;;  %1683 = vst [vmem:[%s2344_s15 + $0x140] sm:$0xff] %v1619_v52  ;;  %v1588_v57 = vmax.f32 %v1524_v53, 0.0  ;;  %v1620_v58 = vmax.f32 %v1556_v54, 0.0 }
 0x142   : > { %v1027_v55 = vpop.f32.mrb[20].mxu0  ;;  %v1155_v56 = vpop.f32.mrb[20].mxu1 }
 0x143   : > { %v1029_v59 = vpop.f32.mrb[21].mxu0  ;;  %v1157_v60 = vpop.f32.mrb[21].mxu1  ;;  %1652 = vst [vmem:[%s2344_s15 + $0x48] sm:$0xff] %v1588_v57  ;;  %1684 = vst [vmem:[%s2344_s15 + $0x148] sm:$0xff] %v1620_v58  ;;  %v1454_v63 = vmul.f32 %v2326_v18, %v1027_v55  ;;  %v1486_v0 = vmul.f32 %v2326_v18, %v1155_v56 }
 0x144   : > { %v1030_v61 = vpop.f32.mrb[22].mxu0  ;;  %v1158_v62 = vpop.f32.mrb[22].mxu1 }
 0x145   : > { %v1032_v1 = vpop.f32.mrb[23].mxu0  ;;  %v1160_v2 = vpop.f32.mrb[23].mxu1  ;;  %v1525_v3 = vadd.f32 %v2331_v22, %v1454_v63  ;;  %v1557_v4 = vadd.f32 %v2331_v22, %v1486_v0  ;;  %v1455_v5 = vmul.f32 %v2326_v18, %v1030_v61  ;;  %v1487_v6 = vmul.f32 %v2326_v18, %v1158_v62 }
 0x147   : > { %v1589_v7 = vmax.f32 %v1525_v3, 0.0  ;;  %v1621_v8 = vmax.f32 %v1557_v4, 0.0  ;;  %v1526_v9 = vadd.f32 %v2331_v22, %v1455_v5  ;;  %v1558_v10 = vadd.f32 %v2331_v22, %v1487_v6 }
 0x149   : > { %1653 = vst [vmem:[%s2344_s15 + $0x50] sm:$0xff] %v1589_v7  ;;  %1685 = vst [vmem:[%s2344_s15 + $0x150] sm:$0xff] %v1621_v8  ;;  %v1590_v13 = vmax.f32 %v1526_v9, 0.0  ;;  %v1622_v14 = vmax.f32 %v1558_v10, 0.0 }
 0x14a   : > { %v1035_v11 = vpop.f32.mrb[24].mxu0  ;;  %v1163_v12 = vpop.f32.mrb[24].mxu1 }
 0x14b   : > { %v1037_v15 = vpop.f32.mrb[25].mxu0  ;;  %v1165_v16 = vpop.f32.mrb[25].mxu1  ;;  %1654 = vst [vmem:[%s2344_s15 + $0x58] sm:$0xff] %v1590_v13  ;;  %1686 = vst [vmem:[%s2344_s15 + $0x158] sm:$0xff] %v1622_v14  ;;  %v1456_v20 = vmul.f32 %v2326_v18, %v1035_v11  ;;  %v1488_v21 = vmul.f32 %v2326_v18, %v1163_v12 }
 0x14c   : > { %v1038_v17 = vpop.f32.mrb[26].mxu0  ;;  %v1166_v19 = vpop.f32.mrb[26].mxu1 }
 0x14d   : > { %v1040_v23 = vpop.f32.mrb[27].mxu0  ;;  %v1168_v24 = vpop.f32.mrb[27].mxu1  ;;  %v1527_v25 = vadd.f32 %v2331_v22, %v1456_v20  ;;  %v1559_v26 = vadd.f32 %v2331_v22, %v1488_v21  ;;  %v1457_v27 = vmul.f32 %v2326_v18, %v1038_v17  ;;  %v1489_v28 = vmul.f32 %v2326_v18, %v1166_v19 }
 0x14f   : > { %v1591_v29 = vmax.f32 %v1527_v25, 0.0  ;;  %v1623_v30 = vmax.f32 %v1559_v26, 0.0  ;;  %v1528_v31 = vadd.f32 %v2331_v22, %v1457_v27  ;;  %v1560_v32 = vadd.f32 %v2331_v22, %v1489_v28 }
 0x151   : > { %1655 = vst [vmem:[%s2344_s15 + $0x60] sm:$0xff] %v1591_v29  ;;  %1687 = vst [vmem:[%s2344_s15 + $0x160] sm:$0xff] %v1623_v30  ;;  %v1592_v35 = vmax.f32 %v1528_v31, 0.0  ;;  %v1624_v36 = vmax.f32 %v1560_v32, 0.0 }
 0x152   : > { %v1043_v33 = vpop.f32.mrb[28].mxu0  ;;  %v1171_v34 = vpop.f32.mrb[28].mxu1 }
 0x153   : > { %v1045_v37 = vpop.f32.mrb[29].mxu0  ;;  %v1173_v38 = vpop.f32.mrb[29].mxu1  ;;  %1656 = vst [vmem:[%s2344_s15 + $0x68] sm:$0xff] %v1592_v35  ;;  %1688 = vst [vmem:[%s2344_s15 + $0x168] sm:$0xff] %v1624_v36  ;;  %v1458_v41 = vmul.f32 %v2326_v18, %v1043_v33  ;;  %v1490_v42 = vmul.f32 %v2326_v18, %v1171_v34 }
 0x154   : > { %v1046_v39 = vpop.f32.mrb[30].mxu0  ;;  %v1174_v40 = vpop.f32.mrb[30].mxu1 }
 0x155   : > { %v1048_v43 = vpop.f32.mrb[31].mxu0  ;;  %v1176_v44 = vpop.f32.mrb[31].mxu1  ;;  %v1529_v45 = vadd.f32 %v2331_v22, %v1458_v41  ;;  %v1561_v46 = vadd.f32 %v2331_v22, %v1490_v42  ;;  %v1459_v47 = vmul.f32 %v2326_v18, %v1046_v39  ;;  %v1491_v48 = vmul.f32 %v2326_v18, %v1174_v40 }
 0x157   : > { %v1593_v49 = vmax.f32 %v1529_v45, 0.0  ;;  %v1625_v50 = vmax.f32 %v1561_v46, 0.0  ;;  %v1530_v51 = vadd.f32 %v2331_v22, %v1459_v47  ;;  %v1562_v52 = vadd.f32 %v2331_v22, %v1491_v48 }
 0x159   : > { %1657 = vst [vmem:[%s2344_s15 + $0x70] sm:$0xff] %v1593_v49  ;;  %1689 = vst [vmem:[%s2344_s15 + $0x170] sm:$0xff] %v1625_v50  ;;  %v1594_v55 = vmax.f32 %v1530_v51, 0.0  ;;  %v1626_v56 = vmax.f32 %v1562_v52, 0.0 }
 0x15a   : > { %v1051_v53 = vpop.f32.mrb[32].mxu0  ;;  %v1179_v54 = vpop.f32.mrb[32].mxu1 }
 0x15b   : > { %v1053_v57 = vpop.f32.mrb[33].mxu0  ;;  %v1181_v58 = vpop.f32.mrb[33].mxu1  ;;  %1658 = vst [vmem:[%s2344_s15 + $0x78] sm:$0xff] %v1594_v55  ;;  %1690 = vst [vmem:[%s2344_s15 + $0x178] sm:$0xff] %v1626_v56  ;;  %v1460_v61 = vmul.f32 %v2326_v18, %v1051_v53  ;;  %v1492_v62 = vmul.f32 %v2326_v18, %v1179_v54 }
 0x15c   : > { %v1054_v59 = vpop.f32.mrb[34].mxu0  ;;  %v1182_v60 = vpop.f32.mrb[34].mxu1 }
 0x15d   : > { %v1056_v63 = vpop.f32.mrb[35].mxu0  ;;  %v1184_v0 = vpop.f32.mrb[35].mxu1  ;;  %v1531_v1 = vadd.f32 %v2331_v22, %v1460_v61  ;;  %v1563_v2 = vadd.f32 %v2331_v22, %v1492_v62  ;;  %v1461_v3 = vmul.f32 %v2326_v18, %v1054_v59  ;;  %v1493_v4 = vmul.f32 %v2326_v18, %v1182_v60 }
 0x15f   : > { %v1595_v5 = vmax.f32 %v1531_v1, 0.0  ;;  %v1627_v6 = vmax.f32 %v1563_v2, 0.0  ;;  %v1532_v7 = vadd.f32 %v2331_v22, %v1461_v3  ;;  %v1564_v8 = vadd.f32 %v2331_v22, %v1493_v4 }
 0x161   : > { %1659 = vst [vmem:[%s2344_s15 + $0x80] sm:$0xff] %v1595_v5  ;;  %1691 = vst [vmem:[%s2344_s15 + $0x180] sm:$0xff] %v1627_v6  ;;  %v1596_v11 = vmax.f32 %v1532_v7, 0.0  ;;  %v1628_v12 = vmax.f32 %v1564_v8, 0.0 }
 0x162   : > { %v1059_v9 = vpop.f32.mrb[36].mxu0  ;;  %v1187_v10 = vpop.f32.mrb[36].mxu1 }
 0x163   : > { %v1061_v13 = vpop.f32.mrb[37].mxu0  ;;  %v1189_v14 = vpop.f32.mrb[37].mxu1  ;;  %1660 = vst [vmem:[%s2344_s15 + $0x88] sm:$0xff] %v1596_v11  ;;  %1692 = vst [vmem:[%s2344_s15 + $0x188] sm:$0xff] %v1628_v12  ;;  %v1462_v17 = vmul.f32 %v2326_v18, %v1059_v9  ;;  %v1494_v19 = vmul.f32 %v2326_v18, %v1187_v10 }
 0x164   : > { %v1062_v15 = vpop.f32.mrb[38].mxu0  ;;  %v1190_v16 = vpop.f32.mrb[38].mxu1 }
 0x165   : > { %v1064_v20 = vpop.f32.mrb[39].mxu0  ;;  %v1192_v21 = vpop.f32.mrb[39].mxu1  ;;  %v1533_v23 = vadd.f32 %v2331_v22, %v1462_v17  ;;  %v1565_v24 = vadd.f32 %v2331_v22, %v1494_v19  ;;  %v1463_v25 = vmul.f32 %v2326_v18, %v1062_v15  ;;  %v1495_v26 = vmul.f32 %v2326_v18, %v1190_v16 }
 0x167   : > { %v1597_v27 = vmax.f32 %v1533_v23, 0.0  ;;  %v1629_v28 = vmax.f32 %v1565_v24, 0.0  ;;  %v1534_v29 = vadd.f32 %v2331_v22, %v1463_v25  ;;  %v1566_v30 = vadd.f32 %v2331_v22, %v1495_v26 }
 0x169   : > { %1661 = vst [vmem:[%s2344_s15 + $0x90] sm:$0xff] %v1597_v27  ;;  %1693 = vst [vmem:[%s2344_s15 + $0x190] sm:$0xff] %v1629_v28  ;;  %v1598_v33 = vmax.f32 %v1534_v29, 0.0  ;;  %v1630_v34 = vmax.f32 %v1566_v30, 0.0 }
 0x16a   : > { %v1067_v31 = vpop.f32.mrb[40].mxu0  ;;  %v1195_v32 = vpop.f32.mrb[40].mxu1 }
 0x16b   : > { %v1069_v35 = vpop.f32.mrb[41].mxu0  ;;  %v1197_v36 = vpop.f32.mrb[41].mxu1  ;;  %1662 = vst [vmem:[%s2344_s15 + $0x98] sm:$0xff] %v1598_v33  ;;  %1694 = vst [vmem:[%s2344_s15 + $0x198] sm:$0xff] %v1630_v34  ;;  %v1464_v39 = vmul.f32 %v2326_v18, %v1067_v31  ;;  %v1496_v40 = vmul.f32 %v2326_v18, %v1195_v32 }
 0x16c   : > { %v1070_v37 = vpop.f32.mrb[42].mxu0  ;;  %v1198_v38 = vpop.f32.mrb[42].mxu1 }
 0x16d   : > { %v1072_v41 = vpop.f32.mrb[43].mxu0  ;;  %v1200_v42 = vpop.f32.mrb[43].mxu1  ;;  %v1535_v43 = vadd.f32 %v2331_v22, %v1464_v39  ;;  %v1567_v44 = vadd.f32 %v2331_v22, %v1496_v40  ;;  %v1465_v45 = vmul.f32 %v2326_v18, %v1070_v37  ;;  %v1497_v46 = vmul.f32 %v2326_v18, %v1198_v38 }
 0x16f   : > { %v1599_v47 = vmax.f32 %v1535_v43, 0.0  ;;  %v1631_v48 = vmax.f32 %v1567_v44, 0.0  ;;  %v1536_v49 = vadd.f32 %v2331_v22, %v1465_v45  ;;  %v1568_v50 = vadd.f32 %v2331_v22, %v1497_v46 }
 0x171   : > { %1663 = vst [vmem:[%s2344_s15 + $0xa0] sm:$0xff] %v1599_v47  ;;  %1695 = vst [vmem:[%s2344_s15 + $0x1a0] sm:$0xff] %v1631_v48  ;;  %v1600_v53 = vmax.f32 %v1536_v49, 0.0  ;;  %v1632_v54 = vmax.f32 %v1568_v50, 0.0 }
 0x172   : > { %v1075_v51 = vpop.f32.mrb[44].mxu0  ;;  %v1203_v52 = vpop.f32.mrb[44].mxu1 }
 0x173   : > { %v1077_v55 = vpop.f32.mrb[45].mxu0  ;;  %v1205_v56 = vpop.f32.mrb[45].mxu1  ;;  %1664 = vst [vmem:[%s2344_s15 + $0xa8] sm:$0xff] %v1600_v53  ;;  %1696 = vst [vmem:[%s2344_s15 + $0x1a8] sm:$0xff] %v1632_v54  ;;  %v1466_v59 = vmul.f32 %v2326_v18, %v1075_v51  ;;  %v1498_v60 = vmul.f32 %v2326_v18, %v1203_v52 }
 0x174   : > { %v1078_v57 = vpop.f32.mrb[46].mxu0  ;;  %v1206_v58 = vpop.f32.mrb[46].mxu1 }
 0x175   : > { %v1080_v61 = vpop.f32.mrb[47].mxu0  ;;  %v1208_v62 = vpop.f32.mrb[47].mxu1  ;;  %v1537_v63 = vadd.f32 %v2331_v22, %v1466_v59  ;;  %v1569_v0 = vadd.f32 %v2331_v22, %v1498_v60  ;;  %v1467_v1 = vmul.f32 %v2326_v18, %v1078_v57  ;;  %v1499_v2 = vmul.f32 %v2326_v18, %v1206_v58 }
 0x177   : > { %v1601_v3 = vmax.f32 %v1537_v63, 0.0  ;;  %v1633_v4 = vmax.f32 %v1569_v0, 0.0  ;;  %v1538_v5 = vadd.f32 %v2331_v22, %v1467_v1  ;;  %v1570_v6 = vadd.f32 %v2331_v22, %v1499_v2 }
 0x179   : > { %1665 = vst [vmem:[%s2344_s15 + $0xb0] sm:$0xff] %v1601_v3  ;;  %1697 = vst [vmem:[%s2344_s15 + $0x1b0] sm:$0xff] %v1633_v4  ;;  %v1602_v9 = vmax.f32 %v1538_v5, 0.0  ;;  %v1634_v10 = vmax.f32 %v1570_v6, 0.0 }
 0x17a   : > { %v1083_v7 = vpop.f32.mrb[48].mxu0  ;;  %v1211_v8 = vpop.f32.mrb[48].mxu1 }
 0x17b   : > { %v1085_v11 = vpop.f32.mrb[49].mxu0  ;;  %v1213_v12 = vpop.f32.mrb[49].mxu1  ;;  %1666 = vst [vmem:[%s2344_s15 + $0xb8] sm:$0xff] %v1602_v9  ;;  %1698 = vst [vmem:[%s2344_s15 + $0x1b8] sm:$0xff] %v1634_v10  ;;  %v1468_v15 = vmul.f32 %v2326_v18, %v1083_v7  ;;  %v1500_v16 = vmul.f32 %v2326_v18, %v1211_v8 }
 0x17c   : > { %v1086_v13 = vpop.f32.mrb[50].mxu0  ;;  %v1214_v14 = vpop.f32.mrb[50].mxu1 }
 0x17d   : > { %v1088_v17 = vpop.f32.mrb[51].mxu0  ;;  %v1216_v19 = vpop.f32.mrb[51].mxu1  ;;  %v1539_v20 = vadd.f32 %v2331_v22, %v1468_v15  ;;  %v1571_v21 = vadd.f32 %v2331_v22, %v1500_v16  ;;  %v1469_v23 = vmul.f32 %v2326_v18, %v1086_v13  ;;  %v1501_v24 = vmul.f32 %v2326_v18, %v1214_v14 }
 0x17f   : > { %v1603_v25 = vmax.f32 %v1539_v20, 0.0  ;;  %v1635_v26 = vmax.f32 %v1571_v21, 0.0  ;;  %v1540_v27 = vadd.f32 %v2331_v22, %v1469_v23  ;;  %v1572_v28 = vadd.f32 %v2331_v22, %v1501_v24 }
 0x181   : > { %1667 = vst [vmem:[%s2344_s15 + $0xc0] sm:$0xff] %v1603_v25  ;;  %1699 = vst [vmem:[%s2344_s15 + $0x1c0] sm:$0xff] %v1635_v26  ;;  %v1604_v31 = vmax.f32 %v1540_v27, 0.0  ;;  %v1636_v32 = vmax.f32 %v1572_v28, 0.0 }
 0x182   : > { %v1091_v29 = vpop.f32.mrb[52].mxu0  ;;  %v1219_v30 = vpop.f32.mrb[52].mxu1 }
 0x183   : > { %v1093_v33 = vpop.f32.mrb[53].mxu0  ;;  %v1221_v34 = vpop.f32.mrb[53].mxu1  ;;  %1668 = vst [vmem:[%s2344_s15 + $0xc8] sm:$0xff] %v1604_v31  ;;  %1700 = vst [vmem:[%s2344_s15 + $0x1c8] sm:$0xff] %v1636_v32  ;;  %v1470_v37 = vmul.f32 %v2326_v18, %v1091_v29  ;;  %v1502_v38 = vmul.f32 %v2326_v18, %v1219_v30 }
 0x184   : > { %v1094_v35 = vpop.f32.mrb[54].mxu0  ;;  %v1222_v36 = vpop.f32.mrb[54].mxu1 }
 0x185   : > { %v1096_v39 = vpop.f32.mrb[55].mxu0  ;;  %v1224_v40 = vpop.f32.mrb[55].mxu1  ;;  %v1541_v41 = vadd.f32 %v2331_v22, %v1470_v37  ;;  %v1573_v42 = vadd.f32 %v2331_v22, %v1502_v38  ;;  %v1471_v43 = vmul.f32 %v2326_v18, %v1094_v35  ;;  %v1503_v44 = vmul.f32 %v2326_v18, %v1222_v36 }
 0x187   : > { %v1605_v45 = vmax.f32 %v1541_v41, 0.0  ;;  %v1637_v46 = vmax.f32 %v1573_v42, 0.0  ;;  %v1542_v47 = vadd.f32 %v2331_v22, %v1471_v43  ;;  %v1574_v48 = vadd.f32 %v2331_v22, %v1503_v44 }
 0x189   : > { %1669 = vst [vmem:[%s2344_s15 + $0xd0] sm:$0xff] %v1605_v45  ;;  %1701 = vst [vmem:[%s2344_s15 + $0x1d0] sm:$0xff] %v1637_v46  ;;  %v1606_v51 = vmax.f32 %v1542_v47, 0.0  ;;  %v1638_v52 = vmax.f32 %v1574_v48, 0.0 }
 0x18a   : > { %v1099_v49 = vpop.f32.mrb[56].mxu0  ;;  %v1227_v50 = vpop.f32.mrb[56].mxu1 }
 0x18b   : > { %v1101_v53 = vpop.f32.mrb[57].mxu0  ;;  %v1229_v54 = vpop.f32.mrb[57].mxu1  ;;  %1670 = vst [vmem:[%s2344_s15 + $0xd8] sm:$0xff] %v1606_v51  ;;  %1702 = vst [vmem:[%s2344_s15 + $0x1d8] sm:$0xff] %v1638_v52  ;;  %v1472_v57 = vmul.f32 %v2326_v18, %v1099_v49  ;;  %v1504_v58 = vmul.f32 %v2326_v18, %v1227_v50 }
 0x18c   : > { %v1102_v55 = vpop.f32.mrb[58].mxu0  ;;  %v1230_v56 = vpop.f32.mrb[58].mxu1 }
 0x18d   : > { %v1104_v59 = vpop.f32.mrb[59].mxu0  ;;  %v1232_v60 = vpop.f32.mrb[59].mxu1  ;;  %v1543_v61 = vadd.f32 %v2331_v22, %v1472_v57  ;;  %v1575_v62 = vadd.f32 %v2331_v22, %v1504_v58  ;;  %v1473_v63 = vmul.f32 %v2326_v18, %v1102_v55  ;;  %v1505_v0 = vmul.f32 %v2326_v18, %v1230_v56 }
 0x18f   : > { %v1607_v1 = vmax.f32 %v1543_v61, 0.0  ;;  %v1639_v2 = vmax.f32 %v1575_v62, 0.0  ;;  %v1544_v3 = vadd.f32 %v2331_v22, %v1473_v63  ;;  %v1576_v4 = vadd.f32 %v2331_v22, %v1505_v0 }
 0x191   : > { %1671 = vst [vmem:[%s2344_s15 + $0xe0] sm:$0xff] %v1607_v1  ;;  %1703 = vst [vmem:[%s2344_s15 + $0x1e0] sm:$0xff] %v1639_v2  ;;  %v1608_v7 = vmax.f32 %v1544_v3, 0.0  ;;  %v1640_v8 = vmax.f32 %v1576_v4, 0.0 }
 0x192   : > { %v1107_v5 = vpop.f32.mrb[60].mxu0  ;;  %v1235_v6 = vpop.f32.mrb[60].mxu1 }
 0x193   : > { %v1109_v9 = vpop.f32.mrb[61].mxu0  ;;  %v1237_v10 = vpop.f32.mrb[61].mxu1  ;;  %1672 = vst [vmem:[%s2344_s15 + $0xe8] sm:$0xff] %v1608_v7  ;;  %1704 = vst [vmem:[%s2344_s15 + $0x1e8] sm:$0xff] %v1640_v8  ;;  %v1474_v13 = vmul.f32 %v2326_v18, %v1107_v5  ;;  %v1506_v14 = vmul.f32 %v2326_v18, %v1235_v6 }
 0x194   : > { %v1110_v11 = vpop.f32.mrb[62].mxu0  ;;  %v1238_v12 = vpop.f32.mrb[62].mxu1 }
 0x195   : > { %v1112_v15 = vpop.f32.mrb[63].mxu0  ;;  %v1240_v16 = vpop.f32.mrb[63].mxu1  ;;  %v1545_v17 = vadd.f32 %v2331_v22, %v1474_v13  ;;  %v1577_v19 = vadd.f32 %v2331_v22, %v1506_v14  ;;  %v1475_v20 = vmul.f32 %v2326_v18, %v1110_v11  ;;  %v1507_v21 = vmul.f32 %v2326_v18, %v1238_v12 }
 0x197   : > { %v1609_v23 = vmax.f32 %v1545_v17, 0.0  ;;  %v1641_v24 = vmax.f32 %v1577_v19, 0.0  ;;  %v1546_v25 = vadd.f32 %v2331_v22, %v1475_v20  ;;  %v1578_v26 = vadd.f32 %v2331_v22, %v1507_v21 }
 0x199   : > { %1673 = vst [vmem:[%s2344_s15 + $0xf0] sm:$0xff] %v1609_v23  ;;  %1705 = vst [vmem:[%s2344_s15 + $0x1f0] sm:$0xff] %v1641_v24  ;;  %v1610_v27 = vmax.f32 %v1546_v25, 0.0  ;;  %v1642_v28 = vmax.f32 %v1578_v26, 0.0 }
 0x19b   : > { %1674 = vst [vmem:[%s2344_s15 + $0xf8] sm:$0xff] %v1610_v27  ;;  %1706 = vst [vmem:[%s2344_s15 + $0x1f8] sm:$0xff] %v1642_v28 }
 0x19c PF: > { %s14_s17 = sadd.s32 1, %s2123_s17   ;;  %s2546_s15 = smov %s2119_s16 }
 0x19d   : > { %p11_p5 = scmp.ge.s32.totalorder %s14_s17, 4   ;;  %s2547_s16 = smov %s2549_s18 }
 0x19f   :  { %13 = sbr.rel (!%p11_p5) target bundleno = 2 (0x2), region = 83 }

// kernel: basnet_forward.92
= control target key start
LH: loop header
LB: loop body
LE: loop exit
PB: predicated region body
PF: predicated region fallthrough
CT: control target
= control target key end

     0   :  { %s1000_s15 = smov 0   ;;  %s1002_s16 = smov 0   ;;  %s1113_s0 = inlined_call_operand.vmem [shape: bf16[256,128], index: 0, kind: input, shape index: {}]   ;;  %s1114_s1 = inlined_call_operand.vmem [shape: bf16[128,128], index: 1, kind: input, shape index: {}]   ;;  %s1115_s2 = inlined_call_operand.vmem [shape: f32[1,128], index: 2, kind: input, shape index: {}]   ;;  %s1116_s3 = inlined_call_operand.vmem [shape: f32[1,128], index: 3, kind: input, shape index: {}]   ;;  %s1117_s4 = inlined_call_operand.vmem [shape: f32[256,128], index: 4, kind: output, shape index: {}]  }
   0x1   :  { %s1004_s17 = smov 0  }
   0x2 LB: > { %s33_s18 = sadd.s32 1, %s969_s16  ;;  %p821_p0 = scmp.ge.s32.totalorder %s973_s17, 1  ;;  %s973_s17 = sphi %s1004_s17, %s14_s17   ;;  %s969_s16 = sphi %s1002_s16, %s1119_s16   ;;  %s965_s15 = sphi %s1000_s15, %s1118_s15  }
   0x3   : > { %p35_p1 = scmp.ge.s32.totalorder %s33_s18, 2  ;;  %p221_p2 = scmp.lt.s32.totalorder %s973_s17, 3 }
   0x5   : > { %s1121_s18 = smov (%p35_p1, %s33_s18), 0  ;;  %p222_p3 = pnand %p821_p0, %p221_p2 }
   0x6   : > { %v935_v0 = vld [vmem:[%s1114_s1] sm:$0xff] (!%p222_p3)   ;;  %s822_s21 = sshll.u32 (!%p222_p3), %s965_s15, 4  ;;  %v936_v1 = vld [vmem:[%s1114_s1 + $0x8] sm:$0xff] (!%p222_p3)   ;;  %v937_v2 = vld [vmem:[%s1114_s1 + $0x10] sm:$0xff] (!%p222_p3)  }
   0x7   : > { %225 = sbr.rel (%p222_p3) target bundleno = 269 (0x10d), region = 36  ;;  %p268_p4 = scmp.lt.s32.totalorder (!%p222_p3), %s822_s21, 31  ;;  %862 = vmatprep.subr.bf16.mxu0 (!%p222_p3), %v935_v0  ;;  %894 = vmatprep.subr.bf16.mxu1 (!%p222_p3), %v935_v0  ;;  %v938_v3 = vld [vmem:[%s1114_s1 + $0x18] sm:$0xff] (!%p222_p3)   ;;  %v939_v6 = vld [vmem:[%s1114_s1 + $0x20] sm:$0xff] (!%p222_p3)   ;;  %v940_v7 = vld [vmem:[%s1114_s1 + $0x28] sm:$0xff] (!%p222_p3)  }
   0x8   : > { %863 = vmatpush3.bf16.msra.mxu0 (!%p222_p3), %v935_v0  ;;  %902 = vmatpush3.bf16.msra.mxu1 (!%p222_p3), %v935_v0  ;;  %v941_v8 = vld [vmem:[%s1114_s1 + $0x30] sm:$0xff] (!%p222_p3)   ;;  %v942_v9 = vld [vmem:[%s1114_s1 + $0x38] sm:$0xff] (!%p222_p3)   ;;  %v842_v17 = vld [vmem:[%s1115_s2] ss:$0 sm:$0xff] (!%p222_p3) }
   0x9   : > { %864 = vmatprep.subr.bf16.mxu0 (!%p222_p3), %v936_v1  ;;  %895 = vmatprep.subr.bf16.mxu1 (!%p222_p3), %v936_v1  ;;  %v1064_v21 = vld [vmem:[%s1116_s3] ss:$0 sm:$0xff] (!%p222_p3) }
   0xc   : > { %865 = vmatpush3.bf16.msra.mxu0 (!%p222_p3), %v936_v1  ;;  %903 = vmatpush3.bf16.msra.mxu1 (!%p222_p3), %v936_v1 }
   0xd   : > { %866 = vmatprep.subr.bf16.mxu0 (!%p222_p3), %v937_v2  ;;  %896 = vmatprep.subr.bf16.mxu1 (!%p222_p3), %v937_v2 }
   0xe   : > { %s1123_s21 = smov (!%p268_p4, %s822_s21), 31 }
   0xf   : > { %s823_s26 = sshll.u32 %s1123_s21, 2  ;;  %s825_s22 = sshll.u32 %s1123_s21, 3 }
  0x10   : > { %s1033_s29 = scalar_lea.vmem %s1113_s0, %s823_s26  ;;  %867 = vmatpush3.bf16.msra.mxu0 %v937_v2  ;;  %904 = vmatpush3.bf16.msra.mxu1 %v937_v2  ;;  %s1072_s25 = scalar_lea.vmem %s1117_s4, %s825_s22 }
  0x11   : > { %v943_v4 = vld [vmem:[%s1033_s29] sm:$0xff]   ;;  %868 = vmatprep.subr.bf16.mxu0 %v938_v3  ;;  %897 = vmatprep.subr.bf16.mxu1 %v938_v3  ;;  %v945_v10 = vld [vmem:[%s1033_s29 + $0x8] sm:$0xff]   ;;  %v947_v12 = vld [vmem:[%s1033_s29 + $0x10] sm:$0xff]  }
  0x12   : > { %v944_v5 = vld [vmem:[%s1033_s29 + $0x20] sm:$0xff]   ;;  %878 = vmatprep.mubr.bf16.mxu0 %v943_v4  ;;  %v946_v11 = vld [vmem:[%s1033_s29 + $0x28] sm:$0xff]   ;;  %v948_v13 = vld [vmem:[%s1033_s29 + $0x30] sm:$0xff]  }
  0x13   : > { %886 = vmatprep.mubr.bf16.mxu1 %v944_v5  ;;  %v949_v14 = vld [vmem:[%s1033_s29 + $0x18] sm:$0xff]  }
  0x14   : > { %869 = vmatpush3.bf16.msra.mxu0 %v938_v3  ;;  %905 = vmatpush3.bf16.msra.mxu1 %v938_v3  ;;  %v950_v15 = vld [vmem:[%s1033_s29 + $0x38] sm:$0xff]  }
  0x15   : > { %870 = vmatprep.subr.bf16.mxu0 %v939_v6  ;;  %898 = vmatprep.subr.bf16.mxu1 %v939_v6 }
  0x18   : > { %871 = vmatpush3.bf16.msra.mxu0 %v939_v6  ;;  %906 = vmatpush3.bf16.msra.mxu1 %v939_v6 }
  0x19   : > { %872 = vmatprep.subr.bf16.mxu0 %v940_v7  ;;  %899 = vmatprep.subr.bf16.mxu1 %v940_v7 }
  0x1c   : > { %873 = vmatpush3.bf16.msra.mxu0 %v940_v7  ;;  %907 = vmatpush3.bf16.msra.mxu1 %v940_v7 }
  0x1d   : > { %874 = vmatprep.subr.bf16.mxu0 %v941_v8  ;;  %900 = vmatprep.subr.bf16.mxu1 %v941_v8 }
  0x20   : > { %875 = vmatpush3.bf16.msra.mxu0 %v941_v8  ;;  %908 = vmatpush3.bf16.msra.mxu1 %v941_v8 }
  0x21   : > { %876 = vmatprep.subr.bf16.mxu0 %v942_v9  ;;  %901 = vmatprep.subr.bf16.mxu1 %v942_v9 }
  0x24   : > { %877 = vmatpush3.bf16.msra.mxu0 %v942_v9  ;;  %909 = vmatpush3.bf16.msra.mxu1 %v942_v9 }
  0x27   : > { %879 = vmatmul.mubr.bf16.vlgmr.msra.gmra.mrb[0].mxu0 %v945_v10  ;;  %887 = vmatmul.mubr.bf16.vlgmr.msra.gmra.mrb[0].mxu1 %v946_v11 }
  0x28   : > { %882 = vmatprep.mubr.bf16.mxu0 %v947_v12  ;;  %890 = vmatprep.mubr.bf16.mxu1 %v948_v13 }
  0x2f   : > { %883 = vmatmul.mubr.bf16.gmra.mrb[4].mxu0 %v949_v14  ;;  %891 = vmatmul.mubr.bf16.gmra.mrb[4].mxu1 %v950_v15 }
  0xfa   : > { %v880_v16 = vpop.f32.mrb[0].mxu0  ;;  %v888_v18 = vpop.f32.mrb[0].mxu1 }
  0xfb   : > { %v499_v19 = vpop.f32.mrb[1].mxu0  ;;  %v531_v20 = vpop.f32.mrb[1].mxu1  ;;  %v622_v24 = vmul.f32 %v880_v16, %v842_v17  ;;  %v630_v25 = vmul.f32 %v888_v18, %v842_v17 }
  0xfc   : > { %v881_v22 = vpop.f32.mrb[2].mxu0  ;;  %v889_v23 = vpop.f32.mrb[2].mxu1  ;;  %v620_v28 = vmul.f32 %v842_v17, %v499_v19  ;;  %v628_v29 = vmul.f32 %v842_v17, %v531_v20 }
  0xfd   : > { %v502_v26 = vpop.f32.mrb[3].mxu0  ;;  %v534_v27 = vpop.f32.mrb[3].mxu1  ;;  %v645_v30 = vadd.f32 %v1064_v21, %v622_v24  ;;  %v653_v31 = vadd.f32 %v1064_v21, %v630_v25  ;;  %v623_v32 = vmul.f32 %v881_v22, %v842_v17  ;;  %v631_v33 = vmul.f32 %v889_v23, %v842_v17 }
  0xfe   : > { %v643_v34 = vadd.f32 %v1064_v21, %v620_v28  ;;  %v651_v35 = vadd.f32 %v1064_v21, %v628_v29  ;;  %v621_v36 = vmul.f32 %v842_v17, %v502_v26  ;;  %v629_v37 = vmul.f32 %v842_v17, %v534_v27 }
  0xff   : > { %v661_v38 = vmax.f32 %v645_v30, 0.0  ;;  %v669_v39 = vmax.f32 %v653_v31, 0.0  ;;  %v646_v40 = vadd.f32 %v1064_v21, %v623_v32  ;;  %v654_v41 = vadd.f32 %v1064_v21, %v631_v33 }
 0x100   : > { %v659_v42 = vmax.f32 %v643_v34, 0.0  ;;  %v667_v43 = vmax.f32 %v651_v35, 0.0  ;;  %v644_v44 = vadd.f32 %v1064_v21, %v621_v36  ;;  %v652_v45 = vadd.f32 %v1064_v21, %v629_v37 }
 0x101   : > { %677 = vst [vmem:[%s1072_s25 + $0x10] sm:$0xff] %v661_v38  ;;  %685 = vst [vmem:[%s1072_s25 + $0x50] sm:$0xff] %v669_v39  ;;  %v662_v48 = vmax.f32 %v646_v40, 0.0  ;;  %v670_v49 = vmax.f32 %v654_v41, 0.0 }
 0x102   : > { %v884_v46 = vpop.f32.mrb[4].mxu0  ;;  %v892_v47 = vpop.f32.mrb[4].mxu1  ;;  %675 = vst [vmem:[%s1072_s25] sm:$0xff] %v659_v42  ;;  %683 = vst [vmem:[%s1072_s25 + $0x40] sm:$0xff] %v667_v43  ;;  %v660_v52 = vmax.f32 %v644_v44, 0.0  ;;  %v668_v53 = vmax.f32 %v652_v45, 0.0 }
 0x103   : > { %v515_v50 = vpop.f32.mrb[5].mxu0  ;;  %v547_v51 = vpop.f32.mrb[5].mxu1  ;;  %678 = vst [vmem:[%s1072_s25 + $0x18] sm:$0xff] %v662_v48  ;;  %686 = vst [vmem:[%s1072_s25 + $0x58] sm:$0xff] %v670_v49  ;;  %v626_v56 = vmul.f32 %v884_v46, %v842_v17  ;;  %v634_v57 = vmul.f32 %v892_v47, %v842_v17 }
 0x104   : > { %v885_v54 = vpop.f32.mrb[6].mxu0  ;;  %v893_v55 = vpop.f32.mrb[6].mxu1  ;;  %676 = vst [vmem:[%s1072_s25 + $0x8] sm:$0xff] %v660_v52  ;;  %684 = vst [vmem:[%s1072_s25 + $0x48] sm:$0xff] %v668_v53  ;;  %v624_v60 = vmul.f32 %v842_v17, %v515_v50  ;;  %v632_v61 = vmul.f32 %v842_v17, %v547_v51 }
 0x105   : > { %v518_v58 = vpop.f32.mrb[7].mxu0  ;;  %v550_v59 = vpop.f32.mrb[7].mxu1  ;;  %v649_v62 = vadd.f32 %v1064_v21, %v626_v56  ;;  %v657_v63 = vadd.f32 %v1064_v21, %v634_v57  ;;  %v627_v0 = vmul.f32 %v885_v54, %v842_v17  ;;  %v635_v1 = vmul.f32 %v893_v55, %v842_v17 }
 0x106   : > { %v647_v2 = vadd.f32 %v1064_v21, %v624_v60  ;;  %v655_v3 = vadd.f32 %v1064_v21, %v632_v61  ;;  %v625_v4 = vmul.f32 %v842_v17, %v518_v58  ;;  %v633_v5 = vmul.f32 %v842_v17, %v550_v59 }
 0x107   : > { %v665_v6 = vmax.f32 %v649_v62, 0.0  ;;  %v673_v7 = vmax.f32 %v657_v63, 0.0  ;;  %v650_v8 = vadd.f32 %v1064_v21, %v627_v0  ;;  %v658_v9 = vadd.f32 %v1064_v21, %v635_v1 }
 0x108   : > { %v663_v10 = vmax.f32 %v647_v2, 0.0  ;;  %v671_v11 = vmax.f32 %v655_v3, 0.0  ;;  %v648_v12 = vadd.f32 %v1064_v21, %v625_v4  ;;  %v656_v13 = vadd.f32 %v1064_v21, %v633_v5 }
 0x109   : > { %681 = vst [vmem:[%s1072_s25 + $0x30] sm:$0xff] %v665_v6  ;;  %689 = vst [vmem:[%s1072_s25 + $0x70] sm:$0xff] %v673_v7  ;;  %v666_v14 = vmax.f32 %v650_v8, 0.0  ;;  %v674_v15 = vmax.f32 %v658_v9, 0.0 }
 0x10a   : > { %679 = vst [vmem:[%s1072_s25 + $0x20] sm:$0xff] %v663_v10  ;;  %687 = vst [vmem:[%s1072_s25 + $0x60] sm:$0xff] %v671_v11  ;;  %v664_v16 = vmax.f32 %v648_v12, 0.0  ;;  %v672_v17 = vmax.f32 %v656_v13, 0.0 }
 0x10b   : > { %682 = vst [vmem:[%s1072_s25 + $0x38] sm:$0xff] %v666_v14  ;;  %690 = vst [vmem:[%s1072_s25 + $0x78] sm:$0xff] %v674_v15 }
 0x10c   : > { %680 = vst [vmem:[%s1072_s25 + $0x28] sm:$0xff] %v664_v16  ;;  %688 = vst [vmem:[%s1072_s25 + $0x68] sm:$0xff] %v672_v17 }
 0x10d PF: > { %s14_s17 = sadd.s32 1, %s973_s17   ;;  %s1118_s15 = smov %s969_s16 }
 0x10e   : > { %p11_p5 = scmp.ge.s32.totalorder %s14_s17, 4   ;;  %s1119_s16 = smov %s1121_s18 }
 0x110   :  { %13 = sbr.rel (!%p11_p5) target bundleno = 2 (0x2), region = 83 }

// kernel: basnet_forward.91
= control target key start
LH: loop header
LB: loop body
LE: loop exit
PB: predicated region body
PF: predicated region fallthrough
CT: control target
= control target key end

     0   :  { %s984_s15 = smov 0   ;;  %s986_s16 = smov 0   ;;  %s1079_s0 = inlined_call_operand.vmem [shape: bf16[256,128], index: 0, kind: input, shape index: {}]   ;;  %s1080_s1 = inlined_call_operand.vmem [shape: bf16[128,128], index: 1, kind: input, shape index: {}]   ;;  %s1081_s2 = inlined_call_operand.vmem [shape: f32[1,128], index: 2, kind: input, shape index: {}]   ;;  %s1082_s3 = inlined_call_operand.vmem [shape: f32[1,128], index: 3, kind: input, shape index: {}]   ;;  %s1083_s4 = inlined_call_operand.vmem [shape: f32[256,128], index: 4, kind: output, shape index: {}]  }
   0x1   :  { %s988_s17 = smov 0  }
   0x2 LB: > { %s33_s18 = sadd.s32 1, %s953_s16  ;;  %p805_p0 = scmp.ge.s32.totalorder %s957_s17, 1  ;;  %s957_s17 = sphi %s988_s17, %s14_s17   ;;  %s953_s16 = sphi %s986_s16, %s1085_s16   ;;  %s949_s15 = sphi %s984_s15, %s1084_s15  }
   0x3   : > { %p35_p1 = scmp.ge.s32.totalorder %s33_s18, 2  ;;  %p221_p2 = scmp.lt.s32.totalorder %s957_s17, 3 }
   0x5   : > { %s1087_s18 = smov (%p35_p1, %s33_s18), 0  ;;  %p222_p3 = pnand %p805_p0, %p221_p2 }
   0x6   : > { %v919_v0 = vld [vmem:[%s1080_s1] sm:$0xff] (!%p222_p3)   ;;  %s806_s21 = sshll.u32 (!%p222_p3), %s949_s15, 4  ;;  %v920_v1 = vld [vmem:[%s1080_s1 + $0x8] sm:$0xff] (!%p222_p3)   ;;  %v921_v2 = vld [vmem:[%s1080_s1 + $0x10] sm:$0xff] (!%p222_p3)  }
   0x7   : > { %225 = sbr.rel (%p222_p3) target bundleno = 267 (0x10b), region = 36  ;;  %p268_p4 = scmp.lt.s32.totalorder (!%p222_p3), %s806_s21, 31  ;;  %846 = vmatprep.subr.bf16.mxu0 (!%p222_p3), %v919_v0  ;;  %878 = vmatprep.subr.bf16.mxu1 (!%p222_p3), %v919_v0  ;;  %v922_v3 = vld [vmem:[%s1080_s1 + $0x18] sm:$0xff] (!%p222_p3)   ;;  %v923_v6 = vld [vmem:[%s1080_s1 + $0x20] sm:$0xff] (!%p222_p3)   ;;  %v924_v7 = vld [vmem:[%s1080_s1 + $0x28] sm:$0xff] (!%p222_p3)  }
   0x8   : > { %847 = vmatpush3.bf16.msra.mxu0 (!%p222_p3), %v919_v0  ;;  %886 = vmatpush3.bf16.msra.mxu1 (!%p222_p3), %v919_v0  ;;  %v925_v8 = vld [vmem:[%s1080_s1 + $0x30] sm:$0xff] (!%p222_p3)   ;;  %v926_v9 = vld [vmem:[%s1080_s1 + $0x38] sm:$0xff] (!%p222_p3)   ;;  %v826_v17 = vld [vmem:[%s1081_s2] ss:$0 sm:$0xff] (!%p222_p3) }
   0x9   : > { %848 = vmatprep.subr.bf16.mxu0 (!%p222_p3), %v920_v1  ;;  %879 = vmatprep.subr.bf16.mxu1 (!%p222_p3), %v920_v1  ;;  %v827_v21 = vld [vmem:[%s1082_s3] ss:$0 sm:$0xff] (!%p222_p3) }
   0xc   : > { %849 = vmatpush3.bf16.msra.mxu0 (!%p222_p3), %v920_v1  ;;  %887 = vmatpush3.bf16.msra.mxu1 (!%p222_p3), %v920_v1 }
   0xd   : > { %850 = vmatprep.subr.bf16.mxu0 (!%p222_p3), %v921_v2  ;;  %880 = vmatprep.subr.bf16.mxu1 (!%p222_p3), %v921_v2 }
   0xe   : > { %s1089_s21 = smov (!%p268_p4, %s806_s21), 31 }
   0xf   : > { %s807_s26 = sshll.u32 %s1089_s21, 2  ;;  %s809_s19 = sshll.u32 %s1089_s21, 3 }
  0x10   : > { %s1017_s29 = scalar_lea.vmem %s1079_s0, %s807_s26  ;;  %851 = vmatpush3.bf16.msra.mxu0 %v921_v2  ;;  %888 = vmatpush3.bf16.msra.mxu1 %v921_v2  ;;  %s1052_s25 = scalar_lea.vmem %s1083_s4, %s809_s19 }
  0x11   : > { %v927_v4 = vld [vmem:[%s1017_s29] sm:$0xff]   ;;  %852 = vmatprep.subr.bf16.mxu0 %v922_v3  ;;  %881 = vmatprep.subr.bf16.mxu1 %v922_v3  ;;  %v929_v10 = vld [vmem:[%s1017_s29 + $0x8] sm:$0xff]   ;;  %v931_v12 = vld [vmem:[%s1017_s29 + $0x10] sm:$0xff]  }
  0x12   : > { %v928_v5 = vld [vmem:[%s1017_s29 + $0x20] sm:$0xff]   ;;  %862 = vmatprep.mubr.bf16.mxu0 %v927_v4  ;;  %v930_v11 = vld [vmem:[%s1017_s29 + $0x28] sm:$0xff]   ;;  %v932_v13 = vld [vmem:[%s1017_s29 + $0x30] sm:$0xff]  }
  0x13   : > { %870 = vmatprep.mubr.bf16.mxu1 %v928_v5  ;;  %v933_v14 = vld [vmem:[%s1017_s29 + $0x18] sm:$0xff]  }
  0x14   : > { %853 = vmatpush3.bf16.msra.mxu0 %v922_v3  ;;  %889 = vmatpush3.bf16.msra.mxu1 %v922_v3  ;;  %v934_v15 = vld [vmem:[%s1017_s29 + $0x38] sm:$0xff]  }
  0x15   : > { %854 = vmatprep.subr.bf16.mxu0 %v923_v6  ;;  %882 = vmatprep.subr.bf16.mxu1 %v923_v6 }
  0x18   : > { %855 = vmatpush3.bf16.msra.mxu0 %v923_v6  ;;  %890 = vmatpush3.bf16.msra.mxu1 %v923_v6 }
  0x19   : > { %856 = vmatprep.subr.bf16.mxu0 %v924_v7  ;;  %883 = vmatprep.subr.bf16.mxu1 %v924_v7 }
  0x1c   : > { %857 = vmatpush3.bf16.msra.mxu0 %v924_v7  ;;  %891 = vmatpush3.bf16.msra.mxu1 %v924_v7 }
  0x1d   : > { %858 = vmatprep.subr.bf16.mxu0 %v925_v8  ;;  %884 = vmatprep.subr.bf16.mxu1 %v925_v8 }
  0x20   : > { %859 = vmatpush3.bf16.msra.mxu0 %v925_v8  ;;  %892 = vmatpush3.bf16.msra.mxu1 %v925_v8 }
  0x21   : > { %860 = vmatprep.subr.bf16.mxu0 %v926_v9  ;;  %885 = vmatprep.subr.bf16.mxu1 %v926_v9 }
  0x24   : > { %861 = vmatpush3.bf16.msra.mxu0 %v926_v9  ;;  %893 = vmatpush3.bf16.msra.mxu1 %v926_v9 }
  0x27   : > { %863 = vmatmul.mubr.bf16.vlgmr.msra.gmra.mrb[0].mxu0 %v929_v10  ;;  %871 = vmatmul.mubr.bf16.vlgmr.msra.gmra.mrb[0].mxu1 %v930_v11 }
  0x28   : > { %866 = vmatprep.mubr.bf16.mxu0 %v931_v12  ;;  %874 = vmatprep.mubr.bf16.mxu1 %v932_v13 }
  0x2f   : > { %867 = vmatmul.mubr.bf16.gmra.mrb[4].mxu0 %v933_v14  ;;  %875 = vmatmul.mubr.bf16.gmra.mrb[4].mxu1 %v934_v15 }
  0xfa   : > { %v864_v16 = vpop.f32.mrb[0].mxu0  ;;  %v872_v18 = vpop.f32.mrb[0].mxu1 }
  0xfb   : > { %v499_v19 = vpop.f32.mrb[1].mxu0  ;;  %v531_v20 = vpop.f32.mrb[1].mxu1  ;;  %v622_v24 = vmul.f32 %v864_v16, %v826_v17  ;;  %v630_v25 = vmul.f32 %v872_v18, %v826_v17 }
  0xfc   : > { %v865_v22 = vpop.f32.mrb[2].mxu0  ;;  %v873_v23 = vpop.f32.mrb[2].mxu1  ;;  %v620_v28 = vmul.f32 %v826_v17, %v499_v19  ;;  %v628_v29 = vmul.f32 %v826_v17, %v531_v20 }
  0xfd   : > { %v502_v26 = vpop.f32.mrb[3].mxu0  ;;  %v534_v27 = vpop.f32.mrb[3].mxu1  ;;  %v645_v30 = vadd.f32 %v827_v21, %v622_v24  ;;  %v653_v31 = vadd.f32 %v827_v21, %v630_v25  ;;  %v623_v32 = vmul.f32 %v865_v22, %v826_v17  ;;  %v631_v33 = vmul.f32 %v873_v23, %v826_v17 }
  0xfe   : > { %v643_v34 = vadd.f32 %v827_v21, %v620_v28  ;;  %v651_v35 = vadd.f32 %v827_v21, %v628_v29  ;;  %v621_v36 = vmul.f32 %v826_v17, %v502_v26  ;;  %v629_v37 = vmul.f32 %v826_v17, %v534_v27 }
  0xff   : > { %661 = vst [vmem:[%s1052_s25 + $0x10] sm:$0xff] %v645_v30  ;;  %669 = vst [vmem:[%s1052_s25 + $0x50] sm:$0xff] %v653_v31  ;;  %v646_v38 = vadd.f32 %v827_v21, %v623_v32  ;;  %v654_v39 = vadd.f32 %v827_v21, %v631_v33 }
 0x100   : > { %659 = vst [vmem:[%s1052_s25] sm:$0xff] %v643_v34  ;;  %667 = vst [vmem:[%s1052_s25 + $0x40] sm:$0xff] %v651_v35  ;;  %v644_v40 = vadd.f32 %v827_v21, %v621_v36  ;;  %v652_v41 = vadd.f32 %v827_v21, %v629_v37 }
 0x101   : > { %662 = vst [vmem:[%s1052_s25 + $0x18] sm:$0xff] %v646_v38  ;;  %670 = vst [vmem:[%s1052_s25 + $0x58] sm:$0xff] %v654_v39 }
 0x102   : > { %v868_v42 = vpop.f32.mrb[4].mxu0  ;;  %v876_v43 = vpop.f32.mrb[4].mxu1  ;;  %660 = vst [vmem:[%s1052_s25 + $0x8] sm:$0xff] %v644_v40  ;;  %668 = vst [vmem:[%s1052_s25 + $0x48] sm:$0xff] %v652_v41 }
 0x103   : > { %v515_v44 = vpop.f32.mrb[5].mxu0  ;;  %v547_v45 = vpop.f32.mrb[5].mxu1  ;;  %v626_v48 = vmul.f32 %v868_v42, %v826_v17  ;;  %v634_v49 = vmul.f32 %v876_v43, %v826_v17 }
 0x104   : > { %v869_v46 = vpop.f32.mrb[6].mxu0  ;;  %v877_v47 = vpop.f32.mrb[6].mxu1  ;;  %v624_v52 = vmul.f32 %v826_v17, %v515_v44  ;;  %v632_v53 = vmul.f32 %v826_v17, %v547_v45 }
 0x105   : > { %v518_v50 = vpop.f32.mrb[7].mxu0  ;;  %v550_v51 = vpop.f32.mrb[7].mxu1  ;;  %v649_v54 = vadd.f32 %v827_v21, %v626_v48  ;;  %v657_v55 = vadd.f32 %v827_v21, %v634_v49  ;;  %v627_v56 = vmul.f32 %v869_v46, %v826_v17  ;;  %v635_v57 = vmul.f32 %v877_v47, %v826_v17 }
 0x106   : > { %v647_v58 = vadd.f32 %v827_v21, %v624_v52  ;;  %v655_v59 = vadd.f32 %v827_v21, %v632_v53  ;;  %v625_v60 = vmul.f32 %v826_v17, %v518_v50  ;;  %v633_v61 = vmul.f32 %v826_v17, %v550_v51 }
 0x107   : > { %665 = vst [vmem:[%s1052_s25 + $0x30] sm:$0xff] %v649_v54  ;;  %673 = vst [vmem:[%s1052_s25 + $0x70] sm:$0xff] %v657_v55  ;;  %v650_v62 = vadd.f32 %v827_v21, %v627_v56  ;;  %v658_v63 = vadd.f32 %v827_v21, %v635_v57 }
 0x108   : > { %663 = vst [vmem:[%s1052_s25 + $0x20] sm:$0xff] %v647_v58  ;;  %671 = vst [vmem:[%s1052_s25 + $0x60] sm:$0xff] %v655_v59  ;;  %v648_v0 = vadd.f32 %v827_v21, %v625_v60  ;;  %v656_v1 = vadd.f32 %v827_v21, %v633_v61 }
 0x109   : > { %666 = vst [vmem:[%s1052_s25 + $0x38] sm:$0xff] %v650_v62  ;;  %674 = vst [vmem:[%s1052_s25 + $0x78] sm:$0xff] %v658_v63 }
 0x10a   : > { %664 = vst [vmem:[%s1052_s25 + $0x28] sm:$0xff] %v648_v0  ;;  %672 = vst [vmem:[%s1052_s25 + $0x68] sm:$0xff] %v656_v1 }
 0x10b PF: > { %s14_s17 = sadd.s32 1, %s957_s17   ;;  %s1084_s15 = smov %s953_s16 }
 0x10c   : > { %p11_p5 = scmp.ge.s32.totalorder %s14_s17, 4   ;;  %s1085_s16 = smov %s1087_s18 }
 0x10e   :  { %13 = sbr.rel (!%p11_p5) target bundleno = 2 (0x2), region = 83 }

// kernel: basnet_forward.94
= control target key start
LH: loop header
LB: loop body
LE: loop exit
PB: predicated region body
PF: predicated region fallthrough
CT: control target
= control target key end

     0   :  { %s1114_s18 = smov 0   ;;  %s1116_s19 = smov 0   ;;  %s1270_s0 = inlined_call_operand.vmem [shape: bf16[256,128], index: 0, kind: input, shape index: {}]   ;;  %s1271_s1 = inlined_call_operand.vmem [shape: bf16[128,128], index: 1, kind: input, shape index: {}]   ;;  %s1272_s2 = inlined_call_operand.vmem [shape: f32[1,128], index: 2, kind: input, shape index: {}]   ;;  %s1273_s3 = inlined_call_operand.vmem [shape: f32[1,128], index: 3, kind: input, shape index: {}]   ;;  %s1274_s4 = inlined_call_operand.vmem [shape: f32[256,128], index: 4, kind: input, shape index: {}]   ;;  %s1275_s5 = inlined_call_operand.vmem [shape: f32[256,128], index: 5, kind: output, shape index: {}]  }
   0x1   :  { %s1118_s20 = smov 0  }
   0x2 LB: > { %s34_s21 = sadd.s32 1, %s1078_s19  ;;  %p928_p0 = scmp.ge.s32.totalorder %s1082_s20, 1  ;;  %s1082_s20 = sphi %s1118_s20, %s15_s20   ;;  %s1078_s19 = sphi %s1116_s19, %s1277_s19   ;;  %s1074_s18 = sphi %s1114_s18, %s1276_s18  }
   0x3   : > { %p36_p1 = scmp.ge.s32.totalorder %s34_s21, 2  ;;  %p262_p2 = scmp.lt.s32.totalorder %s1082_s20, 3 }
   0x5   : > { %s1279_s21 = smov (%p36_p1, %s34_s21), 0  ;;  %p263_p3 = pnand %p928_p0, %p262_p2 }
   0x6   : > { %v1044_v0 = vld [vmem:[%s1271_s1] sm:$0xff] (!%p263_p3)   ;;  %s929_s24 = sshll.u32 (!%p263_p3), %s1074_s18, 4  ;;  %v1045_v1 = vld [vmem:[%s1271_s1 + $0x8] sm:$0xff] (!%p263_p3)   ;;  %v1046_v2 = vld [vmem:[%s1271_s1 + $0x10] sm:$0xff] (!%p263_p3)  }
   0x7   : > { %266 = sbr.rel (%p263_p3) target bundleno = 272 (0x110), region = 40  ;;  %p319_p4 = scmp.lt.s32.totalorder (!%p263_p3), %s929_s24, 31  ;;  %971 = vmatprep.subr.bf16.mxu0 (!%p263_p3), %v1044_v0  ;;  %1003 = vmatprep.subr.bf16.mxu1 (!%p263_p3), %v1044_v0  ;;  %v1047_v3 = vld [vmem:[%s1271_s1 + $0x18] sm:$0xff] (!%p263_p3)   ;;  %v1048_v6 = vld [vmem:[%s1271_s1 + $0x20] sm:$0xff] (!%p263_p3)   ;;  %v1049_v7 = vld [vmem:[%s1271_s1 + $0x28] sm:$0xff] (!%p263_p3)  }
   0x8   : > { %972 = vmatpush3.bf16.msra.mxu0 (!%p263_p3), %v1044_v0  ;;  %1011 = vmatpush3.bf16.msra.mxu1 (!%p263_p3), %v1044_v0  ;;  %v1050_v8 = vld [vmem:[%s1271_s1 + $0x30] sm:$0xff] (!%p263_p3)   ;;  %v1051_v9 = vld [vmem:[%s1271_s1 + $0x38] sm:$0xff] (!%p263_p3)   ;;  %v1176_v17 = vld [vmem:[%s1272_s2] ss:$0 sm:$0xff] (!%p263_p3) }
   0x9   : > { %973 = vmatprep.subr.bf16.mxu0 (!%p263_p3), %v1045_v1  ;;  %1004 = vmatprep.subr.bf16.mxu1 (!%p263_p3), %v1045_v1  ;;  %v1188_v21 = vld [vmem:[%s1273_s3] ss:$0 sm:$0xff] (!%p263_p3) }
   0xc   : > { %974 = vmatpush3.bf16.msra.mxu0 (!%p263_p3), %v1045_v1  ;;  %1012 = vmatpush3.bf16.msra.mxu1 (!%p263_p3), %v1045_v1 }
   0xd   : > { %975 = vmatprep.subr.bf16.mxu0 (!%p263_p3), %v1046_v2  ;;  %1005 = vmatprep.subr.bf16.mxu1 (!%p263_p3), %v1046_v2 }
   0xe   : > { %s1281_s24 = smov (!%p319_p4, %s929_s24), 31 }
   0xf   : > { %s930_s29 = sshll.u32 %s1281_s24, 2  ;;  %s932_s18 = sshll.u32 %s1281_s24, 3 }
  0x10   : > { %s1147_s7 = scalar_lea.vmem %s1270_s0, %s930_s29  ;;  %976 = vmatpush3.bf16.msra.mxu0 %v1046_v2  ;;  %1013 = vmatpush3.bf16.msra.mxu1 %v1046_v2  ;;  %s1183_s27 = scalar_lea.vmem %s1274_s4, %s932_s18 }
  0x11   : > { %v1052_v4 = vld [vmem:[%s1147_s7] sm:$0xff]   ;;  %977 = vmatprep.subr.bf16.mxu0 %v1047_v3  ;;  %1006 = vmatprep.subr.bf16.mxu1 %v1047_v3  ;;  %v1054_v10 = vld [vmem:[%s1147_s7 + $0x8] sm:$0xff]   ;;  %v1056_v12 = vld [vmem:[%s1147_s7 + $0x10] sm:$0xff]  }
  0x12   : > { %v1053_v5 = vld [vmem:[%s1147_s7 + $0x20] sm:$0xff]   ;;  %987 = vmatprep.mubr.bf16.mxu0 %v1052_v4  ;;  %v1055_v11 = vld [vmem:[%s1147_s7 + $0x28] sm:$0xff]   ;;  %v1057_v13 = vld [vmem:[%s1147_s7 + $0x30] sm:$0xff]  }
  0x13   : > { %995 = vmatprep.mubr.bf16.mxu1 %v1053_v5  ;;  %v1058_v14 = vld [vmem:[%s1147_s7 + $0x18] sm:$0xff]   ;;  %v721_v28 = vld [vmem:[%s1183_s27 + $0x10] sm:$0xff]  ;;  %v719_v34 = vld [vmem:[%s1183_s27] sm:$0xff] }
  0x14   : > { %978 = vmatpush3.bf16.msra.mxu0 %v1047_v3  ;;  %1014 = vmatpush3.bf16.msra.mxu1 %v1047_v3  ;;  %v1059_v15 = vld [vmem:[%s1147_s7 + $0x38] sm:$0xff]   ;;  %v729_v29 = vld [vmem:[%s1183_s27 + $0x50] sm:$0xff]  ;;  %v727_v35 = vld [vmem:[%s1183_s27 + $0x40] sm:$0xff]  ;;  %s1217_s7 = scalar_lea.vmem %s1275_s5, %s932_s18 }
  0x15   : > { %979 = vmatprep.subr.bf16.mxu0 %v1048_v6  ;;  %1007 = vmatprep.subr.bf16.mxu1 %v1048_v6  ;;  %v722_v40 = vld [vmem:[%s1183_s27 + $0x18] sm:$0xff]  ;;  %v720_v48 = vld [vmem:[%s1183_s27 + $0x8] sm:$0xff] }
  0x16   : > { %v730_v41 = vld [vmem:[%s1183_s27 + $0x58] sm:$0xff]  ;;  %v728_v49 = vld [vmem:[%s1183_s27 + $0x48] sm:$0xff] }
  0x18   : > { %980 = vmatpush3.bf16.msra.mxu0 %v1048_v6  ;;  %1015 = vmatpush3.bf16.msra.mxu1 %v1048_v6 }
  0x19   : > { %981 = vmatprep.subr.bf16.mxu0 %v1049_v7  ;;  %1008 = vmatprep.subr.bf16.mxu1 %v1049_v7 }
  0x1c   : > { %982 = vmatpush3.bf16.msra.mxu0 %v1049_v7  ;;  %1016 = vmatpush3.bf16.msra.mxu1 %v1049_v7 }
  0x1d   : > { %983 = vmatprep.subr.bf16.mxu0 %v1050_v8  ;;  %1009 = vmatprep.subr.bf16.mxu1 %v1050_v8 }
  0x20   : > { %984 = vmatpush3.bf16.msra.mxu0 %v1050_v8  ;;  %1017 = vmatpush3.bf16.msra.mxu1 %v1050_v8 }
  0x21   : > { %985 = vmatprep.subr.bf16.mxu0 %v1051_v9  ;;  %1010 = vmatprep.subr.bf16.mxu1 %v1051_v9 }
  0x24   : > { %986 = vmatpush3.bf16.msra.mxu0 %v1051_v9  ;;  %1018 = vmatpush3.bf16.msra.mxu1 %v1051_v9 }
  0x27   : > { %988 = vmatmul.mubr.bf16.vlgmr.msra.gmra.mrb[0].mxu0 %v1054_v10  ;;  %996 = vmatmul.mubr.bf16.vlgmr.msra.gmra.mrb[0].mxu1 %v1055_v11 }
  0x28   : > { %991 = vmatprep.mubr.bf16.mxu0 %v1056_v12  ;;  %999 = vmatprep.mubr.bf16.mxu1 %v1057_v13  ;;  %v725_v12 = vld [vmem:[%s1183_s27 + $0x30] sm:$0xff] }
  0x29   : > { %v733_v13 = vld [vmem:[%s1183_s27 + $0x70] sm:$0xff] }
  0x2f   : > { %992 = vmatmul.mubr.bf16.gmra.mrb[4].mxu0 %v1058_v14  ;;  %1000 = vmatmul.mubr.bf16.gmra.mrb[4].mxu1 %v1059_v15 }
  0xfa   : > { %v989_v16 = vpop.f32.mrb[0].mxu0  ;;  %v997_v18 = vpop.f32.mrb[0].mxu1 }
  0xfb   : > { %v559_v19 = vpop.f32.mrb[1].mxu0  ;;  %v591_v20 = vpop.f32.mrb[1].mxu1  ;;  %v682_v24 = vmul.f32 %v989_v16, %v1176_v17  ;;  %v690_v25 = vmul.f32 %v997_v18, %v1176_v17 }
  0xfc   : > { %v990_v22 = vpop.f32.mrb[2].mxu0  ;;  %v998_v23 = vpop.f32.mrb[2].mxu1  ;;  %v680_v30 = vmul.f32 %v1176_v17, %v559_v19  ;;  %v688_v31 = vmul.f32 %v1176_v17, %v591_v20  ;;  %v723_v19 = vld [vmem:[%s1183_s27 + $0x20] sm:$0xff] }
  0xfd   : > { %v562_v26 = vpop.f32.mrb[3].mxu0  ;;  %v594_v27 = vpop.f32.mrb[3].mxu1  ;;  %v705_v32 = vadd.f32 %v1188_v21, %v682_v24  ;;  %v713_v33 = vadd.f32 %v1188_v21, %v690_v25  ;;  %v683_v36 = vmul.f32 %v990_v22, %v1176_v17  ;;  %v691_v37 = vmul.f32 %v998_v23, %v1176_v17  ;;  %v731_v20 = vld [vmem:[%s1183_s27 + $0x60] sm:$0xff] }
  0xfe   : > { %v703_v38 = vadd.f32 %v1188_v21, %v680_v30  ;;  %v711_v39 = vadd.f32 %v1188_v21, %v688_v31  ;;  %v681_v42 = vmul.f32 %v1176_v17, %v562_v26  ;;  %v689_v43 = vmul.f32 %v1176_v17, %v594_v27  ;;  %v726_v26 = vld [vmem:[%s1183_s27 + $0x38] sm:$0xff] }
  0xff   : > { %v737_v44 = vadd.f32 %v721_v28, %v705_v32  ;;  %v745_v45 = vadd.f32 %v729_v29, %v713_v33  ;;  %v706_v46 = vadd.f32 %v1188_v21, %v683_v36  ;;  %v714_v47 = vadd.f32 %v1188_v21, %v691_v37  ;;  %v734_v27 = vld [vmem:[%s1183_s27 + $0x78] sm:$0xff] }
 0x100   : > { %v735_v50 = vadd.f32 %v719_v34, %v703_v38  ;;  %v743_v51 = vadd.f32 %v727_v35, %v711_v39  ;;  %v704_v52 = vadd.f32 %v1188_v21, %v681_v42  ;;  %v712_v53 = vadd.f32 %v1188_v21, %v689_v43  ;;  %v724_v34 = vld [vmem:[%s1183_s27 + $0x28] sm:$0xff] }
 0x101   : > { %v753_v56 = vmax.f32 %v737_v44, 0.0  ;;  %v761_v57 = vmax.f32 %v745_v45, 0.0  ;;  %v738_v58 = vadd.f32 %v722_v40, %v706_v46  ;;  %v746_v59 = vadd.f32 %v730_v41, %v714_v47  ;;  %v732_v35 = vld [vmem:[%s1183_s27 + $0x68] sm:$0xff] }
 0x102   : > { %v993_v54 = vpop.f32.mrb[4].mxu0  ;;  %v1001_v55 = vpop.f32.mrb[4].mxu1  ;;  %v751_v62 = vmax.f32 %v735_v50, 0.0  ;;  %v759_v63 = vmax.f32 %v743_v51, 0.0  ;;  %v736_v0 = vadd.f32 %v720_v48, %v704_v52  ;;  %v744_v1 = vadd.f32 %v728_v49, %v712_v53 }
 0x103   : > { %v575_v60 = vpop.f32.mrb[5].mxu0  ;;  %v607_v61 = vpop.f32.mrb[5].mxu1  ;;  %769 = vst [vmem:[%s1217_s7 + $0x10] sm:$0xff] %v753_v56  ;;  %777 = vst [vmem:[%s1217_s7 + $0x50] sm:$0xff] %v761_v57  ;;  %v754_v4 = vmax.f32 %v738_v58, 0.0  ;;  %v762_v5 = vmax.f32 %v746_v59, 0.0  ;;  %v686_v10 = vmul.f32 %v993_v54, %v1176_v17  ;;  %v694_v11 = vmul.f32 %v1001_v55, %v1176_v17 }
 0x104   : > { %v994_v2 = vpop.f32.mrb[6].mxu0  ;;  %v1002_v3 = vpop.f32.mrb[6].mxu1  ;;  %767 = vst [vmem:[%s1217_s7] sm:$0xff] %v751_v62  ;;  %775 = vst [vmem:[%s1217_s7 + $0x40] sm:$0xff] %v759_v63  ;;  %v752_v8 = vmax.f32 %v736_v0, 0.0  ;;  %v760_v9 = vmax.f32 %v744_v1, 0.0  ;;  %v684_v14 = vmul.f32 %v1176_v17, %v575_v60  ;;  %v692_v15 = vmul.f32 %v1176_v17, %v607_v61 }
 0x105   : > { %v578_v6 = vpop.f32.mrb[7].mxu0  ;;  %v610_v7 = vpop.f32.mrb[7].mxu1  ;;  %770 = vst [vmem:[%s1217_s7 + $0x18] sm:$0xff] %v754_v4  ;;  %778 = vst [vmem:[%s1217_s7 + $0x58] sm:$0xff] %v762_v5  ;;  %v709_v16 = vadd.f32 %v1188_v21, %v686_v10  ;;  %v717_v18 = vadd.f32 %v1188_v21, %v694_v11  ;;  %v687_v22 = vmul.f32 %v994_v2, %v1176_v17 }
 0x106   : > { %768 = vst [vmem:[%s1217_s7 + $0x8] sm:$0xff] %v752_v8  ;;  %776 = vst [vmem:[%s1217_s7 + $0x48] sm:$0xff] %v760_v9  ;;  %v695_v23 = vmul.f32 %v1002_v3, %v1176_v17  ;;  %v707_v24 = vadd.f32 %v1188_v21, %v684_v14  ;;  %v715_v25 = vadd.f32 %v1188_v21, %v692_v15 }
 0x107   : > { %v685_v28 = vmul.f32 %v1176_v17, %v578_v6  ;;  %v693_v29 = vmul.f32 %v1176_v17, %v610_v7  ;;  %v741_v30 = vadd.f32 %v725_v12, %v709_v16  ;;  %v749_v31 = vadd.f32 %v733_v13, %v717_v18 }
 0x108   : > { %v710_v32 = vadd.f32 %v1188_v21, %v687_v22  ;;  %v718_v33 = vadd.f32 %v1188_v21, %v695_v23  ;;  %v739_v36 = vadd.f32 %v723_v19, %v707_v24  ;;  %v747_v37 = vadd.f32 %v731_v20, %v715_v25 }
 0x109   : > { %v708_v38 = vadd.f32 %v1188_v21, %v685_v28  ;;  %v716_v39 = vadd.f32 %v1188_v21, %v693_v29  ;;  %v757_v40 = vmax.f32 %v741_v30, 0.0  ;;  %v765_v17 = vmax.f32 %v749_v31, 0.0 }
 0x10a   : > { %v742_v41 = vadd.f32 %v726_v26, %v710_v32  ;;  %v750_v42 = vadd.f32 %v734_v27, %v718_v33  ;;  %v755_v43 = vmax.f32 %v739_v36, 0.0  ;;  %v763_v44 = vmax.f32 %v747_v37, 0.0 }
 0x10b   : > { %v740_v45 = vadd.f32 %v724_v34, %v708_v38  ;;  %v748_v46 = vadd.f32 %v732_v35, %v716_v39  ;;  %773 = vst [vmem:[%s1217_s7 + $0x30] sm:$0xff] %v757_v40  ;;  %781 = vst [vmem:[%s1217_s7 + $0x70] sm:$0xff] %v765_v17 }
 0x10c   : > { %v758_v47 = vmax.f32 %v742_v41, 0.0  ;;  %v766_v48 = vmax.f32 %v750_v42, 0.0  ;;  %771 = vst [vmem:[%s1217_s7 + $0x20] sm:$0xff] %v755_v43  ;;  %779 = vst [vmem:[%s1217_s7 + $0x60] sm:$0xff] %v763_v44 }
 0x10d   : > { %v756_v49 = vmax.f32 %v740_v45, 0.0  ;;  %v764_v21 = vmax.f32 %v748_v46, 0.0 }
 0x10e   : > { %774 = vst [vmem:[%s1217_s7 + $0x38] sm:$0xff] %v758_v47  ;;  %782 = vst [vmem:[%s1217_s7 + $0x78] sm:$0xff] %v766_v48 }
 0x10f   : > { %772 = vst [vmem:[%s1217_s7 + $0x28] sm:$0xff] %v756_v49  ;;  %780 = vst [vmem:[%s1217_s7 + $0x68] sm:$0xff] %v764_v21 }
 0x110 PF: > { %s15_s20 = sadd.s32 1, %s1082_s20   ;;  %s1276_s18 = smov %s1078_s19 }
 0x111   : > { %p12_p5 = scmp.ge.s32.totalorder %s15_s20, 4   ;;  %s1277_s19 = smov %s1279_s21 }
 0x113   :  { %14 = sbr.rel (!%p12_p5) target bundleno = 2 (0x2), region = 90 }

// kernel: basnet_forward.104
= control target key start
LH: loop header
LB: loop body
LE: loop exit
PB: predicated region body
PF: predicated region fallthrough
CT: control target
= control target key end

     0   :  { %s872_s15 = smov 0   ;;  %s874_s16 = smov 0   ;;  %s986_s0 = inlined_call_operand.vmem [shape: bf16[64,256], index: 0, kind: input, shape index: {}]   ;;  %s987_s1 = inlined_call_operand.vmem [shape: bf16[256,128], index: 1, kind: input, shape index: {}]   ;;  %s988_s2 = inlined_call_operand.vmem [shape: f32[1,128], index: 2, kind: input, shape index: {}]   ;;  %s989_s3 = inlined_call_operand.vmem [shape: f32[1,128], index: 3, kind: input, shape index: {}]   ;;  %s990_s4 = inlined_call_operand.vmem [shape: f32[64,128], index: 4, kind: output, shape index: {}]  }
   0x1   :  { %s876_s17 = smov 0  }
   0x2 LB: > { %s33_s18 = sadd.s32 1, %s840_s16  ;;  %p700_p0 = scmp.ge.s32.totalorder %s844_s17, 1  ;;  %s844_s17 = sphi %s876_s17, %s14_s17   ;;  %s840_s16 = sphi %s874_s16, %s992_s16   ;;  %s836_s15 = sphi %s872_s15, %s991_s15  }
   0x3   : > { %p35_p1 = scmp.ge.s32.totalorder %s33_s18, 2  ;;  %p224_p2 = scmp.lt.s32.totalorder %s844_s17, 3 }
   0x5   : > { %s994_s18 = smov (%p35_p1, %s33_s18), 0  ;;  %p225_p3 = pnand %p700_p0, %p224_p2 }
   0x6   : > { %v800_v0 = vld [vmem:[%s987_s1 + $0x40] sm:$0xff] (!%p225_p3)   ;;  %s701_s21 = sshll.u32 (!%p225_p3), %s836_s15, 2  ;;  %v802_v2 = vld [vmem:[%s987_s1 + $0x48] sm:$0xff] (!%p225_p3)   ;;  %v804_v4 = vld [vmem:[%s987_s1 + $0x50] sm:$0xff] (!%p225_p3)   ;;  %v846_v20 = vmov (!%p225_p3), 0.0  }
   0x7   : > { %228 = sbr.rel (%p225_p3) target bundleno = 273 (0x111), region = 36  ;;  %v801_v1 = vld [vmem:[%s987_s1] sm:$0xff] (!%p225_p3)   ;;  %731 = vmatprep.subr.bf16.mxu0 (!%p225_p3), %v800_v0  ;;  %759 = vmatprep.subr.bf16.mxu1 (!%p225_p3), %v800_v0  ;;  %v803_v3 = vld [vmem:[%s987_s1 + $0x8] sm:$0xff] (!%p225_p3)   ;;  %p274_p4 = scmp.lt.s32.totalorder (!%p225_p3), %s701_s21, 7  ;;  %v805_v5 = vld [vmem:[%s987_s1 + $0x10] sm:$0xff] (!%p225_p3)  }
   0x8   : > { %732 = vmatpush3.bf16.msra.mxu0 (!%p225_p3), %v801_v1  ;;  %767 = vmatpush3.bf16.msra.mxu1 (!%p225_p3), %v801_v1  ;;  %v806_v6 = vld [vmem:[%s987_s1 + $0x58] sm:$0xff] (!%p225_p3)   ;;  %v808_v8 = vld [vmem:[%s987_s1 + $0x60] sm:$0xff] (!%p225_p3)   ;;  %v810_v10 = vld [vmem:[%s987_s1 + $0x68] sm:$0xff] (!%p225_p3)  }
   0x9   : > { %733 = vmatprep.subr.bf16.mxu0 (!%p225_p3), %v802_v2  ;;  %760 = vmatprep.subr.bf16.mxu1 (!%p225_p3), %v802_v2  ;;  %v807_v7 = vld [vmem:[%s987_s1 + $0x18] sm:$0xff] (!%p225_p3)   ;;  %v809_v9 = vld [vmem:[%s987_s1 + $0x20] sm:$0xff] (!%p225_p3)   ;;  %v811_v13 = vld [vmem:[%s987_s1 + $0x28] sm:$0xff] (!%p225_p3)  }
   0xa   : > { %v812_v14 = vld [vmem:[%s987_s1 + $0x70] sm:$0xff] (!%p225_p3)   ;;  %v814_v16 = vld [vmem:[%s987_s1 + $0x78] sm:$0xff] (!%p225_p3)   ;;  %v726_v39 = vld [vmem:[%s988_s2] ss:$0 sm:$0xff] (!%p225_p3) }
   0xb   : > { %v813_v15 = vld [vmem:[%s987_s1 + $0x30] sm:$0xff] (!%p225_p3)   ;;  %v815_v17 = vld [vmem:[%s987_s1 + $0x38] sm:$0xff] (!%p225_p3)   ;;  %v727_v47 = vld [vmem:[%s989_s3] ss:$0 sm:$0xff] (!%p225_p3) }
   0xc   : > { %734 = vmatpush3.bf16.msra.mxu0 (!%p225_p3), %v803_v3  ;;  %768 = vmatpush3.bf16.msra.mxu1 (!%p225_p3), %v803_v3 }
   0xd   : > { %735 = vmatprep.subr.bf16.mxu0 (!%p225_p3), %v804_v4  ;;  %761 = vmatprep.subr.bf16.mxu1 (!%p225_p3), %v804_v4 }
   0xe   : > { %s996_s21 = smov (!%p274_p4, %s701_s21), 7 }
   0xf   : > { %s730_s10 = sshll.u32 %s996_s21, 3 }
  0x10   : > { %736 = vmatpush3.bf16.msra.mxu0 %v805_v5  ;;  %769 = vmatpush3.bf16.msra.mxu1 %v805_v5  ;;  %s281_s15 = scalar_lea.vmem %s986_s0, %s730_s10  ;;  %s951_s11 = scalar_lea.vmem %s990_s4, %s730_s10 }
  0x11   : > { %737 = vmatprep.subr.bf16.mxu0 %v806_v6  ;;  %762 = vmatprep.subr.bf16.mxu1 %v806_v6  ;;  %v818_v11 = vld [vmem:[%s281_s15 + $0x4] ss:$8 sps:$4 sm:$0xff]   ;;  %v821_v12 = vld [vmem:[%s281_s15 + $0x14] ss:$8 sps:$4 sm:$0xff]   ;;  %v816_v18 = vld [vmem:[%s281_s15] ss:$8 sps:$4 sm:$0xff]   ;;  %313 = vst [vmem:[%s951_s11] sm:$0xff] %v846_v20 }
  0x12   : > { %505 = vmatprep.mubr.bf16.mxu0 %v818_v11  ;;  %513 = vmatprep.mubr.bf16.mxu1 %v821_v12  ;;  %v819_v19 = vld [vmem:[%s281_s15 + $0x10] ss:$8 sps:$4 sm:$0xff]   ;;  %314 = vst [vmem:[%s951_s11 + $0x8] sm:$0xff] %v846_v20  ;;  %315 = vst [vmem:[%s951_s11 + $0x10] sm:$0xff] %v846_v20 }
  0x13   : > { %316 = vst [vmem:[%s951_s11 + $0x18] sm:$0xff] %v846_v20 }
  0x14   : > { %738 = vmatpush3.bf16.msra.mxu0 %v807_v7  ;;  %770 = vmatpush3.bf16.msra.mxu1 %v807_v7 }
  0x15   : > { %739 = vmatprep.subr.bf16.mxu0 %v808_v8  ;;  %763 = vmatprep.subr.bf16.mxu1 %v808_v8 }
  0x18   : > { %740 = vmatpush3.bf16.msra.mxu0 %v809_v9  ;;  %771 = vmatpush3.bf16.msra.mxu1 %v809_v9  ;;  %v317_v23 = vld [vmem:[%s951_s11] sm:$0xff] }
  0x19   : > { %741 = vmatprep.subr.bf16.mxu0 %v810_v10  ;;  %764 = vmatprep.subr.bf16.mxu1 %v810_v10  ;;  %v319_v30 = vld [vmem:[%s951_s11 + $0x10] sm:$0xff]  ;;  %v318_v31 = vld [vmem:[%s951_s11 + $0x8] sm:$0xff] }
  0x1c   : > { %742 = vmatpush3.bf16.msra.mxu0 %v811_v13  ;;  %772 = vmatpush3.bf16.msra.mxu1 %v811_v13 }
  0x1d   : > { %743 = vmatprep.subr.bf16.mxu0 %v812_v14  ;;  %765 = vmatprep.subr.bf16.mxu1 %v812_v14 }
  0x20   : > { %744 = vmatpush3.bf16.msra.mxu0 %v813_v15  ;;  %773 = vmatpush3.bf16.msra.mxu1 %v813_v15 }
  0x21   : > { %745 = vmatprep.subr.bf16.mxu0 %v814_v16  ;;  %766 = vmatprep.subr.bf16.mxu1 %v814_v16 }
  0x24   : > { %746 = vmatpush3.bf16.msra.mxu0 %v815_v17  ;;  %774 = vmatpush3.bf16.msra.mxu1 %v815_v17 }
  0x27   : > { %506 = vmatmul.mubr.bf16.vlgmr.msra.gmra.mrb[0].mxu0 %v816_v18  ;;  %514 = vmatmul.mubr.bf16.vlgmr.msra.gmra.mrb[0].mxu1 %v819_v19 }
  0xfa   : > { %v747_v21 = vpop.f32.mrb[0].mxu0  ;;  %v753_v22 = vpop.f32.mrb[0].mxu1 }
  0xfb   : > { %v748_v24 = vpop.f32.mrb[1].mxu0  ;;  %v754_v25 = vpop.f32.mrb[1].mxu1 }
  0xfc   : > { %v749_v26 = vadd.f32 %v748_v24, %v747_v21  ;;  %v755_v27 = vadd.f32 %v754_v25, %v753_v22  ;;  %v750_v28 = vpop.f32.mrb[2].mxu0  ;;  %v756_v29 = vpop.f32.mrb[2].mxu1 }
  0xfd   : > { %v751_v32 = vpop.f32.mrb[3].mxu0  ;;  %v757_v33 = vpop.f32.mrb[3].mxu1 }
  0xfe   : > { %v522_v34 = vadd.f32 %v749_v26, %v317_v23  ;;  %v752_v35 = vadd.f32 %v751_v32, %v750_v28  ;;  %v758_v36 = vadd.f32 %v757_v33, %v756_v29  ;;  %v524_v38 = vadd.f32 %v755_v27, %v319_v30 }
 0x100   : > { %v523_v37 = vadd.f32 %v752_v35, %v318_v31  ;;  %526 = vst [vmem:[%s951_s11] sm:$0xff] %v522_v34  ;;  %528 = vst [vmem:[%s951_s11 + $0x10] sm:$0xff] %v524_v38  ;;  %v547_v43 = vmul.f32 %v758_v36, %v726_v39 }
 0x101   : > { %529 = vst [vmem:[%s951_s11 + $0x18] sm:$0xff] %v758_v36 }
 0x102   : > { %527 = vst [vmem:[%s951_s11 + $0x8] sm:$0xff] %v523_v37  ;;  %v558_v51 = vadd.f32 %v727_v47, %v547_v43 }
 0x104   : > { %v562_v55 = vmax.f32 %v558_v51, 0.0 }
 0x106   : > { %566 = vst [vmem:[%s951_s11 + $0x18] sm:$0xff] %v562_v55 }
 0x107   : > { %v533_v40 = vld [vmem:[%s951_s11] sm:$0xff]  ;;  %v535_v42 = vld [vmem:[%s951_s11 + $0x10] sm:$0xff] }
 0x108   : > { %v544_v44 = vmul.f32 %v726_v39, %v533_v40  ;;  %v546_v46 = vmul.f32 %v726_v39, %v535_v42 }
 0x109   : > { %v534_v41 = vld [vmem:[%s951_s11 + $0x8] sm:$0xff] }
 0x10a   : > { %v545_v45 = vmul.f32 %v726_v39, %v534_v41  ;;  %v555_v48 = vadd.f32 %v727_v47, %v544_v44  ;;  %v557_v50 = vadd.f32 %v727_v47, %v546_v46 }
 0x10c   : > { %v556_v49 = vadd.f32 %v727_v47, %v545_v45  ;;  %v559_v52 = vmax.f32 %v555_v48, 0.0  ;;  %v561_v54 = vmax.f32 %v557_v50, 0.0 }
 0x10e   : > { %v560_v53 = vmax.f32 %v556_v49, 0.0  ;;  %563 = vst [vmem:[%s951_s11] sm:$0xff] %v559_v52  ;;  %565 = vst [vmem:[%s951_s11 + $0x10] sm:$0xff] %v561_v54 }
 0x110   : > { %564 = vst [vmem:[%s951_s11 + $0x8] sm:$0xff] %v560_v53 }
 0x111 PF: > { %s14_s17 = sadd.s32 1, %s844_s17   ;;  %s991_s15 = smov %s840_s16 }
 0x112   : > { %p11_p5 = scmp.ge.s32.totalorder %s14_s17, 4   ;;  %s992_s16 = smov %s994_s18 }
 0x114   :  { %13 = sbr.rel (!%p11_p5) target bundleno = 2 (0x2), region = 83 }

// kernel: basnet_forward.102
= control target key start
LH: loop header
LB: loop body
LE: loop exit
PB: predicated region body
PF: predicated region fallthrough
CT: control target
= control target key end

     0   :  { %s747_s15 = smov 0   ;;  %s749_s16 = smov 0   ;;  %s830_s0 = inlined_call_operand.vmem [shape: bf16[64,128], index: 0, kind: input, shape index: {}]   ;;  %s831_s1 = inlined_call_operand.vmem [shape: bf16[128,128], index: 1, kind: input, shape index: {}]   ;;  %s832_s2 = inlined_call_operand.vmem [shape: f32[1,128], index: 2, kind: input, shape index: {}]   ;;  %s833_s3 = inlined_call_operand.vmem [shape: f32[1,128], index: 3, kind: input, shape index: {}]   ;;  %s834_s4 = inlined_call_operand.vmem [shape: f32[64,128], index: 4, kind: output, shape index: {}]  }
   0x1   :  { %s751_s17 = smov 0  }
   0x2 LB: > { %s33_s18 = sadd.s32 1, %s715_s16  ;;  %p613_p0 = scmp.ge.s32.totalorder %s719_s17, 1  ;;  %s719_s17 = sphi %s751_s17, %s14_s17   ;;  %s715_s16 = sphi %s749_s16, %s836_s16   ;;  %s711_s15 = sphi %s747_s15, %s835_s15  }
   0x3   : > { %p35_p1 = scmp.ge.s32.totalorder %s33_s18, 2  ;;  %p221_p2 = scmp.lt.s32.totalorder %s719_s17, 3 }
   0x5   : > { %s838_s18 = smov (%p35_p1, %s33_s18), 0  ;;  %p222_p3 = pnand %p613_p0, %p221_p2 }
   0x6   : > { %v687_v0 = vld [vmem:[%s831_s1] sm:$0xff] (!%p222_p3)   ;;  %s614_s21 = sshll.u32 (!%p222_p3), %s711_s15, 2  ;;  %v688_v1 = vld [vmem:[%s831_s1 + $0x8] sm:$0xff] (!%p222_p3)   ;;  %v689_v2 = vld [vmem:[%s831_s1 + $0x10] sm:$0xff] (!%p222_p3)   ;;  %v721_v5 = vmov (!%p222_p3), 0.0  }
   0x7   : > { %225 = sbr.rel (%p222_p3) target bundleno = 269 (0x10d), region = 36  ;;  %p268_p4 = scmp.lt.s32.totalorder (!%p222_p3), %s614_s21, 7  ;;  %642 = vmatprep.subr.bf16.mxu0 (!%p222_p3), %v687_v0  ;;  %v690_v3 = vld [vmem:[%s831_s1 + $0x18] sm:$0xff] (!%p222_p3)   ;;  %v691_v6 = vld [vmem:[%s831_s1 + $0x20] sm:$0xff] (!%p222_p3)   ;;  %v692_v7 = vld [vmem:[%s831_s1 + $0x28] sm:$0xff] (!%p222_p3)  }
   0x8   : > { %643 = vmatpush3.bf16.msra.mxu0 (!%p222_p3), %v687_v0  ;;  %v693_v8 = vld [vmem:[%s831_s1 + $0x30] sm:$0xff] (!%p222_p3)   ;;  %v694_v9 = vld [vmem:[%s831_s1 + $0x38] sm:$0xff] (!%p222_p3)   ;;  %v628_v21 = vld [vmem:[%s832_s2] ss:$0 sm:$0xff] (!%p222_p3) }
   0x9   : > { %644 = vmatprep.subr.bf16.mxu0 (!%p222_p3), %v688_v1  ;;  %v629_v29 = vld [vmem:[%s833_s3] ss:$0 sm:$0xff] (!%p222_p3) }
   0xc   : > { %645 = vmatpush3.bf16.msra.mxu0 (!%p222_p3), %v688_v1 }
   0xd   : > { %646 = vmatprep.subr.bf16.mxu0 (!%p222_p3), %v689_v2 }
   0xe   : > { %s840_s21 = smov (!%p268_p4, %s614_s21), 7 }
   0xf   : > { %s615_s26 = sshll.u32 %s840_s21, 2  ;;  %s617_s30 = sshll.u32 %s840_s21, 3 }
  0x10   : > { %s274_s29 = scalar_lea.vmem %s830_s0, %s615_s26  ;;  %s783_s9 = scalar_lea.vmem %s834_s4, %s617_s30  ;;  %647 = vmatpush3.bf16.msra.mxu0 %v689_v2 }
  0x11   : > { %v695_v4 = vld [vmem:[%s274_s29] sm:$0xff]   ;;  %305 = vst [vmem:[%s783_s9] sm:$0xff] %v721_v5  ;;  %306 = vst [vmem:[%s783_s9 + $0x8] sm:$0xff] %v721_v5  ;;  %648 = vmatprep.subr.bf16.mxu0 %v690_v3  ;;  %v696_v10 = vld [vmem:[%s274_s29 + $0x8] sm:$0xff]  }
  0x12   : > { %658 = vmatprep.mubr.bf16.mxu0 %v695_v4  ;;  %307 = vst [vmem:[%s783_s9 + $0x10] sm:$0xff] %v721_v5  ;;  %308 = vst [vmem:[%s783_s9 + $0x18] sm:$0xff] %v721_v5 }
  0x14   : > { %649 = vmatpush3.bf16.msra.mxu0 %v690_v3 }
  0x15   : > { %650 = vmatprep.subr.bf16.mxu0 %v691_v6 }
  0x18   : > { %651 = vmatpush3.bf16.msra.mxu0 %v691_v6  ;;  %v309_v11 = vld [vmem:[%s783_s9] sm:$0xff]  ;;  %v310_v14 = vld [vmem:[%s783_s9 + $0x8] sm:$0xff] }
  0x19   : > { %652 = vmatprep.subr.bf16.mxu0 %v692_v7  ;;  %v311_v15 = vld [vmem:[%s783_s9 + $0x10] sm:$0xff] }
  0x1c   : > { %653 = vmatpush3.bf16.msra.mxu0 %v692_v7 }
  0x1d   : > { %654 = vmatprep.subr.bf16.mxu0 %v693_v8 }
  0x20   : > { %655 = vmatpush3.bf16.msra.mxu0 %v693_v8 }
  0x21   : > { %656 = vmatprep.subr.bf16.mxu0 %v694_v9 }
  0x24   : > { %657 = vmatpush3.bf16.msra.mxu0 %v694_v9 }
  0x27   : > { %659 = vmatmul.mubr.bf16.vlgmr.msra.gmra.mrb[0].mxu0 %v696_v10 }
  0xfa   : > { %v660_v12 = vpop.f32.mrb[0].mxu0 }
  0xfb   : > { %v427_v13 = vpop.f32.mrb[1].mxu0  ;;  %v444_v20 = vadd.f32 %v660_v12, %v311_v15 }
  0xfc   : > { %v442_v16 = vadd.f32 %v427_v13, %v309_v11  ;;  %v661_v17 = vpop.f32.mrb[2].mxu0 }
  0xfd   : > { %v430_v18 = vpop.f32.mrb[3].mxu0  ;;  %448 = vst [vmem:[%s783_s9 + $0x10] sm:$0xff] %v444_v20  ;;  %449 = vst [vmem:[%s783_s9 + $0x18] sm:$0xff] %v661_v17  ;;  %v467_v28 = vmul.f32 %v661_v17, %v628_v21 }
  0xfe   : > { %v443_v19 = vadd.f32 %v430_v18, %v310_v14  ;;  %446 = vst [vmem:[%s783_s9] sm:$0xff] %v442_v16 }
  0xff   : > { %v478_v33 = vadd.f32 %v629_v29, %v467_v28 }
 0x100   : > { %447 = vst [vmem:[%s783_s9 + $0x8] sm:$0xff] %v443_v19 }
 0x101   : > { %482 = vst [vmem:[%s783_s9 + $0x18] sm:$0xff] %v478_v33 }
 0x104   : > { %v455_v24 = vld [vmem:[%s783_s9 + $0x10] sm:$0xff] }
 0x105   : > { %v453_v22 = vld [vmem:[%s783_s9] sm:$0xff]  ;;  %v466_v27 = vmul.f32 %v628_v21, %v455_v24 }
 0x106   : > { %v464_v25 = vmul.f32 %v628_v21, %v453_v22 }
 0x107   : > { %v454_v23 = vld [vmem:[%s783_s9 + $0x8] sm:$0xff]  ;;  %v477_v32 = vadd.f32 %v629_v29, %v466_v27 }
 0x108   : > { %v465_v26 = vmul.f32 %v628_v21, %v454_v23  ;;  %v475_v30 = vadd.f32 %v629_v29, %v464_v25 }
 0x109   : > { %481 = vst [vmem:[%s783_s9 + $0x10] sm:$0xff] %v477_v32 }
 0x10a   : > { %v476_v31 = vadd.f32 %v629_v29, %v465_v26  ;;  %479 = vst [vmem:[%s783_s9] sm:$0xff] %v475_v30 }
 0x10c   : > { %480 = vst [vmem:[%s783_s9 + $0x8] sm:$0xff] %v476_v31 }
 0x10d PF: > { %s14_s17 = sadd.s32 1, %s719_s17   ;;  %s835_s15 = smov %s715_s16 }
 0x10e   : > { %p11_p5 = scmp.ge.s32.totalorder %s14_s17, 4   ;;  %s836_s16 = smov %s838_s18 }
 0x110   :  { %13 = sbr.rel (!%p11_p5) target bundleno = 2 (0x2), region = 83 }

// kernel: basnet_forward.106
= control target key start
LH: loop header
LB: loop body
LE: loop exit
PB: predicated region body
PF: predicated region fallthrough
CT: control target
= control target key end

     0   :  { %s751_s15 = smov 0   ;;  %s753_s16 = smov 0   ;;  %s834_s0 = inlined_call_operand.vmem [shape: bf16[64,128], index: 0, kind: input, shape index: {}]   ;;  %s835_s1 = inlined_call_operand.vmem [shape: bf16[128,128], index: 1, kind: input, shape index: {}]   ;;  %s836_s2 = inlined_call_operand.vmem [shape: f32[1,128], index: 2, kind: input, shape index: {}]   ;;  %s837_s3 = inlined_call_operand.vmem [shape: f32[1,128], index: 3, kind: input, shape index: {}]   ;;  %s838_s4 = inlined_call_operand.vmem [shape: f32[64,128], index: 4, kind: output, shape index: {}]  }
   0x1   :  { %s755_s17 = smov 0  }
   0x2 LB: > { %s33_s18 = sadd.s32 1, %s719_s16  ;;  %p617_p0 = scmp.ge.s32.totalorder %s723_s17, 1  ;;  %s723_s17 = sphi %s755_s17, %s14_s17   ;;  %s719_s16 = sphi %s753_s16, %s840_s16   ;;  %s715_s15 = sphi %s751_s15, %s839_s15  }
   0x3   : > { %p35_p1 = scmp.ge.s32.totalorder %s33_s18, 2  ;;  %p221_p2 = scmp.lt.s32.totalorder %s723_s17, 3 }
   0x5   : > { %s842_s18 = smov (%p35_p1, %s33_s18), 0  ;;  %p222_p3 = pnand %p617_p0, %p221_p2 }
   0x6   : > { %v691_v0 = vld [vmem:[%s835_s1] sm:$0xff] (!%p222_p3)   ;;  %s618_s21 = sshll.u32 (!%p222_p3), %s715_s15, 2  ;;  %v692_v1 = vld [vmem:[%s835_s1 + $0x8] sm:$0xff] (!%p222_p3)   ;;  %v693_v2 = vld [vmem:[%s835_s1 + $0x10] sm:$0xff] (!%p222_p3)   ;;  %v725_v5 = vmov (!%p222_p3), 0.0  }
   0x7   : > { %225 = sbr.rel (%p222_p3) target bundleno = 271 (0x10f), region = 36  ;;  %p268_p4 = scmp.lt.s32.totalorder (!%p222_p3), %s618_s21, 7  ;;  %646 = vmatprep.subr.bf16.mxu0 (!%p222_p3), %v691_v0  ;;  %v694_v3 = vld [vmem:[%s835_s1 + $0x18] sm:$0xff] (!%p222_p3)   ;;  %v695_v6 = vld [vmem:[%s835_s1 + $0x20] sm:$0xff] (!%p222_p3)   ;;  %v696_v7 = vld [vmem:[%s835_s1 + $0x28] sm:$0xff] (!%p222_p3)  }
   0x8   : > { %647 = vmatpush3.bf16.msra.mxu0 (!%p222_p3), %v691_v0  ;;  %v697_v8 = vld [vmem:[%s835_s1 + $0x30] sm:$0xff] (!%p222_p3)   ;;  %v698_v9 = vld [vmem:[%s835_s1 + $0x38] sm:$0xff] (!%p222_p3)   ;;  %v632_v21 = vld [vmem:[%s836_s2] ss:$0 sm:$0xff] (!%p222_p3) }
   0x9   : > { %648 = vmatprep.subr.bf16.mxu0 (!%p222_p3), %v692_v1  ;;  %v633_v29 = vld [vmem:[%s837_s3] ss:$0 sm:$0xff] (!%p222_p3) }
   0xc   : > { %649 = vmatpush3.bf16.msra.mxu0 (!%p222_p3), %v692_v1 }
   0xd   : > { %650 = vmatprep.subr.bf16.mxu0 (!%p222_p3), %v693_v2 }
   0xe   : > { %s844_s21 = smov (!%p268_p4, %s618_s21), 7 }
   0xf   : > { %s619_s26 = sshll.u32 %s844_s21, 2  ;;  %s621_s30 = sshll.u32 %s844_s21, 3 }
  0x10   : > { %s274_s29 = scalar_lea.vmem %s834_s0, %s619_s26  ;;  %s787_s9 = scalar_lea.vmem %s838_s4, %s621_s30  ;;  %651 = vmatpush3.bf16.msra.mxu0 %v693_v2 }
  0x11   : > { %v699_v4 = vld [vmem:[%s274_s29] sm:$0xff]   ;;  %305 = vst [vmem:[%s787_s9] sm:$0xff] %v725_v5  ;;  %306 = vst [vmem:[%s787_s9 + $0x8] sm:$0xff] %v725_v5  ;;  %652 = vmatprep.subr.bf16.mxu0 %v694_v3  ;;  %v700_v10 = vld [vmem:[%s274_s29 + $0x8] sm:$0xff]  }
  0x12   : > { %662 = vmatprep.mubr.bf16.mxu0 %v699_v4  ;;  %307 = vst [vmem:[%s787_s9 + $0x10] sm:$0xff] %v725_v5  ;;  %308 = vst [vmem:[%s787_s9 + $0x18] sm:$0xff] %v725_v5 }
  0x14   : > { %653 = vmatpush3.bf16.msra.mxu0 %v694_v3 }
  0x15   : > { %654 = vmatprep.subr.bf16.mxu0 %v695_v6 }
  0x18   : > { %655 = vmatpush3.bf16.msra.mxu0 %v695_v6  ;;  %v309_v11 = vld [vmem:[%s787_s9] sm:$0xff]  ;;  %v310_v14 = vld [vmem:[%s787_s9 + $0x8] sm:$0xff] }
  0x19   : > { %656 = vmatprep.subr.bf16.mxu0 %v696_v7  ;;  %v311_v15 = vld [vmem:[%s787_s9 + $0x10] sm:$0xff] }
  0x1c   : > { %657 = vmatpush3.bf16.msra.mxu0 %v696_v7 }
  0x1d   : > { %658 = vmatprep.subr.bf16.mxu0 %v697_v8 }
  0x20   : > { %659 = vmatpush3.bf16.msra.mxu0 %v697_v8 }
  0x21   : > { %660 = vmatprep.subr.bf16.mxu0 %v698_v9 }
  0x24   : > { %661 = vmatpush3.bf16.msra.mxu0 %v698_v9 }
  0x27   : > { %663 = vmatmul.mubr.bf16.vlgmr.msra.gmra.mrb[0].mxu0 %v700_v10 }
  0xfa   : > { %v664_v12 = vpop.f32.mrb[0].mxu0 }
  0xfb   : > { %v427_v13 = vpop.f32.mrb[1].mxu0  ;;  %v444_v20 = vadd.f32 %v664_v12, %v311_v15 }
  0xfc   : > { %v442_v16 = vadd.f32 %v427_v13, %v309_v11  ;;  %v665_v17 = vpop.f32.mrb[2].mxu0 }
  0xfd   : > { %v430_v18 = vpop.f32.mrb[3].mxu0  ;;  %448 = vst [vmem:[%s787_s9 + $0x10] sm:$0xff] %v444_v20  ;;  %449 = vst [vmem:[%s787_s9 + $0x18] sm:$0xff] %v665_v17  ;;  %v467_v25 = vmul.f32 %v665_v17, %v632_v21 }
  0xfe   : > { %v443_v19 = vadd.f32 %v430_v18, %v310_v14  ;;  %446 = vst [vmem:[%s787_s9] sm:$0xff] %v442_v16 }
  0xff   : > { %v478_v33 = vadd.f32 %v633_v29, %v467_v25 }
 0x100   : > { %447 = vst [vmem:[%s787_s9 + $0x8] sm:$0xff] %v443_v19 }
 0x101   : > { %v482_v37 = vmax.f32 %v478_v33, 0.0 }
 0x103   : > { %486 = vst [vmem:[%s787_s9 + $0x18] sm:$0xff] %v482_v37 }
 0x104   : > { %v455_v24 = vld [vmem:[%s787_s9 + $0x10] sm:$0xff] }
 0x105   : > { %v453_v22 = vld [vmem:[%s787_s9] sm:$0xff]  ;;  %v466_v28 = vmul.f32 %v632_v21, %v455_v24 }
 0x106   : > { %v464_v26 = vmul.f32 %v632_v21, %v453_v22 }
 0x107   : > { %v454_v23 = vld [vmem:[%s787_s9 + $0x8] sm:$0xff]  ;;  %v477_v32 = vadd.f32 %v633_v29, %v466_v28 }
 0x108   : > { %v465_v27 = vmul.f32 %v632_v21, %v454_v23  ;;  %v475_v30 = vadd.f32 %v633_v29, %v464_v26 }
 0x109   : > { %v481_v36 = vmax.f32 %v477_v32, 0.0 }
 0x10a   : > { %v476_v31 = vadd.f32 %v633_v29, %v465_v27  ;;  %v479_v34 = vmax.f32 %v475_v30, 0.0 }
 0x10b   : > { %485 = vst [vmem:[%s787_s9 + $0x10] sm:$0xff] %v481_v36 }
 0x10c   : > { %v480_v35 = vmax.f32 %v476_v31, 0.0  ;;  %483 = vst [vmem:[%s787_s9] sm:$0xff] %v479_v34 }
 0x10e   : > { %484 = vst [vmem:[%s787_s9 + $0x8] sm:$0xff] %v480_v35 }
 0x10f PF: > { %s14_s17 = sadd.s32 1, %s723_s17   ;;  %s839_s15 = smov %s719_s16 }
 0x110   : > { %p11_p5 = scmp.ge.s32.totalorder %s14_s17, 4   ;;  %s840_s16 = smov %s842_s18 }
 0x112   :  { %13 = sbr.rel (!%p11_p5) target bundleno = 2 (0x2), region = 83 }

// kernel: basnet_forward.105
= control target key start
LH: loop header
LB: loop body
LE: loop exit
PB: predicated region body
PF: predicated region fallthrough
CT: control target
= control target key end

     0   :  { %s841_s18 = smov 0   ;;  %s843_s19 = smov 0   ;;  %s935_s0 = inlined_call_operand.vmem [shape: bf16[64,128], index: 0, kind: input, shape index: {}]   ;;  %s936_s1 = inlined_call_operand.vmem [shape: bf16[128,128], index: 1, kind: input, shape index: {}]   ;;  %s937_s2 = inlined_call_operand.vmem [shape: f32[1,128], index: 2, kind: input, shape index: {}]   ;;  %s938_s3 = inlined_call_operand.vmem [shape: f32[1,128], index: 3, kind: input, shape index: {}]   ;;  %s939_s4 = inlined_call_operand.vmem [shape: f32[64,128], index: 4, kind: input, shape index: {}]   ;;  %s940_s5 = inlined_call_operand.vmem [shape: f32[64,128], index: 5, kind: output, shape index: {}]  }
   0x1   :  { %s845_s20 = smov 0  }
   0x2 LB: > { %s34_s21 = sadd.s32 1, %s804_s19  ;;  %p700_p0 = scmp.ge.s32.totalorder %s808_s20, 1  ;;  %s808_s20 = sphi %s845_s20, %s15_s20   ;;  %s804_s19 = sphi %s843_s19, %s942_s19   ;;  %s800_s18 = sphi %s841_s18, %s941_s18  }
   0x3   : > { %p36_p1 = scmp.ge.s32.totalorder %s34_s21, 2  ;;  %p262_p2 = scmp.lt.s32.totalorder %s808_s20, 3 }
   0x5   : > { %s944_s21 = smov (%p36_p1, %s34_s21), 0  ;;  %p263_p3 = pnand %p700_p0, %p262_p2 }
   0x6   : > { %v776_v0 = vld [vmem:[%s936_s1] sm:$0xff] (!%p263_p3)   ;;  %s701_s24 = sshll.u32 (!%p263_p3), %s800_s18, 2  ;;  %v777_v1 = vld [vmem:[%s936_s1 + $0x8] sm:$0xff] (!%p263_p3)   ;;  %v778_v2 = vld [vmem:[%s936_s1 + $0x10] sm:$0xff] (!%p263_p3)   ;;  %v810_v5 = vmov (!%p263_p3), 0.0  }
   0x7   : > { %266 = sbr.rel (%p263_p3) target bundleno = 273 (0x111), region = 40  ;;  %p319_p4 = scmp.lt.s32.totalorder (!%p263_p3), %s701_s24, 7  ;;  %731 = vmatprep.subr.bf16.mxu0 (!%p263_p3), %v776_v0  ;;  %v779_v3 = vld [vmem:[%s936_s1 + $0x18] sm:$0xff] (!%p263_p3)   ;;  %v780_v6 = vld [vmem:[%s936_s1 + $0x20] sm:$0xff] (!%p263_p3)   ;;  %v781_v7 = vld [vmem:[%s936_s1 + $0x28] sm:$0xff] (!%p263_p3)  }
   0x8   : > { %732 = vmatpush3.bf16.msra.mxu0 (!%p263_p3), %v776_v0  ;;  %v782_v8 = vld [vmem:[%s936_s1 + $0x30] sm:$0xff] (!%p263_p3)   ;;  %v783_v9 = vld [vmem:[%s936_s1 + $0x38] sm:$0xff] (!%p263_p3)   ;;  %v717_v18 = vld [vmem:[%s937_s2] ss:$0 sm:$0xff] (!%p263_p3) }
   0x9   : > { %733 = vmatprep.subr.bf16.mxu0 (!%p263_p3), %v777_v1  ;;  %v718_v21 = vld [vmem:[%s938_s3] ss:$0 sm:$0xff] (!%p263_p3) }
   0xc   : > { %734 = vmatpush3.bf16.msra.mxu0 (!%p263_p3), %v777_v1 }
   0xd   : > { %735 = vmatprep.subr.bf16.mxu0 (!%p263_p3), %v778_v2 }
   0xe   : > { %s946_s24 = smov (!%p319_p4, %s701_s24), 7 }
   0xf   : > { %s702_s29 = sshll.u32 %s946_s24, 2  ;;  %s704_s8 = sshll.u32 %s946_s24, 3 }
  0x10   : > { %s325_s7 = scalar_lea.vmem %s935_s0, %s702_s29  ;;  %s883_s13 = scalar_lea.vmem %s940_s5, %s704_s8  ;;  %736 = vmatpush3.bf16.msra.mxu0 %v778_v2 }
  0x11   : > { %v784_v4 = vld [vmem:[%s325_s7] sm:$0xff]   ;;  %365 = vst [vmem:[%s883_s13] sm:$0xff] %v810_v5  ;;  %366 = vst [vmem:[%s883_s13 + $0x8] sm:$0xff] %v810_v5  ;;  %737 = vmatprep.subr.bf16.mxu0 %v779_v3  ;;  %v785_v10 = vld [vmem:[%s325_s7 + $0x8] sm:$0xff]   ;;  %s349_s30 = scalar_lea.vmem %s939_s4, %s704_s8 }
  0x12   : > { %747 = vmatprep.mubr.bf16.mxu0 %v784_v4  ;;  %367 = vst [vmem:[%s883_s13 + $0x10] sm:$0xff] %v810_v5  ;;  %368 = vst [vmem:[%s883_s13 + $0x18] sm:$0xff] %v810_v5  ;;  %v542_v24 = vld [vmem:[%s349_s30 + $0x18] sm:$0xff]  ;;  %v539_v33 = vld [vmem:[%s349_s30] sm:$0xff] }
  0x13   : > { %v540_v34 = vld [vmem:[%s349_s30 + $0x8] sm:$0xff]  ;;  %v541_v35 = vld [vmem:[%s349_s30 + $0x10] sm:$0xff] }
  0x14   : > { %738 = vmatpush3.bf16.msra.mxu0 %v779_v3 }
  0x15   : > { %739 = vmatprep.subr.bf16.mxu0 %v780_v6 }
  0x18   : > { %740 = vmatpush3.bf16.msra.mxu0 %v780_v6  ;;  %v369_v11 = vld [vmem:[%s883_s13] sm:$0xff]  ;;  %v370_v14 = vld [vmem:[%s883_s13 + $0x8] sm:$0xff] }
  0x19   : > { %741 = vmatprep.subr.bf16.mxu0 %v781_v7  ;;  %v371_v15 = vld [vmem:[%s883_s13 + $0x10] sm:$0xff] }
  0x1c   : > { %742 = vmatpush3.bf16.msra.mxu0 %v781_v7 }
  0x1d   : > { %743 = vmatprep.subr.bf16.mxu0 %v782_v8 }
  0x20   : > { %744 = vmatpush3.bf16.msra.mxu0 %v782_v8 }
  0x21   : > { %745 = vmatprep.subr.bf16.mxu0 %v783_v9 }
  0x24   : > { %746 = vmatpush3.bf16.msra.mxu0 %v783_v9 }
  0x27   : > { %748 = vmatmul.mubr.bf16.vlgmr.msra.gmra.mrb[0].mxu0 %v785_v10 }
  0xfa   : > { %v749_v12 = vpop.f32.mrb[0].mxu0 }
  0xfb   : > { %v487_v13 = vpop.f32.mrb[1].mxu0  ;;  %v504_v22 = vadd.f32 %v749_v12, %v371_v15 }
  0xfc   : > { %v502_v16 = vadd.f32 %v487_v13, %v369_v11  ;;  %v750_v17 = vpop.f32.mrb[2].mxu0 }
  0xfd   : > { %v490_v19 = vpop.f32.mrb[3].mxu0  ;;  %v527_v23 = vmul.f32 %v750_v17, %v717_v18  ;;  %508 = vst [vmem:[%s883_s13 + $0x10] sm:$0xff] %v504_v22  ;;  %509 = vst [vmem:[%s883_s13 + $0x18] sm:$0xff] %v750_v17 }
  0xfe   : > { %v503_v20 = vadd.f32 %v490_v19, %v370_v14  ;;  %506 = vst [vmem:[%s883_s13] sm:$0xff] %v502_v16 }
  0xff   : > { %v538_v25 = vadd.f32 %v718_v21, %v527_v23 }
 0x100   : > { %507 = vst [vmem:[%s883_s13 + $0x8] sm:$0xff] %v503_v20 }
 0x101   : > { %v546_v26 = vadd.f32 %v542_v24, %v538_v25 }
 0x103   : > { %v550_v45 = vmax.f32 %v546_v26, 0.0 }
 0x104   : > { %v515_v29 = vld [vmem:[%s883_s13 + $0x10] sm:$0xff] }
 0x105   : > { %v513_v27 = vld [vmem:[%s883_s13] sm:$0xff]  ;;  %v526_v32 = vmul.f32 %v717_v18, %v515_v29  ;;  %554 = vst [vmem:[%s883_s13 + $0x18] sm:$0xff] %v550_v45 }
 0x106   : > { %v524_v30 = vmul.f32 %v717_v18, %v513_v27 }
 0x107   : > { %v514_v28 = vld [vmem:[%s883_s13 + $0x8] sm:$0xff]  ;;  %v537_v38 = vadd.f32 %v718_v21, %v526_v32 }
 0x108   : > { %v525_v31 = vmul.f32 %v717_v18, %v514_v28  ;;  %v535_v36 = vadd.f32 %v718_v21, %v524_v30 }
 0x109   : > { %v545_v41 = vadd.f32 %v541_v35, %v537_v38 }
 0x10a   : > { %v536_v37 = vadd.f32 %v718_v21, %v525_v31  ;;  %v543_v39 = vadd.f32 %v539_v33, %v535_v36 }
 0x10b   : > { %v549_v44 = vmax.f32 %v545_v41, 0.0 }
 0x10c   : > { %v544_v40 = vadd.f32 %v540_v34, %v536_v37  ;;  %v547_v42 = vmax.f32 %v543_v39, 0.0 }
 0x10d   : > { %553 = vst [vmem:[%s883_s13 + $0x10] sm:$0xff] %v549_v44 }
 0x10e   : > { %v548_v43 = vmax.f32 %v544_v40, 0.0  ;;  %551 = vst [vmem:[%s883_s13] sm:$0xff] %v547_v42 }
 0x110   : > { %552 = vst [vmem:[%s883_s13 + $0x8] sm:$0xff] %v548_v43 }
 0x111 PF: > { %s15_s20 = sadd.s32 1, %s808_s20   ;;  %s941_s18 = smov %s804_s19 }
 0x112   : > { %p12_p5 = scmp.ge.s32.totalorder %s15_s20, 4   ;;  %s942_s19 = smov %s944_s21 }
 0x114   :  { %14 = sbr.rel (!%p12_p5) target bundleno = 2 (0x2), region = 90 }

// kernel: basnet_forward.118
= control target key start
LH: loop header
LB: loop body
LE: loop exit
PB: predicated region body
PF: predicated region fallthrough
CT: control target
= control target key end

     0   :  { %v465_v1 = vmov 0.0   ;;  %vm466_vm0 = vmmov 0   ;;  %s585_s1 = inlined_call_operand.vmem [shape: bf16[384,128], index: 1, kind: input, shape index: {}]   ;;  %s586_s0 = inlined_call_operand.vmem [shape: bf16[16,384], index: 0, kind: input, shape index: {}]   ;;  %s587_s2 = inlined_call_operand.vmem [shape: f32[1,128], index: 2, kind: input, shape index: {}]   ;;  %s588_s3 = inlined_call_operand.vmem [shape: f32[1,128], index: 3, kind: input, shape index: {}]   ;;  %s589_s4 = inlined_call_operand.vmem [shape: f32[16,128], index: 4, kind: output, shape index: {}]  }
   0x1   :  { %v437_v0 = vld [vmem:[%s585_s1 + $0x40] sm:$0xff]   ;;  %415 = vmatprep.subr.bf16.mxu1 %v465_v1  ;;  %431 = vmatprep.mubr.msk.bf16.mxu1 %vm466_vm0, %v465_v1  ;;  %v440_v4 = vld [vmem:[%s585_s1 + $0x48] sm:$0xff]   ;;  %v443_v7 = vld [vmem:[%s585_s1 + $0x50] sm:$0xff]  }
   0x2   :  { %v438_v2 = vld [vmem:[%s585_s1] sm:$0xff]   ;;  %384 = vmatprep.subr.bf16.mxu0 %v437_v0  ;;  %v441_v5 = vld [vmem:[%s585_s1 + $0x8] sm:$0xff]   ;;  %v444_v8 = vld [vmem:[%s585_s1 + $0x10] sm:$0xff]  }
   0x3   :  { %v439_v3 = vld [vmem:[%s585_s1 + $0x80] sm:$0xff]   ;;  %385 = vmatpush3.bf16.msra.mxu0 %v438_v2  ;;  %v442_v6 = vld [vmem:[%s585_s1 + $0x88] sm:$0xff]   ;;  %v445_v9 = vld [vmem:[%s585_s1 + $0x90] sm:$0xff]  }
   0x4   :  { %416 = vmatpush3.bf16.msra.mxu1 %v439_v3  ;;  %386 = vmatprep.subr.bf16.mxu0 %v440_v4  ;;  %v446_v10 = vld [vmem:[%s585_s1 + $0x58] sm:$0xff]   ;;  %v449_v13 = vld [vmem:[%s585_s1 + $0x60] sm:$0xff]   ;;  %v452_v16 = vld [vmem:[%s585_s1 + $0x68] sm:$0xff]  }
   0x5   :  { %417 = vmatprep.subr.bf16.mxu1 %v465_v1  ;;  %v447_v11 = vld [vmem:[%s585_s1 + $0x18] sm:$0xff]   ;;  %v450_v14 = vld [vmem:[%s585_s1 + $0x20] sm:$0xff]   ;;  %v453_v17 = vld [vmem:[%s585_s1 + $0x28] sm:$0xff]  }
   0x6   :  { %v448_v12 = vld [vmem:[%s585_s1 + $0x98] sm:$0xff]   ;;  %v451_v15 = vld [vmem:[%s585_s1 + $0xa0] sm:$0xff]   ;;  %v454_v18 = vld [vmem:[%s585_s1 + $0xa8] sm:$0xff]  }
   0x7   :  { %387 = vmatpush3.bf16.msra.mxu0 %v441_v5  ;;  %v455_v19 = vld [vmem:[%s585_s1 + $0x70] sm:$0xff]   ;;  %v458_v22 = vld [vmem:[%s585_s1 + $0x78] sm:$0xff]   ;;  %v461_v26 = vld [vmem:[%s586_s0] ss:$12 sps:$4 sm:$0xff]  }
   0x8   :  { %418 = vmatpush3.bf16.msra.mxu1 %v442_v6  ;;  %388 = vmatprep.subr.bf16.mxu0 %v443_v7  ;;  %v456_v20 = vld [vmem:[%s585_s1 + $0x30] sm:$0xff]   ;;  %v459_v24 = vld [vmem:[%s585_s1 + $0x38] sm:$0xff]   ;;  %v382_v39 = vld [vmem:[%s587_s2] ss:$0 sm:$0xff] }
   0x9   :  { %419 = vmatprep.subr.bf16.mxu1 %v465_v1  ;;  %v457_v21 = vld [vmem:[%s585_s1 + $0xb0] sm:$0xff]   ;;  %v460_v25 = vld [vmem:[%s585_s1 + $0xb8] sm:$0xff]   ;;  %v383_v41 = vld [vmem:[%s588_s3] ss:$0 sm:$0xff] }
   0xa   :  { %v463_v23 = vld [vmem:[%s586_s0 + $0x4] ss:$12 sps:$4 sm:$0xff]   ;;  %v464_v27 = vld [vmem:[%s586_s0 + $0x8] ss:$12 sps:$4 sm:$0xff]  }
   0xb   :  { %389 = vmatpush3.bf16.msra.mxu0 %v444_v8  ;;  %270 = vmatprep.mubr.bf16.mxu0 %v463_v23 }
   0xc   :  { %420 = vmatpush3.bf16.msra.mxu1 %v445_v9  ;;  %390 = vmatprep.subr.bf16.mxu0 %v446_v10 }
   0xd   :  { %421 = vmatprep.subr.bf16.mxu1 %v465_v1 }
   0xf   :  { %391 = vmatpush3.bf16.msra.mxu0 %v447_v11 }
  0x10   :  { %422 = vmatpush3.bf16.msra.mxu1 %v448_v12  ;;  %392 = vmatprep.subr.bf16.mxu0 %v449_v13 }
  0x11   :  { %423 = vmatprep.subr.bf16.mxu1 %v465_v1 }
  0x13   :  { %393 = vmatpush3.bf16.msra.mxu0 %v450_v14 }
  0x14   :  { %424 = vmatpush3.bf16.msra.mxu1 %v451_v15  ;;  %394 = vmatprep.subr.bf16.mxu0 %v452_v16 }
  0x15   :  { %425 = vmatprep.subr.bf16.mxu1 %v465_v1 }
  0x17   :  { %395 = vmatpush3.bf16.msra.mxu0 %v453_v17 }
  0x18   :  { %426 = vmatpush3.bf16.msra.mxu1 %v454_v18  ;;  %396 = vmatprep.subr.bf16.mxu0 %v455_v19 }
  0x19   :  { %427 = vmatprep.subr.bf16.mxu1 %v465_v1 }
  0x1b   :  { %397 = vmatpush3.bf16.msra.mxu0 %v456_v20 }
  0x1c   :  { %428 = vmatpush3.bf16.msra.mxu1 %v457_v21  ;;  %398 = vmatprep.subr.bf16.mxu0 %v458_v22 }
  0x1d   :  { %429 = vmatprep.subr.bf16.mxu1 %v465_v1 }
  0x1f   :  { %399 = vmatpush3.bf16.msra.mxu0 %v459_v24 }
  0x20   :  { %430 = vmatpush3.bf16.msra.mxu1 %v460_v25 }
  0x22   :  { %271 = vmatmul.mubr.bf16.vlgmr.msra.gmra.mrb[0].mxu0 %v461_v26 }
  0x23   :  { %432 = vmatmul.mubr.bf16.vlgmr.msra.gmra.mrb[0].mxu1 %v464_v27 }
  0xf5   :  { %v400_v28 = vpop.f32.mrb[0].mxu0 }
  0xf6   :  { %v313_v29 = vpop.f32.mrb[0].mxu1  ;;  %v401_v30 = vpop.f32.mrb[1].mxu0 }
  0xf7   :  { %v402_v31 = vadd.f32 %v401_v30, %v400_v28  ;;  %v433_v32 = vpop.f32.mrb[1].mxu1  ;;  %v403_v33 = vpop.f32.mrb[2].mxu0 }
  0xf8   :  { %v316_v34 = vpop.f32.mrb[2].mxu1  ;;  %v404_v35 = vpop.f32.mrb[3].mxu0 }
  0xf9   :  { %v314_v36 = vadd.f32 %v402_v31, %v313_v29  ;;  %v405_v37 = vadd.f32 %v404_v35, %v403_v33  ;;  %v434_v38 = vpop.f32.mrb[3].mxu1 }
  0xfb   :  { %v317_v40 = vadd.f32 %v405_v37, %v316_v34  ;;  %v336_v42 = vmul.f32 %v382_v39, %v314_v36 }
  0xfd   :  { %v345_v43 = vadd.f32 %v383_v41, %v336_v42  ;;  %v337_v44 = vmul.f32 %v382_v39, %v317_v40 }
  0xff   :  { %v347_v45 = vmax.f32 %v345_v43, 0.0  ;;  %v346_v46 = vadd.f32 %v383_v41, %v337_v44 }
 0x101   :  { %349 = vst [vmem:[%s589_s4] sm:$0xff] %v347_v45  ;;  %v348_v47 = vmax.f32 %v346_v46, 0.0 }
 0x103   :  { %350 = vst [vmem:[%s589_s4 + $0x8] sm:$0xff] %v348_v47 }

// kernel: basnet_forward.116
= control target key start
LH: loop header
LB: loop body
LE: loop exit
PB: predicated region body
PF: predicated region fallthrough
CT: control target
= control target key end

     0   :  { %v223_v0 = vmov 0.0   ;;  %vm224_vm0 = vmmov 0   ;;  %s289_s1 = inlined_call_operand.vmem [shape: bf16[128,128], index: 1, kind: input, shape index: {}]   ;;  %s290_s0 = inlined_call_operand.vmem [shape: bf16[16,128], index: 0, kind: input, shape index: {}]   ;;  %s291_s2 = inlined_call_operand.vmem [shape: f32[1,128], index: 2, kind: input, shape index: {}]   ;;  %s292_s3 = inlined_call_operand.vmem [shape: f32[1,128], index: 3, kind: input, shape index: {}]   ;;  %s293_s4 = inlined_call_operand.vmem [shape: f32[16,128], index: 4, kind: output, shape index: {}]  }
   0x1   :  { %192 = vmatprep.subr.bf16.mxu0 %v223_v0  ;;  %v214_v1 = vld [vmem:[%s289_s1] sm:$0xff]   ;;  %208 = vmatprep.mubr.msk.bf16.mxu0 %vm224_vm0, %v223_v0  ;;  %v215_v2 = vld [vmem:[%s289_s1 + $0x8] sm:$0xff]   ;;  %v216_v3 = vld [vmem:[%s289_s1 + $0x10] sm:$0xff]  }
   0x2   :  { %193 = vmatpush3.bf16.msra.mxu0 %v214_v1  ;;  %v217_v4 = vld [vmem:[%s289_s1 + $0x18] sm:$0xff]   ;;  %v218_v5 = vld [vmem:[%s289_s1 + $0x20] sm:$0xff]   ;;  %v219_v6 = vld [vmem:[%s289_s1 + $0x28] sm:$0xff]  }
   0x3   :  { %194 = vmatprep.subr.bf16.mxu0 %v223_v0  ;;  %v220_v7 = vld [vmem:[%s289_s1 + $0x30] sm:$0xff]   ;;  %v221_v8 = vld [vmem:[%s289_s1 + $0x38] sm:$0xff]   ;;  %v222_v9 = vld [vmem:[%s290_s0] sm:$0xff]  }
   0x4   :  { %v181_v11 = vld [vmem:[%s291_s2] ss:$0 sm:$0xff] }
   0x5   :  { %v182_v13 = vld [vmem:[%s292_s3] ss:$0 sm:$0xff] }
   0x6   :  { %195 = vmatpush3.bf16.msra.mxu0 %v215_v2 }
   0x7   :  { %196 = vmatprep.subr.bf16.mxu0 %v223_v0 }
   0xa   :  { %197 = vmatpush3.bf16.msra.mxu0 %v216_v3 }
   0xb   :  { %198 = vmatprep.subr.bf16.mxu0 %v223_v0 }
   0xe   :  { %199 = vmatpush3.bf16.msra.mxu0 %v217_v4 }
   0xf   :  { %200 = vmatprep.subr.bf16.mxu0 %v223_v0 }
  0x12   :  { %201 = vmatpush3.bf16.msra.mxu0 %v218_v5 }
  0x13   :  { %202 = vmatprep.subr.bf16.mxu0 %v223_v0 }
  0x16   :  { %203 = vmatpush3.bf16.msra.mxu0 %v219_v6 }
  0x17   :  { %204 = vmatprep.subr.bf16.mxu0 %v223_v0 }
  0x1a   :  { %205 = vmatpush3.bf16.msra.mxu0 %v220_v7 }
  0x1b   :  { %206 = vmatprep.subr.bf16.mxu0 %v223_v0 }
  0x1e   :  { %207 = vmatpush3.bf16.msra.mxu0 %v221_v8 }
  0x21   :  { %209 = vmatmul.mubr.bf16.vlgmr.msra.gmra.mrb[0].mxu0 %v222_v9 }
  0xf4   :  { %v132_v10 = vpop.f32.mrb[0].mxu0 }
  0xf5   :  { %v210_v12 = vpop.f32.mrb[1].mxu0  ;;  %v155_v15 = vmul.f32 %v181_v11, %v132_v10 }
  0xf6   :  { %v135_v14 = vpop.f32.mrb[2].mxu0 }
  0xf7   :  { %v211_v16 = vpop.f32.mrb[3].mxu0  ;;  %v164_v17 = vadd.f32 %v182_v13, %v155_v15  ;;  %v156_v18 = vmul.f32 %v181_v11, %v135_v14 }
  0xf9   :  { %166 = vst [vmem:[%s293_s4] sm:$0xff] %v164_v17  ;;  %v165_v19 = vadd.f32 %v182_v13, %v156_v18 }
  0xfb   :  { %167 = vst [vmem:[%s293_s4 + $0x8] sm:$0xff] %v165_v19 }

// kernel: basnet_forward.119
= control target key start
LH: loop header
LB: loop body
LE: loop exit
PB: predicated region body
PF: predicated region fallthrough
CT: control target
= control target key end

     0   :  { %v232_v0 = vmov 0.0   ;;  %vm233_vm0 = vmmov 0   ;;  %s309_s1 = inlined_call_operand.vmem [shape: bf16[128,128], index: 1, kind: input, shape index: {}]   ;;  %s310_s0 = inlined_call_operand.vmem [shape: bf16[16,128], index: 0, kind: input, shape index: {}]   ;;  %s311_s2 = inlined_call_operand.vmem [shape: f32[1,128], index: 2, kind: input, shape index: {}]   ;;  %s312_s3 = inlined_call_operand.vmem [shape: f32[1,128], index: 3, kind: input, shape index: {}]   ;;  %s313_s4 = inlined_call_operand.vmem [shape: f32[16,128], index: 4, kind: input, shape index: {}]   ;;  %s314_s5 = inlined_call_operand.vmem [shape: f32[16,128], index: 5, kind: output, shape index: {}]  }
   0x1   :  { %201 = vmatprep.subr.bf16.mxu0 %v232_v0  ;;  %v223_v1 = vld [vmem:[%s309_s1] sm:$0xff]   ;;  %217 = vmatprep.mubr.msk.bf16.mxu0 %vm233_vm0, %v232_v0  ;;  %v224_v2 = vld [vmem:[%s309_s1 + $0x8] sm:$0xff]   ;;  %v225_v3 = vld [vmem:[%s309_s1 + $0x10] sm:$0xff]  }
   0x2   :  { %202 = vmatpush3.bf16.msra.mxu0 %v223_v1  ;;  %v226_v4 = vld [vmem:[%s309_s1 + $0x18] sm:$0xff]   ;;  %v227_v5 = vld [vmem:[%s309_s1 + $0x20] sm:$0xff]   ;;  %v228_v6 = vld [vmem:[%s309_s1 + $0x28] sm:$0xff]  }
   0x3   :  { %203 = vmatprep.subr.bf16.mxu0 %v232_v0  ;;  %v229_v7 = vld [vmem:[%s309_s1 + $0x30] sm:$0xff]   ;;  %v230_v8 = vld [vmem:[%s309_s1 + $0x38] sm:$0xff]   ;;  %v231_v9 = vld [vmem:[%s310_s0] sm:$0xff]  }
   0x4   :  { %v190_v11 = vld [vmem:[%s311_s2] ss:$0 sm:$0xff]  ;;  %v170_v20 = vld [vmem:[%s313_s4 + $0x8] sm:$0xff] }
   0x5   :  { %v191_v13 = vld [vmem:[%s312_s3] ss:$0 sm:$0xff] }
   0x6   :  { %204 = vmatpush3.bf16.msra.mxu0 %v224_v2  ;;  %v169_v17 = vld [vmem:[%s313_s4] sm:$0xff] }
   0x7   :  { %205 = vmatprep.subr.bf16.mxu0 %v232_v0 }
   0xa   :  { %206 = vmatpush3.bf16.msra.mxu0 %v225_v3 }
   0xb   :  { %207 = vmatprep.subr.bf16.mxu0 %v232_v0 }
   0xe   :  { %208 = vmatpush3.bf16.msra.mxu0 %v226_v4 }
   0xf   :  { %209 = vmatprep.subr.bf16.mxu0 %v232_v0 }
  0x12   :  { %210 = vmatpush3.bf16.msra.mxu0 %v227_v5 }
  0x13   :  { %211 = vmatprep.subr.bf16.mxu0 %v232_v0 }
  0x16   :  { %212 = vmatpush3.bf16.msra.mxu0 %v228_v6 }
  0x17   :  { %213 = vmatprep.subr.bf16.mxu0 %v232_v0 }
  0x1a   :  { %214 = vmatpush3.bf16.msra.mxu0 %v229_v7 }
  0x1b   :  { %215 = vmatprep.subr.bf16.mxu0 %v232_v0 }
  0x1e   :  { %216 = vmatpush3.bf16.msra.mxu0 %v230_v8 }
  0x21   :  { %218 = vmatmul.mubr.bf16.vlgmr.msra.gmra.mrb[0].mxu0 %v231_v9 }
  0xf4   :  { %v135_v10 = vpop.f32.mrb[0].mxu0 }
  0xf5   :  { %v219_v12 = vpop.f32.mrb[1].mxu0  ;;  %v158_v15 = vmul.f32 %v190_v11, %v135_v10 }
  0xf6   :  { %v138_v14 = vpop.f32.mrb[2].mxu0 }
  0xf7   :  { %v220_v16 = vpop.f32.mrb[3].mxu0  ;;  %v167_v18 = vadd.f32 %v191_v13, %v158_v15  ;;  %v159_v19 = vmul.f32 %v190_v11, %v138_v14 }
  0xf9   :  { %v171_v21 = vadd.f32 %v169_v17, %v167_v18  ;;  %v168_v22 = vadd.f32 %v191_v13, %v159_v19 }
  0xfb   :  { %v173_v23 = vmax.f32 %v171_v21, 0.0  ;;  %v172_v24 = vadd.f32 %v170_v20, %v168_v22 }
  0xfd   :  { %175 = vst [vmem:[%s314_s5] sm:$0xff] %v173_v23  ;;  %v174_v25 = vmax.f32 %v172_v24, 0.0 }
  0xff   :  { %176 = vst [vmem:[%s314_s5 + $0x8] sm:$0xff] %v174_v25 }

// kernel: basnet_forward.120
= control target key start
LH: loop header
LB: loop body
LE: loop exit
PB: predicated region body
PF: predicated region fallthrough
CT: control target
= control target key end

     0   :  { %v225_v0 = vmov 0.0   ;;  %vm226_vm0 = vmmov 0   ;;  %s291_s1 = inlined_call_operand.vmem [shape: bf16[128,128], index: 1, kind: input, shape index: {}]   ;;  %s292_s0 = inlined_call_operand.vmem [shape: bf16[16,128], index: 0, kind: input, shape index: {}]   ;;  %s293_s2 = inlined_call_operand.vmem [shape: f32[1,128], index: 2, kind: input, shape index: {}]   ;;  %s294_s3 = inlined_call_operand.vmem [shape: f32[1,128], index: 3, kind: input, shape index: {}]   ;;  %s295_s4 = inlined_call_operand.vmem [shape: f32[16,128], index: 4, kind: output, shape index: {}]  }
   0x1   :  { %194 = vmatprep.subr.bf16.mxu0 %v225_v0  ;;  %v216_v1 = vld [vmem:[%s291_s1] sm:$0xff]   ;;  %210 = vmatprep.mubr.msk.bf16.mxu0 %vm226_vm0, %v225_v0  ;;  %v217_v2 = vld [vmem:[%s291_s1 + $0x8] sm:$0xff]   ;;  %v218_v3 = vld [vmem:[%s291_s1 + $0x10] sm:$0xff]  }
   0x2   :  { %195 = vmatpush3.bf16.msra.mxu0 %v216_v1  ;;  %v219_v4 = vld [vmem:[%s291_s1 + $0x18] sm:$0xff]   ;;  %v220_v5 = vld [vmem:[%s291_s1 + $0x20] sm:$0xff]   ;;  %v221_v6 = vld [vmem:[%s291_s1 + $0x28] sm:$0xff]  }
   0x3   :  { %196 = vmatprep.subr.bf16.mxu0 %v225_v0  ;;  %v222_v7 = vld [vmem:[%s291_s1 + $0x30] sm:$0xff]   ;;  %v223_v8 = vld [vmem:[%s291_s1 + $0x38] sm:$0xff]   ;;  %v224_v9 = vld [vmem:[%s292_s0] sm:$0xff]  }
   0x4   :  { %v183_v11 = vld [vmem:[%s293_s2] ss:$0 sm:$0xff] }
   0x5   :  { %v184_v13 = vld [vmem:[%s294_s3] ss:$0 sm:$0xff] }
   0x6   :  { %197 = vmatpush3.bf16.msra.mxu0 %v217_v2 }
   0x7   :  { %198 = vmatprep.subr.bf16.mxu0 %v225_v0 }
   0xa   :  { %199 = vmatpush3.bf16.msra.mxu0 %v218_v3 }
   0xb   :  { %200 = vmatprep.subr.bf16.mxu0 %v225_v0 }
   0xe   :  { %201 = vmatpush3.bf16.msra.mxu0 %v219_v4 }
   0xf   :  { %202 = vmatprep.subr.bf16.mxu0 %v225_v0 }
  0x12   :  { %203 = vmatpush3.bf16.msra.mxu0 %v220_v5 }
  0x13   :  { %204 = vmatprep.subr.bf16.mxu0 %v225_v0 }
  0x16   :  { %205 = vmatpush3.bf16.msra.mxu0 %v221_v6 }
  0x17   :  { %206 = vmatprep.subr.bf16.mxu0 %v225_v0 }
  0x1a   :  { %207 = vmatpush3.bf16.msra.mxu0 %v222_v7 }
  0x1b   :  { %208 = vmatprep.subr.bf16.mxu0 %v225_v0 }
  0x1e   :  { %209 = vmatpush3.bf16.msra.mxu0 %v223_v8 }
  0x21   :  { %211 = vmatmul.mubr.bf16.vlgmr.msra.gmra.mrb[0].mxu0 %v224_v9 }
  0xf4   :  { %v132_v10 = vpop.f32.mrb[0].mxu0 }
  0xf5   :  { %v212_v12 = vpop.f32.mrb[1].mxu0  ;;  %v155_v15 = vmul.f32 %v183_v11, %v132_v10 }
  0xf6   :  { %v135_v14 = vpop.f32.mrb[2].mxu0 }
  0xf7   :  { %v213_v16 = vpop.f32.mrb[3].mxu0  ;;  %v164_v17 = vadd.f32 %v184_v13, %v155_v15  ;;  %v156_v18 = vmul.f32 %v183_v11, %v135_v14 }
  0xf9   :  { %v166_v19 = vmax.f32 %v164_v17, 0.0  ;;  %v165_v20 = vadd.f32 %v184_v13, %v156_v18 }
  0xfb   :  { %168 = vst [vmem:[%s295_s4] sm:$0xff] %v166_v19  ;;  %v167_v21 = vmax.f32 %v165_v20, 0.0 }
  0xfd   :  { %169 = vst [vmem:[%s295_s4 + $0x8] sm:$0xff] %v167_v21 }

// kernel: basnet_forward.138
= control target key start
LH: loop header
LB: loop body
LE: loop exit
PB: predicated region body
PF: predicated region fallthrough
CT: control target
= control target key end

     0   :  { %s1092_s15 = smov 0   ;;  %s1094_s16 = smov 0   ;;  %s1235_s0 = inlined_call_operand.vmem [shape: bf16[16,1024], index: 0, kind: input, shape index: {}]   ;;  %s1236_s1 = inlined_call_operand.vmem [shape: bf16[1024,128], index: 1, kind: input, shape index: {}]   ;;  %s1237_s2 = inlined_call_operand.vmem [shape: f32[1,128], index: 2, kind: input, shape index: {}]   ;;  %s1238_s3 = inlined_call_operand.vmem [shape: f32[1,128], index: 3, kind: input, shape index: {}]   ;;  %s1239_s4 = inlined_call_operand.vmem [shape: f32[16,128], index: 4, kind: output, shape index: {}]  }
   0x1   :  { %s1096_s17 = smov 0   ;;  %s1098_s18 = smov 0  }
   0x2   :  { %s1100_s19 = smov 0  }
   0x3 LB: > { %s26_s20 = sadd.s32 1, %s1060_s18  ;;  %p49_p1 = scmp.ne.s32.totalorder %s1052_s16, %s1048_s15  ;;  %s1064_s19 = sphi %s1100_s19, %s14_s19   ;;  %s1060_s18 = sphi %s1098_s18, %s1243_s18   ;;  %s1056_s17 = sphi %s1096_s17, %s1242_s17   ;;  %s1052_s16 = sphi %s1094_s16, %s1241_s16   ;;  %s1048_s15 = sphi %s1092_s15, %s1240_s15  }
   0x4   : > { %p27_p0 = scmp.ge.s32.totalorder %s26_s20, 2  ;;  %p50_p2 = scmp.eq.s32.totalorder %s1064_s19, 0 }
   0x5   : > { %s42_s22 = sadd.s32 1, %s1052_s16  ;;  %p850_p5 = scmp.ge.s32.totalorder %s1064_s19, 2 }
   0x6   : > { %s1245_s20 = smov (%p27_p0, %s26_s20), 0  ;;  %p51_p3 = por %p50_p2, %p49_p1 }
   0x7   : > { %s38_s21 = ssub.s32 %s1060_s18, %s1245_s20  ;;  %195 = sbr.rel (%p850_p5) target bundleno = 21 (0x15), region = 24 }
   0x8   : > { %p40_p4 = scmp.eq.s32.totalorder %s38_s21, 0 }
   0xa   : > { %s1127_s23 = scalar_select %p40_p4, %s1052_s16, %s42_s22  }
   0xe   : > { %198 = sbr.rel (!%p51_p3) target bundleno = 21 (0x15), region = 28  ;;  %s200_s24 = sand.u32 (%p51_p3), 1, %s1052_s16  }
   0xf   : > { %s902_s25 = sshll.u32 (%p51_p3), %s1060_s18, 4  ;;  %s851_s26 = sshll.u32 (%p51_p3), %s200_s24, 5 }
  0x10   : > { %s208_s29 = scalar_lea.vmem (%p51_p3), %s1235_s0, %s902_s25  ;;  %s202_s30 = scalar_lea.vmem (%p51_p3), [#allocation2], %s851_s26 }
  0x11   : > { %v221_v0 = vld [vmem:[%s208_s29] sm:$0xff] (%p51_p3)  ;;  %v223_v1 = vld [vmem:[%s208_s29 + $0x8] sm:$0xff] (%p51_p3) }
  0x12   : > { %v225_v2 = vld [vmem:[%s208_s29 + $0x20] sm:$0xff] (%p51_p3)  ;;  %222 = vst [vmem:[%s202_s30] sm:$0xff] (%p51_p3), %v221_v0  ;;  %224 = vst [vmem:[%s202_s30 + $0x8] sm:$0xff] (%p51_p3), %v223_v1  ;;  %v227_v3 = vld [vmem:[%s208_s29 + $0x28] sm:$0xff] (%p51_p3) }
  0x13   : > { %226 = vst [vmem:[%s202_s30 + $0x10] sm:$0xff] (%p51_p3), %v225_v2  ;;  %228 = vst [vmem:[%s202_s30 + $0x18] sm:$0xff] (%p51_p3), %v227_v3 }
  0x15 PF: > { %p854_p6 = scmp.ge.s32.totalorder %s1064_s19, 1  ;;  %p245_p7 = scmp.lt.s32.totalorder %s1064_s19, 3 }
  0x17   : > { %p246_p8 = pnand %p854_p6, %p245_p7 }
  0x18   : > { %s252_s5 = sand.u32 (!%p246_p8), 1, %s1048_s15   ;;  %s856_s6 = sshll.u32 (!%p246_p8), %s1056_s17, 6 }
  0x19   : > { %249 = sbr.rel (%p246_p8) target bundleno = 310 (0x136), region = 55  ;;  %s855_s7 = sshll.u32 (!%p246_p8), %s252_s5, 5 }
  0x1a   : > { %p297_p9 = scmp.lt.s32.totalorder (!%p246_p8), %s856_s6, 127  ;;  %s1144_s12 = scalar_lea.vmem (!%p246_p8), [#allocation2], %s855_s7 }
  0x1b   : > { %p858_p10 = scmp.ne.s32.totalorder (!%p246_p8), %s1056_s17, 0 }
  0x20   : > { %s1247_s6 = smov (!%p297_p9, %s856_s6), 127  ;;  %324 = sbr.rel (%p858_p10) target bundleno = 39 (0x27), region = 63 }
  0x21   : > { %s857_s8 = sshll.u32 %s1247_s6, 2  ;;  %v1066_v4 = vmov (!%p858_p10), 0.0  }
  0x22   : > { %s1142_s11 = scalar_lea.vmem %s1236_s1, %s857_s8  ;;  %325 = vst [vmem:[%s1239_s4] sm:$0xff] (!%p858_p10), %v1066_v4  ;;  %326 = vst [vmem:[%s1239_s4 + $0x8] sm:$0xff] (!%p858_p10), %v1066_v4 }
  0x27 PF: > { %v988_v5 = vld [vmem:[%s1142_s11 + $0x40] sm:$0xff]   ;;  %v992_v9 = vld [vmem:[%s1142_s11 + $0x48] sm:$0xff]   ;;  %v996_v13 = vld [vmem:[%s1142_s11 + $0x50] sm:$0xff]   ;;  %p895_p11 = scmp.ne.s32.totalorder %s1056_s17, 1 }
  0x28   : > { %v989_v6 = vld [vmem:[%s1142_s11 + $0xc0] sm:$0xff]   ;;  %903 = vmatprep.subr.bf16.mxu0 %v988_v5  ;;  %v993_v10 = vld [vmem:[%s1142_s11 + $0xc8] sm:$0xff]   ;;  %v997_v14 = vld [vmem:[%s1142_s11 + $0xd0] sm:$0xff]  }
  0x29   : > { %v990_v7 = vld [vmem:[%s1142_s11] sm:$0xff]   ;;  %925 = vmatprep.subr.bf16.mxu1 %v989_v6  ;;  %v994_v11 = vld [vmem:[%s1142_s11 + $0x8] sm:$0xff]   ;;  %v998_v15 = vld [vmem:[%s1142_s11 + $0x10] sm:$0xff]  }
  0x2a   : > { %v991_v8 = vld [vmem:[%s1142_s11 + $0x80] sm:$0xff]   ;;  %904 = vmatpush3.bf16.msra.mxu0 %v990_v7  ;;  %v995_v12 = vld [vmem:[%s1142_s11 + $0x88] sm:$0xff]   ;;  %v999_v16 = vld [vmem:[%s1142_s11 + $0x90] sm:$0xff]  }
  0x2b   : > { %926 = vmatpush3.bf16.msra.mxu1 %v991_v8  ;;  %905 = vmatprep.subr.bf16.mxu0 %v992_v9  ;;  %v1000_v17 = vld [vmem:[%s1142_s11 + $0x58] sm:$0xff]   ;;  %v1004_v21 = vld [vmem:[%s1142_s11 + $0x60] sm:$0xff]   ;;  %v1008_v25 = vld [vmem:[%s1142_s11 + $0x68] sm:$0xff]  }
  0x2c   : > { %927 = vmatprep.subr.bf16.mxu1 %v993_v10  ;;  %v1001_v18 = vld [vmem:[%s1142_s11 + $0xd8] sm:$0xff]   ;;  %v1005_v22 = vld [vmem:[%s1142_s11 + $0xe0] sm:$0xff]   ;;  %v1009_v26 = vld [vmem:[%s1142_s11 + $0xe8] sm:$0xff]  }
  0x2d   : > { %v1002_v19 = vld [vmem:[%s1142_s11 + $0x18] sm:$0xff]   ;;  %v1006_v23 = vld [vmem:[%s1142_s11 + $0x20] sm:$0xff]   ;;  %v1010_v27 = vld [vmem:[%s1142_s11 + $0x28] sm:$0xff]  }
  0x2e   : > { %906 = vmatpush3.bf16.msra.mxu0 %v994_v11  ;;  %v1003_v20 = vld [vmem:[%s1142_s11 + $0x98] sm:$0xff]   ;;  %v1007_v24 = vld [vmem:[%s1142_s11 + $0xa0] sm:$0xff]   ;;  %v1011_v28 = vld [vmem:[%s1142_s11 + $0xa8] sm:$0xff]  }
  0x2f   : > { %928 = vmatpush3.bf16.msra.mxu1 %v995_v12  ;;  %907 = vmatprep.subr.bf16.mxu0 %v996_v13  ;;  %v1012_v29 = vld [vmem:[%s1142_s11 + $0x70] sm:$0xff]   ;;  %v1016_v33 = vld [vmem:[%s1142_s11 + $0x78] sm:$0xff]   ;;  %v327_v50 = vld [vmem:[%s1239_s4] sm:$0xff] }
  0x30   : > { %929 = vmatprep.subr.bf16.mxu1 %v997_v14  ;;  %v1013_v30 = vld [vmem:[%s1142_s11 + $0xf0] sm:$0xff]   ;;  %v1017_v34 = vld [vmem:[%s1142_s11 + $0xf8] sm:$0xff]   ;;  %v328_v55 = vld [vmem:[%s1239_s4 + $0x8] sm:$0xff] }
  0x31   : > { %v1014_v31 = vld [vmem:[%s1142_s11 + $0x30] sm:$0xff]   ;;  %v1018_v35 = vld [vmem:[%s1142_s11 + $0x38] sm:$0xff]   ;;  %v896_v60 = vld [vmem:[%s1237_s2] ss:$0 sm:$0xff] (!%p895_p11) }
  0x32   : > { %908 = vmatpush3.bf16.msra.mxu0 %v998_v15  ;;  %v1015_v32 = vld [vmem:[%s1142_s11 + $0xb0] sm:$0xff]   ;;  %v1019_v36 = vld [vmem:[%s1142_s11 + $0xb8] sm:$0xff]   ;;  %v897_v61 = vld [vmem:[%s1238_s3] ss:$0 sm:$0xff] (!%p895_p11) }
  0x33   : > { %930 = vmatpush3.bf16.msra.mxu1 %v999_v16  ;;  %909 = vmatprep.subr.bf16.mxu0 %v1000_v17  ;;  %v1020_v37 = vld [vmem:[%s1144_s12] ss:$16 sps:$4 sm:$0xff]   ;;  %v1022_v38 = vld [vmem:[%s1144_s12 + $0x4] ss:$16 sps:$4 sm:$0xff]   ;;  %v1023_v39 = vld [vmem:[%s1144_s12 + $0x8] ss:$16 sps:$4 sm:$0xff]  }
  0x34   : > { %931 = vmatprep.subr.bf16.mxu1 %v1001_v18  ;;  %v1025_v40 = vld [vmem:[%s1144_s12 + $0xc] ss:$16 sps:$4 sm:$0xff]   ;;  %641 = vmatprep.mubr.bf16.mxu0 %v1022_v38 }
  0x35   : > { %682 = vmatprep.mubr.bf16.mxu1 %v1025_v40 }
  0x36   : > { %910 = vmatpush3.bf16.msra.mxu0 %v1002_v19 }
  0x37   : > { %932 = vmatpush3.bf16.msra.mxu1 %v1003_v20  ;;  %911 = vmatprep.subr.bf16.mxu0 %v1004_v21 }
  0x38   : > { %933 = vmatprep.subr.bf16.mxu1 %v1005_v22 }
  0x3a   : > { %912 = vmatpush3.bf16.msra.mxu0 %v1006_v23 }
  0x3b   : > { %934 = vmatpush3.bf16.msra.mxu1 %v1007_v24  ;;  %913 = vmatprep.subr.bf16.mxu0 %v1008_v25 }
  0x3c   : > { %935 = vmatprep.subr.bf16.mxu1 %v1009_v26 }
  0x3e   : > { %914 = vmatpush3.bf16.msra.mxu0 %v1010_v27 }
  0x3f   : > { %936 = vmatpush3.bf16.msra.mxu1 %v1011_v28  ;;  %915 = vmatprep.subr.bf16.mxu0 %v1012_v29 }
  0x40   : > { %937 = vmatprep.subr.bf16.mxu1 %v1013_v30 }
  0x42   : > { %916 = vmatpush3.bf16.msra.mxu0 %v1014_v31 }
  0x43   : > { %938 = vmatpush3.bf16.msra.mxu1 %v1015_v32  ;;  %917 = vmatprep.subr.bf16.mxu0 %v1016_v33 }
  0x44   : > { %939 = vmatprep.subr.bf16.mxu1 %v1017_v34 }
  0x46   : > { %918 = vmatpush3.bf16.msra.mxu0 %v1018_v35 }
  0x47   : > { %940 = vmatpush3.bf16.msra.mxu1 %v1019_v36 }
  0x49   : > { %642 = vmatmul.mubr.bf16.vlgmr.msra.gmra.mrb[0].mxu0 %v1020_v37 }
  0x4a   : > { %683 = vmatmul.mubr.bf16.vlgmr.msra.gmra.mrb[0].mxu1 %v1023_v39 }
 0x11c   : > { %v919_v41 = vpop.f32.mrb[0].mxu0 }
 0x11d   : > { %v941_v42 = vpop.f32.mrb[0].mxu1  ;;  %v920_v43 = vpop.f32.mrb[1].mxu0 }
 0x11e   : > { %v921_v44 = vadd.f32 %v920_v43, %v919_v41  ;;  %v942_v45 = vpop.f32.mrb[1].mxu1  ;;  %v922_v46 = vpop.f32.mrb[2].mxu0 }
 0x11f   : > { %v943_v47 = vadd.f32 %v942_v45, %v941_v42  ;;  %v944_v48 = vpop.f32.mrb[2].mxu1  ;;  %v923_v49 = vpop.f32.mrb[3].mxu0 }
 0x120   : > { %v924_v51 = vadd.f32 %v923_v49, %v922_v46  ;;  %v945_v52 = vpop.f32.mrb[3].mxu1 }
 0x121   : > { %v685_v53 = vadd.f32 %v943_v47, %v921_v44  ;;  %v946_v54 = vadd.f32 %v945_v52, %v944_v48  ;;  %698 = sbr.rel (%p895_p11) target bundleno = 310 (0x136), region = 67 }
 0x123   : > { %v691_v56 = vadd.f32 %v685_v53, %v327_v50  ;;  %v688_v57 = vadd.f32 %v946_v54, %v924_v51 }
 0x125   : > { %693 = vst [vmem:[%s1239_s4] sm:$0xff] %v691_v56  ;;  %v692_v58 = vadd.f32 %v688_v57, %v328_v55 }
 0x127   : > { %694 = vst [vmem:[%s1239_s4 + $0x8] sm:$0xff] %v692_v58 }
 0x12c   : > { %v699_v59 = vld [vmem:[%s1239_s4] sm:$0xff] }
 0x12d   : > { %v708_v62 = vmul.f32 %v896_v60, %v699_v59 }
 0x12e   : > { %v700_v63 = vld [vmem:[%s1239_s4 + $0x8] sm:$0xff] }
 0x12f   : > { %v709_v0 = vmul.f32 %v896_v60, %v700_v63  ;;  %v717_v1 = vadd.f32 %v897_v61, %v708_v62 }
 0x131   : > { %v718_v2 = vadd.f32 %v897_v61, %v709_v0  ;;  %v719_v3 = vmax.f32 %v717_v1, 0.0 }
 0x133   : > { %v720_v4 = vmax.f32 %v718_v2, 0.0  ;;  %721 = vst [vmem:[%s1239_s4] sm:$0xff] %v719_v3 }
 0x135   : > { %722 = vst [vmem:[%s1239_s4 + $0x8] sm:$0xff] %v720_v4 }
 0x136 PF: > { %s14_s19 = sadd.s32 1, %s1064_s19   ;;  %s1240_s15 = smov %s1052_s16 }
 0x137   : > { %p11_p12 = scmp.ge.s32.totalorder %s14_s19, 4   ;;  %s1241_s16 = smov %s1127_s23 }
 0x138   : > { %s1242_s17 = smov %s1060_s18  ;;  %s1243_s18 = smov %s1245_s20 }
 0x139   :  { %13 = sbr.rel (!%p11_p12) target bundleno = 3 (0x3), region = 111 }

// kernel: basnet_forward.136
= control target key start
LH: loop header
LB: loop body
LE: loop exit
PB: predicated region body
PF: predicated region fallthrough
CT: control target
= control target key end

     0   :  { %v276_v1 = vmov 0   ;;  %v194_v18 = vlaneseq  ;;  %s371_s1 = inlined_call_operand.vmem [shape: bf16[128,256], index: 1, kind: input, shape index: {}]   ;;  %s372_s0 = inlined_call_operand.vmem [shape: bf16[16,128], index: 0, kind: input, shape index: {}]   ;;  %s373_s2 = inlined_call_operand.vmem [shape: f32[1,256], index: 2, kind: input, shape index: {}]   ;;  %s374_s3 = inlined_call_operand.vmem [shape: f32[1,256], index: 3, kind: input, shape index: {}]   ;;  %s375_s4 = inlined_call_operand.vmem [shape: f32[16,256], index: 4, kind: output, shape index: {}]  }
   0x1   :  { %v251_v0 = vld [vmem:[%s371_s1 + $0x4] ss:$8 sps:$4 sm:$0xff]   ;;  %166 = vmatprep.mubr.bf16.mxu0 %v276_v1  ;;  %v253_v2 = vld [vmem:[%s371_s1] ss:$8 sps:$4 sm:$0xff]   ;;  %v254_v3 = vld [vmem:[%s371_s1 + $0x14] ss:$8 sps:$4 sm:$0xff]  }
   0x2   :  { %134 = vmatprep.subr.bf16.mxu0 %v251_v0  ;;  %v256_v4 = vld [vmem:[%s371_s1 + $0x10] ss:$8 sps:$4 sm:$0xff]   ;;  %v257_v5 = vld [vmem:[%s371_s1 + $0x24] ss:$8 sps:$4 sm:$0xff]   ;;  %v259_v6 = vld [vmem:[%s371_s1 + $0x20] ss:$8 sps:$4 sm:$0xff]  }
   0x3   :  { %135 = vmatpush1.bf16.msra.mxu0 %v253_v2  ;;  %v260_v7 = vld [vmem:[%s371_s1 + $0x34] ss:$8 sps:$4 sm:$0xff]   ;;  %v262_v8 = vld [vmem:[%s371_s1 + $0x30] ss:$8 sps:$4 sm:$0xff]   ;;  %v263_v9 = vld [vmem:[%s371_s1 + $0x44] ss:$8 sps:$4 sm:$0xff]  }
   0x4   :  { %136 = vmatprep.subr.bf16.mxu0 %v254_v3  ;;  %v265_v10 = vld [vmem:[%s371_s1 + $0x40] ss:$8 sps:$4 sm:$0xff]   ;;  %v266_v11 = vld [vmem:[%s371_s1 + $0x54] ss:$8 sps:$4 sm:$0xff]   ;;  %v268_v12 = vld [vmem:[%s371_s1 + $0x50] ss:$8 sps:$4 sm:$0xff]  }
   0x5   :  { %v269_v13 = vld [vmem:[%s371_s1 + $0x64] ss:$8 sps:$4 sm:$0xff]   ;;  %v271_v14 = vld [vmem:[%s371_s1 + $0x60] ss:$8 sps:$4 sm:$0xff]   ;;  %v272_v15 = vld [vmem:[%s371_s1 + $0x74] ss:$8 sps:$4 sm:$0xff]  }
   0x6   :  { %v274_v16 = vld [vmem:[%s371_s1 + $0x70] ss:$8 sps:$4 sm:$0xff]   ;;  %v275_v17 = vld [vmem:[%s372_s0] sm:$0xff]   ;;  %v195_v19 = vshrl.u32 %v194_v18, 7 }
   0x7   :  { %137 = vmatpush1.bf16.msra.mxu0 %v256_v4  ;;  %v192_v21 = vld [vmem:[%s373_s2] sm:$0x3] }
   0x8   :  { %138 = vmatprep.subr.bf16.mxu0 %v257_v5  ;;  %v196_v20 = vsub.s32 0, %v195_v19  ;;  %v200_v22 = vsub.s32 1, %v195_v19  ;;  %v208_v23 = vld [vmem:[%s374_s3] sm:$0x3] }
   0xa   :  { %v197_v24 = vrot.slane %v192_v21, %v196_v20  ;;  %v201_v26 = vrot.slane %v192_v21, %v200_v22  ;;  %v213_v27 = vrot.slane %v208_v23, %v196_v20  ;;  %v217_v29 = vrot.slane %v208_v23, %v200_v22 }
   0xb   :  { %139 = vmatpush1.bf16.msra.mxu0 %v259_v6 }
   0xc   :  { %140 = vmatprep.subr.bf16.mxu0 %v260_v7 }
   0xf   :  { %141 = vmatpush1.bf16.msra.mxu0 %v262_v8 }
  0x10   :  { %142 = vmatprep.subr.bf16.mxu0 %v263_v9 }
  0x13   :  { %143 = vmatpush1.bf16.msra.mxu0 %v265_v10 }
  0x14   :  { %144 = vmatprep.subr.bf16.mxu0 %v266_v11 }
  0x17   :  { %145 = vmatpush1.bf16.msra.mxu0 %v268_v12 }
  0x18   :  { %146 = vmatprep.subr.bf16.mxu0 %v269_v13 }
  0x1b   :  { %147 = vmatpush1.bf16.msra.mxu0 %v271_v14 }
  0x1c   :  { %148 = vmatprep.subr.bf16.mxu0 %v272_v15 }
  0x1f   :  { %149 = vmatpush1.bf16.msra.mxu0 %v274_v16 }
  0x22   :  { %167 = vmatmul.mubr.bf16.vlgmr.msra.gmra.mrb[0].mxu0 %v275_v17 }
  0xf5   :  { %v168_v25 = vpop.f32.mrb[0].mxu0 }
  0xf6   :  { %v170_v28 = vpop.f32.mrb[1].mxu0  ;;  %v204_v31 = vmul.f32 %v197_v24, %v168_v25 }
  0xf7   :  { %v172_v30 = vpop.f32.mrb[2].mxu0  ;;  %v205_v33 = vmul.f32 %v201_v26, %v170_v28 }
  0xf8   :  { %v174_v32 = vpop.f32.mrb[3].mxu0  ;;  %v220_v34 = vadd.f32 %v213_v27, %v204_v31  ;;  %v206_v35 = vmul.f32 %v197_v24, %v172_v30 }
  0xf9   :  { %v221_v36 = vadd.f32 %v217_v29, %v205_v33  ;;  %v207_v37 = vmul.f32 %v201_v26, %v174_v32 }
  0xfa   :  { %224 = vst [vmem:[%s375_s4] sm:$0xff] %v220_v34  ;;  %v222_v38 = vadd.f32 %v213_v27, %v206_v35 }
  0xfb   :  { %225 = vst [vmem:[%s375_s4 + $0x8] sm:$0xff] %v221_v36  ;;  %v223_v39 = vadd.f32 %v217_v29, %v207_v37 }
  0xfc   :  { %226 = vst [vmem:[%s375_s4 + $0x10] sm:$0xff] %v222_v38 }
  0xfd   :  { %227 = vst [vmem:[%s375_s4 + $0x18] sm:$0xff] %v223_v39 }

// kernel: basnet_forward.139
= control target key start
LH: loop header
LB: loop body
LE: loop exit
PB: predicated region body
PF: predicated region fallthrough
CT: control target
= control target key end

     0   :  { %v291_v1 = vmov 0   ;;  %v197_v18 = vlaneseq  ;;  %s403_s1 = inlined_call_operand.vmem [shape: bf16[128,256], index: 1, kind: input, shape index: {}]   ;;  %s404_s0 = inlined_call_operand.vmem [shape: bf16[16,128], index: 0, kind: input, shape index: {}]   ;;  %s405_s2 = inlined_call_operand.vmem [shape: f32[1,256], index: 2, kind: input, shape index: {}]   ;;  %s406_s3 = inlined_call_operand.vmem [shape: f32[1,256], index: 3, kind: input, shape index: {}]   ;;  %s407_s4 = inlined_call_operand.vmem [shape: f32[16,256], index: 4, kind: input, shape index: {}]   ;;  %s408_s5 = inlined_call_operand.vmem [shape: f32[16,256], index: 5, kind: output, shape index: {}]  }
   0x1   :  { %v266_v0 = vld [vmem:[%s403_s1 + $0x4] ss:$8 sps:$4 sm:$0xff]   ;;  %169 = vmatprep.mubr.bf16.mxu0 %v291_v1  ;;  %v268_v2 = vld [vmem:[%s403_s1] ss:$8 sps:$4 sm:$0xff]   ;;  %v269_v3 = vld [vmem:[%s403_s1 + $0x14] ss:$8 sps:$4 sm:$0xff]  }
   0x2   :  { %137 = vmatprep.subr.bf16.mxu0 %v266_v0  ;;  %v271_v4 = vld [vmem:[%s403_s1 + $0x10] ss:$8 sps:$4 sm:$0xff]   ;;  %v272_v5 = vld [vmem:[%s403_s1 + $0x24] ss:$8 sps:$4 sm:$0xff]   ;;  %v274_v6 = vld [vmem:[%s403_s1 + $0x20] ss:$8 sps:$4 sm:$0xff]  }
   0x3   :  { %138 = vmatpush1.bf16.msra.mxu0 %v268_v2  ;;  %v275_v7 = vld [vmem:[%s403_s1 + $0x34] ss:$8 sps:$4 sm:$0xff]   ;;  %v277_v8 = vld [vmem:[%s403_s1 + $0x30] ss:$8 sps:$4 sm:$0xff]   ;;  %v278_v9 = vld [vmem:[%s403_s1 + $0x44] ss:$8 sps:$4 sm:$0xff]  }
   0x4   :  { %139 = vmatprep.subr.bf16.mxu0 %v269_v3  ;;  %v280_v10 = vld [vmem:[%s403_s1 + $0x40] ss:$8 sps:$4 sm:$0xff]   ;;  %v281_v11 = vld [vmem:[%s403_s1 + $0x54] ss:$8 sps:$4 sm:$0xff]   ;;  %v283_v12 = vld [vmem:[%s403_s1 + $0x50] ss:$8 sps:$4 sm:$0xff]  }
   0x5   :  { %v284_v13 = vld [vmem:[%s403_s1 + $0x64] ss:$8 sps:$4 sm:$0xff]   ;;  %v286_v14 = vld [vmem:[%s403_s1 + $0x60] ss:$8 sps:$4 sm:$0xff]   ;;  %v287_v15 = vld [vmem:[%s403_s1 + $0x74] ss:$8 sps:$4 sm:$0xff]  }
   0x6   :  { %v289_v16 = vld [vmem:[%s403_s1 + $0x70] ss:$8 sps:$4 sm:$0xff]   ;;  %v290_v17 = vld [vmem:[%s404_s0] sm:$0xff]   ;;  %v198_v19 = vshrl.u32 %v197_v18, 7  ;;  %v228_v36 = vld [vmem:[%s407_s4 + $0x8] sm:$0xff] }
   0x7   :  { %140 = vmatpush1.bf16.msra.mxu0 %v271_v4  ;;  %v195_v21 = vld [vmem:[%s405_s2] sm:$0x3]  ;;  %v229_v39 = vld [vmem:[%s407_s4 + $0x10] sm:$0xff]  ;;  %v230_v43 = vld [vmem:[%s407_s4 + $0x18] sm:$0xff] }
   0x8   :  { %141 = vmatprep.subr.bf16.mxu0 %v272_v5  ;;  %v199_v20 = vsub.s32 0, %v198_v19  ;;  %v203_v22 = vsub.s32 1, %v198_v19  ;;  %v211_v23 = vld [vmem:[%s406_s3] sm:$0x3] }
   0x9   :  { %v227_v33 = vld [vmem:[%s407_s4] sm:$0xff] }
   0xa   :  { %v200_v24 = vrot.slane %v195_v21, %v199_v20  ;;  %v204_v26 = vrot.slane %v195_v21, %v203_v22  ;;  %v216_v27 = vrot.slane %v211_v23, %v199_v20  ;;  %v220_v29 = vrot.slane %v211_v23, %v203_v22 }
   0xb   :  { %142 = vmatpush1.bf16.msra.mxu0 %v274_v6 }
   0xc   :  { %143 = vmatprep.subr.bf16.mxu0 %v275_v7 }
   0xf   :  { %144 = vmatpush1.bf16.msra.mxu0 %v277_v8 }
  0x10   :  { %145 = vmatprep.subr.bf16.mxu0 %v278_v9 }
  0x13   :  { %146 = vmatpush1.bf16.msra.mxu0 %v280_v10 }
  0x14   :  { %147 = vmatprep.subr.bf16.mxu0 %v281_v11 }
  0x17   :  { %148 = vmatpush1.bf16.msra.mxu0 %v283_v12 }
  0x18   :  { %149 = vmatprep.subr.bf16.mxu0 %v284_v13 }
  0x1b   :  { %150 = vmatpush1.bf16.msra.mxu0 %v286_v14 }
  0x1c   :  { %151 = vmatprep.subr.bf16.mxu0 %v287_v15 }
  0x1f   :  { %152 = vmatpush1.bf16.msra.mxu0 %v289_v16 }
  0x22   :  { %170 = vmatmul.mubr.bf16.vlgmr.msra.gmra.mrb[0].mxu0 %v290_v17 }
  0xf5   :  { %v171_v25 = vpop.f32.mrb[0].mxu0 }
  0xf6   :  { %v173_v28 = vpop.f32.mrb[1].mxu0  ;;  %v207_v31 = vmul.f32 %v200_v24, %v171_v25 }
  0xf7   :  { %v175_v30 = vpop.f32.mrb[2].mxu0  ;;  %v208_v34 = vmul.f32 %v204_v26, %v173_v28 }
  0xf8   :  { %v177_v32 = vpop.f32.mrb[3].mxu0  ;;  %v223_v35 = vadd.f32 %v216_v27, %v207_v31  ;;  %v209_v37 = vmul.f32 %v200_v24, %v175_v30 }
  0xf9   :  { %v224_v38 = vadd.f32 %v220_v29, %v208_v34  ;;  %v210_v40 = vmul.f32 %v204_v26, %v177_v32 }
  0xfa   :  { %v231_v41 = vadd.f32 %v227_v33, %v223_v35  ;;  %v225_v42 = vadd.f32 %v216_v27, %v209_v37 }
  0xfb   :  { %v232_v44 = vadd.f32 %v228_v36, %v224_v38  ;;  %v226_v45 = vadd.f32 %v220_v29, %v210_v40 }
  0xfc   :  { %v235_v46 = vmax.f32 %v231_v41, 0.0  ;;  %v233_v47 = vadd.f32 %v229_v39, %v225_v42 }
  0xfd   :  { %v236_v48 = vmax.f32 %v232_v44, 0.0  ;;  %v234_v49 = vadd.f32 %v230_v43, %v226_v45 }
  0xfe   :  { %239 = vst [vmem:[%s408_s5] sm:$0xff] %v235_v46  ;;  %v237_v50 = vmax.f32 %v233_v47, 0.0 }
  0xff   :  { %240 = vst [vmem:[%s408_s5 + $0x8] sm:$0xff] %v236_v48  ;;  %v238_v51 = vmax.f32 %v234_v49, 0.0 }
 0x100   :  { %241 = vst [vmem:[%s408_s5 + $0x10] sm:$0xff] %v237_v50 }
 0x101   :  { %242 = vst [vmem:[%s408_s5 + $0x18] sm:$0xff] %v238_v51 }

// kernel: basnet_forward.140
= control target key start
LH: loop header
LB: loop body
LE: loop exit
PB: predicated region body
PF: predicated region fallthrough
CT: control target
= control target key end

     0   :  { %s395_s1 = inlined_call_operand.vmem [shape: bf16[256,128], index: 1, kind: input, shape index: {}]   ;;  %s396_s0 = inlined_call_operand.vmem [shape: bf16[16,256], index: 0, kind: input, shape index: {}]   ;;  %s397_s2 = inlined_call_operand.vmem [shape: f32[1,128], index: 2, kind: input, shape index: {}]   ;;  %s398_s3 = inlined_call_operand.vmem [shape: f32[1,128], index: 3, kind: input, shape index: {}]   ;;  %s399_s4 = inlined_call_operand.vmem [shape: f32[16,128], index: 4, kind: output, shape index: {}]  }
   0x1   :  { %v285_v0 = vld [vmem:[%s395_s1 + $0x40] sm:$0xff]   ;;  %v287_v2 = vld [vmem:[%s395_s1 + $0x48] sm:$0xff]   ;;  %v289_v4 = vld [vmem:[%s395_s1 + $0x50] sm:$0xff]  }
   0x2   :  { %v286_v1 = vld [vmem:[%s395_s1] sm:$0xff]   ;;  %262 = vmatprep.subr.bf16.mxu0 %v285_v0  ;;  %v288_v3 = vld [vmem:[%s395_s1 + $0x8] sm:$0xff]   ;;  %v290_v5 = vld [vmem:[%s395_s1 + $0x10] sm:$0xff]  }
   0x3   :  { %263 = vmatpush3.bf16.msra.mxu0 %v286_v1  ;;  %v291_v6 = vld [vmem:[%s395_s1 + $0x58] sm:$0xff]   ;;  %v293_v8 = vld [vmem:[%s395_s1 + $0x60] sm:$0xff]   ;;  %v295_v10 = vld [vmem:[%s395_s1 + $0x68] sm:$0xff]  }
   0x4   :  { %264 = vmatprep.subr.bf16.mxu0 %v287_v2  ;;  %v292_v7 = vld [vmem:[%s395_s1 + $0x18] sm:$0xff]   ;;  %v294_v9 = vld [vmem:[%s395_s1 + $0x20] sm:$0xff]   ;;  %v296_v12 = vld [vmem:[%s395_s1 + $0x28] sm:$0xff]  }
   0x5   :  { %v303_v11 = vld [vmem:[%s396_s0 + $0x4] ss:$8 sps:$4 sm:$0xff]   ;;  %v297_v13 = vld [vmem:[%s395_s1 + $0x70] sm:$0xff]   ;;  %v299_v15 = vld [vmem:[%s395_s1 + $0x78] sm:$0xff]  }
   0x6   :  { %198 = vmatprep.mubr.bf16.mxu0 %v303_v11  ;;  %v298_v14 = vld [vmem:[%s395_s1 + $0x30] sm:$0xff]   ;;  %v300_v16 = vld [vmem:[%s395_s1 + $0x38] sm:$0xff]   ;;  %v301_v17 = vld [vmem:[%s396_s0] ss:$8 sps:$4 sm:$0xff]  }
   0x7   :  { %265 = vmatpush3.bf16.msra.mxu0 %v288_v3  ;;  %v260_v22 = vld [vmem:[%s397_s2] ss:$0 sm:$0xff] }
   0x8   :  { %266 = vmatprep.subr.bf16.mxu0 %v289_v4  ;;  %v261_v25 = vld [vmem:[%s398_s3] ss:$0 sm:$0xff] }
   0xb   :  { %267 = vmatpush3.bf16.msra.mxu0 %v290_v5 }
   0xc   :  { %268 = vmatprep.subr.bf16.mxu0 %v291_v6 }
   0xf   :  { %269 = vmatpush3.bf16.msra.mxu0 %v292_v7 }
  0x10   :  { %270 = vmatprep.subr.bf16.mxu0 %v293_v8 }
  0x13   :  { %271 = vmatpush3.bf16.msra.mxu0 %v294_v9 }
  0x14   :  { %272 = vmatprep.subr.bf16.mxu0 %v295_v10 }
  0x17   :  { %273 = vmatpush3.bf16.msra.mxu0 %v296_v12 }
  0x18   :  { %274 = vmatprep.subr.bf16.mxu0 %v297_v13 }
  0x1b   :  { %275 = vmatpush3.bf16.msra.mxu0 %v298_v14 }
  0x1c   :  { %276 = vmatprep.subr.bf16.mxu0 %v299_v15 }
  0x1f   :  { %277 = vmatpush3.bf16.msra.mxu0 %v300_v16 }
  0x22   :  { %199 = vmatmul.mubr.bf16.vlgmr.msra.gmra.mrb[0].mxu0 %v301_v17 }
  0xf5   :  { %v278_v18 = vpop.f32.mrb[0].mxu0 }
  0xf6   :  { %v279_v19 = vpop.f32.mrb[1].mxu0 }
  0xf7   :  { %v280_v20 = vadd.f32 %v279_v19, %v278_v18  ;;  %v281_v21 = vpop.f32.mrb[2].mxu0 }
  0xf8   :  { %v282_v23 = vpop.f32.mrb[3].mxu0 }
  0xf9   :  { %v283_v24 = vadd.f32 %v282_v23, %v281_v21  ;;  %v223_v26 = vmul.f32 %v280_v20, %v260_v22 }
  0xfb   :  { %v232_v27 = vadd.f32 %v261_v25, %v223_v26  ;;  %v224_v28 = vmul.f32 %v283_v24, %v260_v22 }
  0xfd   :  { %v234_v29 = vmax.f32 %v232_v27, 0.0  ;;  %v233_v30 = vadd.f32 %v261_v25, %v224_v28 }
  0xff   :  { %236 = vst [vmem:[%s399_s4] sm:$0xff] %v234_v29  ;;  %v235_v31 = vmax.f32 %v233_v30, 0.0 }
 0x101   :  { %237 = vst [vmem:[%s399_s4 + $0x8] sm:$0xff] %v235_v31 }

// kernel: basnet_forward.149
= control target key start
LH: loop header
LB: loop body
LE: loop exit
PB: predicated region body
PF: predicated region fallthrough
CT: control target
= control target key end

     0   :  { %s413_s1 = inlined_call_operand.vmem [shape: bf16[256,128], index: 1, kind: input, shape index: {}]   ;;  %s414_s0 = inlined_call_operand.vmem [shape: bf16[16,256], index: 0, kind: input, shape index: {}]   ;;  %s415_s2 = inlined_call_operand.vmem [shape: f32[1,128], index: 2, kind: input, shape index: {}]   ;;  %s416_s3 = inlined_call_operand.vmem [shape: f32[1,128], index: 3, kind: input, shape index: {}]   ;;  %s417_s4 = inlined_call_operand.vmem [shape: f32[16,128], index: 4, kind: input, shape index: {}]   ;;  %s418_s5 = inlined_call_operand.vmem [shape: f32[16,128], index: 5, kind: output, shape index: {}]  }
   0x1   :  { %v292_v0 = vld [vmem:[%s413_s1 + $0x40] sm:$0xff]   ;;  %v294_v2 = vld [vmem:[%s413_s1 + $0x48] sm:$0xff]   ;;  %v296_v4 = vld [vmem:[%s413_s1 + $0x50] sm:$0xff]  }
   0x2   :  { %v293_v1 = vld [vmem:[%s413_s1] sm:$0xff]   ;;  %269 = vmatprep.subr.bf16.mxu0 %v292_v0  ;;  %v295_v3 = vld [vmem:[%s413_s1 + $0x8] sm:$0xff]   ;;  %v297_v5 = vld [vmem:[%s413_s1 + $0x10] sm:$0xff]  }
   0x3   :  { %270 = vmatpush3.bf16.msra.mxu0 %v293_v1  ;;  %v298_v6 = vld [vmem:[%s413_s1 + $0x58] sm:$0xff]   ;;  %v300_v8 = vld [vmem:[%s413_s1 + $0x60] sm:$0xff]   ;;  %v302_v10 = vld [vmem:[%s413_s1 + $0x68] sm:$0xff]  }
   0x4   :  { %271 = vmatprep.subr.bf16.mxu0 %v294_v2  ;;  %v299_v7 = vld [vmem:[%s413_s1 + $0x18] sm:$0xff]   ;;  %v301_v9 = vld [vmem:[%s413_s1 + $0x20] sm:$0xff]   ;;  %v303_v12 = vld [vmem:[%s413_s1 + $0x28] sm:$0xff]  }
   0x5   :  { %v310_v11 = vld [vmem:[%s414_s0 + $0x4] ss:$8 sps:$4 sm:$0xff]   ;;  %v304_v13 = vld [vmem:[%s413_s1 + $0x70] sm:$0xff]   ;;  %v306_v15 = vld [vmem:[%s413_s1 + $0x78] sm:$0xff]  }
   0x6   :  { %201 = vmatprep.mubr.bf16.mxu0 %v310_v11  ;;  %v305_v14 = vld [vmem:[%s413_s1 + $0x30] sm:$0xff]   ;;  %v307_v16 = vld [vmem:[%s413_s1 + $0x38] sm:$0xff]   ;;  %v308_v17 = vld [vmem:[%s414_s0] ss:$8 sps:$4 sm:$0xff]  }
   0x7   :  { %272 = vmatpush3.bf16.msra.mxu0 %v295_v3  ;;  %v267_v22 = vld [vmem:[%s415_s2] ss:$0 sm:$0xff]  ;;  %v238_v30 = vld [vmem:[%s417_s4 + $0x8] sm:$0xff] }
   0x8   :  { %273 = vmatprep.subr.bf16.mxu0 %v296_v4  ;;  %v268_v25 = vld [vmem:[%s416_s3] ss:$0 sm:$0xff] }
   0x9   :  { %v237_v27 = vld [vmem:[%s417_s4] sm:$0xff] }
   0xb   :  { %274 = vmatpush3.bf16.msra.mxu0 %v297_v5 }
   0xc   :  { %275 = vmatprep.subr.bf16.mxu0 %v298_v6 }
   0xf   :  { %276 = vmatpush3.bf16.msra.mxu0 %v299_v7 }
  0x10   :  { %277 = vmatprep.subr.bf16.mxu0 %v300_v8 }
  0x13   :  { %278 = vmatpush3.bf16.msra.mxu0 %v301_v9 }
  0x14   :  { %279 = vmatprep.subr.bf16.mxu0 %v302_v10 }
  0x17   :  { %280 = vmatpush3.bf16.msra.mxu0 %v303_v12 }
  0x18   :  { %281 = vmatprep.subr.bf16.mxu0 %v304_v13 }
  0x1b   :  { %282 = vmatpush3.bf16.msra.mxu0 %v305_v14 }
  0x1c   :  { %283 = vmatprep.subr.bf16.mxu0 %v306_v15 }
  0x1f   :  { %284 = vmatpush3.bf16.msra.mxu0 %v307_v16 }
  0x22   :  { %202 = vmatmul.mubr.bf16.vlgmr.msra.gmra.mrb[0].mxu0 %v308_v17 }
  0xf5   :  { %v285_v18 = vpop.f32.mrb[0].mxu0 }
  0xf6   :  { %v286_v19 = vpop.f32.mrb[1].mxu0 }
  0xf7   :  { %v287_v20 = vadd.f32 %v286_v19, %v285_v18  ;;  %v288_v21 = vpop.f32.mrb[2].mxu0 }
  0xf8   :  { %v289_v23 = vpop.f32.mrb[3].mxu0 }
  0xf9   :  { %v290_v24 = vadd.f32 %v289_v23, %v288_v21  ;;  %v226_v26 = vmul.f32 %v287_v20, %v267_v22 }
  0xfb   :  { %v235_v28 = vadd.f32 %v268_v25, %v226_v26  ;;  %v227_v29 = vmul.f32 %v290_v24, %v267_v22 }
  0xfd   :  { %v239_v31 = vadd.f32 %v237_v27, %v235_v28  ;;  %v236_v32 = vadd.f32 %v268_v25, %v227_v29 }
  0xff   :  { %v241_v33 = vmax.f32 %v239_v31, 0.0  ;;  %v240_v34 = vadd.f32 %v238_v30, %v236_v32 }
 0x101   :  { %243 = vst [vmem:[%s418_s5] sm:$0xff] %v241_v33  ;;  %v242_v35 = vmax.f32 %v240_v34, 0.0 }
 0x103   :  { %244 = vst [vmem:[%s418_s5 + $0x8] sm:$0xff] %v242_v35 }

// kernel: basnet_forward.172
= control target key start
LH: loop header
LB: loop body
LE: loop exit
PB: predicated region body
PF: predicated region fallthrough
CT: control target
= control target key end

     0   :  { %s393_s1 = inlined_call_operand.vmem [shape: bf16[256,128], index: 1, kind: input, shape index: {}]   ;;  %s394_s0 = inlined_call_operand.vmem [shape: bf16[16,256], index: 0, kind: input, shape index: {}]   ;;  %s395_s2 = inlined_call_operand.vmem [shape: f32[1,128], index: 2, kind: input, shape index: {}]   ;;  %s396_s3 = inlined_call_operand.vmem [shape: f32[1,128], index: 3, kind: input, shape index: {}]   ;;  %s397_s4 = inlined_call_operand.vmem [shape: f32[16,128], index: 4, kind: output, shape index: {}]  }
   0x1   :  { %v283_v0 = vld [vmem:[%s393_s1 + $0x40] sm:$0xff]   ;;  %v285_v2 = vld [vmem:[%s393_s1 + $0x48] sm:$0xff]   ;;  %v287_v4 = vld [vmem:[%s393_s1 + $0x50] sm:$0xff]  }
   0x2   :  { %v284_v1 = vld [vmem:[%s393_s1] sm:$0xff]   ;;  %260 = vmatprep.subr.bf16.mxu0 %v283_v0  ;;  %v286_v3 = vld [vmem:[%s393_s1 + $0x8] sm:$0xff]   ;;  %v288_v5 = vld [vmem:[%s393_s1 + $0x10] sm:$0xff]  }
   0x3   :  { %261 = vmatpush3.bf16.msra.mxu0 %v284_v1  ;;  %v289_v6 = vld [vmem:[%s393_s1 + $0x58] sm:$0xff]   ;;  %v291_v8 = vld [vmem:[%s393_s1 + $0x60] sm:$0xff]   ;;  %v293_v10 = vld [vmem:[%s393_s1 + $0x68] sm:$0xff]  }
   0x4   :  { %262 = vmatprep.subr.bf16.mxu0 %v285_v2  ;;  %v290_v7 = vld [vmem:[%s393_s1 + $0x18] sm:$0xff]   ;;  %v292_v9 = vld [vmem:[%s393_s1 + $0x20] sm:$0xff]   ;;  %v294_v12 = vld [vmem:[%s393_s1 + $0x28] sm:$0xff]  }
   0x5   :  { %v301_v11 = vld [vmem:[%s394_s0 + $0x4] ss:$8 sps:$4 sm:$0xff]   ;;  %v295_v13 = vld [vmem:[%s393_s1 + $0x70] sm:$0xff]   ;;  %v297_v15 = vld [vmem:[%s393_s1 + $0x78] sm:$0xff]  }
   0x6   :  { %198 = vmatprep.mubr.bf16.mxu0 %v301_v11  ;;  %v296_v14 = vld [vmem:[%s393_s1 + $0x30] sm:$0xff]   ;;  %v298_v16 = vld [vmem:[%s393_s1 + $0x38] sm:$0xff]   ;;  %v299_v17 = vld [vmem:[%s394_s0] ss:$8 sps:$4 sm:$0xff]  }
   0x7   :  { %263 = vmatpush3.bf16.msra.mxu0 %v286_v3  ;;  %v258_v22 = vld [vmem:[%s395_s2] ss:$0 sm:$0xff] }
   0x8   :  { %264 = vmatprep.subr.bf16.mxu0 %v287_v4  ;;  %v259_v25 = vld [vmem:[%s396_s3] ss:$0 sm:$0xff] }
   0xb   :  { %265 = vmatpush3.bf16.msra.mxu0 %v288_v5 }
   0xc   :  { %266 = vmatprep.subr.bf16.mxu0 %v289_v6 }
   0xf   :  { %267 = vmatpush3.bf16.msra.mxu0 %v290_v7 }
  0x10   :  { %268 = vmatprep.subr.bf16.mxu0 %v291_v8 }
  0x13   :  { %269 = vmatpush3.bf16.msra.mxu0 %v292_v9 }
  0x14   :  { %270 = vmatprep.subr.bf16.mxu0 %v293_v10 }
  0x17   :  { %271 = vmatpush3.bf16.msra.mxu0 %v294_v12 }
  0x18   :  { %272 = vmatprep.subr.bf16.mxu0 %v295_v13 }
  0x1b   :  { %273 = vmatpush3.bf16.msra.mxu0 %v296_v14 }
  0x1c   :  { %274 = vmatprep.subr.bf16.mxu0 %v297_v15 }
  0x1f   :  { %275 = vmatpush3.bf16.msra.mxu0 %v298_v16 }
  0x22   :  { %199 = vmatmul.mubr.bf16.vlgmr.msra.gmra.mrb[0].mxu0 %v299_v17 }
  0xf5   :  { %v276_v18 = vpop.f32.mrb[0].mxu0 }
  0xf6   :  { %v277_v19 = vpop.f32.mrb[1].mxu0 }
  0xf7   :  { %v278_v20 = vadd.f32 %v277_v19, %v276_v18  ;;  %v279_v21 = vpop.f32.mrb[2].mxu0 }
  0xf8   :  { %v280_v23 = vpop.f32.mrb[3].mxu0 }
  0xf9   :  { %v281_v24 = vadd.f32 %v280_v23, %v279_v21  ;;  %v223_v26 = vmul.f32 %v278_v20, %v258_v22 }
  0xfb   :  { %v232_v27 = vadd.f32 %v259_v25, %v223_v26  ;;  %v224_v28 = vmul.f32 %v281_v24, %v258_v22 }
  0xfd   :  { %234 = vst [vmem:[%s397_s4] sm:$0xff] %v232_v27  ;;  %v233_v29 = vadd.f32 %v259_v25, %v224_v28 }
  0xff   :  { %235 = vst [vmem:[%s397_s4 + $0x8] sm:$0xff] %v233_v29 }

// kernel: basnet_forward.159
= control target key start
LH: loop header
LB: loop body
LE: loop exit
PB: predicated region body
PF: predicated region fallthrough
CT: control target
= control target key end

     0   :  { %s962_s18 = smov 0   ;;  %s964_s19 = smov 0   ;;  %s1077_s0 = inlined_call_operand.vmem [shape: bf16[64,256], index: 0, kind: input, shape index: {}]   ;;  %s1078_s1 = inlined_call_operand.vmem [shape: bf16[256,128], index: 1, kind: input, shape index: {}]   ;;  %s1079_s2 = inlined_call_operand.vmem [shape: f32[1,128], index: 2, kind: input, shape index: {}]   ;;  %s1080_s3 = inlined_call_operand.vmem [shape: f32[1,128], index: 3, kind: input, shape index: {}]   ;;  %s1081_s4 = inlined_call_operand.vmem [shape: f32[64,128], index: 4, kind: input, shape index: {}]   ;;  %s1082_s5 = inlined_call_operand.vmem [shape: f32[64,128], index: 5, kind: output, shape index: {}]  }
   0x1   :  { %s966_s20 = smov 0  }
   0x2 LB: > { %s34_s21 = sadd.s32 1, %s925_s19  ;;  %p783_p0 = scmp.ge.s32.totalorder %s929_s20, 1  ;;  %s929_s20 = sphi %s966_s20, %s15_s20   ;;  %s925_s19 = sphi %s964_s19, %s1084_s19   ;;  %s921_s18 = sphi %s962_s18, %s1083_s18  }
   0x3   : > { %p36_p1 = scmp.ge.s32.totalorder %s34_s21, 2  ;;  %p265_p2 = scmp.lt.s32.totalorder %s929_s20, 3 }
   0x5   : > { %s1086_s21 = smov (%p36_p1, %s34_s21), 0  ;;  %p266_p3 = pnand %p783_p0, %p265_p2 }
   0x6   : > { %v885_v0 = vld [vmem:[%s1078_s1 + $0x40] sm:$0xff] (!%p266_p3)   ;;  %s784_s24 = sshll.u32 (!%p266_p3), %s921_s18, 2  ;;  %v887_v2 = vld [vmem:[%s1078_s1 + $0x48] sm:$0xff] (!%p266_p3)   ;;  %v889_v4 = vld [vmem:[%s1078_s1 + $0x50] sm:$0xff] (!%p266_p3)   ;;  %v931_v20 = vmov (!%p266_p3), 0.0  }
   0x7   : > { %269 = sbr.rel (%p266_p3) target bundleno = 275 (0x113), region = 40  ;;  %v886_v1 = vld [vmem:[%s1078_s1] sm:$0xff] (!%p266_p3)   ;;  %816 = vmatprep.subr.bf16.mxu0 (!%p266_p3), %v885_v0  ;;  %844 = vmatprep.subr.bf16.mxu1 (!%p266_p3), %v885_v0  ;;  %v888_v3 = vld [vmem:[%s1078_s1 + $0x8] sm:$0xff] (!%p266_p3)   ;;  %p325_p4 = scmp.lt.s32.totalorder (!%p266_p3), %s784_s24, 7  ;;  %v890_v5 = vld [vmem:[%s1078_s1 + $0x10] sm:$0xff] (!%p266_p3)  }
   0x8   : > { %817 = vmatpush3.bf16.msra.mxu0 (!%p266_p3), %v886_v1  ;;  %852 = vmatpush3.bf16.msra.mxu1 (!%p266_p3), %v886_v1  ;;  %v891_v6 = vld [vmem:[%s1078_s1 + $0x58] sm:$0xff] (!%p266_p3)   ;;  %v893_v8 = vld [vmem:[%s1078_s1 + $0x60] sm:$0xff] (!%p266_p3)   ;;  %v895_v10 = vld [vmem:[%s1078_s1 + $0x68] sm:$0xff] (!%p266_p3)  }
   0x9   : > { %818 = vmatprep.subr.bf16.mxu0 (!%p266_p3), %v887_v2  ;;  %845 = vmatprep.subr.bf16.mxu1 (!%p266_p3), %v887_v2  ;;  %v892_v7 = vld [vmem:[%s1078_s1 + $0x18] sm:$0xff] (!%p266_p3)   ;;  %v894_v9 = vld [vmem:[%s1078_s1 + $0x20] sm:$0xff] (!%p266_p3)   ;;  %v896_v12 = vld [vmem:[%s1078_s1 + $0x28] sm:$0xff] (!%p266_p3)  }
   0xa   : > { %v897_v14 = vld [vmem:[%s1078_s1 + $0x70] sm:$0xff] (!%p266_p3)   ;;  %v899_v16 = vld [vmem:[%s1078_s1 + $0x78] sm:$0xff] (!%p266_p3)   ;;  %v811_v37 = vld [vmem:[%s1079_s2] ss:$0 sm:$0xff] (!%p266_p3) }
   0xb   : > { %v898_v15 = vld [vmem:[%s1078_s1 + $0x30] sm:$0xff] (!%p266_p3)   ;;  %v900_v17 = vld [vmem:[%s1078_s1 + $0x38] sm:$0xff] (!%p266_p3)   ;;  %v812_v40 = vld [vmem:[%s1080_s3] ss:$0 sm:$0xff] (!%p266_p3) }
   0xc   : > { %819 = vmatpush3.bf16.msra.mxu0 (!%p266_p3), %v888_v3  ;;  %853 = vmatpush3.bf16.msra.mxu1 (!%p266_p3), %v888_v3 }
   0xd   : > { %820 = vmatprep.subr.bf16.mxu0 (!%p266_p3), %v889_v4  ;;  %846 = vmatprep.subr.bf16.mxu1 (!%p266_p3), %v889_v4 }
   0xe   : > { %s1088_s24 = smov (!%p325_p4, %s784_s24), 7 }
   0xf   : > { %s1004_s14 = sshll.u32 %s1088_s24, 3 }
  0x10   : > { %821 = vmatpush3.bf16.msra.mxu0 %v890_v5  ;;  %854 = vmatpush3.bf16.msra.mxu1 %v890_v5  ;;  %s332_s22 = scalar_lea.vmem %s1077_s0, %s1004_s14  ;;  %s1038_s15 = scalar_lea.vmem %s1082_s5, %s1004_s14 }
  0x11   : > { %822 = vmatprep.subr.bf16.mxu0 %v891_v6  ;;  %847 = vmatprep.subr.bf16.mxu1 %v891_v6  ;;  %v903_v11 = vld [vmem:[%s332_s22 + $0x4] ss:$8 sps:$4 sm:$0xff]   ;;  %v906_v13 = vld [vmem:[%s332_s22 + $0x14] ss:$8 sps:$4 sm:$0xff]   ;;  %v901_v18 = vld [vmem:[%s332_s22] ss:$8 sps:$4 sm:$0xff]   ;;  %373 = vst [vmem:[%s1038_s15] sm:$0xff] %v931_v20  ;;  %s357_s23 = scalar_lea.vmem %s1081_s4, %s1004_s14 }
  0x12   : > { %565 = vmatprep.mubr.bf16.mxu0 %v903_v11  ;;  %573 = vmatprep.mubr.bf16.mxu1 %v906_v13  ;;  %v904_v19 = vld [vmem:[%s332_s22 + $0x10] ss:$8 sps:$4 sm:$0xff]   ;;  %374 = vst [vmem:[%s1038_s15 + $0x8] sm:$0xff] %v931_v20  ;;  %375 = vst [vmem:[%s1038_s15 + $0x10] sm:$0xff] %v931_v20  ;;  %v619_v51 = vld [vmem:[%s357_s23] sm:$0xff] }
  0x13   : > { %376 = vst [vmem:[%s1038_s15 + $0x18] sm:$0xff] %v931_v20  ;;  %v622_v42 = vld [vmem:[%s357_s23 + $0x18] sm:$0xff]  ;;  %v620_v52 = vld [vmem:[%s357_s23 + $0x8] sm:$0xff]  ;;  %v621_v53 = vld [vmem:[%s357_s23 + $0x10] sm:$0xff] }
  0x14   : > { %823 = vmatpush3.bf16.msra.mxu0 %v892_v7  ;;  %855 = vmatpush3.bf16.msra.mxu1 %v892_v7 }
  0x15   : > { %824 = vmatprep.subr.bf16.mxu0 %v893_v8  ;;  %848 = vmatprep.subr.bf16.mxu1 %v893_v8 }
  0x18   : > { %825 = vmatpush3.bf16.msra.mxu0 %v894_v9  ;;  %856 = vmatpush3.bf16.msra.mxu1 %v894_v9  ;;  %v377_v23 = vld [vmem:[%s1038_s15] sm:$0xff] }
  0x19   : > { %826 = vmatprep.subr.bf16.mxu0 %v895_v10  ;;  %849 = vmatprep.subr.bf16.mxu1 %v895_v10  ;;  %v379_v30 = vld [vmem:[%s1038_s15 + $0x10] sm:$0xff]  ;;  %v378_v31 = vld [vmem:[%s1038_s15 + $0x8] sm:$0xff] }
  0x1c   : > { %827 = vmatpush3.bf16.msra.mxu0 %v896_v12  ;;  %857 = vmatpush3.bf16.msra.mxu1 %v896_v12 }
  0x1d   : > { %828 = vmatprep.subr.bf16.mxu0 %v897_v14  ;;  %850 = vmatprep.subr.bf16.mxu1 %v897_v14 }
  0x20   : > { %829 = vmatpush3.bf16.msra.mxu0 %v898_v15  ;;  %858 = vmatpush3.bf16.msra.mxu1 %v898_v15 }
  0x21   : > { %830 = vmatprep.subr.bf16.mxu0 %v899_v16  ;;  %851 = vmatprep.subr.bf16.mxu1 %v899_v16 }
  0x24   : > { %831 = vmatpush3.bf16.msra.mxu0 %v900_v17  ;;  %859 = vmatpush3.bf16.msra.mxu1 %v900_v17 }
  0x27   : > { %566 = vmatmul.mubr.bf16.vlgmr.msra.gmra.mrb[0].mxu0 %v901_v18  ;;  %574 = vmatmul.mubr.bf16.vlgmr.msra.gmra.mrb[0].mxu1 %v904_v19 }
  0xfa   : > { %v832_v21 = vpop.f32.mrb[0].mxu0  ;;  %v838_v22 = vpop.f32.mrb[0].mxu1 }
  0xfb   : > { %v833_v24 = vpop.f32.mrb[1].mxu0  ;;  %v839_v25 = vpop.f32.mrb[1].mxu1 }
  0xfc   : > { %v834_v26 = vadd.f32 %v833_v24, %v832_v21  ;;  %v840_v27 = vadd.f32 %v839_v25, %v838_v22  ;;  %v835_v28 = vpop.f32.mrb[2].mxu0  ;;  %v841_v29 = vpop.f32.mrb[2].mxu1 }
  0xfd   : > { %v836_v32 = vpop.f32.mrb[3].mxu0  ;;  %v842_v33 = vpop.f32.mrb[3].mxu1 }
  0xfe   : > { %v582_v34 = vadd.f32 %v834_v26, %v377_v23  ;;  %v837_v35 = vadd.f32 %v836_v32, %v835_v28  ;;  %v843_v36 = vadd.f32 %v842_v33, %v841_v29  ;;  %v584_v39 = vadd.f32 %v840_v27, %v379_v30 }
 0x100   : > { %v583_v38 = vadd.f32 %v837_v35, %v378_v31  ;;  %586 = vst [vmem:[%s1038_s15] sm:$0xff] %v582_v34  ;;  %v607_v41 = vmul.f32 %v843_v36, %v811_v37  ;;  %588 = vst [vmem:[%s1038_s15 + $0x10] sm:$0xff] %v584_v39 }
 0x101   : > { %589 = vst [vmem:[%s1038_s15 + $0x18] sm:$0xff] %v843_v36 }
 0x102   : > { %587 = vst [vmem:[%s1038_s15 + $0x8] sm:$0xff] %v583_v38  ;;  %v618_v43 = vadd.f32 %v812_v40, %v607_v41 }
 0x104   : > { %v626_v44 = vadd.f32 %v622_v42, %v618_v43 }
 0x106   : > { %v630_v63 = vmax.f32 %v626_v44, 0.0 }
 0x107   : > { %v593_v45 = vld [vmem:[%s1038_s15] sm:$0xff]  ;;  %v595_v47 = vld [vmem:[%s1038_s15 + $0x10] sm:$0xff] }
 0x108   : > { %v604_v48 = vmul.f32 %v811_v37, %v593_v45  ;;  %v606_v50 = vmul.f32 %v811_v37, %v595_v47  ;;  %634 = vst [vmem:[%s1038_s15 + $0x18] sm:$0xff] %v630_v63 }
 0x109   : > { %v594_v46 = vld [vmem:[%s1038_s15 + $0x8] sm:$0xff] }
 0x10a   : > { %v605_v49 = vmul.f32 %v811_v37, %v594_v46  ;;  %v615_v54 = vadd.f32 %v812_v40, %v604_v48  ;;  %v617_v56 = vadd.f32 %v812_v40, %v606_v50 }
 0x10c   : > { %v616_v55 = vadd.f32 %v812_v40, %v605_v49  ;;  %v623_v57 = vadd.f32 %v619_v51, %v615_v54  ;;  %v625_v59 = vadd.f32 %v621_v53, %v617_v56 }
 0x10e   : > { %v624_v58 = vadd.f32 %v620_v52, %v616_v55  ;;  %v627_v60 = vmax.f32 %v623_v57, 0.0  ;;  %v629_v62 = vmax.f32 %v625_v59, 0.0 }
 0x110   : > { %v628_v61 = vmax.f32 %v624_v58, 0.0  ;;  %631 = vst [vmem:[%s1038_s15] sm:$0xff] %v627_v60  ;;  %633 = vst [vmem:[%s1038_s15 + $0x10] sm:$0xff] %v629_v62 }
 0x112   : > { %632 = vst [vmem:[%s1038_s15 + $0x8] sm:$0xff] %v628_v61 }
 0x113 PF: > { %s15_s20 = sadd.s32 1, %s929_s20   ;;  %s1083_s18 = smov %s925_s19 }
 0x114   : > { %p12_p5 = scmp.ge.s32.totalorder %s15_s20, 4   ;;  %s1084_s19 = smov %s1086_s21 }
 0x116   :  { %14 = sbr.rel (!%p12_p5) target bundleno = 2 (0x2), region = 90 }

// kernel: basnet_forward.157
= control target key start
LH: loop header
LB: loop body
LE: loop exit
PB: predicated region body
PF: predicated region fallthrough
CT: control target
= control target key end

     0   :  { %s1034_s15 = smov 0   ;;  %s1036_s16 = smov 0   ;;  %s1172_s0 = inlined_call_operand.vmem [shape: bf16[64,384], index: 0, kind: input, shape index: {}]   ;;  %s1173_s1 = inlined_call_operand.vmem [shape: bf16[384,128], index: 1, kind: input, shape index: {}]   ;;  %s1174_s2 = inlined_call_operand.vmem [shape: f32[1,128], index: 2, kind: input, shape index: {}]   ;;  %s1175_s3 = inlined_call_operand.vmem [shape: f32[1,128], index: 3, kind: input, shape index: {}]   ;;  %s1176_s4 = inlined_call_operand.vmem [shape: f32[64,128], index: 4, kind: output, shape index: {}]  }
   0x1   :  { %s1038_s17 = smov 0  }
   0x2 LB: > { %s33_s18 = sadd.s32 1, %s1002_s16  ;;  %p829_p0 = scmp.ge.s32.totalorder %s1006_s17, 1  ;;  %s1006_s17 = sphi %s1038_s17, %s14_s17   ;;  %s1002_s16 = sphi %s1036_s16, %s1178_s16   ;;  %s998_s15 = sphi %s1034_s15, %s1177_s15  }
   0x3   : > { %p35_p1 = scmp.ge.s32.totalorder %s33_s18, 2  ;;  %p224_p2 = scmp.lt.s32.totalorder %s1006_s17, 3 }
   0x5   : > { %s1180_s18 = smov (%p35_p1, %s33_s18), 0  ;;  %p225_p3 = pnand %p829_p0, %p224_p2 }
   0x6   : > { %v952_v0 = vld [vmem:[%s1173_s1 + $0x40] sm:$0xff] (!%p225_p3)   ;;  %v955_v3 = vld [vmem:[%s1173_s1 + $0x48] sm:$0xff] (!%p225_p3)   ;;  %v958_v6 = vld [vmem:[%s1173_s1 + $0x50] sm:$0xff] (!%p225_p3)   ;;  %s830_s9 = sshll.u32 (!%p225_p3), %s998_s15, 2  ;;  %v1008_v30 = vmov (!%p225_p3), 0.0  }
   0x7   : > { %228 = sbr.rel (%p225_p3) target bundleno = 281 (0x119), region = 36  ;;  %v953_v1 = vld [vmem:[%s1173_s1] sm:$0xff] (!%p225_p3)   ;;  %868 = vmatprep.subr.bf16.mxu0 (!%p225_p3), %v952_v0  ;;  %v956_v4 = vld [vmem:[%s1173_s1 + $0x8] sm:$0xff] (!%p225_p3)   ;;  %v959_v7 = vld [vmem:[%s1173_s1 + $0x10] sm:$0xff] (!%p225_p3)   ;;  %p274_p4 = scmp.lt.s32.totalorder (!%p225_p3), %s830_s9, 7 }
   0x8   : > { %v954_v2 = vld [vmem:[%s1173_s1 + $0x80] sm:$0xff] (!%p225_p3)   ;;  %869 = vmatpush3.bf16.msra.mxu0 (!%p225_p3), %v953_v1  ;;  %v957_v5 = vld [vmem:[%s1173_s1 + $0x88] sm:$0xff] (!%p225_p3)   ;;  %v960_v8 = vld [vmem:[%s1173_s1 + $0x90] sm:$0xff] (!%p225_p3)  }
   0x9   : > { %906 = vmatprep.subr.bf16.mxu1 (!%p225_p3), %v954_v2  ;;  %870 = vmatprep.subr.bf16.mxu0 (!%p225_p3), %v955_v3  ;;  %v961_v9 = vld [vmem:[%s1173_s1 + $0x58] sm:$0xff] (!%p225_p3)   ;;  %v964_v12 = vld [vmem:[%s1173_s1 + $0x60] sm:$0xff] (!%p225_p3)   ;;  %v967_v15 = vld [vmem:[%s1173_s1 + $0x68] sm:$0xff] (!%p225_p3)  }
   0xa   : > { %907 = vmatpush3.bf16.msra.mxu1 (!%p225_p3), %v954_v2  ;;  %v962_v10 = vld [vmem:[%s1173_s1 + $0x18] sm:$0xff] (!%p225_p3)   ;;  %v966_v13 = vld [vmem:[%s1173_s1 + $0xa0] sm:$0xff] (!%p225_p3)   ;;  %v969_v16 = vld [vmem:[%s1173_s1 + $0xa8] sm:$0xff] (!%p225_p3)  }
   0xb   : > { %908 = vmatprep.subr.bf16.mxu1 (!%p225_p3), %v957_v5  ;;  %v963_v11 = vld [vmem:[%s1173_s1 + $0x98] sm:$0xff] (!%p225_p3)   ;;  %v965_v14 = vld [vmem:[%s1173_s1 + $0x20] sm:$0xff] (!%p225_p3)   ;;  %v968_v17 = vld [vmem:[%s1173_s1 + $0x28] sm:$0xff] (!%p225_p3)  }
   0xc   : > { %871 = vmatpush3.bf16.msra.mxu0 (!%p225_p3), %v956_v4  ;;  %v970_v18 = vld [vmem:[%s1173_s1 + $0x70] sm:$0xff] (!%p225_p3)   ;;  %v973_v21 = vld [vmem:[%s1173_s1 + $0x78] sm:$0xff] (!%p225_p3)   ;;  %v864_v57 = vld [vmem:[%s1174_s2] ss:$0 sm:$0xff] (!%p225_p3) }
   0xd   : > { %872 = vmatprep.subr.bf16.mxu0 (!%p225_p3), %v958_v6  ;;  %v971_v19 = vld [vmem:[%s1173_s1 + $0x30] sm:$0xff] (!%p225_p3)   ;;  %v975_v22 = vld [vmem:[%s1173_s1 + $0xb8] sm:$0xff] (!%p225_p3)   ;;  %v865_v1 = vld [vmem:[%s1175_s3] ss:$0 sm:$0xff] (!%p225_p3) }
   0xe   : > { %909 = vmatpush3.bf16.msra.mxu1 %v957_v5  ;;  %s1182_s9 = smov (!%p274_p4, %s830_s9), 7  ;;  %v972_v20 = vld [vmem:[%s1173_s1 + $0xb0] sm:$0xff]   ;;  %v974_v25 = vld [vmem:[%s1173_s1 + $0x38] sm:$0xff]  }
   0xf   : > { %910 = vmatprep.subr.bf16.mxu1 %v960_v8  ;;  %s926_s5 = smul.u32 12, %s1182_s9  ;;  %s833_s27 = sshll.u32 %s1182_s9, 3 }
  0x10   : > { %873 = vmatpush3.bf16.msra.mxu0 %v959_v7  ;;  %s1137_s30 = scalar_lea.vmem %s1176_s4, %s833_s27 }
  0x11   : > { %874 = vmatprep.subr.bf16.mxu0 %v961_v9  ;;  %s281_s21 = scalar_lea.vmem %s1172_s0, %s926_s5  ;;  %313 = vst [vmem:[%s1137_s30] sm:$0xff] %v1008_v30  ;;  %314 = vst [vmem:[%s1137_s30 + $0x8] sm:$0xff] %v1008_v30 }
  0x12   : > { %911 = vmatpush3.bf16.msra.mxu1 %v960_v8  ;;  %v978_v23 = vld [vmem:[%s281_s21 + $0x4] ss:$12 sps:$4 sm:$0xff]   ;;  %v979_v24 = vld [vmem:[%s281_s21 + $0x8] ss:$12 sps:$4 sm:$0xff]   ;;  %v976_v26 = vld [vmem:[%s281_s21] ss:$12 sps:$4 sm:$0xff]  }
  0x13   : > { %912 = vmatprep.subr.bf16.mxu1 %v963_v11  ;;  %585 = vmatprep.mubr.bf16.mxu0 %v978_v23  ;;  %v981_v27 = vld [vmem:[%s281_s21 + $0x1c] ss:$12 sps:$4 sm:$0xff]   ;;  %v980_v28 = vld [vmem:[%s281_s21 + $0x20] ss:$12 sps:$4 sm:$0xff]   ;;  %v983_v29 = vld [vmem:[%s281_s21 + $0x18] ss:$12 sps:$4 sm:$0xff]  }
  0x14   : > { %875 = vmatpush3.bf16.msra.mxu0 %v962_v10  ;;  %922 = vmatprep.mubr.bf16.mxu1 %v979_v24  ;;  %315 = vst [vmem:[%s1137_s30 + $0x10] sm:$0xff] %v1008_v30  ;;  %316 = vst [vmem:[%s1137_s30 + $0x18] sm:$0xff] %v1008_v30 }
  0x15   : > { %876 = vmatprep.subr.bf16.mxu0 %v964_v12 }
  0x16   : > { %913 = vmatpush3.bf16.msra.mxu1 %v963_v11 }
  0x17   : > { %914 = vmatprep.subr.bf16.mxu1 %v966_v13 }
  0x18   : > { %877 = vmatpush3.bf16.msra.mxu0 %v965_v14  ;;  %v317_v37 = vld [vmem:[%s1137_s30] sm:$0xff]  ;;  %v318_v42 = vld [vmem:[%s1137_s30 + $0x8] sm:$0xff] }
  0x19   : > { %878 = vmatprep.subr.bf16.mxu0 %v967_v15 }
  0x1a   : > { %915 = vmatpush3.bf16.msra.mxu1 %v966_v13 }
  0x1b   : > { %916 = vmatprep.subr.bf16.mxu1 %v969_v16  ;;  %v319_v44 = vld [vmem:[%s1137_s30 + $0x10] sm:$0xff] }
  0x1c   : > { %879 = vmatpush3.bf16.msra.mxu0 %v968_v17 }
  0x1d   : > { %880 = vmatprep.subr.bf16.mxu0 %v970_v18 }
  0x1e   : > { %917 = vmatpush3.bf16.msra.mxu1 %v969_v16 }
  0x1f   : > { %918 = vmatprep.subr.bf16.mxu1 %v972_v20 }
  0x20   : > { %881 = vmatpush3.bf16.msra.mxu0 %v971_v19 }
  0x21   : > { %882 = vmatprep.subr.bf16.mxu0 %v973_v21 }
  0x22   : > { %919 = vmatpush3.bf16.msra.mxu1 %v972_v20 }
  0x23   : > { %920 = vmatprep.subr.bf16.mxu1 %v975_v22 }
  0x24   : > { %883 = vmatpush3.bf16.msra.mxu0 %v974_v25 }
  0x26   : > { %921 = vmatpush3.bf16.msra.mxu1 %v975_v22 }
  0x27   : > { %586 = vmatmul.mubr.bf16.vlgmr.msra.gmra.mrb[0].mxu0 %v976_v26 }
  0x28   : > { %593 = vmatprep.mubr.bf16.mxu0 %v981_v27 }
  0x29   : > { %923 = vmatmul.mubr.bf16.vlgmr.msra.gmra.mrb[0].mxu1 %v980_v28 }
  0x2f   : > { %594 = vmatmul.mubr.bf16.gmra.mrb[4].mxu0 %v983_v29 }
  0xfa   : > { %v884_v31 = vpop.f32.mrb[0].mxu0 }
  0xfb   : > { %v885_v32 = vpop.f32.mrb[1].mxu0 }
  0xfc   : > { %v886_v33 = vadd.f32 %v885_v32, %v884_v31  ;;  %v887_v34 = vpop.f32.mrb[2].mxu0  ;;  %v924_v35 = vpop.f32.mrb[0].mxu1 }
  0xfd   : > { %v888_v36 = vpop.f32.mrb[3].mxu0  ;;  %v636_v38 = vpop.f32.mrb[1].mxu1 }
  0xfe   : > { %v889_v39 = vadd.f32 %v888_v36, %v887_v34  ;;  %v637_v40 = vadd.f32 %v886_v33, %v636_v38  ;;  %v925_v41 = vpop.f32.mrb[2].mxu1 }
  0xff   : > { %v639_v43 = vpop.f32.mrb[3].mxu1 }
 0x100   : > { %v651_v45 = vadd.f32 %v637_v40, %v317_v37  ;;  %v640_v46 = vadd.f32 %v889_v39, %v639_v43 }
 0x102   : > { %v652_v47 = vadd.f32 %v640_v46, %v318_v42  ;;  %v890_v48 = vpop.f32.mrb[4].mxu0  ;;  %655 = vst [vmem:[%s1137_s30] sm:$0xff] %v651_v45 }
 0x103   : > { %v891_v49 = vpop.f32.mrb[5].mxu0 }
 0x104   : > { %v892_v50 = vadd.f32 %v891_v49, %v890_v48  ;;  %v893_v51 = vpop.f32.mrb[6].mxu0  ;;  %656 = vst [vmem:[%s1137_s30 + $0x8] sm:$0xff] %v652_v47 }
 0x105   : > { %v894_v52 = vpop.f32.mrb[7].mxu0 }
 0x106   : > { %v645_v53 = vadd.f32 %v924_v35, %v892_v50  ;;  %v895_v54 = vadd.f32 %v894_v52, %v893_v51 }
 0x108   : > { %v653_v55 = vadd.f32 %v645_v53, %v319_v44  ;;  %v648_v56 = vadd.f32 %v925_v41, %v895_v54 }
 0x109   : > { %v662_v58 = vld [vmem:[%s1137_s30] sm:$0xff] }
 0x10a   : > { %657 = vst [vmem:[%s1137_s30 + $0x10] sm:$0xff] %v653_v55  ;;  %658 = vst [vmem:[%s1137_s30 + $0x18] sm:$0xff] %v648_v56  ;;  %v676_v61 = vmul.f32 %v864_v57, %v648_v56  ;;  %v673_v62 = vmul.f32 %v864_v57, %v662_v58 }
 0x10b   : > { %v663_v59 = vld [vmem:[%s1137_s30 + $0x8] sm:$0xff] }
 0x10c   : > { %v674_v63 = vmul.f32 %v864_v57, %v663_v59  ;;  %v684_v2 = vadd.f32 %v865_v1, %v673_v62  ;;  %v687_v5 = vadd.f32 %v865_v1, %v676_v61 }
 0x10e   : > { %v685_v3 = vadd.f32 %v865_v1, %v674_v63  ;;  %v688_v6 = vmax.f32 %v684_v2, 0.0  ;;  %v691_v9 = vmax.f32 %v687_v5, 0.0 }
 0x110   : > { %v689_v7 = vmax.f32 %v685_v3, 0.0  ;;  %692 = vst [vmem:[%s1137_s30] sm:$0xff] %v688_v6  ;;  %695 = vst [vmem:[%s1137_s30 + $0x18] sm:$0xff] %v691_v9 }
 0x111   : > { %v664_v60 = vld [vmem:[%s1137_s30 + $0x10] sm:$0xff] }
 0x112   : > { %v675_v0 = vmul.f32 %v864_v57, %v664_v60  ;;  %693 = vst [vmem:[%s1137_s30 + $0x8] sm:$0xff] %v689_v7 }
 0x114   : > { %v686_v4 = vadd.f32 %v865_v1, %v675_v0 }
 0x116   : > { %v690_v8 = vmax.f32 %v686_v4, 0.0 }
 0x118   : > { %694 = vst [vmem:[%s1137_s30 + $0x10] sm:$0xff] %v690_v8 }
 0x119 PF: > { %s14_s17 = sadd.s32 1, %s1006_s17   ;;  %s1177_s15 = smov %s1002_s16 }
 0x11a   : > { %p11_p5 = scmp.ge.s32.totalorder %s14_s17, 4   ;;  %s1178_s16 = smov %s1180_s18 }
 0x11c   :  { %13 = sbr.rel (!%p11_p5) target bundleno = 2 (0x2), region = 83 }

// kernel: basnet_forward.174
= control target key start
LH: loop header
LB: loop body
LE: loop exit
PB: predicated region body
PF: predicated region fallthrough
CT: control target
= control target key end

     0   :  { %s868_s15 = smov 0   ;;  %s870_s16 = smov 0   ;;  %s982_s0 = inlined_call_operand.vmem [shape: bf16[64,256], index: 0, kind: input, shape index: {}]   ;;  %s983_s1 = inlined_call_operand.vmem [shape: bf16[256,128], index: 1, kind: input, shape index: {}]   ;;  %s984_s2 = inlined_call_operand.vmem [shape: f32[1,128], index: 2, kind: input, shape index: {}]   ;;  %s985_s3 = inlined_call_operand.vmem [shape: f32[1,128], index: 3, kind: input, shape index: {}]   ;;  %s986_s4 = inlined_call_operand.vmem [shape: f32[64,128], index: 4, kind: output, shape index: {}]  }
   0x1   :  { %s872_s17 = smov 0  }
   0x2 LB: > { %s33_s18 = sadd.s32 1, %s836_s16  ;;  %p696_p0 = scmp.ge.s32.totalorder %s840_s17, 1  ;;  %s840_s17 = sphi %s872_s17, %s14_s17   ;;  %s836_s16 = sphi %s870_s16, %s988_s16   ;;  %s832_s15 = sphi %s868_s15, %s987_s15  }
   0x3   : > { %p35_p1 = scmp.ge.s32.totalorder %s33_s18, 2  ;;  %p224_p2 = scmp.lt.s32.totalorder %s840_s17, 3 }
   0x5   : > { %s990_s18 = smov (%p35_p1, %s33_s18), 0  ;;  %p225_p3 = pnand %p696_p0, %p224_p2 }
   0x6   : > { %v796_v0 = vld [vmem:[%s983_s1 + $0x40] sm:$0xff] (!%p225_p3)   ;;  %s697_s21 = sshll.u32 (!%p225_p3), %s832_s15, 2  ;;  %v798_v2 = vld [vmem:[%s983_s1 + $0x48] sm:$0xff] (!%p225_p3)   ;;  %v800_v4 = vld [vmem:[%s983_s1 + $0x50] sm:$0xff] (!%p225_p3)   ;;  %v842_v20 = vmov (!%p225_p3), 0.0  }
   0x7   : > { %228 = sbr.rel (%p225_p3) target bundleno = 271 (0x10f), region = 36  ;;  %v797_v1 = vld [vmem:[%s983_s1] sm:$0xff] (!%p225_p3)   ;;  %727 = vmatprep.subr.bf16.mxu0 (!%p225_p3), %v796_v0  ;;  %755 = vmatprep.subr.bf16.mxu1 (!%p225_p3), %v796_v0  ;;  %v799_v3 = vld [vmem:[%s983_s1 + $0x8] sm:$0xff] (!%p225_p3)   ;;  %p274_p4 = scmp.lt.s32.totalorder (!%p225_p3), %s697_s21, 7  ;;  %v801_v5 = vld [vmem:[%s983_s1 + $0x10] sm:$0xff] (!%p225_p3)  }
   0x8   : > { %728 = vmatpush3.bf16.msra.mxu0 (!%p225_p3), %v797_v1  ;;  %763 = vmatpush3.bf16.msra.mxu1 (!%p225_p3), %v797_v1  ;;  %v802_v6 = vld [vmem:[%s983_s1 + $0x58] sm:$0xff] (!%p225_p3)   ;;  %v804_v8 = vld [vmem:[%s983_s1 + $0x60] sm:$0xff] (!%p225_p3)   ;;  %v806_v10 = vld [vmem:[%s983_s1 + $0x68] sm:$0xff] (!%p225_p3)  }
   0x9   : > { %729 = vmatprep.subr.bf16.mxu0 (!%p225_p3), %v798_v2  ;;  %756 = vmatprep.subr.bf16.mxu1 (!%p225_p3), %v798_v2  ;;  %v803_v7 = vld [vmem:[%s983_s1 + $0x18] sm:$0xff] (!%p225_p3)   ;;  %v805_v9 = vld [vmem:[%s983_s1 + $0x20] sm:$0xff] (!%p225_p3)   ;;  %v807_v13 = vld [vmem:[%s983_s1 + $0x28] sm:$0xff] (!%p225_p3)  }
   0xa   : > { %v808_v14 = vld [vmem:[%s983_s1 + $0x70] sm:$0xff] (!%p225_p3)   ;;  %v810_v16 = vld [vmem:[%s983_s1 + $0x78] sm:$0xff] (!%p225_p3)   ;;  %v722_v39 = vld [vmem:[%s984_s2] ss:$0 sm:$0xff] (!%p225_p3) }
   0xb   : > { %v809_v15 = vld [vmem:[%s983_s1 + $0x30] sm:$0xff] (!%p225_p3)   ;;  %v811_v17 = vld [vmem:[%s983_s1 + $0x38] sm:$0xff] (!%p225_p3)   ;;  %v723_v47 = vld [vmem:[%s985_s3] ss:$0 sm:$0xff] (!%p225_p3) }
   0xc   : > { %730 = vmatpush3.bf16.msra.mxu0 (!%p225_p3), %v799_v3  ;;  %764 = vmatpush3.bf16.msra.mxu1 (!%p225_p3), %v799_v3 }
   0xd   : > { %731 = vmatprep.subr.bf16.mxu0 (!%p225_p3), %v800_v4  ;;  %757 = vmatprep.subr.bf16.mxu1 (!%p225_p3), %v800_v4 }
   0xe   : > { %s992_s21 = smov (!%p274_p4, %s697_s21), 7 }
   0xf   : > { %s726_s10 = sshll.u32 %s992_s21, 3 }
  0x10   : > { %732 = vmatpush3.bf16.msra.mxu0 %v801_v5  ;;  %765 = vmatpush3.bf16.msra.mxu1 %v801_v5  ;;  %s281_s15 = scalar_lea.vmem %s982_s0, %s726_s10  ;;  %s947_s11 = scalar_lea.vmem %s986_s4, %s726_s10 }
  0x11   : > { %733 = vmatprep.subr.bf16.mxu0 %v802_v6  ;;  %758 = vmatprep.subr.bf16.mxu1 %v802_v6  ;;  %v814_v11 = vld [vmem:[%s281_s15 + $0x4] ss:$8 sps:$4 sm:$0xff]   ;;  %v817_v12 = vld [vmem:[%s281_s15 + $0x14] ss:$8 sps:$4 sm:$0xff]   ;;  %v812_v18 = vld [vmem:[%s281_s15] ss:$8 sps:$4 sm:$0xff]   ;;  %313 = vst [vmem:[%s947_s11] sm:$0xff] %v842_v20 }
  0x12   : > { %505 = vmatprep.mubr.bf16.mxu0 %v814_v11  ;;  %513 = vmatprep.mubr.bf16.mxu1 %v817_v12  ;;  %v815_v19 = vld [vmem:[%s281_s15 + $0x10] ss:$8 sps:$4 sm:$0xff]   ;;  %314 = vst [vmem:[%s947_s11 + $0x8] sm:$0xff] %v842_v20  ;;  %315 = vst [vmem:[%s947_s11 + $0x10] sm:$0xff] %v842_v20 }
  0x13   : > { %316 = vst [vmem:[%s947_s11 + $0x18] sm:$0xff] %v842_v20 }
  0x14   : > { %734 = vmatpush3.bf16.msra.mxu0 %v803_v7  ;;  %766 = vmatpush3.bf16.msra.mxu1 %v803_v7 }
  0x15   : > { %735 = vmatprep.subr.bf16.mxu0 %v804_v8  ;;  %759 = vmatprep.subr.bf16.mxu1 %v804_v8 }
  0x18   : > { %736 = vmatpush3.bf16.msra.mxu0 %v805_v9  ;;  %767 = vmatpush3.bf16.msra.mxu1 %v805_v9  ;;  %v317_v23 = vld [vmem:[%s947_s11] sm:$0xff] }
  0x19   : > { %737 = vmatprep.subr.bf16.mxu0 %v806_v10  ;;  %760 = vmatprep.subr.bf16.mxu1 %v806_v10  ;;  %v319_v30 = vld [vmem:[%s947_s11 + $0x10] sm:$0xff]  ;;  %v318_v31 = vld [vmem:[%s947_s11 + $0x8] sm:$0xff] }
  0x1c   : > { %738 = vmatpush3.bf16.msra.mxu0 %v807_v13  ;;  %768 = vmatpush3.bf16.msra.mxu1 %v807_v13 }
  0x1d   : > { %739 = vmatprep.subr.bf16.mxu0 %v808_v14  ;;  %761 = vmatprep.subr.bf16.mxu1 %v808_v14 }
  0x20   : > { %740 = vmatpush3.bf16.msra.mxu0 %v809_v15  ;;  %769 = vmatpush3.bf16.msra.mxu1 %v809_v15 }
  0x21   : > { %741 = vmatprep.subr.bf16.mxu0 %v810_v16  ;;  %762 = vmatprep.subr.bf16.mxu1 %v810_v16 }
  0x24   : > { %742 = vmatpush3.bf16.msra.mxu0 %v811_v17  ;;  %770 = vmatpush3.bf16.msra.mxu1 %v811_v17 }
  0x27   : > { %506 = vmatmul.mubr.bf16.vlgmr.msra.gmra.mrb[0].mxu0 %v812_v18  ;;  %514 = vmatmul.mubr.bf16.vlgmr.msra.gmra.mrb[0].mxu1 %v815_v19 }
  0xfa   : > { %v743_v21 = vpop.f32.mrb[0].mxu0  ;;  %v749_v22 = vpop.f32.mrb[0].mxu1 }
  0xfb   : > { %v744_v24 = vpop.f32.mrb[1].mxu0  ;;  %v750_v25 = vpop.f32.mrb[1].mxu1 }
  0xfc   : > { %v745_v26 = vadd.f32 %v744_v24, %v743_v21  ;;  %v751_v27 = vadd.f32 %v750_v25, %v749_v22  ;;  %v746_v28 = vpop.f32.mrb[2].mxu0  ;;  %v752_v29 = vpop.f32.mrb[2].mxu1 }
  0xfd   : > { %v747_v32 = vpop.f32.mrb[3].mxu0  ;;  %v753_v33 = vpop.f32.mrb[3].mxu1 }
  0xfe   : > { %v522_v34 = vadd.f32 %v745_v26, %v317_v23  ;;  %v748_v35 = vadd.f32 %v747_v32, %v746_v28  ;;  %v754_v36 = vadd.f32 %v753_v33, %v752_v29  ;;  %v524_v38 = vadd.f32 %v751_v27, %v319_v30 }
 0x100   : > { %v523_v37 = vadd.f32 %v748_v35, %v318_v31  ;;  %526 = vst [vmem:[%s947_s11] sm:$0xff] %v522_v34  ;;  %528 = vst [vmem:[%s947_s11 + $0x10] sm:$0xff] %v524_v38  ;;  %v547_v46 = vmul.f32 %v754_v36, %v722_v39 }
 0x101   : > { %529 = vst [vmem:[%s947_s11 + $0x18] sm:$0xff] %v754_v36 }
 0x102   : > { %527 = vst [vmem:[%s947_s11 + $0x8] sm:$0xff] %v523_v37  ;;  %v558_v51 = vadd.f32 %v723_v47, %v547_v46 }
 0x104   : > { %562 = vst [vmem:[%s947_s11 + $0x18] sm:$0xff] %v558_v51 }
 0x107   : > { %v533_v40 = vld [vmem:[%s947_s11] sm:$0xff]  ;;  %v535_v42 = vld [vmem:[%s947_s11 + $0x10] sm:$0xff] }
 0x108   : > { %v544_v43 = vmul.f32 %v722_v39, %v533_v40  ;;  %v546_v45 = vmul.f32 %v722_v39, %v535_v42 }
 0x109   : > { %v534_v41 = vld [vmem:[%s947_s11 + $0x8] sm:$0xff] }
 0x10a   : > { %v545_v44 = vmul.f32 %v722_v39, %v534_v41  ;;  %v555_v48 = vadd.f32 %v723_v47, %v544_v43  ;;  %v557_v50 = vadd.f32 %v723_v47, %v546_v45 }
 0x10c   : > { %v556_v49 = vadd.f32 %v723_v47, %v545_v44  ;;  %559 = vst [vmem:[%s947_s11] sm:$0xff] %v555_v48  ;;  %561 = vst [vmem:[%s947_s11 + $0x10] sm:$0xff] %v557_v50 }
 0x10e   : > { %560 = vst [vmem:[%s947_s11 + $0x8] sm:$0xff] %v556_v49 }
 0x10f PF: > { %s14_s17 = sadd.s32 1, %s840_s17   ;;  %s987_s15 = smov %s836_s16 }
 0x110   : > { %p11_p5 = scmp.ge.s32.totalorder %s14_s17, 4   ;;  %s988_s16 = smov %s990_s18 }
 0x112   :  { %13 = sbr.rel (!%p11_p5) target bundleno = 2 (0x2), region = 83 }

// kernel: basnet_forward.162
= control target key start
LH: loop header
LB: loop body
LE: loop exit
PB: predicated region body
PF: predicated region fallthrough
CT: control target
= control target key end

     0   :  { %s1453_s15 = smov 0   ;;  %s1455_s16 = smov 0   ;;  %s1657_s0 = inlined_call_operand.vmem [shape: bf16[256,384], index: 0, kind: input, shape index: {}]   ;;  %s1658_s1 = inlined_call_operand.vmem [shape: bf16[384,128], index: 1, kind: input, shape index: {}]   ;;  %s1659_s2 = inlined_call_operand.vmem [shape: f32[1,128], index: 2, kind: input, shape index: {}]   ;;  %s1660_s3 = inlined_call_operand.vmem [shape: f32[1,128], index: 3, kind: input, shape index: {}]   ;;  %s1661_s4 = inlined_call_operand.vmem [shape: f32[256,128], index: 4, kind: output, shape index: {}]  }
   0x1   :  { %s1457_s17 = smov 0  }
   0x2 LB: > { %s33_s18 = sadd.s32 1, %s1422_s16  ;;  %p1153_p0 = scmp.ge.s32.totalorder %s1426_s17, 1  ;;  %s1426_s17 = sphi %s1457_s17, %s14_s17   ;;  %s1422_s16 = sphi %s1455_s16, %s1663_s16   ;;  %s1418_s15 = sphi %s1453_s15, %s1662_s15  }
   0x3   : > { %p35_p1 = scmp.ge.s32.totalorder %s33_s18, 2  ;;  %p224_p2 = scmp.lt.s32.totalorder %s1426_s17, 3 }
   0x5   : > { %s1665_s18 = smov (%p35_p1, %s33_s18), 0  ;;  %p225_p3 = pnand %p1153_p0, %p224_p2 }
   0x6   : > { %v1348_v0 = vld [vmem:[%s1658_s1 + $0x40] sm:$0xff] (!%p225_p3)   ;;  %v1351_v3 = vld [vmem:[%s1658_s1 + $0x48] sm:$0xff] (!%p225_p3)   ;;  %v1354_v6 = vld [vmem:[%s1658_s1 + $0x50] sm:$0xff] (!%p225_p3)   ;;  %s1154_s9 = sshll.u32 (!%p225_p3), %s1418_s15, 4 }
   0x7   : > { %228 = sbr.rel (%p225_p3) target bundleno = 321 (0x141), region = 36  ;;  %v1349_v1 = vld [vmem:[%s1658_s1] sm:$0xff] (!%p225_p3)   ;;  %1210 = vmatprep.subr.bf16.mxu0 (!%p225_p3), %v1348_v0  ;;  %v1352_v4 = vld [vmem:[%s1658_s1 + $0x8] sm:$0xff] (!%p225_p3)   ;;  %v1355_v7 = vld [vmem:[%s1658_s1 + $0x10] sm:$0xff] (!%p225_p3)   ;;  %p274_p4 = scmp.lt.s32.totalorder (!%p225_p3), %s1154_s9, 31 }
   0x8   : > { %v1350_v2 = vld [vmem:[%s1658_s1 + $0x80] sm:$0xff] (!%p225_p3)   ;;  %1211 = vmatpush3.bf16.msra.mxu0 (!%p225_p3), %v1349_v1  ;;  %v1353_v5 = vld [vmem:[%s1658_s1 + $0x88] sm:$0xff] (!%p225_p3)   ;;  %v1356_v8 = vld [vmem:[%s1658_s1 + $0x90] sm:$0xff] (!%p225_p3)  }
   0x9   : > { %1290 = vmatprep.subr.bf16.mxu1 (!%p225_p3), %v1350_v2  ;;  %1212 = vmatprep.subr.bf16.mxu0 (!%p225_p3), %v1351_v3  ;;  %v1357_v9 = vld [vmem:[%s1658_s1 + $0x58] sm:$0xff] (!%p225_p3)   ;;  %v1360_v12 = vld [vmem:[%s1658_s1 + $0x60] sm:$0xff] (!%p225_p3)   ;;  %v1363_v15 = vld [vmem:[%s1658_s1 + $0x68] sm:$0xff] (!%p225_p3)  }
   0xa   : > { %1291 = vmatpush3.bf16.msra.mxu1 (!%p225_p3), %v1350_v2  ;;  %v1358_v10 = vld [vmem:[%s1658_s1 + $0x18] sm:$0xff] (!%p225_p3)   ;;  %v1362_v13 = vld [vmem:[%s1658_s1 + $0xa0] sm:$0xff] (!%p225_p3)   ;;  %v1365_v16 = vld [vmem:[%s1658_s1 + $0xa8] sm:$0xff] (!%p225_p3)  }
   0xb   : > { %1292 = vmatprep.subr.bf16.mxu1 (!%p225_p3), %v1353_v5  ;;  %v1359_v11 = vld [vmem:[%s1658_s1 + $0x98] sm:$0xff] (!%p225_p3)   ;;  %v1361_v14 = vld [vmem:[%s1658_s1 + $0x20] sm:$0xff] (!%p225_p3)   ;;  %v1364_v17 = vld [vmem:[%s1658_s1 + $0x28] sm:$0xff] (!%p225_p3)  }
   0xc   : > { %1213 = vmatpush3.bf16.msra.mxu0 (!%p225_p3), %v1352_v4  ;;  %v1366_v18 = vld [vmem:[%s1658_s1 + $0x70] sm:$0xff] (!%p225_p3)   ;;  %v1369_v21 = vld [vmem:[%s1658_s1 + $0x78] sm:$0xff] (!%p225_p3)   ;;  %v1581_v58 = vld [vmem:[%s1659_s2] ss:$0 sm:$0xff] (!%p225_p3) }
   0xd   : > { %1214 = vmatprep.subr.bf16.mxu0 (!%p225_p3), %v1354_v6  ;;  %v1367_v19 = vld [vmem:[%s1658_s1 + $0x30] sm:$0xff] (!%p225_p3)   ;;  %v1371_v22 = vld [vmem:[%s1658_s1 + $0xb8] sm:$0xff] (!%p225_p3)   ;;  %v1586_v61 = vld [vmem:[%s1660_s3] ss:$0 sm:$0xff] (!%p225_p3) }
   0xe   : > { %1293 = vmatpush3.bf16.msra.mxu1 %v1353_v5  ;;  %s1667_s9 = smov (!%p274_p4, %s1154_s9), 31  ;;  %v1368_v20 = vld [vmem:[%s1658_s1 + $0xb0] sm:$0xff]   ;;  %v1370_v25 = vld [vmem:[%s1658_s1 + $0x38] sm:$0xff]  }
   0xf   : > { %1294 = vmatprep.subr.bf16.mxu1 %v1356_v8  ;;  %s1322_s5 = smul.u32 12, %s1667_s9 }
  0x10   : > { %1215 = vmatpush3.bf16.msra.mxu0 %v1355_v7 }
  0x11   : > { %1216 = vmatprep.subr.bf16.mxu0 %v1357_v9  ;;  %s1543_s21 = scalar_lea.vmem %s1657_s0, %s1322_s5  ;;  %s1157_s5 = sshll.u32 %s1667_s9, 3 }
  0x12   : > { %1295 = vmatpush3.bf16.msra.mxu1 %v1356_v8  ;;  %v1374_v23 = vld [vmem:[%s1543_s21 + $0x4] ss:$12 sps:$4 sm:$0xff]   ;;  %v1375_v24 = vld [vmem:[%s1543_s21 + $0x8] ss:$12 sps:$4 sm:$0xff]   ;;  %v1372_v26 = vld [vmem:[%s1543_s21] ss:$12 sps:$4 sm:$0xff]   ;;  %s1595_s8 = scalar_lea.vmem %s1661_s4, %s1157_s5 }
  0x13   : > { %1296 = vmatprep.subr.bf16.mxu1 %v1359_v11  ;;  %729 = vmatprep.mubr.bf16.mxu0 %v1374_v23  ;;  %v1377_v27 = vld [vmem:[%s1543_s21 + $0x1c] ss:$12 sps:$4 sm:$0xff]   ;;  %v1376_v28 = vld [vmem:[%s1543_s21 + $0x20] ss:$12 sps:$4 sm:$0xff]   ;;  %v1383_v29 = vld [vmem:[%s1543_s21 + $0x38] ss:$12 sps:$4 sm:$0xff]  }
  0x14   : > { %1217 = vmatpush3.bf16.msra.mxu0 %v1358_v10  ;;  %1306 = vmatprep.mubr.bf16.mxu1 %v1375_v24  ;;  %v1379_v30 = vld [vmem:[%s1543_s21 + $0x18] ss:$12 sps:$4 sm:$0xff]   ;;  %v1380_v31 = vld [vmem:[%s1543_s21 + $0x34] ss:$12 sps:$4 sm:$0xff]   ;;  %v1384_v32 = vld [vmem:[%s1543_s21 + $0x50] ss:$12 sps:$4 sm:$0xff]  }
  0x15   : > { %1218 = vmatprep.subr.bf16.mxu0 %v1360_v12  ;;  %v1391_v33 = vld [vmem:[%s1543_s21 + $0x68] ss:$12 sps:$4 sm:$0xff]   ;;  %v1382_v34 = vld [vmem:[%s1543_s21 + $0x30] ss:$12 sps:$4 sm:$0xff]   ;;  %v1385_v35 = vld [vmem:[%s1543_s21 + $0x4c] ss:$12 sps:$4 sm:$0xff]  }
  0x16   : > { %1297 = vmatpush3.bf16.msra.mxu1 %v1359_v11  ;;  %v1392_v36 = vld [vmem:[%s1543_s21 + $0x80] ss:$12 sps:$4 sm:$0xff]   ;;  %v1399_v37 = vld [vmem:[%s1543_s21 + $0x98] ss:$12 sps:$4 sm:$0xff]   ;;  %v1387_v38 = vld [vmem:[%s1543_s21 + $0x48] ss:$12 sps:$4 sm:$0xff]  }
  0x17   : > { %1298 = vmatprep.subr.bf16.mxu1 %v1362_v13  ;;  %v1388_v39 = vld [vmem:[%s1543_s21 + $0x64] ss:$12 sps:$4 sm:$0xff]   ;;  %v1390_v41 = vld [vmem:[%s1543_s21 + $0x60] ss:$12 sps:$4 sm:$0xff]   ;;  %v1393_v42 = vld [vmem:[%s1543_s21 + $0x7c] ss:$12 sps:$4 sm:$0xff]  }
  0x18   : > { %1219 = vmatpush3.bf16.msra.mxu0 %v1361_v14  ;;  %v1400_v40 = vld [vmem:[%s1543_s21 + $0xb0] ss:$12 sps:$4 sm:$0xff]   ;;  %v1395_v43 = vld [vmem:[%s1543_s21 + $0x78] ss:$12 sps:$4 sm:$0xff]   ;;  %v1396_v44 = vld [vmem:[%s1543_s21 + $0x94] ss:$12 sps:$4 sm:$0xff]  }
  0x19   : > { %1220 = vmatprep.subr.bf16.mxu0 %v1363_v15  ;;  %v1398_v45 = vld [vmem:[%s1543_s21 + $0x90] ss:$12 sps:$4 sm:$0xff]   ;;  %v1401_v46 = vld [vmem:[%s1543_s21 + $0xac] ss:$12 sps:$4 sm:$0xff]   ;;  %v1403_v47 = vld [vmem:[%s1543_s21 + $0xa8] ss:$12 sps:$4 sm:$0xff]  }
  0x1a   : > { %1299 = vmatpush3.bf16.msra.mxu1 %v1362_v13 }
  0x1b   : > { %1300 = vmatprep.subr.bf16.mxu1 %v1365_v16 }
  0x1c   : > { %1221 = vmatpush3.bf16.msra.mxu0 %v1364_v17 }
  0x1d   : > { %1222 = vmatprep.subr.bf16.mxu0 %v1366_v18 }
  0x1e   : > { %1301 = vmatpush3.bf16.msra.mxu1 %v1365_v16 }
  0x1f   : > { %1302 = vmatprep.subr.bf16.mxu1 %v1368_v20 }
  0x20   : > { %1223 = vmatpush3.bf16.msra.mxu0 %v1367_v19 }
  0x21   : > { %1224 = vmatprep.subr.bf16.mxu0 %v1369_v21 }
  0x22   : > { %1303 = vmatpush3.bf16.msra.mxu1 %v1368_v20 }
  0x23   : > { %1304 = vmatprep.subr.bf16.mxu1 %v1371_v22 }
  0x24   : > { %1225 = vmatpush3.bf16.msra.mxu0 %v1370_v25 }
  0x26   : > { %1305 = vmatpush3.bf16.msra.mxu1 %v1371_v22 }
  0x27   : > { %730 = vmatmul.mubr.bf16.vlgmr.msra.gmra.mrb[0].mxu0 %v1372_v26 }
  0x28   : > { %737 = vmatprep.mubr.bf16.mxu0 %v1377_v27 }
  0x29   : > { %1307 = vmatmul.mubr.bf16.vlgmr.msra.gmra.mrb[0].mxu1 %v1376_v28 }
  0x2a   : > { %1310 = vmatprep.mubr.bf16.mxu1 %v1383_v29 }
  0x2f   : > { %738 = vmatmul.mubr.bf16.gmra.mrb[4].mxu0 %v1379_v30 }
  0x30   : > { %745 = vmatprep.mubr.bf16.mxu0 %v1380_v31 }
  0x31   : > { %1311 = vmatmul.mubr.bf16.gmra.mrb[4].mxu1 %v1384_v32 }
  0x32   : > { %1314 = vmatprep.mubr.bf16.mxu1 %v1391_v33 }
  0x37   : > { %746 = vmatmul.mubr.bf16.gmra.mrb[8].mxu0 %v1382_v34 }
  0x38   : > { %753 = vmatprep.mubr.bf16.mxu0 %v1385_v35 }
  0x39   : > { %1315 = vmatmul.mubr.bf16.gmra.mrb[8].mxu1 %v1392_v36 }
  0x3a   : > { %1318 = vmatprep.mubr.bf16.mxu1 %v1399_v37 }
  0x3f   : > { %754 = vmatmul.mubr.bf16.gmra.mrb[12].mxu0 %v1387_v38 }
  0x40   : > { %761 = vmatprep.mubr.bf16.mxu0 %v1388_v39 }
  0x41   : > { %1319 = vmatmul.mubr.bf16.gmra.mrb[12].mxu1 %v1400_v40 }
  0x47   : > { %762 = vmatmul.mubr.bf16.gmra.mrb[16].mxu0 %v1390_v41 }
  0x48   : > { %769 = vmatprep.mubr.bf16.mxu0 %v1393_v42 }
  0x4f   : > { %770 = vmatmul.mubr.bf16.gmra.mrb[20].mxu0 %v1395_v43 }
  0x50   : > { %777 = vmatprep.mubr.bf16.mxu0 %v1396_v44 }
  0x57   : > { %778 = vmatmul.mubr.bf16.gmra.mrb[24].mxu0 %v1398_v45 }
  0x58   : > { %785 = vmatprep.mubr.bf16.mxu0 %v1401_v46 }
  0x5f   : > { %786 = vmatmul.mubr.bf16.gmra.mrb[28].mxu0 %v1403_v47 }
  0xfa   : > { %v1226_v48 = vpop.f32.mrb[0].mxu0 }
  0xfb   : > { %v1227_v49 = vpop.f32.mrb[1].mxu0 }
  0xfc   : > { %v1228_v50 = vadd.f32 %v1227_v49, %v1226_v48  ;;  %v1229_v51 = vpop.f32.mrb[2].mxu0  ;;  %v1308_v52 = vpop.f32.mrb[0].mxu1 }
  0xfd   : > { %v1230_v53 = vpop.f32.mrb[3].mxu0  ;;  %v828_v54 = vpop.f32.mrb[1].mxu1 }
  0xfe   : > { %v1231_v55 = vadd.f32 %v1230_v53, %v1229_v51  ;;  %v829_v56 = vadd.f32 %v1228_v50, %v828_v54  ;;  %v1309_v57 = vpop.f32.mrb[2].mxu1 }
  0xff   : > { %v831_v59 = vpop.f32.mrb[3].mxu1 }
 0x100   : > { %v832_v60 = vadd.f32 %v1231_v55, %v831_v59  ;;  %v949_v62 = vmul.f32 %v1581_v58, %v829_v56 }
 0x102   : > { %v1232_v63 = vpop.f32.mrb[4].mxu0  ;;  %v972_v1 = vadd.f32 %v1586_v61, %v949_v62  ;;  %v950_v2 = vmul.f32 %v1581_v58, %v832_v60 }
 0x103   : > { %v1233_v0 = vpop.f32.mrb[5].mxu0 }
 0x104   : > { %v1234_v3 = vadd.f32 %v1233_v0, %v1232_v63  ;;  %v1235_v4 = vpop.f32.mrb[6].mxu0  ;;  %v1312_v5 = vpop.f32.mrb[4].mxu1  ;;  %v988_v8 = vmax.f32 %v972_v1, 0.0  ;;  %v973_v9 = vadd.f32 %v1586_v61, %v950_v2 }
 0x105   : > { %v1236_v6 = vpop.f32.mrb[7].mxu0  ;;  %v844_v7 = vpop.f32.mrb[5].mxu1 }
 0x106   : > { %v837_v10 = vadd.f32 %v1308_v52, %v1234_v3  ;;  %v1237_v11 = vadd.f32 %v1236_v6, %v1235_v4  ;;  %v1313_v12 = vpop.f32.mrb[6].mxu1  ;;  %1004 = vst [vmem:[%s1595_s8] sm:$0xff] %v988_v8  ;;  %v989_v14 = vmax.f32 %v973_v9, 0.0 }
 0x107   : > { %v847_v13 = vpop.f32.mrb[7].mxu1 }
 0x108   : > { %v840_v15 = vadd.f32 %v1309_v57, %v1237_v11  ;;  %1005 = vst [vmem:[%s1595_s8 + $0x8] sm:$0xff] %v989_v14  ;;  %v951_v16 = vmul.f32 %v1581_v58, %v837_v10 }
 0x10a   : > { %v1238_v17 = vpop.f32.mrb[8].mxu0  ;;  %v974_v19 = vadd.f32 %v1586_v61, %v951_v16  ;;  %v952_v20 = vmul.f32 %v1581_v58, %v840_v15 }
 0x10b   : > { %v1239_v18 = vpop.f32.mrb[9].mxu0 }
 0x10c   : > { %v1240_v21 = vadd.f32 %v1239_v18, %v1238_v17  ;;  %v1241_v22 = vpop.f32.mrb[10].mxu0  ;;  %v1316_v23 = vpop.f32.mrb[8].mxu1  ;;  %v990_v26 = vmax.f32 %v974_v19, 0.0  ;;  %v975_v27 = vadd.f32 %v1586_v61, %v952_v20 }
 0x10d   : > { %v1242_v24 = vpop.f32.mrb[11].mxu0  ;;  %v860_v25 = vpop.f32.mrb[9].mxu1 }
 0x10e   : > { %v1243_v28 = vadd.f32 %v1242_v24, %v1241_v22  ;;  %v845_v29 = vadd.f32 %v1240_v21, %v844_v7  ;;  %v1317_v30 = vpop.f32.mrb[10].mxu1  ;;  %1006 = vst [vmem:[%s1595_s8 + $0x10] sm:$0xff] %v990_v26  ;;  %v991_v32 = vmax.f32 %v975_v27, 0.0 }
 0x10f   : > { %v863_v31 = vpop.f32.mrb[11].mxu1 }
 0x110   : > { %v848_v33 = vadd.f32 %v1243_v28, %v847_v13  ;;  %1007 = vst [vmem:[%s1595_s8 + $0x18] sm:$0xff] %v991_v32  ;;  %v953_v34 = vmul.f32 %v1581_v58, %v845_v29 }
 0x112   : > { %v1244_v35 = vpop.f32.mrb[12].mxu0  ;;  %v976_v37 = vadd.f32 %v1586_v61, %v953_v34  ;;  %v954_v38 = vmul.f32 %v1581_v58, %v848_v33 }
 0x113   : > { %v1245_v36 = vpop.f32.mrb[13].mxu0 }
 0x114   : > { %v1246_v39 = vadd.f32 %v1245_v36, %v1244_v35  ;;  %v1247_v40 = vpop.f32.mrb[14].mxu0  ;;  %v1609_v41 = vpop.f32.mrb[12].mxu1  ;;  %v992_v44 = vmax.f32 %v976_v37, 0.0  ;;  %v977_v45 = vadd.f32 %v1586_v61, %v954_v38 }
 0x115   : > { %v1248_v42 = vpop.f32.mrb[15].mxu0  ;;  %v876_v43 = vpop.f32.mrb[13].mxu1 }
 0x116   : > { %v853_v46 = vadd.f32 %v1312_v5, %v1246_v39  ;;  %v1249_v47 = vadd.f32 %v1248_v42, %v1247_v40  ;;  %v1612_v48 = vpop.f32.mrb[14].mxu1  ;;  %1008 = vst [vmem:[%s1595_s8 + $0x20] sm:$0xff] %v992_v44  ;;  %v993_v50 = vmax.f32 %v977_v45, 0.0 }
 0x117   : > { %v879_v49 = vpop.f32.mrb[15].mxu1 }
 0x118   : > { %v856_v51 = vadd.f32 %v1313_v12, %v1249_v47  ;;  %1009 = vst [vmem:[%s1595_s8 + $0x28] sm:$0xff] %v993_v50  ;;  %v955_v52 = vmul.f32 %v1581_v58, %v853_v46 }
 0x11a   : > { %v1250_v53 = vpop.f32.mrb[16].mxu0  ;;  %v978_v55 = vadd.f32 %v1586_v61, %v955_v52  ;;  %v956_v56 = vmul.f32 %v1581_v58, %v856_v51 }
 0x11b   : > { %v1251_v54 = vpop.f32.mrb[17].mxu0 }
 0x11c   : > { %v1252_v57 = vadd.f32 %v1251_v54, %v1250_v53  ;;  %v1253_v59 = vpop.f32.mrb[18].mxu0  ;;  %v994_v62 = vmax.f32 %v978_v55, 0.0  ;;  %v979_v63 = vadd.f32 %v1586_v61, %v956_v56 }
 0x11d   : > { %v1254_v60 = vpop.f32.mrb[19].mxu0 }
 0x11e   : > { %v1255_v0 = vadd.f32 %v1254_v60, %v1253_v59  ;;  %v861_v1 = vadd.f32 %v1252_v57, %v860_v25  ;;  %1010 = vst [vmem:[%s1595_s8 + $0x30] sm:$0xff] %v994_v62  ;;  %v995_v2 = vmax.f32 %v979_v63, 0.0 }
 0x120   : > { %v864_v3 = vadd.f32 %v1255_v0, %v863_v31  ;;  %1011 = vst [vmem:[%s1595_s8 + $0x38] sm:$0xff] %v995_v2  ;;  %v957_v4 = vmul.f32 %v1581_v58, %v861_v1 }
 0x122   : > { %v1256_v5 = vpop.f32.mrb[20].mxu0  ;;  %v980_v7 = vadd.f32 %v1586_v61, %v957_v4  ;;  %v958_v8 = vmul.f32 %v1581_v58, %v864_v3 }
 0x123   : > { %v1257_v6 = vpop.f32.mrb[21].mxu0 }
 0x124   : > { %v1258_v9 = vadd.f32 %v1257_v6, %v1256_v5  ;;  %v1259_v10 = vpop.f32.mrb[22].mxu0  ;;  %v996_v12 = vmax.f32 %v980_v7, 0.0  ;;  %v981_v13 = vadd.f32 %v1586_v61, %v958_v8 }
 0x125   : > { %v1260_v11 = vpop.f32.mrb[23].mxu0 }
 0x126   : > { %v869_v14 = vadd.f32 %v1316_v23, %v1258_v9  ;;  %v1261_v15 = vadd.f32 %v1260_v11, %v1259_v10  ;;  %1012 = vst [vmem:[%s1595_s8 + $0x40] sm:$0xff] %v996_v12  ;;  %v997_v16 = vmax.f32 %v981_v13, 0.0 }
 0x128   : > { %v872_v17 = vadd.f32 %v1317_v30, %v1261_v15  ;;  %1013 = vst [vmem:[%s1595_s8 + $0x48] sm:$0xff] %v997_v16  ;;  %v959_v18 = vmul.f32 %v1581_v58, %v869_v14 }
 0x12a   : > { %v1262_v19 = vpop.f32.mrb[24].mxu0  ;;  %v982_v21 = vadd.f32 %v1586_v61, %v959_v18  ;;  %v960_v22 = vmul.f32 %v1581_v58, %v872_v17 }
 0x12b   : > { %v1263_v20 = vpop.f32.mrb[25].mxu0 }
 0x12c   : > { %v1264_v24 = vadd.f32 %v1263_v20, %v1262_v19  ;;  %v1265_v25 = vpop.f32.mrb[26].mxu0  ;;  %v998_v27 = vmax.f32 %v982_v21, 0.0  ;;  %v983_v23 = vadd.f32 %v1586_v61, %v960_v22 }
 0x12d   : > { %v1266_v26 = vpop.f32.mrb[27].mxu0 }
 0x12e   : > { %v1267_v28 = vadd.f32 %v1266_v26, %v1265_v25  ;;  %v877_v29 = vadd.f32 %v1264_v24, %v876_v43  ;;  %1014 = vst [vmem:[%s1595_s8 + $0x50] sm:$0xff] %v998_v27  ;;  %v999_v30 = vmax.f32 %v983_v23, 0.0 }
 0x130   : > { %v880_v31 = vadd.f32 %v1267_v28, %v879_v49  ;;  %1015 = vst [vmem:[%s1595_s8 + $0x58] sm:$0xff] %v999_v30  ;;  %v961_v32 = vmul.f32 %v1581_v58, %v877_v29 }
 0x132   : > { %v1268_v33 = vpop.f32.mrb[28].mxu0  ;;  %v984_v35 = vadd.f32 %v1586_v61, %v961_v32  ;;  %v962_v36 = vmul.f32 %v1581_v58, %v880_v31 }
 0x133   : > { %v1269_v34 = vpop.f32.mrb[29].mxu0 }
 0x134   : > { %v1270_v37 = vadd.f32 %v1269_v34, %v1268_v33  ;;  %v1271_v38 = vpop.f32.mrb[30].mxu0  ;;  %v1000_v40 = vmax.f32 %v984_v35, 0.0  ;;  %v985_v42 = vadd.f32 %v1586_v61, %v962_v36 }
 0x135   : > { %v1272_v39 = vpop.f32.mrb[31].mxu0 }
 0x136   : > { %v885_v43 = vadd.f32 %v1609_v41, %v1270_v37  ;;  %v1273_v44 = vadd.f32 %v1272_v39, %v1271_v38  ;;  %1016 = vst [vmem:[%s1595_s8 + $0x60] sm:$0xff] %v1000_v40  ;;  %v1001_v45 = vmax.f32 %v985_v42, 0.0 }
 0x138   : > { %v888_v46 = vadd.f32 %v1612_v48, %v1273_v44  ;;  %1017 = vst [vmem:[%s1595_s8 + $0x68] sm:$0xff] %v1001_v45  ;;  %v963_v47 = vmul.f32 %v1581_v58, %v885_v43 }
 0x13a   : > { %v986_v49 = vadd.f32 %v1586_v61, %v963_v47  ;;  %v964_v50 = vmul.f32 %v1581_v58, %v888_v46 }
 0x13c   : > { %v1002_v51 = vmax.f32 %v986_v49, 0.0  ;;  %v987_v52 = vadd.f32 %v1586_v61, %v964_v50 }
 0x13e   : > { %1018 = vst [vmem:[%s1595_s8 + $0x70] sm:$0xff] %v1002_v51  ;;  %v1003_v53 = vmax.f32 %v987_v52, 0.0 }
 0x140   : > { %1019 = vst [vmem:[%s1595_s8 + $0x78] sm:$0xff] %v1003_v53 }
 0x141 PF: > { %s14_s17 = sadd.s32 1, %s1426_s17   ;;  %s1662_s15 = smov %s1422_s16 }
 0x142   : > { %p11_p5 = scmp.ge.s32.totalorder %s14_s17, 4   ;;  %s1663_s16 = smov %s1665_s18 }
 0x144   :  { %13 = sbr.rel (!%p11_p5) target bundleno = 2 (0x2), region = 83 }

// kernel: basnet_forward.90
= control target key start
LH: loop header
LB: loop body
LE: loop exit
PB: predicated region body
PF: predicated region fallthrough
CT: control target
= control target key end

     0   :  { %s1936_s15 = smov 0   ;;  %s1938_s16 = smov 0   ;;  %s2235_s0 = inlined_call_operand.vmem [shape: bf16[1024,128], index: 0, kind: input, shape index: {}]   ;;  %s2236_s1 = inlined_call_operand.vmem [shape: bf16[128,128], index: 1, kind: input, shape index: {}]   ;;  %s2237_s2 = inlined_call_operand.vmem [shape: f32[1,128], index: 2, kind: input, shape index: {}]   ;;  %s2238_s3 = inlined_call_operand.vmem [shape: f32[1,128], index: 3, kind: input, shape index: {}]   ;;  %s2239_s4 = inlined_call_operand.vmem [shape: f32[1024,128], index: 4, kind: output, shape index: {}]  }
   0x1   :  { %s1940_s17 = smov 0  }
   0x2 LB: > { %s33_s18 = sadd.s32 1, %s1905_s16  ;;  %p1637_p0 = scmp.ge.s32.totalorder %s1909_s17, 1  ;;  %s1909_s17 = sphi %s1940_s17, %s14_s17   ;;  %s1905_s16 = sphi %s1938_s16, %s2241_s16   ;;  %s1901_s15 = sphi %s1936_s15, %s2240_s15  }
   0x3   : > { %p35_p1 = scmp.ge.s32.totalorder %s33_s18, 2  ;;  %p221_p2 = scmp.lt.s32.totalorder %s1909_s17, 3 }
   0x5   : > { %s2243_s18 = smov (%p35_p1, %s33_s18), 0  ;;  %p222_p3 = pnand %p1637_p0, %p221_p2 }
   0x6   : > { %v1847_v0 = vld [vmem:[%s2236_s1] sm:$0xff] (!%p222_p3)   ;;  %s1638_s21 = sshll.u32 (!%p222_p3), %s1901_s15, 6  ;;  %v1848_v1 = vld [vmem:[%s2236_s1 + $0x8] sm:$0xff] (!%p222_p3)   ;;  %v1849_v2 = vld [vmem:[%s2236_s1 + $0x10] sm:$0xff] (!%p222_p3)  }
   0x7   : > { %225 = sbr.rel (%p222_p3) target bundleno = 317 (0x13d), region = 36  ;;  %p268_p4 = scmp.lt.s32.totalorder (!%p222_p3), %s1638_s21, 127  ;;  %1726 = vmatprep.subr.bf16.mxu0 (!%p222_p3), %v1847_v0  ;;  %1806 = vmatprep.subr.bf16.mxu1 (!%p222_p3), %v1847_v0  ;;  %v1850_v3 = vld [vmem:[%s2236_s1 + $0x18] sm:$0xff] (!%p222_p3)   ;;  %v1851_v6 = vld [vmem:[%s2236_s1 + $0x20] sm:$0xff] (!%p222_p3)   ;;  %v1852_v7 = vld [vmem:[%s2236_s1 + $0x28] sm:$0xff] (!%p222_p3)  }
   0x8   : > { %1727 = vmatpush3.bf16.msra.mxu0 (!%p222_p3), %v1847_v0  ;;  %1814 = vmatpush3.bf16.msra.mxu1 (!%p222_p3), %v1847_v0  ;;  %v1853_v8 = vld [vmem:[%s2236_s1 + $0x30] sm:$0xff] (!%p222_p3)   ;;  %v1854_v9 = vld [vmem:[%s2236_s1 + $0x38] sm:$0xff] (!%p222_p3)   ;;  %v2021_v41 = vld [vmem:[%s2237_s2] ss:$0 sm:$0xff] (!%p222_p3) }
   0x9   : > { %1728 = vmatprep.subr.bf16.mxu0 (!%p222_p3), %v1848_v1  ;;  %1807 = vmatprep.subr.bf16.mxu1 (!%p222_p3), %v1848_v1  ;;  %v2026_v45 = vld [vmem:[%s2238_s3] ss:$0 sm:$0xff] (!%p222_p3) }
   0xc   : > { %1729 = vmatpush3.bf16.msra.mxu0 (!%p222_p3), %v1848_v1  ;;  %1815 = vmatpush3.bf16.msra.mxu1 (!%p222_p3), %v1848_v1 }
   0xd   : > { %1730 = vmatprep.subr.bf16.mxu0 (!%p222_p3), %v1849_v2  ;;  %1808 = vmatprep.subr.bf16.mxu1 (!%p222_p3), %v1849_v2 }
   0xe   : > { %s2245_s21 = smov (!%p268_p4, %s1638_s21), 127 }
   0xf   : > { %s1639_s26 = sshll.u32 %s2245_s21, 2  ;;  %s1641_s22 = sshll.u32 %s2245_s21, 3 }
  0x10   : > { %s1969_s29 = scalar_lea.vmem %s2235_s0, %s1639_s26  ;;  %1731 = vmatpush3.bf16.msra.mxu0 %v1849_v2  ;;  %1816 = vmatpush3.bf16.msra.mxu1 %v1849_v2  ;;  %s2040_s24 = scalar_lea.vmem %s2239_s4, %s1641_s22 }
  0x11   : > { %v1855_v4 = vld [vmem:[%s1969_s29] sm:$0xff]   ;;  %1732 = vmatprep.subr.bf16.mxu0 %v1850_v3  ;;  %1809 = vmatprep.subr.bf16.mxu1 %v1850_v3  ;;  %v1857_v10 = vld [vmem:[%s1969_s29 + $0x8] sm:$0xff]   ;;  %v1859_v12 = vld [vmem:[%s1969_s29 + $0x10] sm:$0xff]  }
  0x12   : > { %v1856_v5 = vld [vmem:[%s1969_s29 + $0x80] sm:$0xff]   ;;  %1742 = vmatprep.mubr.bf16.mxu0 %v1855_v4  ;;  %v1858_v11 = vld [vmem:[%s1969_s29 + $0x88] sm:$0xff]   ;;  %v1860_v13 = vld [vmem:[%s1969_s29 + $0x90] sm:$0xff]  }
  0x13   : > { %1774 = vmatprep.mubr.bf16.mxu1 %v1856_v5  ;;  %v1861_v14 = vld [vmem:[%s1969_s29 + $0x18] sm:$0xff]   ;;  %v1863_v16 = vld [vmem:[%s1969_s29 + $0x20] sm:$0xff]   ;;  %v1865_v18 = vld [vmem:[%s1969_s29 + $0x28] sm:$0xff]  }
  0x14   : > { %1733 = vmatpush3.bf16.msra.mxu0 %v1850_v3  ;;  %1817 = vmatpush3.bf16.msra.mxu1 %v1850_v3  ;;  %v1862_v15 = vld [vmem:[%s1969_s29 + $0x98] sm:$0xff]   ;;  %v1864_v17 = vld [vmem:[%s1969_s29 + $0xa0] sm:$0xff]   ;;  %v1866_v19 = vld [vmem:[%s1969_s29 + $0xa8] sm:$0xff]  }
  0x15   : > { %1734 = vmatprep.subr.bf16.mxu0 %v1851_v6  ;;  %1810 = vmatprep.subr.bf16.mxu1 %v1851_v6  ;;  %v1867_v20 = vld [vmem:[%s1969_s29 + $0x30] sm:$0xff]   ;;  %v1869_v22 = vld [vmem:[%s1969_s29 + $0x38] sm:$0xff]   ;;  %v1871_v24 = vld [vmem:[%s1969_s29 + $0x40] sm:$0xff]  }
  0x16   : > { %v1868_v21 = vld [vmem:[%s1969_s29 + $0xb0] sm:$0xff]   ;;  %v1870_v23 = vld [vmem:[%s1969_s29 + $0xb8] sm:$0xff]   ;;  %v1872_v25 = vld [vmem:[%s1969_s29 + $0xc0] sm:$0xff]  }
  0x17   : > { %v1873_v26 = vld [vmem:[%s1969_s29 + $0x48] sm:$0xff]   ;;  %v1875_v28 = vld [vmem:[%s1969_s29 + $0x50] sm:$0xff]   ;;  %v1877_v30 = vld [vmem:[%s1969_s29 + $0x58] sm:$0xff]  }
  0x18   : > { %1735 = vmatpush3.bf16.msra.mxu0 %v1851_v6  ;;  %1818 = vmatpush3.bf16.msra.mxu1 %v1851_v6  ;;  %v1874_v27 = vld [vmem:[%s1969_s29 + $0xc8] sm:$0xff]   ;;  %v1876_v29 = vld [vmem:[%s1969_s29 + $0xd0] sm:$0xff]   ;;  %v1878_v31 = vld [vmem:[%s1969_s29 + $0xd8] sm:$0xff]  }
  0x19   : > { %1736 = vmatprep.subr.bf16.mxu0 %v1852_v7  ;;  %1811 = vmatprep.subr.bf16.mxu1 %v1852_v7  ;;  %v1879_v32 = vld [vmem:[%s1969_s29 + $0x60] sm:$0xff]   ;;  %v1881_v34 = vld [vmem:[%s1969_s29 + $0x68] sm:$0xff]   ;;  %v1883_v36 = vld [vmem:[%s1969_s29 + $0x70] sm:$0xff]  }
  0x1a   : > { %v1880_v33 = vld [vmem:[%s1969_s29 + $0xe0] sm:$0xff]   ;;  %v1882_v35 = vld [vmem:[%s1969_s29 + $0xe8] sm:$0xff]   ;;  %v1884_v37 = vld [vmem:[%s1969_s29 + $0xf0] sm:$0xff]  }
  0x1b   : > { %v1885_v38 = vld [vmem:[%s1969_s29 + $0x78] sm:$0xff]  }
  0x1c   : > { %1737 = vmatpush3.bf16.msra.mxu0 %v1852_v7  ;;  %1819 = vmatpush3.bf16.msra.mxu1 %v1852_v7  ;;  %v1886_v39 = vld [vmem:[%s1969_s29 + $0xf8] sm:$0xff]  }
  0x1d   : > { %1738 = vmatprep.subr.bf16.mxu0 %v1853_v8  ;;  %1812 = vmatprep.subr.bf16.mxu1 %v1853_v8 }
  0x20   : > { %1739 = vmatpush3.bf16.msra.mxu0 %v1853_v8  ;;  %1820 = vmatpush3.bf16.msra.mxu1 %v1853_v8 }
  0x21   : > { %1740 = vmatprep.subr.bf16.mxu0 %v1854_v9  ;;  %1813 = vmatprep.subr.bf16.mxu1 %v1854_v9 }
  0x24   : > { %1741 = vmatpush3.bf16.msra.mxu0 %v1854_v9  ;;  %1821 = vmatpush3.bf16.msra.mxu1 %v1854_v9 }
  0x27   : > { %1743 = vmatmul.mubr.bf16.vlgmr.msra.gmra.mrb[0].mxu0 %v1857_v10  ;;  %1775 = vmatmul.mubr.bf16.vlgmr.msra.gmra.mrb[0].mxu1 %v1858_v11 }
  0x28   : > { %1746 = vmatprep.mubr.bf16.mxu0 %v1859_v12  ;;  %1778 = vmatprep.mubr.bf16.mxu1 %v1860_v13 }
  0x2f   : > { %1747 = vmatmul.mubr.bf16.gmra.mrb[4].mxu0 %v1861_v14  ;;  %1779 = vmatmul.mubr.bf16.gmra.mrb[4].mxu1 %v1862_v15 }
  0x30   : > { %1750 = vmatprep.mubr.bf16.mxu0 %v1863_v16  ;;  %1782 = vmatprep.mubr.bf16.mxu1 %v1864_v17 }
  0x37   : > { %1751 = vmatmul.mubr.bf16.gmra.mrb[8].mxu0 %v1865_v18  ;;  %1783 = vmatmul.mubr.bf16.gmra.mrb[8].mxu1 %v1866_v19 }
  0x38   : > { %1754 = vmatprep.mubr.bf16.mxu0 %v1867_v20  ;;  %1786 = vmatprep.mubr.bf16.mxu1 %v1868_v21 }
  0x3f   : > { %1755 = vmatmul.mubr.bf16.gmra.mrb[12].mxu0 %v1869_v22  ;;  %1787 = vmatmul.mubr.bf16.gmra.mrb[12].mxu1 %v1870_v23 }
  0x40   : > { %1758 = vmatprep.mubr.bf16.mxu0 %v1871_v24  ;;  %1790 = vmatprep.mubr.bf16.mxu1 %v1872_v25 }
  0x47   : > { %1759 = vmatmul.mubr.bf16.gmra.mrb[16].mxu0 %v1873_v26  ;;  %1791 = vmatmul.mubr.bf16.gmra.mrb[16].mxu1 %v1874_v27 }
  0x48   : > { %1762 = vmatprep.mubr.bf16.mxu0 %v1875_v28  ;;  %1794 = vmatprep.mubr.bf16.mxu1 %v1876_v29 }
  0x4f   : > { %1763 = vmatmul.mubr.bf16.gmra.mrb[20].mxu0 %v1877_v30  ;;  %1795 = vmatmul.mubr.bf16.gmra.mrb[20].mxu1 %v1878_v31 }
  0x50   : > { %1766 = vmatprep.mubr.bf16.mxu0 %v1879_v32  ;;  %1798 = vmatprep.mubr.bf16.mxu1 %v1880_v33 }
  0x57   : > { %1767 = vmatmul.mubr.bf16.gmra.mrb[24].mxu0 %v1881_v34  ;;  %1799 = vmatmul.mubr.bf16.gmra.mrb[24].mxu1 %v1882_v35 }
  0x58   : > { %1770 = vmatprep.mubr.bf16.mxu0 %v1883_v36  ;;  %1802 = vmatprep.mubr.bf16.mxu1 %v1884_v37 }
  0x5f   : > { %1771 = vmatmul.mubr.bf16.gmra.mrb[28].mxu0 %v1885_v38  ;;  %1803 = vmatmul.mubr.bf16.gmra.mrb[28].mxu1 %v1886_v39 }
  0xfa   : > { %v1744_v40 = vpop.f32.mrb[0].mxu0  ;;  %v1776_v42 = vpop.f32.mrb[0].mxu1 }
  0xfb   : > { %v787_v43 = vpop.f32.mrb[1].mxu0  ;;  %v915_v44 = vpop.f32.mrb[1].mxu1  ;;  %v1246_v48 = vmul.f32 %v1744_v40, %v2021_v41  ;;  %v1278_v49 = vmul.f32 %v1776_v42, %v2021_v41 }
  0xfc   : > { %v1745_v46 = vpop.f32.mrb[2].mxu0  ;;  %v1777_v47 = vpop.f32.mrb[2].mxu1  ;;  %v1244_v52 = vmul.f32 %v2021_v41, %v787_v43  ;;  %v1276_v53 = vmul.f32 %v2021_v41, %v915_v44 }
  0xfd   : > { %v790_v50 = vpop.f32.mrb[3].mxu0  ;;  %v918_v51 = vpop.f32.mrb[3].mxu1  ;;  %v1317_v54 = vadd.f32 %v2026_v45, %v1246_v48  ;;  %v1349_v55 = vadd.f32 %v2026_v45, %v1278_v49  ;;  %v1247_v56 = vmul.f32 %v1745_v46, %v2021_v41  ;;  %v1279_v57 = vmul.f32 %v1777_v47, %v2021_v41 }
  0xfe   : > { %v1315_v58 = vadd.f32 %v2026_v45, %v1244_v52  ;;  %v1347_v59 = vadd.f32 %v2026_v45, %v1276_v53  ;;  %v1245_v60 = vmul.f32 %v2021_v41, %v790_v50  ;;  %v1277_v61 = vmul.f32 %v2021_v41, %v918_v51 }
  0xff   : > { %v1381_v62 = vmax.f32 %v1317_v54, 0.0  ;;  %v1413_v63 = vmax.f32 %v1349_v55, 0.0  ;;  %v1318_v0 = vadd.f32 %v2026_v45, %v1247_v56  ;;  %v1350_v1 = vadd.f32 %v2026_v45, %v1279_v57 }
 0x100   : > { %v1379_v2 = vmax.f32 %v1315_v58, 0.0  ;;  %v1411_v3 = vmax.f32 %v1347_v59, 0.0  ;;  %v1316_v4 = vadd.f32 %v2026_v45, %v1245_v60  ;;  %v1348_v5 = vadd.f32 %v2026_v45, %v1277_v61 }
 0x101   : > { %1445 = vst [vmem:[%s2040_s24 + $0x10] sm:$0xff] %v1381_v62  ;;  %1477 = vst [vmem:[%s2040_s24 + $0x110] sm:$0xff] %v1413_v63  ;;  %v1382_v8 = vmax.f32 %v1318_v0, 0.0  ;;  %v1414_v9 = vmax.f32 %v1350_v1, 0.0 }
 0x102   : > { %v1748_v6 = vpop.f32.mrb[4].mxu0  ;;  %v1780_v7 = vpop.f32.mrb[4].mxu1  ;;  %1443 = vst [vmem:[%s2040_s24] sm:$0xff] %v1379_v2  ;;  %1475 = vst [vmem:[%s2040_s24 + $0x100] sm:$0xff] %v1411_v3  ;;  %v1380_v12 = vmax.f32 %v1316_v4, 0.0  ;;  %v1412_v13 = vmax.f32 %v1348_v5, 0.0 }
 0x103   : > { %v803_v10 = vpop.f32.mrb[5].mxu0  ;;  %v931_v11 = vpop.f32.mrb[5].mxu1  ;;  %1446 = vst [vmem:[%s2040_s24 + $0x18] sm:$0xff] %v1382_v8  ;;  %1478 = vst [vmem:[%s2040_s24 + $0x118] sm:$0xff] %v1414_v9  ;;  %v1250_v16 = vmul.f32 %v1748_v6, %v2021_v41  ;;  %v1282_v17 = vmul.f32 %v1780_v7, %v2021_v41 }
 0x104   : > { %v1749_v14 = vpop.f32.mrb[6].mxu0  ;;  %v1781_v15 = vpop.f32.mrb[6].mxu1  ;;  %1444 = vst [vmem:[%s2040_s24 + $0x8] sm:$0xff] %v1380_v12  ;;  %1476 = vst [vmem:[%s2040_s24 + $0x108] sm:$0xff] %v1412_v13  ;;  %v1248_v20 = vmul.f32 %v2021_v41, %v803_v10  ;;  %v1280_v21 = vmul.f32 %v2021_v41, %v931_v11 }
 0x105   : > { %v806_v18 = vpop.f32.mrb[7].mxu0  ;;  %v934_v19 = vpop.f32.mrb[7].mxu1  ;;  %v1321_v22 = vadd.f32 %v2026_v45, %v1250_v16  ;;  %v1353_v23 = vadd.f32 %v2026_v45, %v1282_v17  ;;  %v1251_v24 = vmul.f32 %v1749_v14, %v2021_v41  ;;  %v1283_v25 = vmul.f32 %v1781_v15, %v2021_v41 }
 0x106   : > { %v1319_v26 = vadd.f32 %v2026_v45, %v1248_v20  ;;  %v1351_v27 = vadd.f32 %v2026_v45, %v1280_v21  ;;  %v1249_v28 = vmul.f32 %v2021_v41, %v806_v18  ;;  %v1281_v29 = vmul.f32 %v2021_v41, %v934_v19 }
 0x107   : > { %v1385_v30 = vmax.f32 %v1321_v22, 0.0  ;;  %v1417_v31 = vmax.f32 %v1353_v23, 0.0  ;;  %v1322_v32 = vadd.f32 %v2026_v45, %v1251_v24  ;;  %v1354_v33 = vadd.f32 %v2026_v45, %v1283_v25 }
 0x108   : > { %v1383_v34 = vmax.f32 %v1319_v26, 0.0  ;;  %v1415_v35 = vmax.f32 %v1351_v27, 0.0  ;;  %v1320_v36 = vadd.f32 %v2026_v45, %v1249_v28  ;;  %v1352_v37 = vadd.f32 %v2026_v45, %v1281_v29 }
 0x109   : > { %1449 = vst [vmem:[%s2040_s24 + $0x30] sm:$0xff] %v1385_v30  ;;  %1481 = vst [vmem:[%s2040_s24 + $0x130] sm:$0xff] %v1417_v31  ;;  %v1386_v40 = vmax.f32 %v1322_v32, 0.0  ;;  %v1418_v42 = vmax.f32 %v1354_v33, 0.0 }
 0x10a   : > { %v1752_v38 = vpop.f32.mrb[8].mxu0  ;;  %v1784_v39 = vpop.f32.mrb[8].mxu1  ;;  %1447 = vst [vmem:[%s2040_s24 + $0x20] sm:$0xff] %v1383_v34  ;;  %1479 = vst [vmem:[%s2040_s24 + $0x120] sm:$0xff] %v1415_v35  ;;  %v1384_v46 = vmax.f32 %v1320_v36, 0.0  ;;  %v1416_v47 = vmax.f32 %v1352_v37, 0.0 }
 0x10b   : > { %v819_v43 = vpop.f32.mrb[9].mxu0  ;;  %v947_v44 = vpop.f32.mrb[9].mxu1  ;;  %1450 = vst [vmem:[%s2040_s24 + $0x38] sm:$0xff] %v1386_v40  ;;  %1482 = vst [vmem:[%s2040_s24 + $0x138] sm:$0xff] %v1418_v42  ;;  %v1254_v50 = vmul.f32 %v1752_v38, %v2021_v41  ;;  %v1286_v51 = vmul.f32 %v1784_v39, %v2021_v41 }
 0x10c   : > { %v1753_v48 = vpop.f32.mrb[10].mxu0  ;;  %v1785_v49 = vpop.f32.mrb[10].mxu1  ;;  %1448 = vst [vmem:[%s2040_s24 + $0x28] sm:$0xff] %v1384_v46  ;;  %1480 = vst [vmem:[%s2040_s24 + $0x128] sm:$0xff] %v1416_v47  ;;  %v1252_v54 = vmul.f32 %v2021_v41, %v819_v43  ;;  %v1284_v55 = vmul.f32 %v2021_v41, %v947_v44 }
 0x10d   : > { %v822_v52 = vpop.f32.mrb[11].mxu0  ;;  %v950_v53 = vpop.f32.mrb[11].mxu1  ;;  %v1325_v56 = vadd.f32 %v2026_v45, %v1254_v50  ;;  %v1357_v57 = vadd.f32 %v2026_v45, %v1286_v51  ;;  %v1255_v58 = vmul.f32 %v1753_v48, %v2021_v41  ;;  %v1287_v59 = vmul.f32 %v1785_v49, %v2021_v41 }
 0x10e   : > { %v1323_v60 = vadd.f32 %v2026_v45, %v1252_v54  ;;  %v1355_v61 = vadd.f32 %v2026_v45, %v1284_v55  ;;  %v1253_v62 = vmul.f32 %v2021_v41, %v822_v52  ;;  %v1285_v63 = vmul.f32 %v2021_v41, %v950_v53 }
 0x10f   : > { %v1389_v0 = vmax.f32 %v1325_v56, 0.0  ;;  %v1421_v1 = vmax.f32 %v1357_v57, 0.0  ;;  %v1326_v2 = vadd.f32 %v2026_v45, %v1255_v58  ;;  %v1358_v3 = vadd.f32 %v2026_v45, %v1287_v59 }
 0x110   : > { %v1387_v4 = vmax.f32 %v1323_v60, 0.0  ;;  %v1419_v5 = vmax.f32 %v1355_v61, 0.0  ;;  %v1324_v6 = vadd.f32 %v2026_v45, %v1253_v62  ;;  %v1356_v7 = vadd.f32 %v2026_v45, %v1285_v63 }
 0x111   : > { %1453 = vst [vmem:[%s2040_s24 + $0x50] sm:$0xff] %v1389_v0  ;;  %1485 = vst [vmem:[%s2040_s24 + $0x150] sm:$0xff] %v1421_v1  ;;  %v1390_v10 = vmax.f32 %v1326_v2, 0.0  ;;  %v1422_v11 = vmax.f32 %v1358_v3, 0.0 }
 0x112   : > { %v1756_v8 = vpop.f32.mrb[12].mxu0  ;;  %v1788_v9 = vpop.f32.mrb[12].mxu1  ;;  %1451 = vst [vmem:[%s2040_s24 + $0x40] sm:$0xff] %v1387_v4  ;;  %1483 = vst [vmem:[%s2040_s24 + $0x140] sm:$0xff] %v1419_v5  ;;  %v1388_v14 = vmax.f32 %v1324_v6, 0.0  ;;  %v1420_v15 = vmax.f32 %v1356_v7, 0.0 }
 0x113   : > { %v835_v12 = vpop.f32.mrb[13].mxu0  ;;  %v963_v13 = vpop.f32.mrb[13].mxu1  ;;  %1454 = vst [vmem:[%s2040_s24 + $0x58] sm:$0xff] %v1390_v10  ;;  %1486 = vst [vmem:[%s2040_s24 + $0x158] sm:$0xff] %v1422_v11  ;;  %v1258_v18 = vmul.f32 %v1756_v8, %v2021_v41  ;;  %v1290_v19 = vmul.f32 %v1788_v9, %v2021_v41 }
 0x114   : > { %v1757_v16 = vpop.f32.mrb[14].mxu0  ;;  %v1789_v17 = vpop.f32.mrb[14].mxu1  ;;  %1452 = vst [vmem:[%s2040_s24 + $0x48] sm:$0xff] %v1388_v14  ;;  %1484 = vst [vmem:[%s2040_s24 + $0x148] sm:$0xff] %v1420_v15  ;;  %v1256_v22 = vmul.f32 %v2021_v41, %v835_v12  ;;  %v1288_v23 = vmul.f32 %v2021_v41, %v963_v13 }
 0x115   : > { %v838_v20 = vpop.f32.mrb[15].mxu0  ;;  %v966_v21 = vpop.f32.mrb[15].mxu1  ;;  %v1329_v24 = vadd.f32 %v2026_v45, %v1258_v18  ;;  %v1361_v25 = vadd.f32 %v2026_v45, %v1290_v19  ;;  %v1259_v26 = vmul.f32 %v1757_v16, %v2021_v41  ;;  %v1291_v27 = vmul.f32 %v1789_v17, %v2021_v41 }
 0x116   : > { %v1327_v28 = vadd.f32 %v2026_v45, %v1256_v22  ;;  %v1359_v29 = vadd.f32 %v2026_v45, %v1288_v23  ;;  %v1257_v30 = vmul.f32 %v2021_v41, %v838_v20  ;;  %v1289_v31 = vmul.f32 %v2021_v41, %v966_v21 }
 0x117   : > { %v1393_v32 = vmax.f32 %v1329_v24, 0.0  ;;  %v1425_v33 = vmax.f32 %v1361_v25, 0.0  ;;  %v1330_v34 = vadd.f32 %v2026_v45, %v1259_v26  ;;  %v1362_v35 = vadd.f32 %v2026_v45, %v1291_v27 }
 0x118   : > { %v1391_v36 = vmax.f32 %v1327_v28, 0.0  ;;  %v1423_v37 = vmax.f32 %v1359_v29, 0.0  ;;  %v1328_v38 = vadd.f32 %v2026_v45, %v1257_v30  ;;  %v1360_v39 = vadd.f32 %v2026_v45, %v1289_v31 }
 0x119   : > { %1457 = vst [vmem:[%s2040_s24 + $0x70] sm:$0xff] %v1393_v32  ;;  %1489 = vst [vmem:[%s2040_s24 + $0x170] sm:$0xff] %v1425_v33  ;;  %v1394_v43 = vmax.f32 %v1330_v34, 0.0  ;;  %v1426_v44 = vmax.f32 %v1362_v35, 0.0 }
 0x11a   : > { %v1760_v40 = vpop.f32.mrb[16].mxu0  ;;  %v1792_v42 = vpop.f32.mrb[16].mxu1  ;;  %1455 = vst [vmem:[%s2040_s24 + $0x60] sm:$0xff] %v1391_v36  ;;  %1487 = vst [vmem:[%s2040_s24 + $0x160] sm:$0xff] %v1423_v37  ;;  %v1392_v48 = vmax.f32 %v1328_v38, 0.0  ;;  %v1424_v49 = vmax.f32 %v1360_v39, 0.0 }
 0x11b   : > { %v851_v46 = vpop.f32.mrb[17].mxu0  ;;  %v979_v47 = vpop.f32.mrb[17].mxu1  ;;  %1458 = vst [vmem:[%s2040_s24 + $0x78] sm:$0xff] %v1394_v43  ;;  %1490 = vst [vmem:[%s2040_s24 + $0x178] sm:$0xff] %v1426_v44  ;;  %v1262_v52 = vmul.f32 %v1760_v40, %v2021_v41  ;;  %v1294_v53 = vmul.f32 %v1792_v42, %v2021_v41 }
 0x11c   : > { %v1761_v50 = vpop.f32.mrb[18].mxu0  ;;  %v1793_v51 = vpop.f32.mrb[18].mxu1  ;;  %1456 = vst [vmem:[%s2040_s24 + $0x68] sm:$0xff] %v1392_v48  ;;  %1488 = vst [vmem:[%s2040_s24 + $0x168] sm:$0xff] %v1424_v49  ;;  %v1260_v56 = vmul.f32 %v2021_v41, %v851_v46  ;;  %v1292_v57 = vmul.f32 %v2021_v41, %v979_v47 }
 0x11d   : > { %v854_v54 = vpop.f32.mrb[19].mxu0  ;;  %v982_v55 = vpop.f32.mrb[19].mxu1  ;;  %v1333_v58 = vadd.f32 %v2026_v45, %v1262_v52  ;;  %v1365_v59 = vadd.f32 %v2026_v45, %v1294_v53  ;;  %v1263_v60 = vmul.f32 %v1761_v50, %v2021_v41  ;;  %v1295_v61 = vmul.f32 %v1793_v51, %v2021_v41 }
 0x11e   : > { %v1331_v62 = vadd.f32 %v2026_v45, %v1260_v56  ;;  %v1363_v63 = vadd.f32 %v2026_v45, %v1292_v57  ;;  %v1261_v0 = vmul.f32 %v2021_v41, %v854_v54  ;;  %v1293_v1 = vmul.f32 %v2021_v41, %v982_v55 }
 0x11f   : > { %v1397_v2 = vmax.f32 %v1333_v58, 0.0  ;;  %v1429_v3 = vmax.f32 %v1365_v59, 0.0  ;;  %v1334_v4 = vadd.f32 %v2026_v45, %v1263_v60  ;;  %v1366_v5 = vadd.f32 %v2026_v45, %v1295_v61 }
 0x120   : > { %v1395_v6 = vmax.f32 %v1331_v62, 0.0  ;;  %v1427_v7 = vmax.f32 %v1363_v63, 0.0  ;;  %v1332_v8 = vadd.f32 %v2026_v45, %v1261_v0  ;;  %v1364_v9 = vadd.f32 %v2026_v45, %v1293_v1 }
 0x121   : > { %1461 = vst [vmem:[%s2040_s24 + $0x90] sm:$0xff] %v1397_v2  ;;  %1493 = vst [vmem:[%s2040_s24 + $0x190] sm:$0xff] %v1429_v3  ;;  %v1398_v12 = vmax.f32 %v1334_v4, 0.0  ;;  %v1430_v13 = vmax.f32 %v1366_v5, 0.0 }
 0x122   : > { %v1764_v10 = vpop.f32.mrb[20].mxu0  ;;  %v1796_v11 = vpop.f32.mrb[20].mxu1  ;;  %1459 = vst [vmem:[%s2040_s24 + $0x80] sm:$0xff] %v1395_v6  ;;  %1491 = vst [vmem:[%s2040_s24 + $0x180] sm:$0xff] %v1427_v7  ;;  %v1396_v16 = vmax.f32 %v1332_v8, 0.0  ;;  %v1428_v17 = vmax.f32 %v1364_v9, 0.0 }
 0x123   : > { %v867_v14 = vpop.f32.mrb[21].mxu0  ;;  %v995_v15 = vpop.f32.mrb[21].mxu1  ;;  %1462 = vst [vmem:[%s2040_s24 + $0x98] sm:$0xff] %v1398_v12  ;;  %1494 = vst [vmem:[%s2040_s24 + $0x198] sm:$0xff] %v1430_v13  ;;  %v1266_v20 = vmul.f32 %v1764_v10, %v2021_v41  ;;  %v1298_v21 = vmul.f32 %v1796_v11, %v2021_v41 }
 0x124   : > { %v1765_v18 = vpop.f32.mrb[22].mxu0  ;;  %v1797_v19 = vpop.f32.mrb[22].mxu1  ;;  %1460 = vst [vmem:[%s2040_s24 + $0x88] sm:$0xff] %v1396_v16  ;;  %1492 = vst [vmem:[%s2040_s24 + $0x188] sm:$0xff] %v1428_v17  ;;  %v1264_v24 = vmul.f32 %v2021_v41, %v867_v14  ;;  %v1296_v25 = vmul.f32 %v2021_v41, %v995_v15 }
 0x125   : > { %v870_v22 = vpop.f32.mrb[23].mxu0  ;;  %v998_v23 = vpop.f32.mrb[23].mxu1  ;;  %v1337_v26 = vadd.f32 %v2026_v45, %v1266_v20  ;;  %v1369_v27 = vadd.f32 %v2026_v45, %v1298_v21  ;;  %v1267_v28 = vmul.f32 %v1765_v18, %v2021_v41  ;;  %v1299_v29 = vmul.f32 %v1797_v19, %v2021_v41 }
 0x126   : > { %v1335_v30 = vadd.f32 %v2026_v45, %v1264_v24  ;;  %v1367_v31 = vadd.f32 %v2026_v45, %v1296_v25  ;;  %v1265_v32 = vmul.f32 %v2021_v41, %v870_v22  ;;  %v1297_v33 = vmul.f32 %v2021_v41, %v998_v23 }
 0x127   : > { %v1401_v34 = vmax.f32 %v1337_v26, 0.0  ;;  %v1433_v35 = vmax.f32 %v1369_v27, 0.0  ;;  %v1338_v36 = vadd.f32 %v2026_v45, %v1267_v28  ;;  %v1370_v37 = vadd.f32 %v2026_v45, %v1299_v29 }
 0x128   : > { %v1399_v38 = vmax.f32 %v1335_v30, 0.0  ;;  %v1431_v39 = vmax.f32 %v1367_v31, 0.0  ;;  %v1336_v40 = vadd.f32 %v2026_v45, %v1265_v32  ;;  %v1368_v42 = vadd.f32 %v2026_v45, %v1297_v33 }
 0x129   : > { %1465 = vst [vmem:[%s2040_s24 + $0xb0] sm:$0xff] %v1401_v34  ;;  %1497 = vst [vmem:[%s2040_s24 + $0x1b0] sm:$0xff] %v1433_v35  ;;  %v1402_v46 = vmax.f32 %v1338_v36, 0.0  ;;  %v1434_v47 = vmax.f32 %v1370_v37, 0.0 }
 0x12a   : > { %v1768_v43 = vpop.f32.mrb[24].mxu0  ;;  %v1800_v44 = vpop.f32.mrb[24].mxu1  ;;  %1463 = vst [vmem:[%s2040_s24 + $0xa0] sm:$0xff] %v1399_v38  ;;  %1495 = vst [vmem:[%s2040_s24 + $0x1a0] sm:$0xff] %v1431_v39  ;;  %v1400_v50 = vmax.f32 %v1336_v40, 0.0  ;;  %v1432_v51 = vmax.f32 %v1368_v42, 0.0 }
 0x12b   : > { %v883_v48 = vpop.f32.mrb[25].mxu0  ;;  %v1011_v49 = vpop.f32.mrb[25].mxu1  ;;  %1466 = vst [vmem:[%s2040_s24 + $0xb8] sm:$0xff] %v1402_v46  ;;  %1498 = vst [vmem:[%s2040_s24 + $0x1b8] sm:$0xff] %v1434_v47  ;;  %v1270_v54 = vmul.f32 %v1768_v43, %v2021_v41  ;;  %v1302_v55 = vmul.f32 %v1800_v44, %v2021_v41 }
 0x12c   : > { %v1769_v52 = vpop.f32.mrb[26].mxu0  ;;  %v1801_v53 = vpop.f32.mrb[26].mxu1  ;;  %1464 = vst [vmem:[%s2040_s24 + $0xa8] sm:$0xff] %v1400_v50  ;;  %1496 = vst [vmem:[%s2040_s24 + $0x1a8] sm:$0xff] %v1432_v51  ;;  %v1268_v58 = vmul.f32 %v2021_v41, %v883_v48  ;;  %v1300_v59 = vmul.f32 %v2021_v41, %v1011_v49 }
 0x12d   : > { %v886_v56 = vpop.f32.mrb[27].mxu0  ;;  %v1014_v57 = vpop.f32.mrb[27].mxu1  ;;  %v1341_v60 = vadd.f32 %v2026_v45, %v1270_v54  ;;  %v1373_v61 = vadd.f32 %v2026_v45, %v1302_v55  ;;  %v1271_v62 = vmul.f32 %v1769_v52, %v2021_v41  ;;  %v1303_v63 = vmul.f32 %v1801_v53, %v2021_v41 }
 0x12e   : > { %v1339_v0 = vadd.f32 %v2026_v45, %v1268_v58  ;;  %v1371_v1 = vadd.f32 %v2026_v45, %v1300_v59  ;;  %v1269_v2 = vmul.f32 %v2021_v41, %v886_v56  ;;  %v1301_v3 = vmul.f32 %v2021_v41, %v1014_v57 }
 0x12f   : > { %v1405_v4 = vmax.f32 %v1341_v60, 0.0  ;;  %v1437_v5 = vmax.f32 %v1373_v61, 0.0  ;;  %v1342_v6 = vadd.f32 %v2026_v45, %v1271_v62  ;;  %v1374_v7 = vadd.f32 %v2026_v45, %v1303_v63 }
 0x130   : > { %v1403_v8 = vmax.f32 %v1339_v0, 0.0  ;;  %v1435_v9 = vmax.f32 %v1371_v1, 0.0  ;;  %v1340_v10 = vadd.f32 %v2026_v45, %v1269_v2  ;;  %v1372_v11 = vadd.f32 %v2026_v45, %v1301_v3 }
 0x131   : > { %1469 = vst [vmem:[%s2040_s24 + $0xd0] sm:$0xff] %v1405_v4  ;;  %1501 = vst [vmem:[%s2040_s24 + $0x1d0] sm:$0xff] %v1437_v5  ;;  %v1406_v14 = vmax.f32 %v1342_v6, 0.0  ;;  %v1438_v15 = vmax.f32 %v1374_v7, 0.0 }
 0x132   : > { %v1772_v12 = vpop.f32.mrb[28].mxu0  ;;  %v1804_v13 = vpop.f32.mrb[28].mxu1  ;;  %1467 = vst [vmem:[%s2040_s24 + $0xc0] sm:$0xff] %v1403_v8  ;;  %1499 = vst [vmem:[%s2040_s24 + $0x1c0] sm:$0xff] %v1435_v9  ;;  %v1404_v18 = vmax.f32 %v1340_v10, 0.0  ;;  %v1436_v19 = vmax.f32 %v1372_v11, 0.0 }
 0x133   : > { %v899_v16 = vpop.f32.mrb[29].mxu0  ;;  %v1027_v17 = vpop.f32.mrb[29].mxu1  ;;  %1470 = vst [vmem:[%s2040_s24 + $0xd8] sm:$0xff] %v1406_v14  ;;  %1502 = vst [vmem:[%s2040_s24 + $0x1d8] sm:$0xff] %v1438_v15  ;;  %v1274_v22 = vmul.f32 %v1772_v12, %v2021_v41  ;;  %v1306_v23 = vmul.f32 %v1804_v13, %v2021_v41 }
 0x134   : > { %v1773_v20 = vpop.f32.mrb[30].mxu0  ;;  %v1805_v21 = vpop.f32.mrb[30].mxu1  ;;  %1468 = vst [vmem:[%s2040_s24 + $0xc8] sm:$0xff] %v1404_v18  ;;  %1500 = vst [vmem:[%s2040_s24 + $0x1c8] sm:$0xff] %v1436_v19  ;;  %v1272_v26 = vmul.f32 %v2021_v41, %v899_v16  ;;  %v1304_v27 = vmul.f32 %v2021_v41, %v1027_v17 }
 0x135   : > { %v902_v24 = vpop.f32.mrb[31].mxu0  ;;  %v1030_v25 = vpop.f32.mrb[31].mxu1  ;;  %v1345_v28 = vadd.f32 %v2026_v45, %v1274_v22  ;;  %v1377_v29 = vadd.f32 %v2026_v45, %v1306_v23  ;;  %v1275_v30 = vmul.f32 %v1773_v20, %v2021_v41  ;;  %v1307_v31 = vmul.f32 %v1805_v21, %v2021_v41 }
 0x136   : > { %v1343_v32 = vadd.f32 %v2026_v45, %v1272_v26  ;;  %v1375_v33 = vadd.f32 %v2026_v45, %v1304_v27  ;;  %v1273_v34 = vmul.f32 %v2021_v41, %v902_v24  ;;  %v1305_v35 = vmul.f32 %v2021_v41, %v1030_v25 }
 0x137   : > { %v1409_v36 = vmax.f32 %v1345_v28, 0.0  ;;  %v1441_v37 = vmax.f32 %v1377_v29, 0.0  ;;  %v1346_v38 = vadd.f32 %v2026_v45, %v1275_v30  ;;  %v1378_v39 = vadd.f32 %v2026_v45, %v1307_v31 }
 0x138   : > { %v1407_v40 = vmax.f32 %v1343_v32, 0.0  ;;  %v1439_v42 = vmax.f32 %v1375_v33, 0.0  ;;  %v1344_v43 = vadd.f32 %v2026_v45, %v1273_v34  ;;  %v1376_v44 = vadd.f32 %v2026_v45, %v1305_v35 }
 0x139   : > { %1473 = vst [vmem:[%s2040_s24 + $0xf0] sm:$0xff] %v1409_v36  ;;  %1505 = vst [vmem:[%s2040_s24 + $0x1f0] sm:$0xff] %v1441_v37  ;;  %v1410_v46 = vmax.f32 %v1346_v38, 0.0  ;;  %v1442_v41 = vmax.f32 %v1378_v39, 0.0 }
 0x13a   : > { %1471 = vst [vmem:[%s2040_s24 + $0xe0] sm:$0xff] %v1407_v40  ;;  %1503 = vst [vmem:[%s2040_s24 + $0x1e0] sm:$0xff] %v1439_v42  ;;  %v1408_v47 = vmax.f32 %v1344_v43, 0.0  ;;  %v1440_v48 = vmax.f32 %v1376_v44, 0.0 }
 0x13b   : > { %1474 = vst [vmem:[%s2040_s24 + $0xf8] sm:$0xff] %v1410_v46  ;;  %1506 = vst [vmem:[%s2040_s24 + $0x1f8] sm:$0xff] %v1442_v41 }
 0x13c   : > { %1472 = vst [vmem:[%s2040_s24 + $0xe8] sm:$0xff] %v1408_v47  ;;  %1504 = vst [vmem:[%s2040_s24 + $0x1e8] sm:$0xff] %v1440_v48 }
 0x13d PF: > { %s14_s17 = sadd.s32 1, %s1909_s17   ;;  %s2240_s15 = smov %s1905_s16 }
 0x13e   : > { %p11_p5 = scmp.ge.s32.totalorder %s14_s17, 4   ;;  %s2241_s16 = smov %s2243_s18 }
 0x140   :  { %13 = sbr.rel (!%p11_p5) target bundleno = 2 (0x2), region = 83 }

// kernel: basnet_forward.176
= control target key start
LH: loop header
LB: loop body
LE: loop exit
PB: predicated region body
PF: predicated region fallthrough
CT: control target
= control target key end

     0   :  { %s1872_s15 = smov 0   ;;  %s1874_s16 = smov 0   ;;  %s2171_s0 = inlined_call_operand.vmem [shape: bf16[1024,128], index: 0, kind: input, shape index: {}]   ;;  %s2172_s1 = inlined_call_operand.vmem [shape: bf16[128,128], index: 1, kind: input, shape index: {}]   ;;  %s2173_s2 = inlined_call_operand.vmem [shape: f32[1,128], index: 2, kind: input, shape index: {}]   ;;  %s2174_s3 = inlined_call_operand.vmem [shape: f32[1,128], index: 3, kind: input, shape index: {}]   ;;  %s2175_s4 = inlined_call_operand.vmem [shape: f32[1024,128], index: 4, kind: output, shape index: {}]  }
   0x1   :  { %s1876_s17 = smov 0  }
   0x2 LB: > { %s33_s18 = sadd.s32 1, %s1841_s16  ;;  %p1573_p0 = scmp.ge.s32.totalorder %s1845_s17, 1  ;;  %s1845_s17 = sphi %s1876_s17, %s14_s17   ;;  %s1841_s16 = sphi %s1874_s16, %s2177_s16   ;;  %s1837_s15 = sphi %s1872_s15, %s2176_s15  }
   0x3   : > { %p35_p1 = scmp.ge.s32.totalorder %s33_s18, 2  ;;  %p221_p2 = scmp.lt.s32.totalorder %s1845_s17, 3 }
   0x5   : > { %s2179_s18 = smov (%p35_p1, %s33_s18), 0  ;;  %p222_p3 = pnand %p1573_p0, %p221_p2 }
   0x6   : > { %v1783_v0 = vld [vmem:[%s2172_s1] sm:$0xff] (!%p222_p3)   ;;  %s1574_s21 = sshll.u32 (!%p222_p3), %s1837_s15, 6  ;;  %v1784_v1 = vld [vmem:[%s2172_s1 + $0x8] sm:$0xff] (!%p222_p3)   ;;  %v1785_v2 = vld [vmem:[%s2172_s1 + $0x10] sm:$0xff] (!%p222_p3)  }
   0x7   : > { %225 = sbr.rel (%p222_p3) target bundleno = 315 (0x13b), region = 36  ;;  %p268_p4 = scmp.lt.s32.totalorder (!%p222_p3), %s1574_s21, 127  ;;  %1662 = vmatprep.subr.bf16.mxu0 (!%p222_p3), %v1783_v0  ;;  %1742 = vmatprep.subr.bf16.mxu1 (!%p222_p3), %v1783_v0  ;;  %v1786_v3 = vld [vmem:[%s2172_s1 + $0x18] sm:$0xff] (!%p222_p3)   ;;  %v1787_v6 = vld [vmem:[%s2172_s1 + $0x20] sm:$0xff] (!%p222_p3)   ;;  %v1788_v7 = vld [vmem:[%s2172_s1 + $0x28] sm:$0xff] (!%p222_p3)  }
   0x8   : > { %1663 = vmatpush3.bf16.msra.mxu0 (!%p222_p3), %v1783_v0  ;;  %1750 = vmatpush3.bf16.msra.mxu1 (!%p222_p3), %v1783_v0  ;;  %v1789_v8 = vld [vmem:[%s2172_s1 + $0x30] sm:$0xff] (!%p222_p3)   ;;  %v1790_v9 = vld [vmem:[%s2172_s1 + $0x38] sm:$0xff] (!%p222_p3)   ;;  %v1957_v41 = vld [vmem:[%s2173_s2] ss:$0 sm:$0xff] (!%p222_p3) }
   0x9   : > { %1664 = vmatprep.subr.bf16.mxu0 (!%p222_p3), %v1784_v1  ;;  %1743 = vmatprep.subr.bf16.mxu1 (!%p222_p3), %v1784_v1  ;;  %v1963_v45 = vld [vmem:[%s2174_s3] ss:$0 sm:$0xff] (!%p222_p3) }
   0xc   : > { %1665 = vmatpush3.bf16.msra.mxu0 (!%p222_p3), %v1784_v1  ;;  %1751 = vmatpush3.bf16.msra.mxu1 (!%p222_p3), %v1784_v1 }
   0xd   : > { %1666 = vmatprep.subr.bf16.mxu0 (!%p222_p3), %v1785_v2  ;;  %1744 = vmatprep.subr.bf16.mxu1 (!%p222_p3), %v1785_v2 }
   0xe   : > { %s2181_s21 = smov (!%p268_p4, %s1574_s21), 127 }
   0xf   : > { %s1575_s26 = sshll.u32 %s2181_s21, 2  ;;  %s1577_s19 = sshll.u32 %s2181_s21, 3 }
  0x10   : > { %s1905_s29 = scalar_lea.vmem %s2171_s0, %s1575_s26  ;;  %1667 = vmatpush3.bf16.msra.mxu0 %v1785_v2  ;;  %1752 = vmatpush3.bf16.msra.mxu1 %v1785_v2  ;;  %s1970_s25 = scalar_lea.vmem %s2175_s4, %s1577_s19 }
  0x11   : > { %v1791_v4 = vld [vmem:[%s1905_s29] sm:$0xff]   ;;  %1668 = vmatprep.subr.bf16.mxu0 %v1786_v3  ;;  %1745 = vmatprep.subr.bf16.mxu1 %v1786_v3  ;;  %v1793_v10 = vld [vmem:[%s1905_s29 + $0x8] sm:$0xff]   ;;  %v1795_v12 = vld [vmem:[%s1905_s29 + $0x10] sm:$0xff]  }
  0x12   : > { %v1792_v5 = vld [vmem:[%s1905_s29 + $0x80] sm:$0xff]   ;;  %1678 = vmatprep.mubr.bf16.mxu0 %v1791_v4  ;;  %v1794_v11 = vld [vmem:[%s1905_s29 + $0x88] sm:$0xff]   ;;  %v1796_v13 = vld [vmem:[%s1905_s29 + $0x90] sm:$0xff]  }
  0x13   : > { %1710 = vmatprep.mubr.bf16.mxu1 %v1792_v5  ;;  %v1797_v14 = vld [vmem:[%s1905_s29 + $0x18] sm:$0xff]   ;;  %v1799_v16 = vld [vmem:[%s1905_s29 + $0x20] sm:$0xff]   ;;  %v1801_v18 = vld [vmem:[%s1905_s29 + $0x28] sm:$0xff]  }
  0x14   : > { %1669 = vmatpush3.bf16.msra.mxu0 %v1786_v3  ;;  %1753 = vmatpush3.bf16.msra.mxu1 %v1786_v3  ;;  %v1798_v15 = vld [vmem:[%s1905_s29 + $0x98] sm:$0xff]   ;;  %v1800_v17 = vld [vmem:[%s1905_s29 + $0xa0] sm:$0xff]   ;;  %v1802_v19 = vld [vmem:[%s1905_s29 + $0xa8] sm:$0xff]  }
  0x15   : > { %1670 = vmatprep.subr.bf16.mxu0 %v1787_v6  ;;  %1746 = vmatprep.subr.bf16.mxu1 %v1787_v6  ;;  %v1803_v20 = vld [vmem:[%s1905_s29 + $0x30] sm:$0xff]   ;;  %v1805_v22 = vld [vmem:[%s1905_s29 + $0x38] sm:$0xff]   ;;  %v1807_v24 = vld [vmem:[%s1905_s29 + $0x40] sm:$0xff]  }
  0x16   : > { %v1804_v21 = vld [vmem:[%s1905_s29 + $0xb0] sm:$0xff]   ;;  %v1806_v23 = vld [vmem:[%s1905_s29 + $0xb8] sm:$0xff]   ;;  %v1808_v25 = vld [vmem:[%s1905_s29 + $0xc0] sm:$0xff]  }
  0x17   : > { %v1809_v26 = vld [vmem:[%s1905_s29 + $0x48] sm:$0xff]   ;;  %v1811_v28 = vld [vmem:[%s1905_s29 + $0x50] sm:$0xff]   ;;  %v1813_v30 = vld [vmem:[%s1905_s29 + $0x58] sm:$0xff]  }
  0x18   : > { %1671 = vmatpush3.bf16.msra.mxu0 %v1787_v6  ;;  %1754 = vmatpush3.bf16.msra.mxu1 %v1787_v6  ;;  %v1810_v27 = vld [vmem:[%s1905_s29 + $0xc8] sm:$0xff]   ;;  %v1812_v29 = vld [vmem:[%s1905_s29 + $0xd0] sm:$0xff]   ;;  %v1814_v31 = vld [vmem:[%s1905_s29 + $0xd8] sm:$0xff]  }
  0x19   : > { %1672 = vmatprep.subr.bf16.mxu0 %v1788_v7  ;;  %1747 = vmatprep.subr.bf16.mxu1 %v1788_v7  ;;  %v1815_v32 = vld [vmem:[%s1905_s29 + $0x60] sm:$0xff]   ;;  %v1817_v34 = vld [vmem:[%s1905_s29 + $0x68] sm:$0xff]   ;;  %v1819_v36 = vld [vmem:[%s1905_s29 + $0x70] sm:$0xff]  }
  0x1a   : > { %v1816_v33 = vld [vmem:[%s1905_s29 + $0xe0] sm:$0xff]   ;;  %v1818_v35 = vld [vmem:[%s1905_s29 + $0xe8] sm:$0xff]   ;;  %v1820_v37 = vld [vmem:[%s1905_s29 + $0xf0] sm:$0xff]  }
  0x1b   : > { %v1821_v38 = vld [vmem:[%s1905_s29 + $0x78] sm:$0xff]  }
  0x1c   : > { %1673 = vmatpush3.bf16.msra.mxu0 %v1788_v7  ;;  %1755 = vmatpush3.bf16.msra.mxu1 %v1788_v7  ;;  %v1822_v39 = vld [vmem:[%s1905_s29 + $0xf8] sm:$0xff]  }
  0x1d   : > { %1674 = vmatprep.subr.bf16.mxu0 %v1789_v8  ;;  %1748 = vmatprep.subr.bf16.mxu1 %v1789_v8 }
  0x20   : > { %1675 = vmatpush3.bf16.msra.mxu0 %v1789_v8  ;;  %1756 = vmatpush3.bf16.msra.mxu1 %v1789_v8 }
  0x21   : > { %1676 = vmatprep.subr.bf16.mxu0 %v1790_v9  ;;  %1749 = vmatprep.subr.bf16.mxu1 %v1790_v9 }
  0x24   : > { %1677 = vmatpush3.bf16.msra.mxu0 %v1790_v9  ;;  %1757 = vmatpush3.bf16.msra.mxu1 %v1790_v9 }
  0x27   : > { %1679 = vmatmul.mubr.bf16.vlgmr.msra.gmra.mrb[0].mxu0 %v1793_v10  ;;  %1711 = vmatmul.mubr.bf16.vlgmr.msra.gmra.mrb[0].mxu1 %v1794_v11 }
  0x28   : > { %1682 = vmatprep.mubr.bf16.mxu0 %v1795_v12  ;;  %1714 = vmatprep.mubr.bf16.mxu1 %v1796_v13 }
  0x2f   : > { %1683 = vmatmul.mubr.bf16.gmra.mrb[4].mxu0 %v1797_v14  ;;  %1715 = vmatmul.mubr.bf16.gmra.mrb[4].mxu1 %v1798_v15 }
  0x30   : > { %1686 = vmatprep.mubr.bf16.mxu0 %v1799_v16  ;;  %1718 = vmatprep.mubr.bf16.mxu1 %v1800_v17 }
  0x37   : > { %1687 = vmatmul.mubr.bf16.gmra.mrb[8].mxu0 %v1801_v18  ;;  %1719 = vmatmul.mubr.bf16.gmra.mrb[8].mxu1 %v1802_v19 }
  0x38   : > { %1690 = vmatprep.mubr.bf16.mxu0 %v1803_v20  ;;  %1722 = vmatprep.mubr.bf16.mxu1 %v1804_v21 }
  0x3f   : > { %1691 = vmatmul.mubr.bf16.gmra.mrb[12].mxu0 %v1805_v22  ;;  %1723 = vmatmul.mubr.bf16.gmra.mrb[12].mxu1 %v1806_v23 }
  0x40   : > { %1694 = vmatprep.mubr.bf16.mxu0 %v1807_v24  ;;  %1726 = vmatprep.mubr.bf16.mxu1 %v1808_v25 }
  0x47   : > { %1695 = vmatmul.mubr.bf16.gmra.mrb[16].mxu0 %v1809_v26  ;;  %1727 = vmatmul.mubr.bf16.gmra.mrb[16].mxu1 %v1810_v27 }
  0x48   : > { %1698 = vmatprep.mubr.bf16.mxu0 %v1811_v28  ;;  %1730 = vmatprep.mubr.bf16.mxu1 %v1812_v29 }
  0x4f   : > { %1699 = vmatmul.mubr.bf16.gmra.mrb[20].mxu0 %v1813_v30  ;;  %1731 = vmatmul.mubr.bf16.gmra.mrb[20].mxu1 %v1814_v31 }
  0x50   : > { %1702 = vmatprep.mubr.bf16.mxu0 %v1815_v32  ;;  %1734 = vmatprep.mubr.bf16.mxu1 %v1816_v33 }
  0x57   : > { %1703 = vmatmul.mubr.bf16.gmra.mrb[24].mxu0 %v1817_v34  ;;  %1735 = vmatmul.mubr.bf16.gmra.mrb[24].mxu1 %v1818_v35 }
  0x58   : > { %1706 = vmatprep.mubr.bf16.mxu0 %v1819_v36  ;;  %1738 = vmatprep.mubr.bf16.mxu1 %v1820_v37 }
  0x5f   : > { %1707 = vmatmul.mubr.bf16.gmra.mrb[28].mxu0 %v1821_v38  ;;  %1739 = vmatmul.mubr.bf16.gmra.mrb[28].mxu1 %v1822_v39 }
  0xfa   : > { %v1680_v40 = vpop.f32.mrb[0].mxu0  ;;  %v1712_v42 = vpop.f32.mrb[0].mxu1 }
  0xfb   : > { %v787_v43 = vpop.f32.mrb[1].mxu0  ;;  %v915_v44 = vpop.f32.mrb[1].mxu1  ;;  %v1246_v48 = vmul.f32 %v1680_v40, %v1957_v41  ;;  %v1278_v49 = vmul.f32 %v1712_v42, %v1957_v41 }
  0xfc   : > { %v1681_v46 = vpop.f32.mrb[2].mxu0  ;;  %v1713_v47 = vpop.f32.mrb[2].mxu1  ;;  %v1244_v52 = vmul.f32 %v1957_v41, %v787_v43  ;;  %v1276_v53 = vmul.f32 %v1957_v41, %v915_v44 }
  0xfd   : > { %v790_v50 = vpop.f32.mrb[3].mxu0  ;;  %v918_v51 = vpop.f32.mrb[3].mxu1  ;;  %v1317_v54 = vadd.f32 %v1963_v45, %v1246_v48  ;;  %v1349_v55 = vadd.f32 %v1963_v45, %v1278_v49  ;;  %v1247_v56 = vmul.f32 %v1681_v46, %v1957_v41  ;;  %v1279_v57 = vmul.f32 %v1713_v47, %v1957_v41 }
  0xfe   : > { %v1315_v58 = vadd.f32 %v1963_v45, %v1244_v52  ;;  %v1347_v59 = vadd.f32 %v1963_v45, %v1276_v53  ;;  %v1245_v60 = vmul.f32 %v1957_v41, %v790_v50  ;;  %v1277_v61 = vmul.f32 %v1957_v41, %v918_v51 }
  0xff   : > { %1381 = vst [vmem:[%s1970_s25 + $0x10] sm:$0xff] %v1317_v54  ;;  %1413 = vst [vmem:[%s1970_s25 + $0x110] sm:$0xff] %v1349_v55  ;;  %v1318_v62 = vadd.f32 %v1963_v45, %v1247_v56  ;;  %v1350_v63 = vadd.f32 %v1963_v45, %v1279_v57 }
 0x100   : > { %1379 = vst [vmem:[%s1970_s25] sm:$0xff] %v1315_v58  ;;  %1411 = vst [vmem:[%s1970_s25 + $0x100] sm:$0xff] %v1347_v59  ;;  %v1316_v0 = vadd.f32 %v1963_v45, %v1245_v60  ;;  %v1348_v1 = vadd.f32 %v1963_v45, %v1277_v61 }
 0x101   : > { %1382 = vst [vmem:[%s1970_s25 + $0x18] sm:$0xff] %v1318_v62  ;;  %1414 = vst [vmem:[%s1970_s25 + $0x118] sm:$0xff] %v1350_v63 }
 0x102   : > { %v1684_v2 = vpop.f32.mrb[4].mxu0  ;;  %v1716_v3 = vpop.f32.mrb[4].mxu1  ;;  %1380 = vst [vmem:[%s1970_s25 + $0x8] sm:$0xff] %v1316_v0  ;;  %1412 = vst [vmem:[%s1970_s25 + $0x108] sm:$0xff] %v1348_v1 }
 0x103   : > { %v803_v4 = vpop.f32.mrb[5].mxu0  ;;  %v931_v5 = vpop.f32.mrb[5].mxu1  ;;  %v1250_v8 = vmul.f32 %v1684_v2, %v1957_v41  ;;  %v1282_v9 = vmul.f32 %v1716_v3, %v1957_v41 }
 0x104   : > { %v1685_v6 = vpop.f32.mrb[6].mxu0  ;;  %v1717_v7 = vpop.f32.mrb[6].mxu1  ;;  %v1248_v12 = vmul.f32 %v1957_v41, %v803_v4  ;;  %v1280_v13 = vmul.f32 %v1957_v41, %v931_v5 }
 0x105   : > { %v806_v10 = vpop.f32.mrb[7].mxu0  ;;  %v934_v11 = vpop.f32.mrb[7].mxu1  ;;  %v1321_v14 = vadd.f32 %v1963_v45, %v1250_v8  ;;  %v1353_v15 = vadd.f32 %v1963_v45, %v1282_v9  ;;  %v1251_v16 = vmul.f32 %v1685_v6, %v1957_v41  ;;  %v1283_v17 = vmul.f32 %v1717_v7, %v1957_v41 }
 0x106   : > { %v1319_v18 = vadd.f32 %v1963_v45, %v1248_v12  ;;  %v1351_v19 = vadd.f32 %v1963_v45, %v1280_v13  ;;  %v1249_v20 = vmul.f32 %v1957_v41, %v806_v10  ;;  %v1281_v21 = vmul.f32 %v1957_v41, %v934_v11 }
 0x107   : > { %1385 = vst [vmem:[%s1970_s25 + $0x30] sm:$0xff] %v1321_v14  ;;  %1417 = vst [vmem:[%s1970_s25 + $0x130] sm:$0xff] %v1353_v15  ;;  %v1322_v22 = vadd.f32 %v1963_v45, %v1251_v16  ;;  %v1354_v23 = vadd.f32 %v1963_v45, %v1283_v17 }
 0x108   : > { %1383 = vst [vmem:[%s1970_s25 + $0x20] sm:$0xff] %v1319_v18  ;;  %1415 = vst [vmem:[%s1970_s25 + $0x120] sm:$0xff] %v1351_v19  ;;  %v1320_v24 = vadd.f32 %v1963_v45, %v1249_v20  ;;  %v1352_v25 = vadd.f32 %v1963_v45, %v1281_v21 }
 0x109   : > { %1386 = vst [vmem:[%s1970_s25 + $0x38] sm:$0xff] %v1322_v22  ;;  %1418 = vst [vmem:[%s1970_s25 + $0x138] sm:$0xff] %v1354_v23 }
 0x10a   : > { %v1688_v26 = vpop.f32.mrb[8].mxu0  ;;  %v1720_v27 = vpop.f32.mrb[8].mxu1  ;;  %1384 = vst [vmem:[%s1970_s25 + $0x28] sm:$0xff] %v1320_v24  ;;  %1416 = vst [vmem:[%s1970_s25 + $0x128] sm:$0xff] %v1352_v25 }
 0x10b   : > { %v819_v28 = vpop.f32.mrb[9].mxu0  ;;  %v947_v29 = vpop.f32.mrb[9].mxu1  ;;  %v1254_v32 = vmul.f32 %v1688_v26, %v1957_v41  ;;  %v1286_v33 = vmul.f32 %v1720_v27, %v1957_v41 }
 0x10c   : > { %v1689_v30 = vpop.f32.mrb[10].mxu0  ;;  %v1721_v31 = vpop.f32.mrb[10].mxu1  ;;  %v1252_v36 = vmul.f32 %v1957_v41, %v819_v28  ;;  %v1284_v37 = vmul.f32 %v1957_v41, %v947_v29 }
 0x10d   : > { %v822_v34 = vpop.f32.mrb[11].mxu0  ;;  %v950_v35 = vpop.f32.mrb[11].mxu1  ;;  %v1325_v38 = vadd.f32 %v1963_v45, %v1254_v32  ;;  %v1357_v39 = vadd.f32 %v1963_v45, %v1286_v33  ;;  %v1255_v40 = vmul.f32 %v1689_v30, %v1957_v41  ;;  %v1287_v42 = vmul.f32 %v1721_v31, %v1957_v41 }
 0x10e   : > { %v1323_v43 = vadd.f32 %v1963_v45, %v1252_v36  ;;  %v1355_v44 = vadd.f32 %v1963_v45, %v1284_v37  ;;  %v1253_v46 = vmul.f32 %v1957_v41, %v822_v34  ;;  %v1285_v47 = vmul.f32 %v1957_v41, %v950_v35 }
 0x10f   : > { %1389 = vst [vmem:[%s1970_s25 + $0x50] sm:$0xff] %v1325_v38  ;;  %1421 = vst [vmem:[%s1970_s25 + $0x150] sm:$0xff] %v1357_v39  ;;  %v1326_v48 = vadd.f32 %v1963_v45, %v1255_v40  ;;  %v1358_v49 = vadd.f32 %v1963_v45, %v1287_v42 }
 0x110   : > { %1387 = vst [vmem:[%s1970_s25 + $0x40] sm:$0xff] %v1323_v43  ;;  %1419 = vst [vmem:[%s1970_s25 + $0x140] sm:$0xff] %v1355_v44  ;;  %v1324_v50 = vadd.f32 %v1963_v45, %v1253_v46  ;;  %v1356_v51 = vadd.f32 %v1963_v45, %v1285_v47 }
 0x111   : > { %1390 = vst [vmem:[%s1970_s25 + $0x58] sm:$0xff] %v1326_v48  ;;  %1422 = vst [vmem:[%s1970_s25 + $0x158] sm:$0xff] %v1358_v49 }
 0x112   : > { %v1692_v52 = vpop.f32.mrb[12].mxu0  ;;  %v1724_v53 = vpop.f32.mrb[12].mxu1  ;;  %1388 = vst [vmem:[%s1970_s25 + $0x48] sm:$0xff] %v1324_v50  ;;  %1420 = vst [vmem:[%s1970_s25 + $0x148] sm:$0xff] %v1356_v51 }
 0x113   : > { %v835_v54 = vpop.f32.mrb[13].mxu0  ;;  %v963_v55 = vpop.f32.mrb[13].mxu1  ;;  %v1258_v58 = vmul.f32 %v1692_v52, %v1957_v41  ;;  %v1290_v59 = vmul.f32 %v1724_v53, %v1957_v41 }
 0x114   : > { %v1693_v56 = vpop.f32.mrb[14].mxu0  ;;  %v1725_v57 = vpop.f32.mrb[14].mxu1  ;;  %v1256_v62 = vmul.f32 %v1957_v41, %v835_v54  ;;  %v1288_v63 = vmul.f32 %v1957_v41, %v963_v55 }
 0x115   : > { %v838_v60 = vpop.f32.mrb[15].mxu0  ;;  %v966_v61 = vpop.f32.mrb[15].mxu1  ;;  %v1329_v0 = vadd.f32 %v1963_v45, %v1258_v58  ;;  %v1361_v1 = vadd.f32 %v1963_v45, %v1290_v59  ;;  %v1259_v2 = vmul.f32 %v1693_v56, %v1957_v41  ;;  %v1291_v3 = vmul.f32 %v1725_v57, %v1957_v41 }
 0x116   : > { %v1327_v4 = vadd.f32 %v1963_v45, %v1256_v62  ;;  %v1359_v5 = vadd.f32 %v1963_v45, %v1288_v63  ;;  %v1257_v6 = vmul.f32 %v1957_v41, %v838_v60  ;;  %v1289_v7 = vmul.f32 %v1957_v41, %v966_v61 }
 0x117   : > { %1393 = vst [vmem:[%s1970_s25 + $0x70] sm:$0xff] %v1329_v0  ;;  %1425 = vst [vmem:[%s1970_s25 + $0x170] sm:$0xff] %v1361_v1  ;;  %v1330_v8 = vadd.f32 %v1963_v45, %v1259_v2  ;;  %v1362_v9 = vadd.f32 %v1963_v45, %v1291_v3 }
 0x118   : > { %1391 = vst [vmem:[%s1970_s25 + $0x60] sm:$0xff] %v1327_v4  ;;  %1423 = vst [vmem:[%s1970_s25 + $0x160] sm:$0xff] %v1359_v5  ;;  %v1328_v10 = vadd.f32 %v1963_v45, %v1257_v6  ;;  %v1360_v11 = vadd.f32 %v1963_v45, %v1289_v7 }
 0x119   : > { %1394 = vst [vmem:[%s1970_s25 + $0x78] sm:$0xff] %v1330_v8  ;;  %1426 = vst [vmem:[%s1970_s25 + $0x178] sm:$0xff] %v1362_v9 }
 0x11a   : > { %v1696_v12 = vpop.f32.mrb[16].mxu0  ;;  %v1728_v13 = vpop.f32.mrb[16].mxu1  ;;  %1392 = vst [vmem:[%s1970_s25 + $0x68] sm:$0xff] %v1328_v10  ;;  %1424 = vst [vmem:[%s1970_s25 + $0x168] sm:$0xff] %v1360_v11 }
 0x11b   : > { %v851_v14 = vpop.f32.mrb[17].mxu0  ;;  %v979_v15 = vpop.f32.mrb[17].mxu1  ;;  %v1262_v18 = vmul.f32 %v1696_v12, %v1957_v41  ;;  %v1294_v19 = vmul.f32 %v1728_v13, %v1957_v41 }
 0x11c   : > { %v1697_v16 = vpop.f32.mrb[18].mxu0  ;;  %v1729_v17 = vpop.f32.mrb[18].mxu1  ;;  %v1260_v22 = vmul.f32 %v1957_v41, %v851_v14  ;;  %v1292_v23 = vmul.f32 %v1957_v41, %v979_v15 }
 0x11d   : > { %v854_v20 = vpop.f32.mrb[19].mxu0  ;;  %v982_v21 = vpop.f32.mrb[19].mxu1  ;;  %v1333_v24 = vadd.f32 %v1963_v45, %v1262_v18  ;;  %v1365_v25 = vadd.f32 %v1963_v45, %v1294_v19  ;;  %v1263_v26 = vmul.f32 %v1697_v16, %v1957_v41  ;;  %v1295_v27 = vmul.f32 %v1729_v17, %v1957_v41 }
 0x11e   : > { %v1331_v28 = vadd.f32 %v1963_v45, %v1260_v22  ;;  %v1363_v29 = vadd.f32 %v1963_v45, %v1292_v23  ;;  %v1261_v30 = vmul.f32 %v1957_v41, %v854_v20  ;;  %v1293_v31 = vmul.f32 %v1957_v41, %v982_v21 }
 0x11f   : > { %1397 = vst [vmem:[%s1970_s25 + $0x90] sm:$0xff] %v1333_v24  ;;  %1429 = vst [vmem:[%s1970_s25 + $0x190] sm:$0xff] %v1365_v25  ;;  %v1334_v32 = vadd.f32 %v1963_v45, %v1263_v26  ;;  %v1366_v33 = vadd.f32 %v1963_v45, %v1295_v27 }
 0x120   : > { %1395 = vst [vmem:[%s1970_s25 + $0x80] sm:$0xff] %v1331_v28  ;;  %1427 = vst [vmem:[%s1970_s25 + $0x180] sm:$0xff] %v1363_v29  ;;  %v1332_v34 = vadd.f32 %v1963_v45, %v1261_v30  ;;  %v1364_v35 = vadd.f32 %v1963_v45, %v1293_v31 }
 0x121   : > { %1398 = vst [vmem:[%s1970_s25 + $0x98] sm:$0xff] %v1334_v32  ;;  %1430 = vst [vmem:[%s1970_s25 + $0x198] sm:$0xff] %v1366_v33 }
 0x122   : > { %v1700_v36 = vpop.f32.mrb[20].mxu0  ;;  %v1732_v37 = vpop.f32.mrb[20].mxu1  ;;  %1396 = vst [vmem:[%s1970_s25 + $0x88] sm:$0xff] %v1332_v34  ;;  %1428 = vst [vmem:[%s1970_s25 + $0x188] sm:$0xff] %v1364_v35 }
 0x123   : > { %v867_v38 = vpop.f32.mrb[21].mxu0  ;;  %v995_v39 = vpop.f32.mrb[21].mxu1  ;;  %v1266_v43 = vmul.f32 %v1700_v36, %v1957_v41  ;;  %v1298_v44 = vmul.f32 %v1732_v37, %v1957_v41 }
 0x124   : > { %v1701_v40 = vpop.f32.mrb[22].mxu0  ;;  %v1733_v42 = vpop.f32.mrb[22].mxu1  ;;  %v1264_v48 = vmul.f32 %v1957_v41, %v867_v38  ;;  %v1296_v49 = vmul.f32 %v1957_v41, %v995_v39 }
 0x125   : > { %v870_v46 = vpop.f32.mrb[23].mxu0  ;;  %v998_v47 = vpop.f32.mrb[23].mxu1  ;;  %v1337_v50 = vadd.f32 %v1963_v45, %v1266_v43  ;;  %v1369_v51 = vadd.f32 %v1963_v45, %v1298_v44  ;;  %v1267_v52 = vmul.f32 %v1701_v40, %v1957_v41  ;;  %v1299_v53 = vmul.f32 %v1733_v42, %v1957_v41 }
 0x126   : > { %v1335_v54 = vadd.f32 %v1963_v45, %v1264_v48  ;;  %v1367_v55 = vadd.f32 %v1963_v45, %v1296_v49  ;;  %v1265_v56 = vmul.f32 %v1957_v41, %v870_v46  ;;  %v1297_v57 = vmul.f32 %v1957_v41, %v998_v47 }
 0x127   : > { %1401 = vst [vmem:[%s1970_s25 + $0xb0] sm:$0xff] %v1337_v50  ;;  %1433 = vst [vmem:[%s1970_s25 + $0x1b0] sm:$0xff] %v1369_v51  ;;  %v1338_v58 = vadd.f32 %v1963_v45, %v1267_v52  ;;  %v1370_v59 = vadd.f32 %v1963_v45, %v1299_v53 }
 0x128   : > { %1399 = vst [vmem:[%s1970_s25 + $0xa0] sm:$0xff] %v1335_v54  ;;  %1431 = vst [vmem:[%s1970_s25 + $0x1a0] sm:$0xff] %v1367_v55  ;;  %v1336_v60 = vadd.f32 %v1963_v45, %v1265_v56  ;;  %v1368_v61 = vadd.f32 %v1963_v45, %v1297_v57 }
 0x129   : > { %1402 = vst [vmem:[%s1970_s25 + $0xb8] sm:$0xff] %v1338_v58  ;;  %1434 = vst [vmem:[%s1970_s25 + $0x1b8] sm:$0xff] %v1370_v59 }
 0x12a   : > { %v1704_v62 = vpop.f32.mrb[24].mxu0  ;;  %v1736_v63 = vpop.f32.mrb[24].mxu1  ;;  %1400 = vst [vmem:[%s1970_s25 + $0xa8] sm:$0xff] %v1336_v60  ;;  %1432 = vst [vmem:[%s1970_s25 + $0x1a8] sm:$0xff] %v1368_v61 }
 0x12b   : > { %v883_v0 = vpop.f32.mrb[25].mxu0  ;;  %v1011_v1 = vpop.f32.mrb[25].mxu1  ;;  %v1270_v4 = vmul.f32 %v1704_v62, %v1957_v41  ;;  %v1302_v5 = vmul.f32 %v1736_v63, %v1957_v41 }
 0x12c   : > { %v1705_v2 = vpop.f32.mrb[26].mxu0  ;;  %v1737_v3 = vpop.f32.mrb[26].mxu1  ;;  %v1268_v8 = vmul.f32 %v1957_v41, %v883_v0  ;;  %v1300_v9 = vmul.f32 %v1957_v41, %v1011_v1 }
 0x12d   : > { %v886_v6 = vpop.f32.mrb[27].mxu0  ;;  %v1014_v7 = vpop.f32.mrb[27].mxu1  ;;  %v1341_v10 = vadd.f32 %v1963_v45, %v1270_v4  ;;  %v1373_v11 = vadd.f32 %v1963_v45, %v1302_v5  ;;  %v1271_v12 = vmul.f32 %v1705_v2, %v1957_v41  ;;  %v1303_v13 = vmul.f32 %v1737_v3, %v1957_v41 }
 0x12e   : > { %v1339_v14 = vadd.f32 %v1963_v45, %v1268_v8  ;;  %v1371_v15 = vadd.f32 %v1963_v45, %v1300_v9  ;;  %v1269_v16 = vmul.f32 %v1957_v41, %v886_v6  ;;  %v1301_v17 = vmul.f32 %v1957_v41, %v1014_v7 }
 0x12f   : > { %1405 = vst [vmem:[%s1970_s25 + $0xd0] sm:$0xff] %v1341_v10  ;;  %1437 = vst [vmem:[%s1970_s25 + $0x1d0] sm:$0xff] %v1373_v11  ;;  %v1342_v18 = vadd.f32 %v1963_v45, %v1271_v12  ;;  %v1374_v19 = vadd.f32 %v1963_v45, %v1303_v13 }
 0x130   : > { %1403 = vst [vmem:[%s1970_s25 + $0xc0] sm:$0xff] %v1339_v14  ;;  %1435 = vst [vmem:[%s1970_s25 + $0x1c0] sm:$0xff] %v1371_v15  ;;  %v1340_v20 = vadd.f32 %v1963_v45, %v1269_v16  ;;  %v1372_v21 = vadd.f32 %v1963_v45, %v1301_v17 }
 0x131   : > { %1406 = vst [vmem:[%s1970_s25 + $0xd8] sm:$0xff] %v1342_v18  ;;  %1438 = vst [vmem:[%s1970_s25 + $0x1d8] sm:$0xff] %v1374_v19 }
 0x132   : > { %v1708_v22 = vpop.f32.mrb[28].mxu0  ;;  %v1740_v23 = vpop.f32.mrb[28].mxu1  ;;  %1404 = vst [vmem:[%s1970_s25 + $0xc8] sm:$0xff] %v1340_v20  ;;  %1436 = vst [vmem:[%s1970_s25 + $0x1c8] sm:$0xff] %v1372_v21 }
 0x133   : > { %v899_v24 = vpop.f32.mrb[29].mxu0  ;;  %v1027_v25 = vpop.f32.mrb[29].mxu1  ;;  %v1274_v28 = vmul.f32 %v1708_v22, %v1957_v41  ;;  %v1306_v29 = vmul.f32 %v1740_v23, %v1957_v41 }
 0x134   : > { %v1709_v26 = vpop.f32.mrb[30].mxu0  ;;  %v1741_v27 = vpop.f32.mrb[30].mxu1  ;;  %v1272_v32 = vmul.f32 %v1957_v41, %v899_v24  ;;  %v1304_v33 = vmul.f32 %v1957_v41, %v1027_v25 }
 0x135   : > { %v902_v30 = vpop.f32.mrb[31].mxu0  ;;  %v1030_v31 = vpop.f32.mrb[31].mxu1  ;;  %v1345_v34 = vadd.f32 %v1963_v45, %v1274_v28  ;;  %v1377_v35 = vadd.f32 %v1963_v45, %v1306_v29  ;;  %v1275_v36 = vmul.f32 %v1709_v26, %v1957_v41  ;;  %v1307_v37 = vmul.f32 %v1741_v27, %v1957_v41 }
 0x136   : > { %v1343_v38 = vadd.f32 %v1963_v45, %v1272_v32  ;;  %v1375_v39 = vadd.f32 %v1963_v45, %v1304_v33  ;;  %v1273_v40 = vmul.f32 %v1957_v41, %v902_v30  ;;  %v1305_v42 = vmul.f32 %v1957_v41, %v1030_v31 }
 0x137   : > { %1409 = vst [vmem:[%s1970_s25 + $0xf0] sm:$0xff] %v1345_v34  ;;  %1441 = vst [vmem:[%s1970_s25 + $0x1f0] sm:$0xff] %v1377_v35  ;;  %v1346_v43 = vadd.f32 %v1963_v45, %v1275_v36  ;;  %v1378_v44 = vadd.f32 %v1963_v45, %v1307_v37 }
 0x138   : > { %1407 = vst [vmem:[%s1970_s25 + $0xe0] sm:$0xff] %v1343_v38  ;;  %1439 = vst [vmem:[%s1970_s25 + $0x1e0] sm:$0xff] %v1375_v39  ;;  %v1344_v46 = vadd.f32 %v1963_v45, %v1273_v40  ;;  %v1376_v47 = vadd.f32 %v1963_v45, %v1305_v42 }
 0x139   : > { %1410 = vst [vmem:[%s1970_s25 + $0xf8] sm:$0xff] %v1346_v43  ;;  %1442 = vst [vmem:[%s1970_s25 + $0x1f8] sm:$0xff] %v1378_v44 }
 0x13a   : > { %1408 = vst [vmem:[%s1970_s25 + $0xe8] sm:$0xff] %v1344_v46  ;;  %1440 = vst [vmem:[%s1970_s25 + $0x1e8] sm:$0xff] %v1376_v47 }
 0x13b PF: > { %s14_s17 = sadd.s32 1, %s1845_s17   ;;  %s2176_s15 = smov %s1841_s16 }
 0x13c   : > { %p11_p5 = scmp.ge.s32.totalorder %s14_s17, 4   ;;  %s2177_s16 = smov %s2179_s18 }
 0x13e   :  { %13 = sbr.rel (!%p11_p5) target bundleno = 2 (0x2), region = 83 }

// kernel: basnet_forward.169
= control target key start
LH: loop header
LB: loop body
LE: loop exit
PB: predicated region body
PF: predicated region fallthrough
CT: control target
= control target key end

     0   :  { %s2146_s18 = smov 0   ;;  %s2148_s19 = smov 0   ;;  %s2608_s0 = inlined_call_operand.vmem [shape: bf16[1024,128], index: 0, kind: input, shape index: {}]   ;;  %s2609_s1 = inlined_call_operand.vmem [shape: bf16[128,128], index: 1, kind: input, shape index: {}]   ;;  %s2610_s2 = inlined_call_operand.vmem [shape: f32[1,128], index: 2, kind: input, shape index: {}]   ;;  %s2611_s3 = inlined_call_operand.vmem [shape: f32[1,128], index: 3, kind: input, shape index: {}]   ;;  %s2612_s4 = inlined_call_operand.vmem [shape: f32[1024,128], index: 4, kind: input, shape index: {}]   ;;  %s2613_s5 = inlined_call_operand.vmem [shape: f32[1024,128], index: 5, kind: output, shape index: {}]  }
   0x1   :  { %s2150_s20 = smov 0  }
   0x2 LB: > { %s34_s21 = sadd.s32 1, %s2110_s19  ;;  %p1840_p0 = scmp.ge.s32.totalorder %s2114_s20, 1  ;;  %s2114_s20 = sphi %s2150_s20, %s15_s20   ;;  %s2110_s19 = sphi %s2148_s19, %s2615_s19   ;;  %s2106_s18 = sphi %s2146_s18, %s2614_s18  }
   0x3   : > { %p36_p1 = scmp.ge.s32.totalorder %s34_s21, 2  ;;  %p262_p2 = scmp.lt.s32.totalorder %s2114_s20, 3 }
   0x5   : > { %s2617_s21 = smov (%p36_p1, %s34_s21), 0  ;;  %p263_p3 = pnand %p1840_p0, %p262_p2 }
   0x6   : > { %v2052_v0 = vld [vmem:[%s2609_s1] sm:$0xff] (!%p263_p3)   ;;  %s1841_s24 = sshll.u32 (!%p263_p3), %s2106_s18, 6  ;;  %v2053_v1 = vld [vmem:[%s2609_s1 + $0x8] sm:$0xff] (!%p263_p3)   ;;  %v2054_v2 = vld [vmem:[%s2609_s1 + $0x10] sm:$0xff] (!%p263_p3)  }
   0x7   : > { %266 = sbr.rel (%p263_p3) target bundleno = 323 (0x143), region = 40  ;;  %p319_p4 = scmp.lt.s32.totalorder (!%p263_p3), %s1841_s24, 127  ;;  %1931 = vmatprep.subr.bf16.mxu0 (!%p263_p3), %v2052_v0  ;;  %2011 = vmatprep.subr.bf16.mxu1 (!%p263_p3), %v2052_v0  ;;  %v2055_v3 = vld [vmem:[%s2609_s1 + $0x18] sm:$0xff] (!%p263_p3)   ;;  %v2056_v6 = vld [vmem:[%s2609_s1 + $0x20] sm:$0xff] (!%p263_p3)   ;;  %v2057_v7 = vld [vmem:[%s2609_s1 + $0x28] sm:$0xff] (!%p263_p3)  }
   0x8   : > { %1932 = vmatpush3.bf16.msra.mxu0 (!%p263_p3), %v2052_v0  ;;  %2019 = vmatpush3.bf16.msra.mxu1 (!%p263_p3), %v2052_v0  ;;  %v2058_v8 = vld [vmem:[%s2609_s1 + $0x30] sm:$0xff] (!%p263_p3)   ;;  %v2059_v9 = vld [vmem:[%s2609_s1 + $0x38] sm:$0xff] (!%p263_p3)   ;;  %v2232_v41 = vld [vmem:[%s2610_s2] ss:$0 sm:$0xff] (!%p263_p3) }
   0x9   : > { %1933 = vmatprep.subr.bf16.mxu0 (!%p263_p3), %v2053_v1  ;;  %2012 = vmatprep.subr.bf16.mxu1 (!%p263_p3), %v2053_v1  ;;  %v2244_v45 = vld [vmem:[%s2611_s3] ss:$0 sm:$0xff] (!%p263_p3) }
   0xc   : > { %1934 = vmatpush3.bf16.msra.mxu0 (!%p263_p3), %v2053_v1  ;;  %2020 = vmatpush3.bf16.msra.mxu1 (!%p263_p3), %v2053_v1 }
   0xd   : > { %1935 = vmatprep.subr.bf16.mxu0 (!%p263_p3), %v2054_v2  ;;  %2013 = vmatprep.subr.bf16.mxu1 (!%p263_p3), %v2054_v2 }
   0xe   : > { %s2619_s24 = smov (!%p319_p4, %s1841_s24), 127 }
   0xf   : > { %s1842_s29 = sshll.u32 %s2619_s24, 2  ;;  %s1844_s18 = sshll.u32 %s2619_s24, 3 }
  0x10   : > { %s2179_s7 = scalar_lea.vmem %s2608_s0, %s1842_s29  ;;  %1936 = vmatpush3.bf16.msra.mxu0 %v2054_v2  ;;  %2021 = vmatpush3.bf16.msra.mxu1 %v2054_v2  ;;  %s2239_s27 = scalar_lea.vmem %s2612_s4, %s1844_s18 }
  0x11   : > { %v2060_v4 = vld [vmem:[%s2179_s7] sm:$0xff]   ;;  %1937 = vmatprep.subr.bf16.mxu0 %v2055_v3  ;;  %2014 = vmatprep.subr.bf16.mxu1 %v2055_v3  ;;  %v2062_v10 = vld [vmem:[%s2179_s7 + $0x8] sm:$0xff]   ;;  %v2064_v12 = vld [vmem:[%s2179_s7 + $0x10] sm:$0xff]  }
  0x12   : > { %v2061_v5 = vld [vmem:[%s2179_s7 + $0x80] sm:$0xff]   ;;  %1947 = vmatprep.mubr.bf16.mxu0 %v2060_v4  ;;  %v2063_v11 = vld [vmem:[%s2179_s7 + $0x88] sm:$0xff]   ;;  %v2065_v13 = vld [vmem:[%s2179_s7 + $0x90] sm:$0xff]  }
  0x13   : > { %1979 = vmatprep.mubr.bf16.mxu1 %v2061_v5  ;;  %v2066_v14 = vld [vmem:[%s2179_s7 + $0x18] sm:$0xff]   ;;  %v2068_v16 = vld [vmem:[%s2179_s7 + $0x20] sm:$0xff]   ;;  %v2070_v18 = vld [vmem:[%s2179_s7 + $0x28] sm:$0xff]  }
  0x14   : > { %1938 = vmatpush3.bf16.msra.mxu0 %v2055_v3  ;;  %2022 = vmatpush3.bf16.msra.mxu1 %v2055_v3  ;;  %v2067_v15 = vld [vmem:[%s2179_s7 + $0x98] sm:$0xff]   ;;  %v2069_v17 = vld [vmem:[%s2179_s7 + $0xa0] sm:$0xff]   ;;  %v2071_v19 = vld [vmem:[%s2179_s7 + $0xa8] sm:$0xff]  }
  0x15   : > { %1939 = vmatprep.subr.bf16.mxu0 %v2056_v6  ;;  %2015 = vmatprep.subr.bf16.mxu1 %v2056_v6  ;;  %v2072_v20 = vld [vmem:[%s2179_s7 + $0x30] sm:$0xff]   ;;  %v2074_v22 = vld [vmem:[%s2179_s7 + $0x38] sm:$0xff]   ;;  %v2076_v24 = vld [vmem:[%s2179_s7 + $0x40] sm:$0xff]  }
  0x16   : > { %v2073_v21 = vld [vmem:[%s2179_s7 + $0xb0] sm:$0xff]   ;;  %v2075_v23 = vld [vmem:[%s2179_s7 + $0xb8] sm:$0xff]   ;;  %v2077_v25 = vld [vmem:[%s2179_s7 + $0xc0] sm:$0xff]  }
  0x17   : > { %v2078_v26 = vld [vmem:[%s2179_s7 + $0x48] sm:$0xff]   ;;  %v2080_v28 = vld [vmem:[%s2179_s7 + $0x50] sm:$0xff]   ;;  %v2082_v30 = vld [vmem:[%s2179_s7 + $0x58] sm:$0xff]  }
  0x18   : > { %1940 = vmatpush3.bf16.msra.mxu0 %v2056_v6  ;;  %2023 = vmatpush3.bf16.msra.mxu1 %v2056_v6  ;;  %v2079_v27 = vld [vmem:[%s2179_s7 + $0xc8] sm:$0xff]   ;;  %v2081_v29 = vld [vmem:[%s2179_s7 + $0xd0] sm:$0xff]   ;;  %v2083_v31 = vld [vmem:[%s2179_s7 + $0xd8] sm:$0xff]  }
  0x19   : > { %1941 = vmatprep.subr.bf16.mxu0 %v2057_v7  ;;  %2016 = vmatprep.subr.bf16.mxu1 %v2057_v7  ;;  %v2084_v32 = vld [vmem:[%s2179_s7 + $0x60] sm:$0xff]   ;;  %v2086_v34 = vld [vmem:[%s2179_s7 + $0x68] sm:$0xff]   ;;  %v2088_v36 = vld [vmem:[%s2179_s7 + $0x70] sm:$0xff]  }
  0x1a   : > { %v2085_v33 = vld [vmem:[%s2179_s7 + $0xe0] sm:$0xff]   ;;  %v2087_v35 = vld [vmem:[%s2179_s7 + $0xe8] sm:$0xff]   ;;  %v2089_v37 = vld [vmem:[%s2179_s7 + $0xf0] sm:$0xff]  }
  0x1b   : > { %v2090_v38 = vld [vmem:[%s2179_s7 + $0x78] sm:$0xff]   ;;  %v1441_v52 = vld [vmem:[%s2239_s27 + $0x10] sm:$0xff]  ;;  %v1439_v58 = vld [vmem:[%s2239_s27] sm:$0xff] }
  0x1c   : > { %1942 = vmatpush3.bf16.msra.mxu0 %v2057_v7  ;;  %2024 = vmatpush3.bf16.msra.mxu1 %v2057_v7  ;;  %v2091_v39 = vld [vmem:[%s2179_s7 + $0xf8] sm:$0xff]   ;;  %v1473_v53 = vld [vmem:[%s2239_s27 + $0x110] sm:$0xff]  ;;  %v1471_v59 = vld [vmem:[%s2239_s27 + $0x100] sm:$0xff]  ;;  %s2273_s7 = scalar_lea.vmem %s2613_s5, %s1844_s18 }
  0x1d   : > { %1943 = vmatprep.subr.bf16.mxu0 %v2058_v8  ;;  %2017 = vmatprep.subr.bf16.mxu1 %v2058_v8  ;;  %v1442_v0 = vld [vmem:[%s2239_s27 + $0x18] sm:$0xff] }
  0x1e   : > { %v1474_v1 = vld [vmem:[%s2239_s27 + $0x118] sm:$0xff] }
  0x20   : > { %1944 = vmatpush3.bf16.msra.mxu0 %v2058_v8  ;;  %2025 = vmatpush3.bf16.msra.mxu1 %v2058_v8  ;;  %v1440_v8 = vld [vmem:[%s2239_s27 + $0x8] sm:$0xff] }
  0x21   : > { %1945 = vmatprep.subr.bf16.mxu0 %v2059_v9  ;;  %2018 = vmatprep.subr.bf16.mxu1 %v2059_v9 }
  0x24   : > { %1946 = vmatpush3.bf16.msra.mxu0 %v2059_v9  ;;  %2026 = vmatpush3.bf16.msra.mxu1 %v2059_v9  ;;  %v1472_v9 = vld [vmem:[%s2239_s27 + $0x108] sm:$0xff] }
  0x27   : > { %1948 = vmatmul.mubr.bf16.vlgmr.msra.gmra.mrb[0].mxu0 %v2062_v10  ;;  %1980 = vmatmul.mubr.bf16.vlgmr.msra.gmra.mrb[0].mxu1 %v2063_v11 }
  0x28   : > { %1951 = vmatprep.mubr.bf16.mxu0 %v2064_v12  ;;  %1983 = vmatprep.mubr.bf16.mxu1 %v2065_v13 }
  0x2f   : > { %1952 = vmatmul.mubr.bf16.gmra.mrb[4].mxu0 %v2066_v14  ;;  %1984 = vmatmul.mubr.bf16.gmra.mrb[4].mxu1 %v2067_v15 }
  0x30   : > { %1955 = vmatprep.mubr.bf16.mxu0 %v2068_v16  ;;  %1987 = vmatprep.mubr.bf16.mxu1 %v2069_v17 }
  0x37   : > { %1956 = vmatmul.mubr.bf16.gmra.mrb[8].mxu0 %v2070_v18  ;;  %1988 = vmatmul.mubr.bf16.gmra.mrb[8].mxu1 %v2071_v19 }
  0x38   : > { %1959 = vmatprep.mubr.bf16.mxu0 %v2072_v20  ;;  %1991 = vmatprep.mubr.bf16.mxu1 %v2073_v21 }
  0x3f   : > { %1960 = vmatmul.mubr.bf16.gmra.mrb[12].mxu0 %v2074_v22  ;;  %1992 = vmatmul.mubr.bf16.gmra.mrb[12].mxu1 %v2075_v23 }
  0x40   : > { %1963 = vmatprep.mubr.bf16.mxu0 %v2076_v24  ;;  %1995 = vmatprep.mubr.bf16.mxu1 %v2077_v25 }
  0x47   : > { %1964 = vmatmul.mubr.bf16.gmra.mrb[16].mxu0 %v2078_v26  ;;  %1996 = vmatmul.mubr.bf16.gmra.mrb[16].mxu1 %v2079_v27 }
  0x48   : > { %1967 = vmatprep.mubr.bf16.mxu0 %v2080_v28  ;;  %1999 = vmatprep.mubr.bf16.mxu1 %v2081_v29 }
  0x4f   : > { %1968 = vmatmul.mubr.bf16.gmra.mrb[20].mxu0 %v2082_v30  ;;  %2000 = vmatmul.mubr.bf16.gmra.mrb[20].mxu1 %v2083_v31 }
  0x50   : > { %1971 = vmatprep.mubr.bf16.mxu0 %v2084_v32  ;;  %2003 = vmatprep.mubr.bf16.mxu1 %v2085_v33 }
  0x57   : > { %1972 = vmatmul.mubr.bf16.gmra.mrb[24].mxu0 %v2086_v34  ;;  %2004 = vmatmul.mubr.bf16.gmra.mrb[24].mxu1 %v2087_v35 }
  0x58   : > { %1975 = vmatprep.mubr.bf16.mxu0 %v2088_v36  ;;  %2007 = vmatprep.mubr.bf16.mxu1 %v2089_v37  ;;  %v1445_v36 = vld [vmem:[%s2239_s27 + $0x30] sm:$0xff] }
  0x59   : > { %v1477_v37 = vld [vmem:[%s2239_s27 + $0x130] sm:$0xff] }
  0x5f   : > { %1976 = vmatmul.mubr.bf16.gmra.mrb[28].mxu0 %v2090_v38  ;;  %2008 = vmatmul.mubr.bf16.gmra.mrb[28].mxu1 %v2091_v39 }
  0xfa   : > { %v1949_v40 = vpop.f32.mrb[0].mxu0  ;;  %v1981_v42 = vpop.f32.mrb[0].mxu1 }
  0xfb   : > { %v847_v43 = vpop.f32.mrb[1].mxu0  ;;  %v975_v44 = vpop.f32.mrb[1].mxu1  ;;  %v1306_v48 = vmul.f32 %v1949_v40, %v2232_v41  ;;  %v1338_v49 = vmul.f32 %v1981_v42, %v2232_v41 }
  0xfc   : > { %v1950_v46 = vpop.f32.mrb[2].mxu0  ;;  %v1982_v47 = vpop.f32.mrb[2].mxu1  ;;  %v1304_v54 = vmul.f32 %v2232_v41, %v847_v43  ;;  %v1336_v55 = vmul.f32 %v2232_v41, %v975_v44  ;;  %v1443_v43 = vld [vmem:[%s2239_s27 + $0x20] sm:$0xff] }
  0xfd   : > { %v850_v50 = vpop.f32.mrb[3].mxu0  ;;  %v978_v51 = vpop.f32.mrb[3].mxu1  ;;  %v1377_v56 = vadd.f32 %v2244_v45, %v1306_v48  ;;  %v1409_v57 = vadd.f32 %v2244_v45, %v1338_v49  ;;  %v1307_v60 = vmul.f32 %v1950_v46, %v2232_v41  ;;  %v1339_v61 = vmul.f32 %v1982_v47, %v2232_v41  ;;  %v1475_v44 = vld [vmem:[%s2239_s27 + $0x120] sm:$0xff] }
  0xfe   : > { %v1375_v62 = vadd.f32 %v2244_v45, %v1304_v54  ;;  %v1407_v63 = vadd.f32 %v2244_v45, %v1336_v55  ;;  %v1305_v2 = vmul.f32 %v2232_v41, %v850_v50  ;;  %v1337_v3 = vmul.f32 %v2232_v41, %v978_v51  ;;  %v1446_v50 = vld [vmem:[%s2239_s27 + $0x38] sm:$0xff] }
  0xff   : > { %v1505_v4 = vadd.f32 %v1441_v52, %v1377_v56  ;;  %v1537_v5 = vadd.f32 %v1473_v53, %v1409_v57  ;;  %v1378_v6 = vadd.f32 %v2244_v45, %v1307_v60  ;;  %v1410_v7 = vadd.f32 %v2244_v45, %v1339_v61  ;;  %v1478_v51 = vld [vmem:[%s2239_s27 + $0x138] sm:$0xff]  ;;  %v1444_v60 = vld [vmem:[%s2239_s27 + $0x28] sm:$0xff] }
 0x100   : > { %v1503_v10 = vadd.f32 %v1439_v58, %v1375_v62  ;;  %v1535_v11 = vadd.f32 %v1471_v59, %v1407_v63  ;;  %v1376_v12 = vadd.f32 %v2244_v45, %v1305_v2  ;;  %v1408_v13 = vadd.f32 %v2244_v45, %v1337_v3  ;;  %v1476_v61 = vld [vmem:[%s2239_s27 + $0x128] sm:$0xff] }
 0x101   : > { %v1569_v16 = vmax.f32 %v1505_v4, 0.0  ;;  %v1601_v17 = vmax.f32 %v1537_v5, 0.0  ;;  %v1506_v18 = vadd.f32 %v1442_v0, %v1378_v6  ;;  %v1538_v19 = vadd.f32 %v1474_v1, %v1410_v7 }
 0x102   : > { %v1953_v14 = vpop.f32.mrb[4].mxu0  ;;  %v1985_v15 = vpop.f32.mrb[4].mxu1  ;;  %v1567_v22 = vmax.f32 %v1503_v10, 0.0  ;;  %v1599_v23 = vmax.f32 %v1535_v11, 0.0  ;;  %v1504_v24 = vadd.f32 %v1440_v8, %v1376_v12  ;;  %v1536_v25 = vadd.f32 %v1472_v9, %v1408_v13 }
 0x103   : > { %v863_v20 = vpop.f32.mrb[5].mxu0  ;;  %v991_v21 = vpop.f32.mrb[5].mxu1  ;;  %1633 = vst [vmem:[%s2273_s7 + $0x10] sm:$0xff] %v1569_v16  ;;  %1665 = vst [vmem:[%s2273_s7 + $0x110] sm:$0xff] %v1601_v17  ;;  %v1570_v28 = vmax.f32 %v1506_v18, 0.0  ;;  %v1602_v29 = vmax.f32 %v1538_v19, 0.0  ;;  %v1310_v34 = vmul.f32 %v1953_v14, %v2232_v41  ;;  %v1342_v35 = vmul.f32 %v1985_v15, %v2232_v41 }
 0x104   : > { %v1954_v26 = vpop.f32.mrb[6].mxu0  ;;  %v1986_v27 = vpop.f32.mrb[6].mxu1  ;;  %1631 = vst [vmem:[%s2273_s7] sm:$0xff] %v1567_v22  ;;  %1663 = vst [vmem:[%s2273_s7 + $0x100] sm:$0xff] %v1599_v23  ;;  %v1568_v32 = vmax.f32 %v1504_v24, 0.0  ;;  %v1600_v33 = vmax.f32 %v1536_v25, 0.0  ;;  %v1308_v38 = vmul.f32 %v2232_v41, %v863_v20  ;;  %v1340_v39 = vmul.f32 %v2232_v41, %v991_v21  ;;  %v1449_v22 = vld [vmem:[%s2239_s27 + $0x50] sm:$0xff] }
 0x105   : > { %v866_v30 = vpop.f32.mrb[7].mxu0  ;;  %v994_v31 = vpop.f32.mrb[7].mxu1  ;;  %1634 = vst [vmem:[%s2273_s7 + $0x18] sm:$0xff] %v1570_v28  ;;  %1666 = vst [vmem:[%s2273_s7 + $0x118] sm:$0xff] %v1602_v29  ;;  %v1381_v40 = vadd.f32 %v2244_v45, %v1310_v34  ;;  %v1413_v42 = vadd.f32 %v2244_v45, %v1342_v35  ;;  %v1311_v46 = vmul.f32 %v1954_v26, %v2232_v41  ;;  %v1481_v23 = vld [vmem:[%s2239_s27 + $0x150] sm:$0xff] }
 0x106   : > { %1632 = vst [vmem:[%s2273_s7 + $0x8] sm:$0xff] %v1568_v32  ;;  %1664 = vst [vmem:[%s2273_s7 + $0x108] sm:$0xff] %v1600_v33  ;;  %v1343_v47 = vmul.f32 %v1986_v27, %v2232_v41  ;;  %v1379_v48 = vadd.f32 %v2244_v45, %v1308_v38  ;;  %v1411_v49 = vadd.f32 %v2244_v45, %v1340_v39  ;;  %v1450_v38 = vld [vmem:[%s2239_s27 + $0x58] sm:$0xff] }
 0x107   : > { %v1309_v52 = vmul.f32 %v2232_v41, %v866_v30  ;;  %v1341_v53 = vmul.f32 %v2232_v41, %v994_v31  ;;  %v1509_v56 = vadd.f32 %v1445_v36, %v1381_v40  ;;  %v1541_v57 = vadd.f32 %v1477_v37, %v1413_v42  ;;  %v1447_v30 = vld [vmem:[%s2239_s27 + $0x40] sm:$0xff]  ;;  %v1482_v39 = vld [vmem:[%s2239_s27 + $0x158] sm:$0xff] }
 0x108   : > { %v1382_v58 = vadd.f32 %v2244_v45, %v1311_v46  ;;  %v1414_v59 = vadd.f32 %v2244_v45, %v1343_v47  ;;  %v1507_v0 = vadd.f32 %v1443_v43, %v1379_v48  ;;  %v1539_v1 = vadd.f32 %v1475_v44, %v1411_v49  ;;  %v1479_v31 = vld [vmem:[%s2239_s27 + $0x140] sm:$0xff] }
 0x109   : > { %v1380_v2 = vadd.f32 %v2244_v45, %v1309_v52  ;;  %v1412_v3 = vadd.f32 %v2244_v45, %v1341_v53  ;;  %v1573_v6 = vmax.f32 %v1509_v56, 0.0  ;;  %v1605_v7 = vmax.f32 %v1541_v57, 0.0 }
 0x10a   : > { %v1957_v54 = vpop.f32.mrb[8].mxu0  ;;  %v1989_v55 = vpop.f32.mrb[8].mxu1  ;;  %v1510_v8 = vadd.f32 %v1446_v50, %v1382_v58  ;;  %v1542_v9 = vadd.f32 %v1478_v51, %v1414_v59  ;;  %v1571_v12 = vmax.f32 %v1507_v0, 0.0  ;;  %v1603_v13 = vmax.f32 %v1539_v1, 0.0  ;;  %v1448_v50 = vld [vmem:[%s2239_s27 + $0x48] sm:$0xff] }
 0x10b   : > { %v879_v62 = vpop.f32.mrb[9].mxu0  ;;  %v1007_v63 = vpop.f32.mrb[9].mxu1  ;;  %v1508_v14 = vadd.f32 %v1444_v60, %v1380_v2  ;;  %v1540_v15 = vadd.f32 %v1476_v61, %v1412_v3  ;;  %1637 = vst [vmem:[%s2273_s7 + $0x30] sm:$0xff] %v1573_v6  ;;  %1669 = vst [vmem:[%s2273_s7 + $0x130] sm:$0xff] %v1605_v7  ;;  %v1314_v20 = vmul.f32 %v1957_v54, %v2232_v41  ;;  %v1480_v51 = vld [vmem:[%s2239_s27 + $0x148] sm:$0xff] }
 0x10c   : > { %v1958_v4 = vpop.f32.mrb[10].mxu0  ;;  %v1990_v5 = vpop.f32.mrb[10].mxu1  ;;  %v1574_v16 = vmax.f32 %v1510_v8, 0.0  ;;  %v1606_v17 = vmax.f32 %v1542_v9, 0.0  ;;  %1635 = vst [vmem:[%s2273_s7 + $0x20] sm:$0xff] %v1571_v12  ;;  %1667 = vst [vmem:[%s2273_s7 + $0x120] sm:$0xff] %v1603_v13  ;;  %v1346_v21 = vmul.f32 %v1989_v55, %v2232_v41  ;;  %v1312_v24 = vmul.f32 %v2232_v41, %v879_v62 }
 0x10d   : > { %v882_v10 = vpop.f32.mrb[11].mxu0  ;;  %v1010_v11 = vpop.f32.mrb[11].mxu1  ;;  %v1572_v18 = vmax.f32 %v1508_v14, 0.0  ;;  %v1604_v19 = vmax.f32 %v1540_v15, 0.0  ;;  %v1344_v25 = vmul.f32 %v2232_v41, %v1007_v63  ;;  %v1385_v28 = vadd.f32 %v2244_v45, %v1314_v20  ;;  %v1453_v12 = vld [vmem:[%s2239_s27 + $0x70] sm:$0xff]  ;;  %v1451_v20 = vld [vmem:[%s2239_s27 + $0x60] sm:$0xff] }
 0x10e   : > { %1638 = vst [vmem:[%s2273_s7 + $0x38] sm:$0xff] %v1574_v16  ;;  %1670 = vst [vmem:[%s2273_s7 + $0x138] sm:$0xff] %v1606_v17  ;;  %v1417_v29 = vadd.f32 %v2244_v45, %v1346_v21  ;;  %v1315_v32 = vmul.f32 %v1958_v4, %v2232_v41  ;;  %v1347_v33 = vmul.f32 %v1990_v5, %v2232_v41  ;;  %v1485_v13 = vld [vmem:[%s2239_s27 + $0x170] sm:$0xff]  ;;  %v1483_v21 = vld [vmem:[%s2239_s27 + $0x160] sm:$0xff] }
 0x10f   : > { %1636 = vst [vmem:[%s2273_s7 + $0x28] sm:$0xff] %v1572_v18  ;;  %1668 = vst [vmem:[%s2273_s7 + $0x128] sm:$0xff] %v1604_v19  ;;  %v1383_v36 = vadd.f32 %v2244_v45, %v1312_v24  ;;  %v1415_v37 = vadd.f32 %v2244_v45, %v1344_v25  ;;  %v1313_v40 = vmul.f32 %v2232_v41, %v882_v10 }
 0x110   : > { %v1345_v42 = vmul.f32 %v2232_v41, %v1010_v11  ;;  %v1513_v46 = vadd.f32 %v1449_v22, %v1385_v28  ;;  %v1545_v47 = vadd.f32 %v1481_v23, %v1417_v29  ;;  %v1386_v48 = vadd.f32 %v2244_v45, %v1315_v32  ;;  %v1454_v28 = vld [vmem:[%s2239_s27 + $0x78] sm:$0xff] }
 0x111   : > { %v1418_v49 = vadd.f32 %v2244_v45, %v1347_v33  ;;  %v1511_v54 = vadd.f32 %v1447_v30, %v1383_v36  ;;  %v1543_v55 = vadd.f32 %v1479_v31, %v1415_v37  ;;  %v1384_v56 = vadd.f32 %v2244_v45, %v1313_v40  ;;  %v1486_v29 = vld [vmem:[%s2239_s27 + $0x178] sm:$0xff]  ;;  %v1452_v36 = vld [vmem:[%s2239_s27 + $0x68] sm:$0xff] }
 0x112   : > { %v1961_v26 = vpop.f32.mrb[12].mxu0  ;;  %v1993_v27 = vpop.f32.mrb[12].mxu1  ;;  %v1416_v57 = vadd.f32 %v2244_v45, %v1345_v42  ;;  %v1577_v58 = vmax.f32 %v1513_v46, 0.0  ;;  %v1609_v59 = vmax.f32 %v1545_v47, 0.0  ;;  %v1514_v60 = vadd.f32 %v1450_v38, %v1386_v48  ;;  %v1484_v37 = vld [vmem:[%s2239_s27 + $0x168] sm:$0xff] }
 0x113   : > { %v895_v34 = vpop.f32.mrb[13].mxu0  ;;  %v1023_v35 = vpop.f32.mrb[13].mxu1  ;;  %v1546_v61 = vadd.f32 %v1482_v39, %v1418_v49  ;;  %v1575_v62 = vmax.f32 %v1511_v54, 0.0  ;;  %v1607_v63 = vmax.f32 %v1543_v55, 0.0  ;;  %v1512_v0 = vadd.f32 %v1448_v50, %v1384_v56 }
 0x114   : > { %v1962_v43 = vpop.f32.mrb[14].mxu0  ;;  %v1994_v44 = vpop.f32.mrb[14].mxu1  ;;  %v1544_v1 = vadd.f32 %v1480_v51, %v1416_v57  ;;  %1641 = vst [vmem:[%s2273_s7 + $0x50] sm:$0xff] %v1577_v58  ;;  %1673 = vst [vmem:[%s2273_s7 + $0x150] sm:$0xff] %v1609_v59  ;;  %v1578_v2 = vmax.f32 %v1514_v60, 0.0  ;;  %v1318_v8 = vmul.f32 %v1961_v26, %v2232_v41  ;;  %v1350_v9 = vmul.f32 %v1993_v27, %v2232_v41 }
 0x115   : > { %v898_v52 = vpop.f32.mrb[15].mxu0  ;;  %v1026_v53 = vpop.f32.mrb[15].mxu1  ;;  %v1610_v3 = vmax.f32 %v1546_v61, 0.0  ;;  %1639 = vst [vmem:[%s2273_s7 + $0x40] sm:$0xff] %v1575_v62  ;;  %1671 = vst [vmem:[%s2273_s7 + $0x140] sm:$0xff] %v1607_v63  ;;  %v1576_v4 = vmax.f32 %v1512_v0, 0.0  ;;  %v1316_v14 = vmul.f32 %v2232_v41, %v895_v34  ;;  %v1348_v15 = vmul.f32 %v2232_v41, %v1023_v35 }
 0x116   : > { %v1608_v5 = vmax.f32 %v1544_v1, 0.0  ;;  %1642 = vst [vmem:[%s2273_s7 + $0x58] sm:$0xff] %v1578_v2  ;;  %v1389_v18 = vadd.f32 %v2244_v45, %v1318_v8  ;;  %v1421_v19 = vadd.f32 %v2244_v45, %v1350_v9  ;;  %v1319_v22 = vmul.f32 %v1962_v43, %v2232_v41  ;;  %v1457_v2 = vld [vmem:[%s2239_s27 + $0x90] sm:$0xff]  ;;  %v1455_v8 = vld [vmem:[%s2239_s27 + $0x80] sm:$0xff] }
 0x117   : > { %1674 = vst [vmem:[%s2273_s7 + $0x158] sm:$0xff] %v1610_v3  ;;  %1640 = vst [vmem:[%s2273_s7 + $0x48] sm:$0xff] %v1576_v4  ;;  %v1351_v23 = vmul.f32 %v1994_v44, %v2232_v41  ;;  %v1387_v26 = vadd.f32 %v2244_v45, %v1316_v14  ;;  %v1419_v27 = vadd.f32 %v2244_v45, %v1348_v15  ;;  %v1489_v3 = vld [vmem:[%s2239_s27 + $0x190] sm:$0xff]  ;;  %v1487_v9 = vld [vmem:[%s2239_s27 + $0x180] sm:$0xff] }
 0x118   : > { %1672 = vst [vmem:[%s2273_s7 + $0x148] sm:$0xff] %v1608_v5  ;;  %v1317_v30 = vmul.f32 %v2232_v41, %v898_v52  ;;  %v1349_v31 = vmul.f32 %v2232_v41, %v1026_v53  ;;  %v1517_v32 = vadd.f32 %v1453_v12, %v1389_v18  ;;  %v1549_v33 = vadd.f32 %v1485_v13, %v1421_v19  ;;  %v1458_v15 = vld [vmem:[%s2239_s27 + $0x98] sm:$0xff] }
 0x119   : > { %v1390_v34 = vadd.f32 %v2244_v45, %v1319_v22  ;;  %v1422_v35 = vadd.f32 %v2244_v45, %v1351_v23  ;;  %v1515_v38 = vadd.f32 %v1451_v20, %v1387_v26  ;;  %v1547_v39 = vadd.f32 %v1483_v21, %v1419_v27  ;;  %v1488_v26 = vld [vmem:[%s2239_s27 + $0x188] sm:$0xff] }
 0x11a   : > { %v2345_v6 = vpop.f32.mrb[16].mxu0  ;;  %v2347_v7 = vpop.f32.mrb[16].mxu1  ;;  %v1388_v40 = vadd.f32 %v2244_v45, %v1317_v30  ;;  %v1420_v42 = vadd.f32 %v2244_v45, %v1349_v31  ;;  %v1581_v43 = vmax.f32 %v1517_v32, 0.0  ;;  %v1613_v44 = vmax.f32 %v1549_v33, 0.0 }
 0x11b   : > { %v2353_v10 = vpop.f32.mrb[17].mxu0  ;;  %v2355_v11 = vpop.f32.mrb[17].mxu1  ;;  %v1518_v46 = vadd.f32 %v1454_v28, %v1390_v34  ;;  %v1550_v47 = vadd.f32 %v1486_v29, %v1422_v35  ;;  %v1579_v48 = vmax.f32 %v1515_v38, 0.0  ;;  %v1611_v49 = vmax.f32 %v1547_v39, 0.0 }
 0x11c   : > { %v2363_v16 = vpop.f32.mrb[18].mxu0  ;;  %v2365_v17 = vpop.f32.mrb[18].mxu1  ;;  %v1516_v50 = vadd.f32 %v1452_v36, %v1388_v40  ;;  %v1548_v51 = vadd.f32 %v1484_v37, %v1420_v42  ;;  %1645 = vst [vmem:[%s2273_s7 + $0x70] sm:$0xff] %v1581_v43  ;;  %1677 = vst [vmem:[%s2273_s7 + $0x170] sm:$0xff] %v1613_v44  ;;  %v1322_v62 = vmul.f32 %v2345_v6, %v2232_v41 }
 0x11d   : > { %v914_v24 = vpop.f32.mrb[19].mxu0  ;;  %v1042_v25 = vpop.f32.mrb[19].mxu1  ;;  %v1582_v54 = vmax.f32 %v1518_v46, 0.0  ;;  %v1614_v55 = vmax.f32 %v1550_v47, 0.0  ;;  %1643 = vst [vmem:[%s2273_s7 + $0x60] sm:$0xff] %v1579_v48  ;;  %1675 = vst [vmem:[%s2273_s7 + $0x160] sm:$0xff] %v1611_v49  ;;  %v1354_v63 = vmul.f32 %v2347_v7, %v2232_v41  ;;  %v1320_v4 = vmul.f32 %v2232_v41, %v2353_v10 }
 0x11e   : > { %v1580_v58 = vmax.f32 %v1516_v50, 0.0  ;;  %v1612_v59 = vmax.f32 %v1548_v51, 0.0  ;;  %v1352_v5 = vmul.f32 %v2232_v41, %v2355_v11  ;;  %v1393_v6 = vadd.f32 %v2244_v45, %v1322_v62  ;;  %v1490_v11 = vld [vmem:[%s2239_s27 + $0x198] sm:$0xff] }
 0x11f   : > { %1646 = vst [vmem:[%s2273_s7 + $0x78] sm:$0xff] %v1582_v54  ;;  %1678 = vst [vmem:[%s2273_s7 + $0x178] sm:$0xff] %v1614_v55  ;;  %v1425_v7 = vadd.f32 %v2244_v45, %v1354_v63  ;;  %v1323_v12 = vmul.f32 %v2363_v16, %v2232_v41  ;;  %v1355_v13 = vmul.f32 %v2365_v17, %v2232_v41  ;;  %v1456_v16 = vld [vmem:[%s2239_s27 + $0x88] sm:$0xff]  ;;  %v1461_v54 = vld [vmem:[%s2239_s27 + $0xb0] sm:$0xff] }
 0x120   : > { %1644 = vst [vmem:[%s2273_s7 + $0x68] sm:$0xff] %v1580_v58  ;;  %1676 = vst [vmem:[%s2273_s7 + $0x168] sm:$0xff] %v1612_v59  ;;  %v1391_v14 = vadd.f32 %v2244_v45, %v1320_v4  ;;  %v1423_v10 = vadd.f32 %v2244_v45, %v1352_v5  ;;  %v1321_v18 = vmul.f32 %v2232_v41, %v914_v24  ;;  %v1493_v55 = vld [vmem:[%s2239_s27 + $0x1b0] sm:$0xff]  ;;  %v1462_v5 = vld [vmem:[%s2239_s27 + $0xb8] sm:$0xff] }
 0x121   : > { %v1353_v19 = vmul.f32 %v2232_v41, %v1042_v25  ;;  %v1521_v20 = vadd.f32 %v1457_v2, %v1393_v6  ;;  %v1553_v21 = vadd.f32 %v1489_v3, %v1425_v7  ;;  %v1394_v22 = vadd.f32 %v2244_v45, %v1323_v12  ;;  %v1491_v2 = vld [vmem:[%s2239_s27 + $0x1a0] sm:$0xff] }
 0x122   : > { %v2385_v52 = vpop.f32.mrb[20].mxu0  ;;  %v2387_v53 = vpop.f32.mrb[20].mxu1  ;;  %v1426_v23 = vadd.f32 %v2244_v45, %v1355_v13  ;;  %v1519_v27 = vadd.f32 %v1455_v8, %v1391_v14  ;;  %v1551_v17 = vadd.f32 %v1487_v9, %v1423_v10  ;;  %v1392_v28 = vadd.f32 %v2244_v45, %v1321_v18  ;;  %v1460_v14 = vld [vmem:[%s2239_s27 + $0xa8] sm:$0xff] }
 0x123   : > { %v2391_v56 = vpop.f32.mrb[21].mxu0  ;;  %v2393_v57 = vpop.f32.mrb[21].mxu1  ;;  %v1424_v29 = vadd.f32 %v2244_v45, %v1353_v19  ;;  %v1585_v25 = vmax.f32 %v1521_v20, 0.0  ;;  %v1617_v31 = vmax.f32 %v1553_v21, 0.0  ;;  %v1522_v32 = vadd.f32 %v1458_v15, %v1394_v22  ;;  %v1492_v10 = vld [vmem:[%s2239_s27 + $0x1a8] sm:$0xff] }
 0x124   : > { %v2397_v60 = vpop.f32.mrb[22].mxu0  ;;  %v2399_v61 = vpop.f32.mrb[22].mxu1  ;;  %v1554_v33 = vadd.f32 %v1490_v11, %v1426_v23  ;;  %v1583_v36 = vmax.f32 %v1519_v27, 0.0  ;;  %v1615_v37 = vmax.f32 %v1551_v17, 0.0  ;;  %v1520_v38 = vadd.f32 %v1456_v16, %v1392_v28 }
 0x125   : > { %v2407_v0 = vpop.f32.mrb[23].mxu0  ;;  %v2409_v1 = vpop.f32.mrb[23].mxu1  ;;  %v1552_v39 = vadd.f32 %v1488_v26, %v1424_v29  ;;  %1649 = vst [vmem:[%s2273_s7 + $0x90] sm:$0xff] %v1585_v25  ;;  %1681 = vst [vmem:[%s2273_s7 + $0x190] sm:$0xff] %v1617_v31  ;;  %v1586_v43 = vmax.f32 %v1522_v32, 0.0  ;;  %v1326_v50 = vmul.f32 %v2385_v52, %v2232_v41  ;;  %v1358_v51 = vmul.f32 %v2387_v53, %v2232_v41  ;;  %v1459_v52 = vld [vmem:[%s2239_s27 + $0xa0] sm:$0xff] }
 0x126   : > { %v1618_v44 = vmax.f32 %v1554_v33, 0.0  ;;  %1647 = vst [vmem:[%s2273_s7 + $0x80] sm:$0xff] %v1583_v36  ;;  %1679 = vst [vmem:[%s2273_s7 + $0x180] sm:$0xff] %v1615_v37  ;;  %v1584_v48 = vmax.f32 %v1520_v38, 0.0  ;;  %v1324_v58 = vmul.f32 %v2232_v41, %v2391_v56  ;;  %v1356_v59 = vmul.f32 %v2232_v41, %v2393_v57  ;;  %v1494_v57 = vld [vmem:[%s2239_s27 + $0x1b8] sm:$0xff] }
 0x127   : > { %v1616_v49 = vmax.f32 %v1552_v39, 0.0  ;;  %1650 = vst [vmem:[%s2273_s7 + $0x98] sm:$0xff] %v1586_v43  ;;  %v1397_v62 = vadd.f32 %v2244_v45, %v1326_v50  ;;  %v1429_v63 = vadd.f32 %v2244_v45, %v1358_v51  ;;  %v1327_v53 = vmul.f32 %v2397_v60, %v2232_v41  ;;  %v1465_v43 = vld [vmem:[%s2239_s27 + $0xd0] sm:$0xff]  ;;  %v1463_v51 = vld [vmem:[%s2239_s27 + $0xc0] sm:$0xff] }
 0x128   : > { %1682 = vst [vmem:[%s2273_s7 + $0x198] sm:$0xff] %v1618_v44  ;;  %1648 = vst [vmem:[%s2273_s7 + $0x88] sm:$0xff] %v1584_v48  ;;  %v1359_v3 = vmul.f32 %v2399_v61, %v2232_v41  ;;  %v1395_v4 = vadd.f32 %v2244_v45, %v1324_v58  ;;  %v1427_v56 = vadd.f32 %v2244_v45, %v1356_v59  ;;  %v1497_v44 = vld [vmem:[%s2239_s27 + $0x1d0] sm:$0xff]  ;;  %v1466_v59 = vld [vmem:[%s2239_s27 + $0xd8] sm:$0xff] }
 0x129   : > { %1680 = vst [vmem:[%s2273_s7 + $0x188] sm:$0xff] %v1616_v49  ;;  %v1325_v6 = vmul.f32 %v2232_v41, %v2407_v0  ;;  %v1357_v7 = vmul.f32 %v2232_v41, %v2409_v1  ;;  %v1525_v60 = vadd.f32 %v1461_v54, %v1397_v62  ;;  %v1557_v12 = vadd.f32 %v1493_v55, %v1429_v63  ;;  %v1495_v54 = vld [vmem:[%s2239_s27 + $0x1c0] sm:$0xff] }
 0x12a   : > { %v2439_v30 = vpop.f32.mrb[24].mxu0  ;;  %v2441_v24 = vpop.f32.mrb[24].mxu1  ;;  %v1398_v61 = vadd.f32 %v2244_v45, %v1327_v53  ;;  %v1430_v13 = vadd.f32 %v2244_v45, %v1359_v3  ;;  %v1523_v0 = vadd.f32 %v1459_v52, %v1395_v4  ;;  %v1555_v18 = vadd.f32 %v1491_v2, %v1427_v56  ;;  %v1496_v3 = vld [vmem:[%s2239_s27 + $0x1c8] sm:$0xff] }
 0x12b   : > { %v2443_v34 = vpop.f32.mrb[25].mxu0  ;;  %v2445_v35 = vpop.f32.mrb[25].mxu1  ;;  %v1396_v1 = vadd.f32 %v2244_v45, %v1325_v6  ;;  %v1428_v19 = vadd.f32 %v2244_v45, %v1357_v7  ;;  %v1589_v22 = vmax.f32 %v1525_v60, 0.0  ;;  %v1621_v23 = vmax.f32 %v1557_v12, 0.0 }
 0x12c   : > { %v2447_v40 = vpop.f32.mrb[26].mxu0  ;;  %v2449_v42 = vpop.f32.mrb[26].mxu1  ;;  %v1526_v16 = vadd.f32 %v1462_v5, %v1398_v61  ;;  %v1558_v26 = vadd.f32 %v1494_v57, %v1430_v13  ;;  %v1587_v28 = vmax.f32 %v1523_v0, 0.0  ;;  %v1619_v29 = vmax.f32 %v1555_v18, 0.0 }
 0x12d   : > { %v2453_v46 = vpop.f32.mrb[27].mxu0  ;;  %v2455_v47 = vpop.f32.mrb[27].mxu1  ;;  %v1524_v25 = vadd.f32 %v1460_v14, %v1396_v1  ;;  %v1556_v31 = vadd.f32 %v1492_v10, %v1428_v19  ;;  %1653 = vst [vmem:[%s2273_s7 + $0xb0] sm:$0xff] %v1589_v22  ;;  %1685 = vst [vmem:[%s2273_s7 + $0x1b0] sm:$0xff] %v1621_v23  ;;  %v1330_v38 = vmul.f32 %v2439_v30, %v2232_v41  ;;  %v1469_v22 = vld [vmem:[%s2239_s27 + $0xf0] sm:$0xff] }
 0x12e   : > { %v1590_v32 = vmax.f32 %v1526_v16, 0.0  ;;  %v1622_v33 = vmax.f32 %v1558_v26, 0.0  ;;  %1651 = vst [vmem:[%s2273_s7 + $0xa0] sm:$0xff] %v1587_v28  ;;  %1683 = vst [vmem:[%s2273_s7 + $0x1a0] sm:$0xff] %v1619_v29  ;;  %v1362_v39 = vmul.f32 %v2441_v24, %v2232_v41  ;;  %v1328_v48 = vmul.f32 %v2232_v41, %v2443_v34  ;;  %v1501_v23 = vld [vmem:[%s2239_s27 + $0x1f0] sm:$0xff]  ;;  %v1467_v29 = vld [vmem:[%s2239_s27 + $0xe0] sm:$0xff] }
 0x12f   : > { %v1588_v36 = vmax.f32 %v1524_v25, 0.0  ;;  %v1620_v37 = vmax.f32 %v1556_v31, 0.0  ;;  %v1360_v49 = vmul.f32 %v2232_v41, %v2445_v35  ;;  %v1401_v50 = vadd.f32 %v2244_v45, %v1330_v38  ;;  %v1498_v35 = vld [vmem:[%s2239_s27 + $0x1d8] sm:$0xff]  ;;  %v1499_v25 = vld [vmem:[%s2239_s27 + $0x1e0] sm:$0xff] }
 0x130   : > { %1654 = vst [vmem:[%s2273_s7 + $0xb8] sm:$0xff] %v1590_v32  ;;  %1686 = vst [vmem:[%s2273_s7 + $0x1b8] sm:$0xff] %v1622_v33  ;;  %v1433_v30 = vadd.f32 %v2244_v45, %v1362_v39  ;;  %v1331_v24 = vmul.f32 %v2447_v40, %v2232_v41  ;;  %v1363_v55 = vmul.f32 %v2449_v42, %v2232_v41  ;;  %v1464_v42 = vld [vmem:[%s2239_s27 + $0xc8] sm:$0xff]  ;;  %v1470_v33 = vld [vmem:[%s2239_s27 + $0xf8] sm:$0xff] }
 0x131   : > { %1652 = vst [vmem:[%s2273_s7 + $0xa8] sm:$0xff] %v1588_v36  ;;  %1684 = vst [vmem:[%s2273_s7 + $0x1a8] sm:$0xff] %v1620_v37  ;;  %v1399_v58 = vadd.f32 %v2244_v45, %v1328_v48  ;;  %v1431_v34 = vadd.f32 %v2244_v45, %v1360_v49  ;;  %v1329_v62 = vmul.f32 %v2232_v41, %v2453_v46 }
 0x132   : > { %v2489_v8 = vpop.f32.mrb[28].mxu0  ;;  %v2491_v9 = vpop.f32.mrb[28].mxu1  ;;  %v1361_v63 = vmul.f32 %v2232_v41, %v2455_v47  ;;  %v1529_v52 = vadd.f32 %v1465_v43, %v1401_v50  ;;  %v1561_v2 = vadd.f32 %v1497_v44, %v1433_v30  ;;  %v1402_v53 = vadd.f32 %v2244_v45, %v1331_v24  ;;  %v1500_v44 = vld [vmem:[%s2239_s27 + $0x1e8] sm:$0xff] }
 0x133   : > { %v2497_v15 = vpop.f32.mrb[29].mxu0  ;;  %v2499_v11 = vpop.f32.mrb[29].mxu1  ;;  %v1434_v40 = vadd.f32 %v2244_v45, %v1363_v55  ;;  %v1527_v4 = vadd.f32 %v1463_v51, %v1399_v58  ;;  %v1559_v56 = vadd.f32 %v1495_v54, %v1431_v34  ;;  %v1400_v5 = vadd.f32 %v2244_v45, %v1329_v62 }
 0x134   : > { %v2503_v20 = vpop.f32.mrb[30].mxu0  ;;  %v2505_v21 = vpop.f32.mrb[30].mxu1  ;;  %v1432_v46 = vadd.f32 %v2244_v45, %v1361_v63  ;;  %v1593_v57 = vmax.f32 %v1529_v52, 0.0  ;;  %v1625_v47 = vmax.f32 %v1561_v2, 0.0  ;;  %v1530_v6 = vadd.f32 %v1466_v59, %v1402_v53 }
 0x135   : > { %v2507_v27 = vpop.f32.mrb[31].mxu0  ;;  %v2509_v17 = vpop.f32.mrb[31].mxu1  ;;  %v1562_v7 = vadd.f32 %v1498_v35, %v1434_v40  ;;  %v1591_v60 = vmax.f32 %v1527_v4, 0.0  ;;  %v1623_v12 = vmax.f32 %v1559_v56, 0.0  ;;  %v1528_v61 = vadd.f32 %v1464_v42, %v1400_v5 }
 0x136   : > { %v1560_v13 = vadd.f32 %v1496_v3, %v1432_v46  ;;  %1657 = vst [vmem:[%s2273_s7 + $0xd0] sm:$0xff] %v1593_v57  ;;  %1689 = vst [vmem:[%s2273_s7 + $0x1d0] sm:$0xff] %v1625_v47  ;;  %v1594_v14 = vmax.f32 %v1530_v6, 0.0  ;;  %v1334_v1 = vmul.f32 %v2489_v8, %v2232_v41  ;;  %v1366_v19 = vmul.f32 %v2491_v9, %v2232_v41 }
 0x137   : > { %v1626_v10 = vmax.f32 %v1562_v7, 0.0  ;;  %1655 = vst [vmem:[%s2273_s7 + $0xc0] sm:$0xff] %v1591_v60  ;;  %1687 = vst [vmem:[%s2273_s7 + $0x1c0] sm:$0xff] %v1623_v12  ;;  %v1592_v0 = vmax.f32 %v1528_v61, 0.0  ;;  %v1332_v16 = vmul.f32 %v2232_v41, %v2497_v15  ;;  %v1364_v26 = vmul.f32 %v2232_v41, %v2499_v11  ;;  %v1502_v11 = vld [vmem:[%s2239_s27 + $0x1f8] sm:$0xff] }
 0x138   : > { %v1624_v18 = vmax.f32 %v1560_v13, 0.0  ;;  %1658 = vst [vmem:[%s2273_s7 + $0xd8] sm:$0xff] %v1594_v14  ;;  %v1405_v28 = vadd.f32 %v2244_v45, %v1334_v1  ;;  %v1437_v8 = vadd.f32 %v2244_v45, %v1366_v19  ;;  %v1335_v9 = vmul.f32 %v2503_v20, %v2232_v41 }
 0x139   : > { %1690 = vst [vmem:[%s2273_s7 + $0x1d8] sm:$0xff] %v1626_v10  ;;  %1656 = vst [vmem:[%s2273_s7 + $0xc8] sm:$0xff] %v1592_v0  ;;  %v1367_v31 = vmul.f32 %v2505_v21, %v2232_v41  ;;  %v1403_v32 = vadd.f32 %v2244_v45, %v1332_v16  ;;  %v1435_v15 = vadd.f32 %v2244_v45, %v1364_v26  ;;  %v1468_v21 = vld [vmem:[%s2239_s27 + $0xe8] sm:$0xff] }
 0x13a   : > { %1688 = vst [vmem:[%s2273_s7 + $0x1c8] sm:$0xff] %v1624_v18  ;;  %v1333_v36 = vmul.f32 %v2232_v41, %v2507_v27  ;;  %v1365_v37 = vmul.f32 %v2232_v41, %v2509_v17  ;;  %v1533_v38 = vadd.f32 %v1469_v22, %v1405_v28  ;;  %v1565_v39 = vadd.f32 %v1501_v23, %v1437_v8 }
 0x13b   : > { %v1406_v43 = vadd.f32 %v2244_v45, %v1335_v9  ;;  %v1438_v20 = vadd.f32 %v2244_v45, %v1367_v31  ;;  %v1531_v48 = vadd.f32 %v1467_v29, %v1403_v32  ;;  %v1563_v49 = vadd.f32 %v1499_v25, %v1435_v15 }
 0x13c   : > { %v1404_v50 = vadd.f32 %v2244_v45, %v1333_v36  ;;  %v1436_v27 = vadd.f32 %v2244_v45, %v1365_v37  ;;  %v1597_v30 = vmax.f32 %v1533_v38, 0.0  ;;  %v1629_v41 = vmax.f32 %v1565_v39, 0.0 }
 0x13d   : > { %v1534_v17 = vadd.f32 %v1470_v33, %v1406_v43  ;;  %v1566_v51 = vadd.f32 %v1502_v11, %v1438_v20  ;;  %v1595_v54 = vmax.f32 %v1531_v48, 0.0  ;;  %v1627_v24 = vmax.f32 %v1563_v49, 0.0 }
 0x13e   : > { %v1532_v55 = vadd.f32 %v1468_v21, %v1404_v50  ;;  %v1564_v58 = vadd.f32 %v1500_v44, %v1436_v27  ;;  %1661 = vst [vmem:[%s2273_s7 + $0xf0] sm:$0xff] %v1597_v30  ;;  %1693 = vst [vmem:[%s2273_s7 + $0x1f0] sm:$0xff] %v1629_v41 }
 0x13f   : > { %v1598_v34 = vmax.f32 %v1534_v17, 0.0  ;;  %v1630_v59 = vmax.f32 %v1566_v51, 0.0  ;;  %1659 = vst [vmem:[%s2273_s7 + $0xe0] sm:$0xff] %v1595_v54  ;;  %1691 = vst [vmem:[%s2273_s7 + $0x1e0] sm:$0xff] %v1627_v24 }
 0x140   : > { %v1596_v35 = vmax.f32 %v1532_v55, 0.0  ;;  %v1628_v45 = vmax.f32 %v1564_v58, 0.0 }
 0x141   : > { %1662 = vst [vmem:[%s2273_s7 + $0xf8] sm:$0xff] %v1598_v34  ;;  %1694 = vst [vmem:[%s2273_s7 + $0x1f8] sm:$0xff] %v1630_v59 }
 0x142   : > { %1660 = vst [vmem:[%s2273_s7 + $0xe8] sm:$0xff] %v1596_v35  ;;  %1692 = vst [vmem:[%s2273_s7 + $0x1e8] sm:$0xff] %v1628_v45 }
 0x143 PF: > { %s15_s20 = sadd.s32 1, %s2114_s20   ;;  %s2614_s18 = smov %s2110_s19 }
 0x144   : > { %p12_p5 = scmp.ge.s32.totalorder %s15_s20, 4   ;;  %s2615_s19 = smov %s2617_s21 }
 0x146   :  { %14 = sbr.rel (!%p12_p5) target bundleno = 2 (0x2), region = 90 }

// kernel: basnet_forward.177
= control target key start
LH: loop header
LB: loop body
LE: loop exit
PB: predicated region body
PF: predicated region fallthrough
CT: control target
= control target key end

     0   :  { %s2578_s15 = smov 0   ;;  %s2580_s16 = smov 0   ;;  %s3031_s0 = inlined_call_operand.vmem [shape: bf16[4096,128], index: 0, kind: input, shape index: {}]   ;;  %s3032_s1 = inlined_call_operand.vmem [shape: bf16[128,128], index: 1, kind: input, shape index: {}]   ;;  %s3033_s2 = inlined_call_operand.vmem [shape: f32[1,128], index: 2, kind: input, shape index: {}]   ;;  %s3034_s3 = inlined_call_operand.vmem [shape: f32[1,128], index: 3, kind: input, shape index: {}]   ;;  %s3035_s4 = inlined_call_operand.vmem [shape: f32[4096,128], index: 4, kind: output, shape index: {}]  }
   0x1   :  { %s2582_s17 = smov 0  }
   0x2 LB: > { %s33_s18 = sadd.s32 1, %s2547_s16  ;;  %p1957_p0 = scmp.ge.s32.totalorder %s2551_s17, 1  ;;  %s2551_s17 = sphi %s2582_s17, %s14_s17   ;;  %s2547_s16 = sphi %s2580_s16, %s3037_s16   ;;  %s2543_s15 = sphi %s2578_s15, %s3036_s15  }
   0x3   : > { %p35_p1 = scmp.ge.s32.totalorder %s33_s18, 8  ;;  %p221_p2 = scmp.lt.s32.totalorder %s2551_s17, 9 }
   0x5   : > { %s3039_s18 = smov (%p35_p1, %s33_s18), 0  ;;  %p222_p3 = pnand %p1957_p0, %p221_p2 }
   0x6   : > { %v2231_v0 = vld [vmem:[%s3032_s1] sm:$0xff] (!%p222_p3)   ;;  %s1958_s21 = sshll.u32 (!%p222_p3), %s2543_s15, 6  ;;  %v2232_v1 = vld [vmem:[%s3032_s1 + $0x8] sm:$0xff] (!%p222_p3)   ;;  %v2233_v2 = vld [vmem:[%s3032_s1 + $0x10] sm:$0xff] (!%p222_p3)  }
   0x7   : > { %225 = sbr.rel (%p222_p3) target bundleno = 402 (0x192), region = 36  ;;  %p268_p4 = scmp.lt.s32.totalorder (!%p222_p3), %s1958_s21, 511  ;;  %2110 = vmatprep.subr.bf16.mxu0 (!%p222_p3), %v2231_v0  ;;  %2190 = vmatprep.subr.bf16.mxu1 (!%p222_p3), %v2231_v0  ;;  %v2234_v3 = vld [vmem:[%s3032_s1 + $0x18] sm:$0xff] (!%p222_p3)   ;;  %v2235_v6 = vld [vmem:[%s3032_s1 + $0x20] sm:$0xff] (!%p222_p3)   ;;  %v2236_v7 = vld [vmem:[%s3032_s1 + $0x28] sm:$0xff] (!%p222_p3)  }
   0x8   : > { %2111 = vmatpush3.bf16.msra.mxu0 (!%p222_p3), %v2231_v0  ;;  %2198 = vmatpush3.bf16.msra.mxu1 (!%p222_p3), %v2231_v0  ;;  %v2237_v8 = vld [vmem:[%s3032_s1 + $0x30] sm:$0xff] (!%p222_p3)   ;;  %v2238_v9 = vld [vmem:[%s3032_s1 + $0x38] sm:$0xff] (!%p222_p3)   ;;  %v2663_v41 = vld [vmem:[%s3033_s2] ss:$0 sm:$0xff] (!%p222_p3) }
   0x9   : > { %2112 = vmatprep.subr.bf16.mxu0 (!%p222_p3), %v2232_v1  ;;  %2191 = vmatprep.subr.bf16.mxu1 (!%p222_p3), %v2232_v1  ;;  %v2668_v45 = vld [vmem:[%s3034_s3] ss:$0 sm:$0xff] (!%p222_p3) }
   0xc   : > { %2113 = vmatpush3.bf16.msra.mxu0 (!%p222_p3), %v2232_v1  ;;  %2199 = vmatpush3.bf16.msra.mxu1 (!%p222_p3), %v2232_v1 }
   0xd   : > { %2114 = vmatprep.subr.bf16.mxu0 (!%p222_p3), %v2233_v2  ;;  %2192 = vmatprep.subr.bf16.mxu1 (!%p222_p3), %v2233_v2 }
   0xe   : > { %s3041_s21 = smov (!%p268_p4, %s1958_s21), 511 }
   0xf   : > { %s1959_s26 = sshll.u32 %s3041_s21, 2  ;;  %s1961_s22 = sshll.u32 %s3041_s21, 3 }
  0x10   : > { %s2611_s29 = scalar_lea.vmem %s3031_s0, %s1959_s26  ;;  %2115 = vmatpush3.bf16.msra.mxu0 %v2233_v2  ;;  %2200 = vmatpush3.bf16.msra.mxu1 %v2233_v2  ;;  %s2740_s24 = scalar_lea.vmem %s3035_s4, %s1961_s22 }
  0x11   : > { %v2239_v4 = vld [vmem:[%s2611_s29] sm:$0xff]   ;;  %2116 = vmatprep.subr.bf16.mxu0 %v2234_v3  ;;  %2193 = vmatprep.subr.bf16.mxu1 %v2234_v3  ;;  %v2241_v10 = vld [vmem:[%s2611_s29 + $0x8] sm:$0xff]   ;;  %v2243_v12 = vld [vmem:[%s2611_s29 + $0x10] sm:$0xff]  }
  0x12   : > { %v2240_v5 = vld [vmem:[%s2611_s29 + $0x80] sm:$0xff]   ;;  %2126 = vmatprep.mubr.bf16.mxu0 %v2239_v4  ;;  %v2242_v11 = vld [vmem:[%s2611_s29 + $0x88] sm:$0xff]   ;;  %v2244_v13 = vld [vmem:[%s2611_s29 + $0x90] sm:$0xff]  }
  0x13   : > { %2158 = vmatprep.mubr.bf16.mxu1 %v2240_v5  ;;  %v2245_v14 = vld [vmem:[%s2611_s29 + $0x18] sm:$0xff]   ;;  %v2247_v16 = vld [vmem:[%s2611_s29 + $0x20] sm:$0xff]   ;;  %v2249_v18 = vld [vmem:[%s2611_s29 + $0x28] sm:$0xff]  }
  0x14   : > { %2117 = vmatpush3.bf16.msra.mxu0 %v2234_v3  ;;  %2201 = vmatpush3.bf16.msra.mxu1 %v2234_v3  ;;  %v2246_v15 = vld [vmem:[%s2611_s29 + $0x98] sm:$0xff]   ;;  %v2248_v17 = vld [vmem:[%s2611_s29 + $0xa0] sm:$0xff]   ;;  %v2250_v19 = vld [vmem:[%s2611_s29 + $0xa8] sm:$0xff]  }
  0x15   : > { %2118 = vmatprep.subr.bf16.mxu0 %v2235_v6  ;;  %2194 = vmatprep.subr.bf16.mxu1 %v2235_v6  ;;  %v2251_v20 = vld [vmem:[%s2611_s29 + $0x30] sm:$0xff]   ;;  %v2253_v22 = vld [vmem:[%s2611_s29 + $0x38] sm:$0xff]   ;;  %v2255_v24 = vld [vmem:[%s2611_s29 + $0x40] sm:$0xff]  }
  0x16   : > { %v2252_v21 = vld [vmem:[%s2611_s29 + $0xb0] sm:$0xff]   ;;  %v2254_v23 = vld [vmem:[%s2611_s29 + $0xb8] sm:$0xff]   ;;  %v2256_v25 = vld [vmem:[%s2611_s29 + $0xc0] sm:$0xff]  }
  0x17   : > { %v2257_v26 = vld [vmem:[%s2611_s29 + $0x48] sm:$0xff]   ;;  %v2259_v28 = vld [vmem:[%s2611_s29 + $0x50] sm:$0xff]   ;;  %v2261_v30 = vld [vmem:[%s2611_s29 + $0x58] sm:$0xff]  }
  0x18   : > { %2119 = vmatpush3.bf16.msra.mxu0 %v2235_v6  ;;  %2202 = vmatpush3.bf16.msra.mxu1 %v2235_v6  ;;  %v2258_v27 = vld [vmem:[%s2611_s29 + $0xc8] sm:$0xff]   ;;  %v2260_v29 = vld [vmem:[%s2611_s29 + $0xd0] sm:$0xff]   ;;  %v2262_v31 = vld [vmem:[%s2611_s29 + $0xd8] sm:$0xff]  }
  0x19   : > { %2120 = vmatprep.subr.bf16.mxu0 %v2236_v7  ;;  %2195 = vmatprep.subr.bf16.mxu1 %v2236_v7  ;;  %v2263_v32 = vld [vmem:[%s2611_s29 + $0x60] sm:$0xff]   ;;  %v2265_v34 = vld [vmem:[%s2611_s29 + $0x68] sm:$0xff]   ;;  %v2267_v36 = vld [vmem:[%s2611_s29 + $0x70] sm:$0xff]  }
  0x1a   : > { %v2264_v33 = vld [vmem:[%s2611_s29 + $0xe0] sm:$0xff]   ;;  %v2266_v35 = vld [vmem:[%s2611_s29 + $0xe8] sm:$0xff]   ;;  %v2268_v37 = vld [vmem:[%s2611_s29 + $0xf0] sm:$0xff]  }
  0x1b   : > { %v2269_v38 = vld [vmem:[%s2611_s29 + $0x78] sm:$0xff]  }
  0x1c   : > { %2121 = vmatpush3.bf16.msra.mxu0 %v2236_v7  ;;  %2203 = vmatpush3.bf16.msra.mxu1 %v2236_v7  ;;  %v2270_v39 = vld [vmem:[%s2611_s29 + $0xf8] sm:$0xff]  }
  0x1d   : > { %2122 = vmatprep.subr.bf16.mxu0 %v2237_v8  ;;  %2196 = vmatprep.subr.bf16.mxu1 %v2237_v8 }
  0x20   : > { %2123 = vmatpush3.bf16.msra.mxu0 %v2237_v8  ;;  %2204 = vmatpush3.bf16.msra.mxu1 %v2237_v8 }
  0x21   : > { %2124 = vmatprep.subr.bf16.mxu0 %v2238_v9  ;;  %2197 = vmatprep.subr.bf16.mxu1 %v2238_v9 }
  0x24   : > { %2125 = vmatpush3.bf16.msra.mxu0 %v2238_v9  ;;  %2205 = vmatpush3.bf16.msra.mxu1 %v2238_v9 }
  0x27   : > { %2127 = vmatmul.mubr.bf16.vlgmr.msra.gmra.mrb[0].mxu0 %v2241_v10  ;;  %2159 = vmatmul.mubr.bf16.vlgmr.msra.gmra.mrb[0].mxu1 %v2242_v11 }
  0x28   : > { %2130 = vmatprep.mubr.bf16.mxu0 %v2243_v12  ;;  %2162 = vmatprep.mubr.bf16.mxu1 %v2244_v13 }
  0x2f   : > { %2131 = vmatmul.mubr.bf16.gmra.mrb[4].mxu0 %v2245_v14  ;;  %2163 = vmatmul.mubr.bf16.gmra.mrb[4].mxu1 %v2246_v15 }
  0x30   : > { %2134 = vmatprep.mubr.bf16.mxu0 %v2247_v16  ;;  %2166 = vmatprep.mubr.bf16.mxu1 %v2248_v17 }
  0x37   : > { %2135 = vmatmul.mubr.bf16.gmra.mrb[8].mxu0 %v2249_v18  ;;  %2167 = vmatmul.mubr.bf16.gmra.mrb[8].mxu1 %v2250_v19 }
  0x38   : > { %2138 = vmatprep.mubr.bf16.mxu0 %v2251_v20  ;;  %2170 = vmatprep.mubr.bf16.mxu1 %v2252_v21 }
  0x3f   : > { %2139 = vmatmul.mubr.bf16.gmra.mrb[12].mxu0 %v2253_v22  ;;  %2171 = vmatmul.mubr.bf16.gmra.mrb[12].mxu1 %v2254_v23 }
  0x40   : > { %2142 = vmatprep.mubr.bf16.mxu0 %v2255_v24  ;;  %2174 = vmatprep.mubr.bf16.mxu1 %v2256_v25 }
  0x47   : > { %2143 = vmatmul.mubr.bf16.gmra.mrb[16].mxu0 %v2257_v26  ;;  %2175 = vmatmul.mubr.bf16.gmra.mrb[16].mxu1 %v2258_v27 }
  0x48   : > { %2146 = vmatprep.mubr.bf16.mxu0 %v2259_v28  ;;  %2178 = vmatprep.mubr.bf16.mxu1 %v2260_v29 }
  0x4f   : > { %2147 = vmatmul.mubr.bf16.gmra.mrb[20].mxu0 %v2261_v30  ;;  %2179 = vmatmul.mubr.bf16.gmra.mrb[20].mxu1 %v2262_v31 }
  0x50   : > { %2150 = vmatprep.mubr.bf16.mxu0 %v2263_v32  ;;  %2182 = vmatprep.mubr.bf16.mxu1 %v2264_v33 }
  0x57   : > { %2151 = vmatmul.mubr.bf16.gmra.mrb[24].mxu0 %v2265_v34  ;;  %2183 = vmatmul.mubr.bf16.gmra.mrb[24].mxu1 %v2266_v35 }
  0x58   : > { %2154 = vmatprep.mubr.bf16.mxu0 %v2267_v36  ;;  %2186 = vmatprep.mubr.bf16.mxu1 %v2268_v37 }
  0x5f   : > { %2155 = vmatmul.mubr.bf16.gmra.mrb[28].mxu0 %v2269_v38  ;;  %2187 = vmatmul.mubr.bf16.gmra.mrb[28].mxu1 %v2270_v39 }
  0xfa   : > { %v2128_v40 = vpop.f32.mrb[0].mxu0  ;;  %v2160_v42 = vpop.f32.mrb[0].mxu1 }
  0xfb   : > { %v787_v43 = vpop.f32.mrb[1].mxu0  ;;  %v915_v44 = vpop.f32.mrb[1].mxu1  ;;  %v1246_v48 = vmul.f32 %v2128_v40, %v2663_v41  ;;  %v1278_v49 = vmul.f32 %v2160_v42, %v2663_v41 }
  0xfc   : > { %v2129_v46 = vpop.f32.mrb[2].mxu0  ;;  %v2161_v47 = vpop.f32.mrb[2].mxu1  ;;  %v1244_v52 = vmul.f32 %v2663_v41, %v787_v43  ;;  %v1276_v53 = vmul.f32 %v2663_v41, %v915_v44 }
  0xfd   : > { %v790_v50 = vpop.f32.mrb[3].mxu0  ;;  %v918_v51 = vpop.f32.mrb[3].mxu1  ;;  %v1317_v54 = vadd.f32 %v2668_v45, %v1246_v48  ;;  %v1349_v55 = vadd.f32 %v2668_v45, %v1278_v49  ;;  %v1247_v56 = vmul.f32 %v2129_v46, %v2663_v41  ;;  %v1279_v57 = vmul.f32 %v2161_v47, %v2663_v41 }
  0xfe   : > { %v1315_v58 = vadd.f32 %v2668_v45, %v1244_v52  ;;  %v1347_v59 = vadd.f32 %v2668_v45, %v1276_v53  ;;  %v1245_v60 = vmul.f32 %v2663_v41, %v790_v50  ;;  %v1277_v61 = vmul.f32 %v2663_v41, %v918_v51 }
  0xff   : > { %v2006_v62 = vmul.f32 -1.442695, %v1317_v54  ;;  %v2038_v63 = vmul.f32 -1.442695, %v1349_v55  ;;  %v1318_v0 = vadd.f32 %v2668_v45, %v1247_v56  ;;  %v1350_v1 = vadd.f32 %v2668_v45, %v1279_v57 }
 0x100   : > { %v2004_v2 = vmul.f32 -1.442695, %v1315_v58  ;;  %v2036_v3 = vmul.f32 -1.442695, %v1347_v59  ;;  %v1316_v4 = vadd.f32 %v2668_v45, %v1245_v60  ;;  %v1348_v5 = vadd.f32 %v2668_v45, %v1277_v61 }
 0x101   : > { %2271 = vpow2.f32 %v2006_v62  ;;  %v2007_v8 = vmul.f32 -1.442695, %v1318_v0  ;;  %v2039_v9 = vmul.f32 -1.442695, %v1350_v1 }
 0x102   : > { %v2132_v6 = vpop.f32.mrb[4].mxu0  ;;  %v2164_v7 = vpop.f32.mrb[4].mxu1  ;;  %2273 = vpow2.f32 %v2038_v63  ;;  %v2005_v12 = vmul.f32 -1.442695, %v1316_v4  ;;  %v2037_v13 = vmul.f32 -1.442695, %v1348_v5 }
 0x103   : > { %v803_v10 = vpop.f32.mrb[5].mxu0  ;;  %v931_v11 = vpop.f32.mrb[5].mxu1  ;;  %2275 = vpow2.f32 %v2004_v2  ;;  %v1250_v16 = vmul.f32 %v2132_v6, %v2663_v41  ;;  %v1282_v19 = vmul.f32 %v2164_v7, %v2663_v41 }
 0x104   : > { %v2133_v14 = vpop.f32.mrb[6].mxu0  ;;  %v2165_v15 = vpop.f32.mrb[6].mxu1  ;;  %2277 = vpow2.f32 %v2036_v3  ;;  %v1248_v21 = vmul.f32 %v2663_v41, %v803_v10  ;;  %v1280_v22 = vmul.f32 %v2663_v41, %v931_v11 }
 0x105   : > { %v806_v17 = vpop.f32.mrb[7].mxu0  ;;  %v934_v18 = vpop.f32.mrb[7].mxu1  ;;  %2279 = vpow2.f32 %v2007_v8  ;;  %v1321_v20 = vadd.f32 %v2668_v45, %v1250_v16  ;;  %v1353_v23 = vadd.f32 %v2668_v45, %v1282_v19  ;;  %v1251_v24 = vmul.f32 %v2133_v14, %v2663_v41 }
 0x106   : > { %2281 = vpow2.f32 %v2039_v9  ;;  %v1283_v25 = vmul.f32 %v2165_v15, %v2663_v41  ;;  %v1319_v27 = vadd.f32 %v2668_v45, %v1248_v21  ;;  %v1351_v28 = vadd.f32 %v2668_v45, %v1280_v22 }
 0x107   : > { %2283 = vpow2.f32 %v2005_v12  ;;  %v2010_v26 = vmul.f32 -1.442695, %v1321_v20  ;;  %v2042_v29 = vmul.f32 -1.442695, %v1353_v23  ;;  %v1322_v30 = vadd.f32 %v2668_v45, %v1251_v24 }
 0x108   : > { %2285 = vpow2.f32 %v2037_v13  ;;  %v2008_v33 = vmul.f32 -1.442695, %v1319_v27  ;;  %v2040_v34 = vmul.f32 -1.442695, %v1351_v28  ;;  %v1354_v42 = vadd.f32 %v2668_v45, %v1283_v25 }
 0x109   : > { %2287 = vpow2.f32 %v2010_v26  ;;  %v2011_v37 = vmul.f32 -1.442695, %v1322_v30  ;;  %v1249_v43 = vmul.f32 %v2663_v41, %v806_v17  ;;  %v1281_v49 = vmul.f32 %v2663_v41, %v934_v18 }
 0x10a   : > { %v2136_v31 = vpop.f32.mrb[8].mxu0  ;;  %v2168_v32 = vpop.f32.mrb[8].mxu1  ;;  %2289 = vpow2.f32 %v2042_v29  ;;  %v2711_v61 = vmul.f32 -1.442695, %v1354_v42 }
 0x10b   : > { %v819_v35 = vpop.f32.mrb[9].mxu0  ;;  %v947_v36 = vpop.f32.mrb[9].mxu1  ;;  %2291 = vpow2.f32 %v2008_v33  ;;  %v1320_v52 = vadd.f32 %v2668_v45, %v1249_v43  ;;  %v1254_v53 = vmul.f32 %v2136_v31, %v2663_v41  ;;  %v1352_v58 = vadd.f32 %v2668_v45, %v1281_v49 }
 0x10c   : > { %v2697_v38 = vpop.f32.mrb[10].mxu0  ;;  %v2699_v39 = vpop.f32.mrb[10].mxu1  ;;  %2293 = vpow2.f32 %v2040_v34  ;;  %v1286_v62 = vmul.f32 %v2168_v32, %v2663_v41  ;;  %v1252_v9 = vmul.f32 %v2663_v41, %v819_v35  ;;  %v1284_v23 = vmul.f32 %v2663_v41, %v947_v36 }
 0x10d   : > { %v2272_v40 = vpop.eup %2271  ;;  %v2703_v44 = vpop.f32.mrb[11].mxu0  ;;  %2295 = vpow2.f32 %v2011_v37  ;;  %v2718_v3 = vmul.f32 -1.442695, %v1320_v52  ;;  %v1325_v4 = vadd.f32 %v2668_v45, %v1254_v53  ;;  %v2041_v14 = vmul.f32 -1.442695, %v1352_v58 }
 0x10e   : > { %v2705_v46 = vpop.f32.mrb[11].mxu1  ;;  %v2274_v47 = vpop.eup %2273  ;;  %v1573_v48 = vadd.f32 1.0, %v2272_v40  ;;  %v1357_v19 = vadd.f32 %v2668_v45, %v1286_v62  ;;  %v1323_v26 = vadd.f32 %v2668_v45, %v1252_v9  ;;  %v1255_v27 = vmul.f32 %v2697_v38, %v2663_v41 }
 0x10f   : > { %v2276_v50 = vpop.eup %2275  ;;  %v1605_v51 = vadd.f32 1.0, %v2274_v47  ;;  %v2014_v22 = vmul.f32 -1.442695, %v1325_v4  ;;  %v1287_v30 = vmul.f32 %v2699_v39, %v2663_v41  ;;  %v1355_v37 = vadd.f32 %v2668_v45, %v1284_v23 }
 0x110   : > { %v2278_v54 = vpop.eup %2277  ;;  %2297 = vrcp.f32 %v1573_v48  ;;  %v1571_v55 = vadd.f32 1.0, %v2276_v50  ;;  %v2046_v33 = vmul.f32 -1.442695, %v1357_v19  ;;  %v1253_v38 = vmul.f32 %v2663_v41, %v2703_v44 }
 0x111   : > { %v2280_v56 = vpop.eup %2279  ;;  %2299 = vrcp.f32 %v1605_v51  ;;  %v1603_v57 = vadd.f32 1.0, %v2278_v54  ;;  %v1326_v43 = vadd.f32 %v2668_v45, %v1255_v27  ;;  %v2012_v44 = vmul.f32 -1.442695, %v1323_v26 }
 0x112   : > { %v2282_v59 = vpop.eup %2281  ;;  %2301 = vrcp.f32 %v1571_v55  ;;  %v1574_v60 = vadd.f32 1.0, %v2280_v56  ;;  %v2714_v63 = vpop.f32.mrb[12].mxu0  ;;  %v1358_v50 = vadd.f32 %v2668_v45, %v1287_v30  ;;  %v1285_v51 = vmul.f32 %v2663_v41, %v2705_v46 }
 0x113   : > { %v2716_v0 = vpop.f32.mrb[12].mxu1  ;;  %v2284_v1 = vpop.eup %2283  ;;  %2303 = vrcp.f32 %v1603_v57  ;;  %v1606_v2 = vadd.f32 1.0, %v2282_v59  ;;  %v1324_v55 = vadd.f32 %v2668_v45, %v1253_v38  ;;  %v1258_v56 = vmul.f32 %v2714_v63, %v2663_v41 }
 0x114   : > { %v2721_v5 = vpop.f32.mrb[13].mxu0  ;;  %v2723_v6 = vpop.f32.mrb[13].mxu1  ;;  %2305 = vrcp.f32 %v1574_v60  ;;  %v1572_v8 = vadd.f32 1.0, %v2284_v1  ;;  %v1290_v57 = vmul.f32 %v2716_v0, %v2663_v41  ;;  %v2044_v46 = vmul.f32 -1.442695, %v1355_v37 }
 0x115   : > { %v2286_v7 = vpop.eup %2285  ;;  %v2726_v10 = vpop.f32.mrb[14].mxu0  ;;  %2307 = vrcp.f32 %v1606_v2  ;;  %v1356_v59 = vadd.f32 %v2668_v45, %v1285_v51  ;;  %v1329_v62 = vadd.f32 %v2668_v45, %v1258_v56  ;;  %v2047_v63 = vmul.f32 -1.442695, %v1358_v50 }
 0x116   : > { %v2728_v11 = vpop.f32.mrb[14].mxu1  ;;  %v2288_v12 = vpop.eup %2287  ;;  %v1604_v13 = vadd.f32 1.0, %v2286_v7  ;;  %2309 = vrcp.f32 %v1572_v8  ;;  %v1361_v0 = vadd.f32 %v2668_v45, %v1290_v57  ;;  %v1288_v19 = vmul.f32 %v2663_v41, %v2723_v6 }
 0x117   : > { %v2731_v15 = vpop.f32.mrb[15].mxu0  ;;  %v2733_v16 = vpop.f32.mrb[15].mxu1  ;;  %v1577_v18 = vadd.f32 1.0, %v2288_v12  ;;  %v2045_v9 = vmul.f32 -1.442695, %v1356_v59  ;;  %v1256_v12 = vmul.f32 %v2663_v41, %v2721_v5 }
 0x118   : > { %v2290_v17 = vpop.eup %2289  ;;  %2311 = vrcp.f32 %v1604_v13  ;;  %v2050_v5 = vmul.f32 -1.442695, %v1361_v0 }
 0x119   : > { %v2292_v20 = vpop.eup %2291  ;;  %v1609_v21 = vadd.f32 1.0, %v2290_v17  ;;  %2313 = vrcp.f32 %v1577_v18  ;;  %v2018_v18 = vmul.f32 -1.442695, %v1329_v62  ;;  %v1327_v6 = vadd.f32 %v2668_v45, %v1256_v12 }
 0x11a   : > { %v2294_v24 = vpop.eup %2293  ;;  %v1575_v25 = vadd.f32 1.0, %v2292_v20  ;;  %v2747_v34 = vpop.f32.mrb[16].mxu0 }
 0x11b   : > { %v2296_v28 = vpop.eup %2295  ;;  %2315 = vrcp.f32 %v1609_v21  ;;  %v1607_v29 = vadd.f32 1.0, %v2294_v24  ;;  %v2749_v35 = vpop.f32.mrb[16].mxu1 }
 0x11c   : > { %v2298_v31 = vpop.eup %2297  ;;  %2317 = vrcp.f32 %v1575_v25  ;;  %v1578_v32 = vadd.f32 1.0, %v2296_v28  ;;  %v2755_v40 = vpop.f32.mrb[17].mxu0 }
 0x11d   : > { %v2300_v36 = vpop.eup %2299  ;;  %1765 = vst [vmem:[%s2740_s24 + $0x10] sm:$0xff] %v2298_v31  ;;  %2319 = vrcp.f32 %v1607_v29  ;;  %v2757_v39 = vpop.f32.mrb[17].mxu1  ;;  %v1359_v29 = vadd.f32 %v2668_v45, %v1288_v19 }
 0x11e   : > { %v2302_v42 = vpop.eup %2301  ;;  %1797 = vst [vmem:[%s2740_s24 + $0x110] sm:$0xff] %v2300_v36  ;;  %2321 = vrcp.f32 %v1578_v32  ;;  %v2761_v47 = vpop.f32.mrb[18].mxu0  ;;  %v1259_v32 = vmul.f32 %v2726_v10, %v2663_v41 }
 0x11f   : > { %v2763_v48 = vpop.f32.mrb[18].mxu1  ;;  %v2304_v49 = vpop.eup %2303  ;;  %1763 = vst [vmem:[%s2740_s24] sm:$0xff] %v2302_v42  ;;  %2323 = vpow2.f32 %v2711_v61  ;;  %v2015_v61 = vmul.f32 -1.442695, %v1326_v43  ;;  %v2819_v43 = vmul.f32 -1.442695, %v1327_v6 }
 0x120   : > { %v2770_v52 = vpop.f32.mrb[19].mxu0  ;;  %v2772_v53 = vpop.f32.mrb[19].mxu1  ;;  %1795 = vst [vmem:[%s2740_s24 + $0x100] sm:$0xff] %v2304_v49  ;;  %2325 = vpow2.f32 %v2718_v3  ;;  %v2013_v3 = vmul.f32 -1.442695, %v1324_v55  ;;  %v1291_v49 = vmul.f32 %v2728_v11, %v2663_v41  ;;  %v1257_v11 = vmul.f32 %v2663_v41, %v2731_v15 }
 0x121   : > { %v2306_v54 = vpop.eup %2305  ;;  %2327 = vpow2.f32 %v2041_v14 }
 0x122   : > { %v2308_v58 = vpop.eup %2307  ;;  %1766 = vst [vmem:[%s2740_s24 + $0x18] sm:$0xff] %v2306_v54  ;;  %2329 = vpow2.f32 %v2014_v22  ;;  %v2788_v4 = vpop.f32.mrb[20].mxu0  ;;  %v2827_v54 = vmul.f32 -1.442695, %v1359_v29 }
 0x123   : > { %v2310_v60 = vpop.eup %2309  ;;  %1798 = vst [vmem:[%s2740_s24 + $0x118] sm:$0xff] %v2308_v58  ;;  %2331 = vpow2.f32 %v2046_v33  ;;  %v2790_v7 = vpop.f32.mrb[20].mxu1 }
 0x124   : > { %v2312_v1 = vpop.eup %2311  ;;  %1764 = vst [vmem:[%s2740_s24 + $0x8] sm:$0xff] %v2310_v60  ;;  %2333 = vpow2.f32 %v2012_v44  ;;  %v2795_v13 = vpop.f32.mrb[21].mxu0 }
 0x125   : > { %v2314_v2 = vpop.eup %2313  ;;  %1796 = vst [vmem:[%s2740_s24 + $0x108] sm:$0xff] %v2312_v1  ;;  %2335 = vpow2.f32 %v2044_v46  ;;  %v2797_v14 = vpop.f32.mrb[21].mxu1  ;;  %v1330_v46 = vadd.f32 %v2668_v45, %v1259_v32  ;;  %v1289_v1 = vmul.f32 %v2663_v41, %v2733_v16 }
 0x126   : > { %v2316_v8 = vpop.eup %2315  ;;  %1769 = vst [vmem:[%s2740_s24 + $0x30] sm:$0xff] %v2314_v2  ;;  %2337 = vpow2.f32 %v2015_v61  ;;  %v2802_v20 = vpop.f32.mrb[22].mxu0 }
 0x127   : > { %v2318_v17 = vpop.eup %2317  ;;  %1801 = vst [vmem:[%s2740_s24 + $0x130] sm:$0xff] %v2316_v8  ;;  %v2804_v21 = vpop.f32.mrb[22].mxu1  ;;  %2339 = vpow2.f32 %v2047_v63  ;;  %v1360_v6 = vadd.f32 %v2668_v45, %v1289_v1 }
 0x128   : > { %v2320_v22 = vpop.eup %2319  ;;  %1767 = vst [vmem:[%s2740_s24 + $0x20] sm:$0xff] %v2318_v17  ;;  %v2807_v23 = vpop.f32.mrb[23].mxu0  ;;  %2341 = vpow2.f32 %v2013_v3  ;;  %v1362_v3 = vadd.f32 %v2668_v45, %v1291_v49 }
 0x129   : > { %v2809_v24 = vpop.f32.mrb[23].mxu1  ;;  %v2322_v25 = vpop.eup %2321  ;;  %1799 = vst [vmem:[%s2740_s24 + $0x120] sm:$0xff] %v2320_v22  ;;  %2343 = vpow2.f32 %v2045_v9  ;;  %v1262_v9 = vmul.f32 %v2747_v34, %v2663_v41  ;;  %v1294_v22 = vmul.f32 %v2749_v35, %v2663_v41  ;;  %v1260_v34 = vmul.f32 %v2663_v41, %v2755_v40 }
 0x12a   : > { %v2324_v26 = vpop.eup %2323  ;;  %1770 = vst [vmem:[%s2740_s24 + $0x38] sm:$0xff] %v2322_v25  ;;  %2345 = vpow2.f32 %v2018_v18  ;;  %v2817_v37 = vpop.f32.mrb[24].mxu0  ;;  %v1328_v18 = vadd.f32 %v2668_v45, %v1257_v11  ;;  %v1292_v35 = vmul.f32 %v2663_v41, %v2757_v39  ;;  %v2019_v40 = vmul.f32 -1.442695, %v1330_v46 }
 0x12b   : > { %v2326_v27 = vpop.eup %2325  ;;  %v1610_v28 = vadd.f32 1.0, %v2324_v26  ;;  %2347 = vpow2.f32 %v2050_v5  ;;  %v2823_v44 = vpop.f32.mrb[24].mxu1  ;;  %v1331_v11 = vadd.f32 %v2668_v45, %v1260_v34  ;;  %v2049_v1 = vmul.f32 -1.442695, %v1360_v6 }
 0x12c   : > { %v2328_v30 = vpop.eup %2327  ;;  %v1576_v31 = vadd.f32 1.0, %v2326_v27  ;;  %v2825_v50 = vpop.f32.mrb[25].mxu0 }
 0x12d   : > { %v2330_v33 = vpop.eup %2329  ;;  %2349 = vrcp.f32 %v1610_v28  ;;  %v1608_v36 = vadd.f32 1.0, %v2328_v30  ;;  %v2829_v55 = vpop.f32.mrb[25].mxu1 }
 0x12e   : > { %v2332_v38 = vpop.eup %2331  ;;  %2351 = vrcp.f32 %v1576_v31  ;;  %v1581_v42 = vadd.f32 1.0, %v2330_v33  ;;  %v2831_v56 = vpop.f32.mrb[26].mxu0 }
 0x12f   : > { %v2334_v51 = vpop.eup %2333  ;;  %2353 = vrcp.f32 %v1608_v36  ;;  %v1613_v10 = vadd.f32 1.0, %v2332_v38  ;;  %v2836_v59 = vpop.f32.mrb[26].mxu1  ;;  %v1333_v36 = vadd.f32 %v2668_v45, %v1262_v9  ;;  %v1263_v38 = vmul.f32 %v2761_v47, %v2663_v41 }
 0x130   : > { %v2336_v57 = vpop.eup %2335  ;;  %2355 = vrcp.f32 %v1581_v42  ;;  %v1579_v58 = vadd.f32 1.0, %v2334_v51  ;;  %v2838_v60 = vpop.f32.mrb[27].mxu0  ;;  %v2051_v51 = vmul.f32 -1.442695, %v1362_v3  ;;  %v2017_v47 = vmul.f32 -1.442695, %v1328_v18 }
 0x131   : > { %v2338_v61 = vpop.eup %2337  ;;  %2357 = vrcp.f32 %v1613_v10  ;;  %v1611_v62 = vadd.f32 1.0, %v2336_v57  ;;  %v2842_v63 = vpop.f32.mrb[27].mxu1  ;;  %v1365_v10 = vadd.f32 %v2668_v45, %v1294_v22  ;;  %v1295_v57 = vmul.f32 %v2763_v48, %v2663_v41 }
 0x132   : > { %v2340_v0 = vpop.eup %2339  ;;  %2359 = vrcp.f32 %v1579_v58  ;;  %v1582_v2 = vadd.f32 1.0, %v2338_v61  ;;  %v2850_v5 = vpop.f32.mrb[28].mxu0  ;;  %v1261_v61 = vmul.f32 %v2663_v41, %v2770_v52  ;;  %v1363_v48 = vadd.f32 %v2668_v45, %v1292_v35 }
 0x133   : > { %v2342_v8 = vpop.eup %2341  ;;  %2361 = vrcp.f32 %v1611_v62  ;;  %v1614_v15 = vadd.f32 1.0, %v2340_v0  ;;  %v2855_v27 = vpop.f32.mrb[28].mxu1  ;;  %v2054_v52 = vmul.f32 -1.442695, %v1365_v10  ;;  %v1298_v35 = vmul.f32 %v2790_v7, %v2663_v41 }
 0x134   : > { %v2344_v12 = vpop.eup %2343  ;;  %2363 = vrcp.f32 %v1582_v2  ;;  %v1580_v17 = vadd.f32 1.0, %v2342_v8  ;;  %v2857_v28 = vpop.f32.mrb[29].mxu0  ;;  %v2022_v2 = vmul.f32 -1.442695, %v1333_v36  ;;  %v1366_v8 = vadd.f32 %v2668_v45, %v1295_v57 }
 0x135   : > { %v2346_v19 = vpop.eup %2345  ;;  %2365 = vrcp.f32 %v1614_v15  ;;  %v1612_v16 = vadd.f32 1.0, %v2344_v12  ;;  %v2861_v31 = vpop.f32.mrb[29].mxu1  ;;  %v1332_v9 = vadd.f32 %v2668_v45, %v1261_v61  ;;  %v1369_v7 = vadd.f32 %v2668_v45, %v1298_v35 }
 0x136   : > { %v2348_v25 = vpop.eup %2347  ;;  %2367 = vrcp.f32 %v1580_v17  ;;  %v1585_v26 = vadd.f32 1.0, %v2346_v19  ;;  %v2863_v32 = vpop.f32.mrb[30].mxu0  ;;  %v2052_v17 = vmul.f32 -1.442695, %v1363_v48  ;;  %v2055_v22 = vmul.f32 -1.442695, %v1366_v8 }
 0x137   : > { %v2350_v29 = vpop.eup %2349  ;;  %2369 = vrcp.f32 %v1612_v16  ;;  %v1617_v30 = vadd.f32 1.0, %v2348_v25  ;;  %v2869_v42 = vpop.f32.mrb[30].mxu1  ;;  %v1293_v25 = vmul.f32 %v2663_v41, %v2772_v53  ;;  %v2021_v6 = vmul.f32 -1.442695, %v1332_v9 }
 0x138   : > { %v2352_v33 = vpop.eup %2351  ;;  %1802 = vst [vmem:[%s2740_s24 + $0x138] sm:$0xff] %v2350_v29  ;;  %2371 = vrcp.f32 %v1585_v26  ;;  %v2871_v49 = vpop.f32.mrb[31].mxu0  ;;  %v1266_v29 = vmul.f32 %v2788_v4, %v2663_v41  ;;  %v1302_v35 = vmul.f32 %v2823_v44, %v2663_v41  ;;  %v1300_v44 = vmul.f32 %v2663_v41, %v2829_v55 }
 0x139   : > { %v2354_v39 = vpop.eup %2353  ;;  %1768 = vst [vmem:[%s2740_s24 + $0x28] sm:$0xff] %v2352_v33  ;;  %2373 = vrcp.f32 %v1617_v30  ;;  %v2877_v58 = vpop.f32.mrb[31].mxu1  ;;  %v1364_v53 = vadd.f32 %v2668_v45, %v1293_v25 }
 0x13a   : > { %v2356_v46 = vpop.eup %2355  ;;  %1800 = vst [vmem:[%s2740_s24 + $0x128] sm:$0xff] %v2354_v39  ;;  %2375 = vpow2.f32 %v2819_v43  ;;  %v1334_v43 = vadd.f32 %v2668_v45, %v1263_v38  ;;  %v1264_v39 = vmul.f32 %v2663_v41, %v2795_v13  ;;  %v1337_v10 = vadd.f32 %v2668_v45, %v1266_v29 }
 0x13b   : > { %v2358_v62 = vpop.eup %2357  ;;  %1773 = vst [vmem:[%s2740_s24 + $0x50] sm:$0xff] %v2356_v46  ;;  %2377 = vpow2.f32 %v2827_v54  ;;  %v2020_v54 = vmul.f32 -1.442695, %v1331_v11 }
 0x13c   : > { %v2360_v0 = vpop.eup %2359  ;;  %1805 = vst [vmem:[%s2740_s24 + $0x150] sm:$0xff] %v2358_v62  ;;  %2379 = vpow2.f32 %v2019_v40  ;;  %v2023_v19 = vmul.f32 -1.442695, %v1334_v43  ;;  %v2053_v62 = vmul.f32 -1.442695, %v1364_v53  ;;  %v1335_v48 = vadd.f32 %v2668_v45, %v1264_v39 }
 0x13d   : > { %v2362_v3 = vpop.eup %2361  ;;  %1771 = vst [vmem:[%s2740_s24 + $0x40] sm:$0xff] %v2360_v0  ;;  %2381 = vpow2.f32 %v2051_v51  ;;  %v2026_v43 = vmul.f32 -1.442695, %v1337_v10 }
 0x13e   : > { %v2364_v15 = vpop.eup %2363  ;;  %1803 = vst [vmem:[%s2740_s24 + $0x140] sm:$0xff] %v2362_v3  ;;  %2383 = vpow2.f32 %v2017_v47  ;;  %v1296_v47 = vmul.f32 %v2663_v41, %v2797_v14 }
 0x13f   : > { %v2366_v12 = vpop.eup %2365  ;;  %1774 = vst [vmem:[%s2740_s24 + $0x58] sm:$0xff] %v2364_v15  ;;  %2385 = vpow2.f32 %v2049_v1 }
 0x140   : > { %v2368_v18 = vpop.eup %2367  ;;  %1806 = vst [vmem:[%s2740_s24 + $0x158] sm:$0xff] %v2366_v12  ;;  %2387 = vpow2.f32 %v2022_v2  ;;  %v1367_v8 = vadd.f32 %v2668_v45, %v1296_v47 }
 0x141   : > { %v2370_v16 = vpop.eup %2369  ;;  %1772 = vst [vmem:[%s2740_s24 + $0x48] sm:$0xff] %v2368_v18  ;;  %2389 = vpow2.f32 %v2054_v52 }
 0x142   : > { %v2372_v26 = vpop.eup %2371  ;;  %1804 = vst [vmem:[%s2740_s24 + $0x148] sm:$0xff] %v2370_v16  ;;  %2391 = vpow2.f32 %v2020_v54  ;;  %v1267_v54 = vmul.f32 %v2802_v20, %v2663_v41  ;;  %v1265_v16 = vmul.f32 %v2663_v41, %v2807_v23  ;;  %v1297_v20 = vmul.f32 %v2663_v41, %v2809_v24 }
 0x143   : > { %v2374_v34 = vpop.eup %2373  ;;  %1777 = vst [vmem:[%s2740_s24 + $0x70] sm:$0xff] %v2372_v26  ;;  %2393 = vpow2.f32 %v2052_v17  ;;  %v1299_v17 = vmul.f32 %v2804_v21, %v2663_v41  ;;  %v1270_v21 = vmul.f32 %v2817_v37, %v2663_v41  ;;  %v2058_v23 = vmul.f32 -1.442695, %v1369_v7 }
 0x144   : > { %v2376_v30 = vpop.eup %2375  ;;  %1809 = vst [vmem:[%s2740_s24 + $0x170] sm:$0xff] %v2374_v34  ;;  %2395 = vpow2.f32 %v2023_v19  ;;  %v1338_v34 = vadd.f32 %v2668_v45, %v1267_v54  ;;  %v1268_v37 = vmul.f32 %v2663_v41, %v2825_v50 }
 0x145   : > { %v2378_v33 = vpop.eup %2377  ;;  %v1583_v40 = vadd.f32 1.0, %v2376_v30  ;;  %2397 = vpow2.f32 %v2055_v22  ;;  %v1370_v30 = vadd.f32 %v2668_v45, %v1299_v17 }
 0x146   : > { %v2380_v36 = vpop.eup %2379  ;;  %v1615_v38 = vadd.f32 1.0, %v2378_v33  ;;  %2399 = vpow2.f32 %v2021_v6  ;;  %v2024_v33 = vmul.f32 -1.442695, %v1335_v48  ;;  %v1339_v55 = vadd.f32 %v2668_v45, %v1268_v37 }
 0x147   : > { %v2382_v51 = vpop.eup %2381  ;;  %2401 = vrcp.f32 %v1583_v40  ;;  %v1586_v4 = vadd.f32 1.0, %v2380_v36  ;;  %v1336_v40 = vadd.f32 %v2668_v45, %v1265_v16  ;;  %v2056_v36 = vmul.f32 -1.442695, %v1367_v8 }
 0x148   : > { %v2384_v57 = vpop.eup %2383  ;;  %2403 = vrcp.f32 %v1615_v38  ;;  %v1618_v46 = vadd.f32 1.0, %v2382_v51  ;;  %v1368_v38 = vadd.f32 %v2668_v45, %v1297_v20  ;;  %v2027_v51 = vmul.f32 -1.442695, %v1338_v34 }
 0x149   : > { %v2386_v11 = vpop.eup %2385  ;;  %2405 = vrcp.f32 %v1586_v4  ;;  %v1584_v61 = vadd.f32 1.0, %v2384_v57  ;;  %v1341_v4 = vadd.f32 %v2668_v45, %v1270_v21  ;;  %v2059_v50 = vmul.f32 -1.442695, %v1370_v30 }
 0x14a   : > { %v2388_v1 = vpop.eup %2387  ;;  %2407 = vrcp.f32 %v1618_v46  ;;  %v1616_v13 = vadd.f32 1.0, %v2386_v11  ;;  %v1373_v57 = vadd.f32 %v2668_v45, %v1302_v35  ;;  %v2025_v7 = vmul.f32 -1.442695, %v1336_v40 }
 0x14b   : > { %v2390_v0 = vpop.eup %2389  ;;  %2409 = vrcp.f32 %v1584_v61  ;;  %v1589_v2 = vadd.f32 1.0, %v2388_v1  ;;  %v2057_v11 = vmul.f32 -1.442695, %v1368_v38  ;;  %v1371_v61 = vadd.f32 %v2668_v45, %v1300_v44  ;;  %v2953_v45 = vld [vmem:[%s3033_s2] ss:$0 sm:$0xff] }
 0x14c   : > { %v2392_v3 = vpop.eup %2391  ;;  %2411 = vrcp.f32 %v1616_v13  ;;  %v1621_v52 = vadd.f32 1.0, %v2390_v0  ;;  %v2030_v1 = vmul.f32 -1.442695, %v1341_v4  ;;  %v2062_v48 = vmul.f32 -1.442695, %v1373_v57 }
 0x14d   : > { %v2394_v15 = vpop.eup %2393  ;;  %2413 = vrcp.f32 %v1589_v2  ;;  %v1587_v14 = vadd.f32 1.0, %v2392_v3  ;;  %v1271_v0 = vmul.f32 %v2831_v56, %v2663_v41  ;;  %v1303_v3 = vmul.f32 %v2953_v45, %v2836_v59  ;;  %v2963_v56 = vld [vmem:[%s3034_s3] ss:$0 sm:$0xff] }
 0x14e   : > { %v2396_v9 = vpop.eup %2395  ;;  %2415 = vrcp.f32 %v1621_v52  ;;  %v1619_v12 = vadd.f32 1.0, %v2394_v15  ;;  %v2060_v8 = vmul.f32 -1.442695, %v1371_v61  ;;  %v1274_v40 = vmul.f32 %v2953_v45, %v2850_v5 }
 0x14f   : > { %v2398_v18 = vpop.eup %2397  ;;  %2417 = vrcp.f32 %v1587_v14  ;;  %v1590_v19 = vadd.f32 1.0, %v2396_v9  ;;  %v1342_v14 = vadd.f32 %v2963_v56, %v1271_v0  ;;  %v1374_v59 = vadd.f32 %v2963_v56, %v1303_v3 }
 0x150   : > { %v2400_v22 = vpop.eup %2399  ;;  %2419 = vrcp.f32 %v1619_v12  ;;  %v1622_v25 = vadd.f32 1.0, %v2398_v18  ;;  %v1269_v18 = vmul.f32 %v2953_v45, %v2838_v60  ;;  %v1345_v57 = vadd.f32 %v2963_v56, %v1274_v40 }
 0x151   : > { %v2402_v26 = vpop.eup %2401  ;;  %2421 = vrcp.f32 %v1590_v19  ;;  %v1588_v6 = vadd.f32 1.0, %v2400_v22  ;;  %v1301_v22 = vmul.f32 %v2953_v45, %v2842_v63  ;;  %v2063_v21 = vmul.f32 -1.442695, %v1374_v59 }
 0x152   : > { %v2404_v29 = vpop.eup %2403  ;;  %1775 = vst [vmem:[%s2740_s24 + $0x60] sm:$0xff] %v2402_v26  ;;  %2423 = vrcp.f32 %v1622_v25  ;;  %v2031_v26 = vmul.f32 -1.442695, %v1342_v14  ;;  %v1340_v30 = vadd.f32 %v2963_v56, %v1269_v18  ;;  %v1273_v61 = vmul.f32 %v2953_v45, %v2871_v49 }
 0x153   : > { %v2406_v24 = vpop.eup %2405  ;;  %1807 = vst [vmem:[%s2740_s24 + $0x160] sm:$0xff] %v2404_v29  ;;  %2425 = vrcp.f32 %v1588_v6 }
 0x154   : > { %v2408_v53 = vpop.eup %2407  ;;  %1778 = vst [vmem:[%s2740_s24 + $0x78] sm:$0xff] %v2406_v24  ;;  %2427 = vpow2.f32 %v2053_v62  ;;  %v1372_v24 = vadd.f32 %v2963_v56, %v1301_v22 }
 0x155   : > { %v2410_v39 = vpop.eup %2409  ;;  %1810 = vst [vmem:[%s2740_s24 + $0x178] sm:$0xff] %v2408_v53  ;;  %2429 = vpow2.f32 %v2026_v43  ;;  %v2028_v43 = vmul.f32 -1.442695, %v1339_v55  ;;  %v1307_v55 = vmul.f32 %v2953_v45, %v2869_v42  ;;  %v1305_v42 = vmul.f32 %v2953_v45, %v2877_v58 }
 0x156   : > { %v2412_v10 = vpop.eup %2411  ;;  %1776 = vst [vmem:[%s2740_s24 + $0x68] sm:$0xff] %v2410_v39  ;;  %2431 = vpow2.f32 %v2058_v23  ;;  %v1272_v39 = vmul.f32 %v2953_v45, %v2857_v28  ;;  %v1344_v58 = vadd.f32 %v2963_v56, %v1273_v61 }
 0x157   : > { %v2414_v46 = vpop.eup %2413  ;;  %1808 = vst [vmem:[%s2740_s24 + $0x168] sm:$0xff] %v2412_v10  ;;  %2433 = vpow2.f32 %v2024_v33  ;;  %v1304_v10 = vmul.f32 %v2953_v45, %v2861_v31  ;;  %v2029_v31 = vmul.f32 -1.442695, %v1340_v30 }
 0x158   : > { %v2416_v47 = vpop.eup %2415  ;;  %1781 = vst [vmem:[%s2740_s24 + $0x90] sm:$0xff] %v2414_v46  ;;  %2435 = vpow2.f32 %v2056_v36  ;;  %v1306_v36 = vmul.f32 %v2953_v45, %v2855_v27  ;;  %v1275_v27 = vmul.f32 %v2953_v45, %v2863_v32 }
 0x159   : > { %v2418_v62 = vpop.eup %2417  ;;  %1813 = vst [vmem:[%s2740_s24 + $0x190] sm:$0xff] %v2416_v47  ;;  %2437 = vpow2.f32 %v2027_v51 }
 0x15a   : > { %v2420_v13 = vpop.eup %2419  ;;  %1779 = vst [vmem:[%s2740_s24 + $0x80] sm:$0xff] %v2418_v62  ;;  %2439 = vpow2.f32 %v2059_v50  ;;  %v1377_v28 = vadd.f32 %v2963_v56, %v1306_v36  ;;  %v2061_v62 = vmul.f32 -1.442695, %v1372_v24  ;;  %v1346_v0 = vadd.f32 %v2963_v56, %v1275_v27 }
 0x15b   : > { %v2422_v2 = vpop.eup %2421  ;;  %1811 = vst [vmem:[%s2740_s24 + $0x180] sm:$0xff] %v2420_v13  ;;  %2441 = vpow2.f32 %v2025_v7 }
 0x15c   : > { %v2424_v52 = vpop.eup %2423  ;;  %1782 = vst [vmem:[%s2740_s24 + $0x98] sm:$0xff] %v2422_v2  ;;  %2443 = vpow2.f32 %v2057_v11  ;;  %v1343_v11 = vadd.f32 %v2963_v56, %v1272_v39  ;;  %v2066_v49 = vmul.f32 -1.442695, %v1377_v28  ;;  %v2035_v14 = vmul.f32 -1.442695, %v1346_v0 }
 0x15d   : > { %v2426_v15 = vpop.eup %2425  ;;  %1814 = vst [vmem:[%s2740_s24 + $0x198] sm:$0xff] %v2424_v52  ;;  %2445 = vpow2.f32 %v2030_v1  ;;  %v1375_v1 = vadd.f32 %v2963_v56, %v1304_v10 }
 0x15e   : > { %v2428_v41 = vpop.eup %2427  ;;  %1780 = vst [vmem:[%s2740_s24 + $0x88] sm:$0xff] %v2426_v15  ;;  %2447 = vpow2.f32 %v2062_v48  ;;  %v2034_v48 = vmul.f32 -1.442695, %v1345_v57  ;;  %v2032_v52 = vmul.f32 -1.442695, %v1343_v11  ;;  %v1376_v15 = vadd.f32 %v2963_v56, %v1305_v42 }
 0x15f   : > { %v2430_v54 = vpop.eup %2429  ;;  %v1620_v9 = vadd.f32 1.0, %v2428_v41  ;;  %2449 = vpow2.f32 %v2028_v43  ;;  %v1378_v43 = vadd.f32 %v2963_v56, %v1307_v55 }
 0x160   : > { %v2432_v12 = vpop.eup %2431  ;;  %v1593_v17 = vadd.f32 1.0, %v2430_v54  ;;  %2451 = vpow2.f32 %v2060_v8  ;;  %v2064_v8 = vmul.f32 -1.442695, %v1375_v1  ;;  %v2065_v18 = vmul.f32 -1.442695, %v1376_v15 }
 0x161   : > { %v2434_v19 = vpop.eup %2433  ;;  %2453 = vrcp.f32 %v1620_v9  ;;  %v1625_v16 = vadd.f32 1.0, %v2432_v12  ;;  %v2067_v9 = vmul.f32 -1.442695, %v1378_v43  ;;  %v2033_v12 = vmul.f32 -1.442695, %v1344_v58 }
 0x162   : > { %v2436_v25 = vpop.eup %2435  ;;  %2455 = vrcp.f32 %v1593_v17  ;;  %v1591_v20 = vadd.f32 1.0, %v2434_v19 }
 0x163   : > { %v2438_v6 = vpop.eup %2437  ;;  %2457 = vrcp.f32 %v1625_v16  ;;  %v1623_v34 = vadd.f32 1.0, %v2436_v25 }
 0x164   : > { %v2440_v29 = vpop.eup %2439  ;;  %2459 = vrcp.f32 %v1591_v20  ;;  %v1594_v23 = vadd.f32 1.0, %v2438_v6 }
 0x165   : > { %v2442_v60 = vpop.eup %2441  ;;  %2461 = vrcp.f32 %v1623_v34  ;;  %v1626_v35 = vadd.f32 1.0, %v2440_v29 }
 0x166   : > { %v2444_v33 = vpop.eup %2443  ;;  %2463 = vrcp.f32 %v1594_v23  ;;  %v1592_v63 = vadd.f32 1.0, %v2442_v60 }
 0x167   : > { %v2446_v37 = vpop.eup %2445  ;;  %2465 = vrcp.f32 %v1626_v35  ;;  %v1624_v53 = vadd.f32 1.0, %v2444_v33 }
 0x168   : > { %v2448_v38 = vpop.eup %2447  ;;  %2467 = vrcp.f32 %v1592_v63  ;;  %v1597_v44 = vadd.f32 1.0, %v2446_v37 }
 0x169   : > { %v2450_v51 = vpop.eup %2449  ;;  %2469 = vrcp.f32 %v1624_v53  ;;  %v1629_v4 = vadd.f32 1.0, %v2448_v38 }
 0x16a   : > { %v2452_v5 = vpop.eup %2451  ;;  %2471 = vrcp.f32 %v1597_v44  ;;  %v1595_v50 = vadd.f32 1.0, %v2450_v51 }
 0x16b   : > { %v2454_v46 = vpop.eup %2453  ;;  %2473 = vrcp.f32 %v1629_v4  ;;  %v1627_v7 = vadd.f32 1.0, %v2452_v5 }
 0x16c   : > { %v2456_v47 = vpop.eup %2455  ;;  %1812 = vst [vmem:[%s2740_s24 + $0x188] sm:$0xff] %v2454_v46  ;;  %2475 = vrcp.f32 %v1595_v50 }
 0x16d   : > { %v2458_v32 = vpop.eup %2457  ;;  %1785 = vst [vmem:[%s2740_s24 + $0xb0] sm:$0xff] %v2456_v47  ;;  %2477 = vrcp.f32 %v1627_v7 }
 0x16e   : > { %v2460_v13 = vpop.eup %2459  ;;  %1817 = vst [vmem:[%s2740_s24 + $0x1b0] sm:$0xff] %v2458_v32  ;;  %2479 = vpow2.f32 %v2031_v26 }
 0x16f   : > { %v2462_v2 = vpop.eup %2461  ;;  %1783 = vst [vmem:[%s2740_s24 + $0xa0] sm:$0xff] %v2460_v13  ;;  %2481 = vpow2.f32 %v2063_v21 }
 0x170   : > { %v2464_v3 = vpop.eup %2463  ;;  %1815 = vst [vmem:[%s2740_s24 + $0x1a0] sm:$0xff] %v2462_v2  ;;  %2483 = vpow2.f32 %v2029_v31 }
 0x171   : > { %v2466_v45 = vpop.eup %2465  ;;  %1786 = vst [vmem:[%s2740_s24 + $0xb8] sm:$0xff] %v2464_v3  ;;  %2485 = vpow2.f32 %v2061_v62 }
 0x172   : > { %v2468_v41 = vpop.eup %2467  ;;  %1818 = vst [vmem:[%s2740_s24 + $0x1b8] sm:$0xff] %v2466_v45  ;;  %2487 = vpow2.f32 %v2034_v48 }
 0x173   : > { %v2470_v54 = vpop.eup %2469  ;;  %1784 = vst [vmem:[%s2740_s24 + $0xa8] sm:$0xff] %v2468_v41  ;;  %2489 = vpow2.f32 %v2066_v49 }
 0x174   : > { %v2472_v59 = vpop.eup %2471  ;;  %1816 = vst [vmem:[%s2740_s24 + $0x1a8] sm:$0xff] %v2470_v54  ;;  %2491 = vpow2.f32 %v2032_v52 }
 0x175   : > { %v2474_v17 = vpop.eup %2473  ;;  %1789 = vst [vmem:[%s2740_s24 + $0xd0] sm:$0xff] %v2472_v59  ;;  %2493 = vpow2.f32 %v2064_v8 }
 0x176   : > { %v2476_v56 = vpop.eup %2475  ;;  %1821 = vst [vmem:[%s2740_s24 + $0x1d0] sm:$0xff] %v2474_v17  ;;  %2495 = vpow2.f32 %v2035_v14 }
 0x177   : > { %v2478_v19 = vpop.eup %2477  ;;  %1787 = vst [vmem:[%s2740_s24 + $0xc0] sm:$0xff] %v2476_v56  ;;  %2497 = vpow2.f32 %v2067_v9 }
 0x178   : > { %v2480_v16 = vpop.eup %2479  ;;  %1819 = vst [vmem:[%s2740_s24 + $0x1c0] sm:$0xff] %v2478_v19  ;;  %2499 = vpow2.f32 %v2033_v12 }
 0x179   : > { %v2482_v22 = vpop.eup %2481  ;;  %v1598_v25 = vadd.f32 1.0, %v2480_v16  ;;  %2501 = vpow2.f32 %v2065_v18 }
 0x17a   : > { %v2484_v20 = vpop.eup %2483  ;;  %v1630_v26 = vadd.f32 1.0, %v2482_v22 }
 0x17b   : > { %v2486_v6 = vpop.eup %2485  ;;  %2503 = vrcp.f32 %v1598_v25  ;;  %v1596_v34 = vadd.f32 1.0, %v2484_v20 }
 0x17c   : > { %v2488_v21 = vpop.eup %2487  ;;  %2505 = vrcp.f32 %v1630_v26  ;;  %v1628_v29 = vadd.f32 1.0, %v2486_v6 }
 0x17d   : > { %v2490_v23 = vpop.eup %2489  ;;  %2507 = vrcp.f32 %v1596_v34  ;;  %v1601_v30 = vadd.f32 1.0, %v2488_v21 }
 0x17e   : > { %v2492_v60 = vpop.eup %2491  ;;  %2509 = vrcp.f32 %v1628_v29  ;;  %v1633_v35 = vadd.f32 1.0, %v2490_v23 }
 0x17f   : > { %v2494_v24 = vpop.eup %2493  ;;  %2511 = vrcp.f32 %v1601_v30  ;;  %v1599_v33 = vadd.f32 1.0, %v2492_v60 }
 0x180   : > { %v2496_v63 = vpop.eup %2495  ;;  %2513 = vrcp.f32 %v1633_v35  ;;  %v1631_v40 = vadd.f32 1.0, %v2494_v24 }
 0x181   : > { %v2498_v37 = vpop.eup %2497  ;;  %2515 = vrcp.f32 %v1599_v33  ;;  %v1602_v53 = vadd.f32 1.0, %v2496_v63 }
 0x182   : > { %v2500_v36 = vpop.eup %2499  ;;  %2517 = vrcp.f32 %v1631_v40  ;;  %v1634_v38 = vadd.f32 1.0, %v2498_v37 }
 0x183   : > { %v2502_v44 = vpop.eup %2501  ;;  %2519 = vrcp.f32 %v1602_v53  ;;  %v1600_v39 = vadd.f32 1.0, %v2500_v36 }
 0x184   : > { %2521 = vrcp.f32 %v1634_v38  ;;  %v1632_v51 = vadd.f32 1.0, %v2502_v44 }
 0x185   : > { %v2504_v4 = vpop.eup %2503  ;;  %2523 = vrcp.f32 %v1600_v39 }
 0x186   : > { %v2506_v10 = vpop.eup %2505  ;;  %1790 = vst [vmem:[%s2740_s24 + $0xd8] sm:$0xff] %v2504_v4  ;;  %2525 = vrcp.f32 %v1632_v51 }
 0x187   : > { %v2508_v5 = vpop.eup %2507  ;;  %1822 = vst [vmem:[%s2740_s24 + $0x1d8] sm:$0xff] %v2506_v10 }
 0x188   : > { %v2510_v50 = vpop.eup %2509  ;;  %1788 = vst [vmem:[%s2740_s24 + $0xc8] sm:$0xff] %v2508_v5 }
 0x189   : > { %v2512_v57 = vpop.eup %2511  ;;  %1820 = vst [vmem:[%s2740_s24 + $0x1c8] sm:$0xff] %v2510_v50 }
 0x18a   : > { %v2514_v27 = vpop.eup %2513  ;;  %1793 = vst [vmem:[%s2740_s24 + $0xf0] sm:$0xff] %v2512_v57 }
 0x18b   : > { %v2516_v46 = vpop.eup %2515  ;;  %1825 = vst [vmem:[%s2740_s24 + $0x1f0] sm:$0xff] %v2514_v27 }
 0x18c   : > { %v2518_v7 = vpop.eup %2517  ;;  %1791 = vst [vmem:[%s2740_s24 + $0xe0] sm:$0xff] %v2516_v46 }
 0x18d   : > { %v2520_v28 = vpop.eup %2519  ;;  %1823 = vst [vmem:[%s2740_s24 + $0x1e0] sm:$0xff] %v2518_v7 }
 0x18e   : > { %v2522_v55 = vpop.eup %2521  ;;  %1794 = vst [vmem:[%s2740_s24 + $0xf8] sm:$0xff] %v2520_v28 }
 0x18f   : > { %v2524_v47 = vpop.eup %2523  ;;  %1826 = vst [vmem:[%s2740_s24 + $0x1f8] sm:$0xff] %v2522_v55 }
 0x190   : > { %v2526_v31 = vpop.eup %2525  ;;  %1792 = vst [vmem:[%s2740_s24 + $0xe8] sm:$0xff] %v2524_v47 }
 0x191   : > { %1824 = vst [vmem:[%s2740_s24 + $0x1e8] sm:$0xff] %v2526_v31 }
 0x192 PF: > { %s14_s17 = sadd.s32 1, %s2551_s17   ;;  %s3036_s15 = smov %s2547_s16 }
 0x193   : > { %p11_p5 = scmp.ge.s32.totalorder %s14_s17, 10   ;;  %s3037_s16 = smov %s3039_s18 }
 0x195   :  { %13 = sbr.rel (!%p11_p5) target bundleno = 2 (0x2), region = 83 }

</bundles_post_ra>
